<compile_context>
chip_gen: v5e
topology: v5e:2x2
jax: 0.10.0
libtpu: 0.0.40
codegen_flags: <defaults>
</compile_context>

<pallas_src>
import functools

import numpy as np
import jax
import jax.numpy as jnp
from jax.experimental import pallas as pl
from jax.experimental.pallas import tpu as pltpu


def _generator_kernel(
    x_ref,                       # (cin_pad, B*P) f32 input, channels in sublanes
    wh_ref, bh_ref,              # head : (C, 9*cin_pad) bf16, (C, 1) f32
    wb_ref, bb_ref,              # body : (NB, C, 9*C) bf16, (NB, C, 1) f32
    wgx_ref, bgx_ref,            # FFM [W_g | W_x] fused : (C, 2C) bf16, (C, 1) f32
    wpsi_ref, bpsi_ref,          # FFM psi : (1, C) bf16, (1, 1) f32
    aprelu_ref,                  # FFM PReLU shared slope : (1, 1) f32
    wt_ref, bt_ref,              # tail : (3, 9*C) bf16, (3, 1) f32
    interp_ref,                  # (B*P, B*P) bf16 block-diag bilinear resize matrix
    o_ref,                       # (3, B*P) f32
    *, row_stride, num_body):
  BP = x_ref.shape[-1]
  f32 = jnp.float32
  bf16 = jnp.bfloat16

  def shifts9(v):
    # The 9 spatial taps of a 3x3 "valid" conv, stacked along the sublane (K) axis:
    # (C_in, BP) -> (9*C_in, BP).  Lane rotations run on the XLU (free slot).
    # Wrapped values (across image boundaries or around the end of the lane axis)
    # only land at flat positions outside each image's top-left-anchored valid
    # window, which no later layer ever reads (asserted in _make_constants).
    parts = []
    for k in range(9):
      dy, dx = divmod(k, 3)
      s = dy * row_stride + dx
      parts.append(v if s == 0 else pltpu.roll(v, shift=BP - s, axis=1))
    return jnp.concatenate(parts, axis=0)

  def conv3x3(v, w, bias):
    # One fused K = 9*C_in bf16 MXU contraction over all batch*pixel lanes instead
    # of 9 shallow K=C_in dots chained through a serial accumulator.
    taps = shifts9(v).astype(bf16)
    return jnp.dot(w, taps, preferred_element_type=f32) + bias

  def lrelu(v):                          # ConvBlock's LeakyReLU(0.2)
    return jnp.where(v >= 0, v, 0.2 * v)

  # head ConvBlock (Conv3x3 + folded BN + LeakyReLU)
  x1 = lrelu(conv3x3(x_ref[...], wh_ref[...], bh_ref[...]))     # (C, BP) f32

  # body ConvBlocks
  h = x1
  for i in range(num_body):
    h = lrelu(conv3x3(h, wb_ref[i], bb_ref[i]))
  x2 = h                                                        # (C, BP) f32

  # x1 = F.interpolate(x1, size=spatial(x2), bilinear, align_corners=False),
  # expressed as a per-image (block-diagonal) constant matmul over the lane axis.
  g = jnp.dot(x1.astype(bf16), interp_ref[...], preferred_element_type=f32)

  # FFM: s = W_g(g) + W_x(x2) fused into one K=2C dot; PReLU; psi 1x1 on the MXU.
  gx = jnp.concatenate([g, x2], axis=0).astype(bf16)            # (2C, BP)
  s = jnp.dot(wgx_ref[...], gx, preferred_element_type=f32) + bgx_ref[...]
  a_pr = aprelu_ref[...]
  s = jnp.where(s >= 0, s, a_pr * s)                            # shared-slope PReLU
  psi = jnp.dot(wpsi_ref[...], s.astype(bf16),
                preferred_element_type=f32) + bpsi_ref[...]     # (1, BP)
  psi = jax.nn.sigmoid(psi)
  x3 = x2 * psi                                                 # (C, BP)

  # tail: Conv3x3 (no BN) + Tanh.  Emit the full lane-dense (3, B*P) map; the
  # wrapper crops the valid 6x6 window and adds the centered crop of y for free.
  x4 = jnp.tanh(jnp.dot(wt_ref[...], shifts9(x3).astype(bf16),
                        preferred_element_type=f32) + bt_ref[...])
  o_ref[...] = x4.astype(o_ref.dtype)


def _make_constants(H, W, B, num_body):
  """Block-diagonal bilinear-resize matrix + static geometry checks (numpy glue)."""
  P = H * W
  h1, w1 = H - 2, W - 2                              # head output valid size
  h2, w2 = h1 - 2 * num_body, w1 - 2 * num_body      # body output valid size
  ho, wo = h2 - 2, w2 - 2                            # final output size
  assert h2 >= 1 and w2 >= 1 and ho >= 1 and wo >= 1

  # Roll-safety invariant for the batch-in-lanes layout: reads issued from any valid
  # output position of any 3x3 conv stay inside that image's own P-lane block, i.e.
  # the lane roll never bleeds another image's (or wrapped) data into a value that
  # is read downstream.  Max read index from a valid output is (h_in-1)*W + (w_in-1).
  conv_input_sizes = [(H, W)] + [(h1 - 2 * i, w1 - 2 * i) for i in range(num_body)] \
                     + [(h2, w2)]
  for (hi, wi) in conv_input_sizes:
    assert (hi - 1) * W + (wi - 1) <= P - 1, \
        "3x3-conv roll wrap would bleed across image boundaries"

  def src_coord(dst, src_size, dst_size):
    s = (dst + 0.5) * (src_size / dst_size) - 0.5    # align_corners=False
    s = max(s, 0.0)
    i0 = min(int(np.floor(s)), src_size - 1)
    frac = s - i0
    i1 = min(i0 + 1, src_size - 1)
    return i0, i1, frac

  R = np.zeros((P, P), np.float32)
  for yo in range(h2):
    y0, y1i, fy = src_coord(yo, h1, h2)
    for xo in range(w2):
      x0, x1i, fx = src_coord(xo, w1, w2)
      po = yo * W + xo
      R[y0 * W + x0, po] += (1 - fy) * (1 - fx)
      R[y0 * W + x1i, po] += (1 - fy) * fx
      R[y1i * W + x0, po] += fy * (1 - fx)
      R[y1i * W + x1i, po] += fy * fx

  Rbd = np.zeros((B * P, B * P), np.float32)         # per-image block-diagonal
  for b in range(B):
    Rbd[b * P:(b + 1) * P, b * P:(b + 1) * P] = R
  return jnp.asarray(Rbd, jnp.bfloat16), (ho, wo)


def make_params(key, *, nc_im, nfc, min_nfc, num_layer):
  """Deterministic inference-mode parameters, BN folded, weights flattened for the
  fused-tap conv dots and stored bf16 (biases stay f32)."""
  eps = 1e-5
  keys = iter(jax.random.split(key, 64))
  bf16 = jnp.bfloat16

  def fold_conv(cin, cout, k, with_bn, cin_pad=None, w_scale=0.1):
    w = w_scale * jax.random.normal(next(keys), (cout, cin, k, k), jnp.float32)
    bias = 0.1 * jax.random.normal(next(keys), (cout,), jnp.float32)
    if with_bn:
      gamma = 1.0 + 0.1 * jax.random.normal(next(keys), (cout,), jnp.float32)
      beta = 0.1 * jax.random.normal(next(keys), (cout,), jnp.float32)
      mean = jnp.zeros((cout,), jnp.float32)
      var = jnp.ones((cout,), jnp.float32)
      s = gamma / jnp.sqrt(var + eps)
      w = w * s[:, None, None, None]
      bias = (bias - mean) * s + beta
    if cin_pad is not None and cin_pad > cin:
      w = jnp.pad(w, ((0, 0), (0, cin_pad - cin), (0, 0), (0, 0)))
      cin = cin_pad
    # (cout, cin, k, k) -> (cout, k*k*cin); column index = (ky*k+kx)*cin + ci, which
    # matches the kernel's tap-major / channel-minor stacked input.
    w_flat = jnp.transpose(w, (0, 2, 3, 1)).reshape(cout, k * k * cin)
    return w_flat, bias.reshape(cout, 1)

  # Channel bookkeeping exactly as in the module.
  N = nfc
  head_out = N
  body_io = []
  for i in range(num_layer - 2):
    N = int(nfc / (2 ** (i + 1)))
    body_io.append((max(2 * N, min_nfc), max(N, min_nfc)))
  f_g, f_l, f_int = max(2 * N, min_nfc), max(N, min_nfc), max(N, min_nfc)
  tail_in = max(N, min_nfc)

  # Single-kernel implementation assumes a uniform hidden width (true when
  # nfc == min_nfc, as in SinGAN-style opts); FFM also needs F_g == head channels.
  C = head_out
  assert all(ci == C and co == C for ci, co in body_io)
  assert f_g == C and f_l == C and f_int == C and tail_in == C

  cin_pad = ((nc_im + 7) // 8) * 8            # sublane-aligned head input channels
  wh, bh = fold_conv(nc_im, C, 3, True, cin_pad=cin_pad)
  body = [fold_conv(C, C, 3, True) for _ in body_io]
  wb = jnp.stack([w for w, _ in body])
  bb = jnp.stack([b for _, b in body])
  wg, bg = fold_conv(C, C, 1, True)
  wx, bx = fold_conv(C, C, 1, True)
  wpsi, bpsi = fold_conv(C, 1, 1, True)
  wt, bt = fold_conv(C, 3, 3, False)
  return dict(
      wh=wh.astype(bf16), bh=bh,
      wb=wb.astype(bf16), bb=bb,
      wgx=jnp.concatenate([wg, wx], axis=1).astype(bf16), bgx=bg + bx,
      wpsi=wpsi.astype(bf16), bpsi=bpsi,
      aprelu=jnp.full((1, 1), 0.25, jnp.float32),        # nn.PReLU() default init
      wt=wt.astype(bf16), bt=bt)


@jax.jit
def generator_forward(x, y, params):
  """GeneratorConcatSkip2CleanAdd.forward -> (out1, loss), inference mode."""
  B, C_im, H, W = x.shape
  assert H == W, "square inputs (the module crops both axes with a single `ind`)"
  num_body = params["wb"].shape[0]
  P = H * W
  BP = B * P
  interp_bd, (ho, wo) = _make_constants(H, W, B, num_body)
  assert (H - ho) % 2 == 0, "centered y-crop must match the tail output size"
  cin_pad = params["wh"].shape[1] // 9

  # NCHW -> channels in sublanes, (batch*pixels) in lanes: (C, B*H*W).  Tiny
  # transpose/pad done once in XLA outside the kernel (lane index = b*P + p).
  xf = jnp.transpose(x, (1, 0, 2, 3)).reshape(C_im, BP)
  if cin_pad > C_im:
    xf = jnp.pad(xf, ((0, cin_pad - C_im), (0, 0)))
  xf = xf.astype(jnp.float32)

  kernel = functools.partial(_generator_kernel, row_stride=W, num_body=num_body)
  out_flat = pl.pallas_call(
      kernel,
      out_shape=jax.ShapeDtypeStruct((3, BP), jnp.float32),
  )(xf,
    params["wh"], params["bh"], params["wb"], params["bb"],
    params["wgx"], params["bgx"], params["wpsi"], params["bpsi"],
    params["aprelu"], params["wt"], params["bt"],
    interp_bd)

  # Crop x4's valid top-left window and add the centered crop of y (free XLA slices
  # on tiny arrays; keeps the kernel's output store lane-dense).
  x4 = jnp.transpose(out_flat.reshape(3, B, H, W), (1, 0, 2, 3))[:, :, :ho, :wo]
  ind = (H - ho) // 2
  y1 = y[:, :, ind:H - ind, ind:W - ind].astype(jnp.float32)
  out1 = x4 + y1

  # forward() runs forward_once twice on identical inputs with deterministic
  # (eval-mode) modules, so out2 == out1 bit-for-bit; reuse the single kernel pass.
  out2 = jax.lax.stop_gradient(out1)                 # part2.detach()
  d = out1 - out2
  ad = jnp.abs(d)
  loss = jnp.mean(jnp.where(ad < 1.0, 0.5 * d * d, ad - 0.5))   # SmoothL1Loss
  return out1, loss


if __name__ == "__main__":
  key = jax.random.PRNGKey(0)
  kx, ky, kp = jax.random.split(key, 3)

  # opt: nc_im=3, nfc=min_nfc=32, ker_size=3, padd_size=0, num_layer=5
  B, C_IM, H, W = 2, 3, 16, 16
  NFC = MIN_NFC = 32
  NUM_LAYER = 5

  x = jax.random.normal(kx, (B, C_IM, H, W), jnp.float32)   # NCHW, PyTorch layout
  y = jax.random.normal(ky, (B, C_IM, H, W), jnp.float32)
  params = make_params(kp, nc_im=C_IM, nfc=NFC, min_nfc=MIN_NFC,
                       num_layer=NUM_LAYER)

  out1, loss = generator_forward(x, y, params)
  jax.block_until_ready((out1, loss))

  assert out1.shape == (B, 3, 6, 6), out1.shape
  assert bool(jnp.all(jnp.isfinite(out1))) and bool(jnp.isfinite(loss))
  print("KERNEL_OK")
</pallas_src>

<mosaic_0001>
module attributes {stable_mosaic.version = 11 : i64} {
  func.func @_generator_kernel(%arg0: memref<8x512xf32, #tpu.memory_space<vmem>>, %arg1: memref<32x72xbf16, #tpu.memory_space<vmem>>, %arg2: memref<32x1xf32, #tpu.memory_space<vmem>>, %arg3: memref<3x32x288xbf16, #tpu.memory_space<vmem>>, %arg4: memref<3x32x1xf32, #tpu.memory_space<vmem>>, %arg5: memref<32x64xbf16, #tpu.memory_space<vmem>>, %arg6: memref<32x1xf32, #tpu.memory_space<vmem>>, %arg7: memref<1x32xbf16, #tpu.memory_space<vmem>>, %arg8: memref<1x1xf32, #tpu.memory_space<vmem>>, %arg9: memref<1x1xf32, #tpu.memory_space<vmem>>, %arg10: memref<3x288xbf16, #tpu.memory_space<vmem>>, %arg11: memref<3x1xf32, #tpu.memory_space<vmem>>, %arg12: memref<512x512xbf16, #tpu.memory_space<vmem>>, %arg13: memref<3x512xf32, #tpu.memory_space<vmem>>) attributes {dimension_semantics = [], scalar_prefetch = 0 : i64, scratch_operands = 0 : i64, tpu.core_type = #tpu.core_type<tc>} {
    %c0 = arith.constant 0 : index
    %c0_0 = arith.constant 0 : index
    %0 = vector.load %arg0[%c0, %c0_0] : memref<8x512xf32, #tpu.memory_space<vmem>>, vector<8x512xf32>
    %c0_1 = arith.constant 0 : index
    %c0_2 = arith.constant 0 : index
    %1 = vector.load %arg1[%c0_1, %c0_2] : memref<32x72xbf16, #tpu.memory_space<vmem>>, vector<32x72xbf16>
    %c0_3 = arith.constant 0 : index
    %c0_4 = arith.constant 0 : index
    %2 = vector.load %arg2[%c0_3, %c0_4] : memref<32x1xf32, #tpu.memory_space<vmem>>, vector<32x1xf32>
    %c511_i32 = arith.constant 511 : i32
    %3 = tpu.dynamic_rotate %0 by %c511_i32 dim 1 : vector<8x512xf32>, i32 -> vector<8x512xf32>
    %c510_i32 = arith.constant 510 : i32
    %4 = tpu.dynamic_rotate %0 by %c510_i32 dim 1 : vector<8x512xf32>, i32 -> vector<8x512xf32>
    %c496_i32 = arith.constant 496 : i32
    %5 = tpu.dynamic_rotate %0 by %c496_i32 dim 1 : vector<8x512xf32>, i32 -> vector<8x512xf32>
    %c495_i32 = arith.constant 495 : i32
    %6 = tpu.dynamic_rotate %0 by %c495_i32 dim 1 : vector<8x512xf32>, i32 -> vector<8x512xf32>
    %c494_i32 = arith.constant 494 : i32
    %7 = tpu.dynamic_rotate %0 by %c494_i32 dim 1 : vector<8x512xf32>, i32 -> vector<8x512xf32>
    %c480_i32 = arith.constant 480 : i32
    %8 = tpu.dynamic_rotate %0 by %c480_i32 dim 1 : vector<8x512xf32>, i32 -> vector<8x512xf32>
    %c479_i32 = arith.constant 479 : i32
    %9 = tpu.dynamic_rotate %0 by %c479_i32 dim 1 : vector<8x512xf32>, i32 -> vector<8x512xf32>
    %c478_i32 = arith.constant 478 : i32
    %10 = tpu.dynamic_rotate %0 by %c478_i32 dim 1 : vector<8x512xf32>, i32 -> vector<8x512xf32>
    %11 = tpu.concatenate %0, %3, %4, %5, %6, %7, %8, %9, %10 in 0 : vector<8x512xf32>, vector<8x512xf32>, vector<8x512xf32>, vector<8x512xf32>, vector<8x512xf32>, vector<8x512xf32>, vector<8x512xf32>, vector<8x512xf32>, vector<8x512xf32> -> vector<72x512xf32>
    %12 = arith.truncf %11 : vector<72x512xf32> to vector<72x512xbf16>
    %cst = arith.constant dense<0.000000e+00> : vector<32x512xf32>
    %13 = tpu.matmul %1, %12, %cst {dimension_numbers = #tpu.dot_dimension_numbers<[1], [0], [0], [1], [0, 0, 1, 1], [], []>} : vector<32x72xbf16>, vector<72x512xbf16>, vector<32x512xf32> -> vector<32x512xf32>
    %14 = vector.broadcast %2 : vector<32x1xf32> to vector<32x512xf32>
    %15 = arith.addf %13, %14 : vector<32x512xf32>
    %cst_5 = arith.constant 0.000000e+00 : f32
    %16 = vector.broadcast %cst_5 : f32 to vector<32x512xf32>
    %17 = arith.cmpf oge, %15, %16 : vector<32x512xf32>
    %cst_6 = arith.constant 2.000000e-01 : f32
    %18 = vector.broadcast %cst_6 : f32 to vector<32x512xf32>
    %19 = arith.mulf %18, %15 : vector<32x512xf32>
    %20 = arith.select %17, %15, %19 : vector<32x512xi1>, vector<32x512xf32>
    %c0_7 = arith.constant 0 : index
    %c0_8 = arith.constant 0 : index
    %c0_9 = arith.constant 0 : index
    %21 = vector.load %arg3[%c0_7, %c0_8, %c0_9] : memref<3x32x288xbf16, #tpu.memory_space<vmem>>, vector<1x32x288xbf16>
    %22 = vector.shape_cast %21 : vector<1x32x288xbf16> to vector<32x288xbf16>
    %c0_10 = arith.constant 0 : index
    %c0_11 = arith.constant 0 : index
    %c0_12 = arith.constant 0 : index
    %23 = vector.load %arg4[%c0_10, %c0_11, %c0_12] : memref<3x32x1xf32, #tpu.memory_space<vmem>>, vector<1x32x1xf32>
    %24 = vector.shape_cast %23 : vector<1x32x1xf32> to vector<32x1xf32>
    %c511_i32_13 = arith.constant 511 : i32
    %25 = tpu.dynamic_rotate %20 by %c511_i32_13 dim 1 : vector<32x512xf32>, i32 -> vector<32x512xf32>
    %c510_i32_14 = arith.constant 510 : i32
    %26 = tpu.dynamic_rotate %20 by %c510_i32_14 dim 1 : vector<32x512xf32>, i32 -> vector<32x512xf32>
    %c496_i32_15 = arith.constant 496 : i32
    %27 = tpu.dynamic_rotate %20 by %c496_i32_15 dim 1 : vector<32x512xf32>, i32 -> vector<32x512xf32>
    %c495_i32_16 = arith.constant 495 : i32
    %28 = tpu.dynamic_rotate %20 by %c495_i32_16 dim 1 : vector<32x512xf32>, i32 -> vector<32x512xf32>
    %c494_i32_17 = arith.constant 494 : i32
    %29 = tpu.dynamic_rotate %20 by %c494_i32_17 dim 1 : vector<32x512xf32>, i32 -> vector<32x512xf32>
    %c480_i32_18 = arith.constant 480 : i32
    %30 = tpu.dynamic_rotate %20 by %c480_i32_18 dim 1 : vector<32x512xf32>, i32 -> vector<32x512xf32>
    %c479_i32_19 = arith.constant 479 : i32
    %31 = tpu.dynamic_rotate %20 by %c479_i32_19 dim 1 : vector<32x512xf32>, i32 -> vector<32x512xf32>
    %c478_i32_20 = arith.constant 478 : i32
    %32 = tpu.dynamic_rotate %20 by %c478_i32_20 dim 1 : vector<32x512xf32>, i32 -> vector<32x512xf32>
    %33 = tpu.concatenate %20, %25, %26, %27, %28, %29, %30, %31, %32 in 0 : vector<32x512xf32>, vector<32x512xf32>, vector<32x512xf32>, vector<32x512xf32>, vector<32x512xf32>, vector<32x512xf32>, vector<32x512xf32>, vector<32x512xf32>, vector<32x512xf32> -> vector<288x512xf32>
    %34 = arith.truncf %33 : vector<288x512xf32> to vector<288x512xbf16>
    %cst_21 = arith.constant dense<0.000000e+00> : vector<32x512xf32>
    %35 = tpu.matmul %22, %34, %cst_21 {dimension_numbers = #tpu.dot_dimension_numbers<[1], [0], [0], [1], [0, 0, 1, 1], [], []>} : vector<32x288xbf16>, vector<288x512xbf16>, vector<32x512xf32> -> vector<32x512xf32>
    %36 = vector.broadcast %24 : vector<32x1xf32> to vector<32x512xf32>
    %37 = arith.addf %35, %36 : vector<32x512xf32>
    %cst_22 = arith.constant 0.000000e+00 : f32
    %38 = vector.broadcast %cst_22 : f32 to vector<32x512xf32>
    %39 = arith.cmpf oge, %37, %38 : vector<32x512xf32>
    %cst_23 = arith.constant 2.000000e-01 : f32
    %40 = vector.broadcast %cst_23 : f32 to vector<32x512xf32>
    %41 = arith.mulf %40, %37 : vector<32x512xf32>
    %42 = arith.select %39, %37, %41 : vector<32x512xi1>, vector<32x512xf32>
    %c1 = arith.constant 1 : index
    %c0_24 = arith.constant 0 : index
    %c0_25 = arith.constant 0 : index
    %43 = vector.load %arg3[%c1, %c0_24, %c0_25] : memref<3x32x288xbf16, #tpu.memory_space<vmem>>, vector<1x32x288xbf16>
    %44 = vector.shape_cast %43 : vector<1x32x288xbf16> to vector<32x288xbf16>
    %c1_26 = arith.constant 1 : index
    %c0_27 = arith.constant 0 : index
    %c0_28 = arith.constant 0 : index
    %45 = vector.load %arg4[%c1_26, %c0_27, %c0_28] : memref<3x32x1xf32, #tpu.memory_space<vmem>>, vector<1x32x1xf32>
    %46 = vector.shape_cast %45 : vector<1x32x1xf32> to vector<32x1xf32>
    %c511_i32_29 = arith.constant 511 : i32
    %47 = tpu.dynamic_rotate %42 by %c511_i32_29 dim 1 : vector<32x512xf32>, i32 -> vector<32x512xf32>
    %c510_i32_30 = arith.constant 510 : i32
    %48 = tpu.dynamic_rotate %42 by %c510_i32_30 dim 1 : vector<32x512xf32>, i32 -> vector<32x512xf32>
    %c496_i32_31 = arith.constant 496 : i32
    %49 = tpu.dynamic_rotate %42 by %c496_i32_31 dim 1 : vector<32x512xf32>, i32 -> vector<32x512xf32>
    %c495_i32_32 = arith.constant 495 : i32
    %50 = tpu.dynamic_rotate %42 by %c495_i32_32 dim 1 : vector<32x512xf32>, i32 -> vector<32x512xf32>
    %c494_i32_33 = arith.constant 494 : i32
    %51 = tpu.dynamic_rotate %42 by %c494_i32_33 dim 1 : vector<32x512xf32>, i32 -> vector<32x512xf32>
    %c480_i32_34 = arith.constant 480 : i32
    %52 = tpu.dynamic_rotate %42 by %c480_i32_34 dim 1 : vector<32x512xf32>, i32 -> vector<32x512xf32>
    %c479_i32_35 = arith.constant 479 : i32
    %53 = tpu.dynamic_rotate %42 by %c479_i32_35 dim 1 : vector<32x512xf32>, i32 -> vector<32x512xf32>
    %c478_i32_36 = arith.constant 478 : i32
    %54 = tpu.dynamic_rotate %42 by %c478_i32_36 dim 1 : vector<32x512xf32>, i32 -> vector<32x512xf32>
    %55 = tpu.concatenate %42, %47, %48, %49, %50, %51, %52, %53, %54 in 0 : vector<32x512xf32>, vector<32x512xf32>, vector<32x512xf32>, vector<32x512xf32>, vector<32x512xf32>, vector<32x512xf32>, vector<32x512xf32>, vector<32x512xf32>, vector<32x512xf32> -> vector<288x512xf32>
    %56 = arith.truncf %55 : vector<288x512xf32> to vector<288x512xbf16>
    %cst_37 = arith.constant dense<0.000000e+00> : vector<32x512xf32>
    %57 = tpu.matmul %44, %56, %cst_37 {dimension_numbers = #tpu.dot_dimension_numbers<[1], [0], [0], [1], [0, 0, 1, 1], [], []>} : vector<32x288xbf16>, vector<288x512xbf16>, vector<32x512xf32> -> vector<32x512xf32>
    %58 = vector.broadcast %46 : vector<32x1xf32> to vector<32x512xf32>
    %59 = arith.addf %57, %58 : vector<32x512xf32>
    %cst_38 = arith.constant 0.000000e+00 : f32
    %60 = vector.broadcast %cst_38 : f32 to vector<32x512xf32>
    %61 = arith.cmpf oge, %59, %60 : vector<32x512xf32>
    %cst_39 = arith.constant 2.000000e-01 : f32
    %62 = vector.broadcast %cst_39 : f32 to vector<32x512xf32>
    %63 = arith.mulf %62, %59 : vector<32x512xf32>
    %64 = arith.select %61, %59, %63 : vector<32x512xi1>, vector<32x512xf32>
    %c2 = arith.constant 2 : index
    %c0_40 = arith.constant 0 : index
    %c0_41 = arith.constant 0 : index
    %65 = vector.load %arg3[%c2, %c0_40, %c0_41] : memref<3x32x288xbf16, #tpu.memory_space<vmem>>, vector<1x32x288xbf16>
    %66 = vector.shape_cast %65 : vector<1x32x288xbf16> to vector<32x288xbf16>
    %c2_42 = arith.constant 2 : index
    %c0_43 = arith.constant 0 : index
    %c0_44 = arith.constant 0 : index
    %67 = vector.load %arg4[%c2_42, %c0_43, %c0_44] : memref<3x32x1xf32, #tpu.memory_space<vmem>>, vector<1x32x1xf32>
    %68 = vector.shape_cast %67 : vector<1x32x1xf32> to vector<32x1xf32>
    %c511_i32_45 = arith.constant 511 : i32
    %69 = tpu.dynamic_rotate %64 by %c511_i32_45 dim 1 : vector<32x512xf32>, i32 -> vector<32x512xf32>
    %c510_i32_46 = arith.constant 510 : i32
    %70 = tpu.dynamic_rotate %64 by %c510_i32_46 dim 1 : vector<32x512xf32>, i32 -> vector<32x512xf32>
    %c496_i32_47 = arith.constant 496 : i32
    %71 = tpu.dynamic_rotate %64 by %c496_i32_47 dim 1 : vector<32x512xf32>, i32 -> vector<32x512xf32>
    %c495_i32_48 = arith.constant 495 : i32
    %72 = tpu.dynamic_rotate %64 by %c495_i32_48 dim 1 : vector<32x512xf32>, i32 -> vector<32x512xf32>
    %c494_i32_49 = arith.constant 494 : i32
    %73 = tpu.dynamic_rotate %64 by %c494_i32_49 dim 1 : vector<32x512xf32>, i32 -> vector<32x512xf32>
    %c480_i32_50 = arith.constant 480 : i32
    %74 = tpu.dynamic_rotate %64 by %c480_i32_50 dim 1 : vector<32x512xf32>, i32 -> vector<32x512xf32>
    %c479_i32_51 = arith.constant 479 : i32
    %75 = tpu.dynamic_rotate %64 by %c479_i32_51 dim 1 : vector<32x512xf32>, i32 -> vector<32x512xf32>
    %c478_i32_52 = arith.constant 478 : i32
    %76 = tpu.dynamic_rotate %64 by %c478_i32_52 dim 1 : vector<32x512xf32>, i32 -> vector<32x512xf32>
    %77 = tpu.concatenate %64, %69, %70, %71, %72, %73, %74, %75, %76 in 0 : vector<32x512xf32>, vector<32x512xf32>, vector<32x512xf32>, vector<32x512xf32>, vector<32x512xf32>, vector<32x512xf32>, vector<32x512xf32>, vector<32x512xf32>, vector<32x512xf32> -> vector<288x512xf32>
    %78 = arith.truncf %77 : vector<288x512xf32> to vector<288x512xbf16>
    %cst_53 = arith.constant dense<0.000000e+00> : vector<32x512xf32>
    %79 = tpu.matmul %66, %78, %cst_53 {dimension_numbers = #tpu.dot_dimension_numbers<[1], [0], [0], [1], [0, 0, 1, 1], [], []>} : vector<32x288xbf16>, vector<288x512xbf16>, vector<32x512xf32> -> vector<32x512xf32>
    %80 = vector.broadcast %68 : vector<32x1xf32> to vector<32x512xf32>
    %81 = arith.addf %79, %80 : vector<32x512xf32>
    %cst_54 = arith.constant 0.000000e+00 : f32
    %82 = vector.broadcast %cst_54 : f32 to vector<32x512xf32>
    %83 = arith.cmpf oge, %81, %82 : vector<32x512xf32>
    %cst_55 = arith.constant 2.000000e-01 : f32
    %84 = vector.broadcast %cst_55 : f32 to vector<32x512xf32>
    %85 = arith.mulf %84, %81 : vector<32x512xf32>
    %86 = arith.select %83, %81, %85 : vector<32x512xi1>, vector<32x512xf32>
    %87 = arith.truncf %20 : vector<32x512xf32> to vector<32x512xbf16>
    %c0_56 = arith.constant 0 : index
    %c0_57 = arith.constant 0 : index
    %88 = vector.load %arg12[%c0_56, %c0_57] : memref<512x512xbf16, #tpu.memory_space<vmem>>, vector<512x512xbf16>
    %cst_58 = arith.constant dense<0.000000e+00> : vector<32x512xf32>
    %89 = tpu.matmul %87, %88, %cst_58 {dimension_numbers = #tpu.dot_dimension_numbers<[1], [0], [0], [1], [0, 0, 1, 1], [], []>} : vector<32x512xbf16>, vector<512x512xbf16>, vector<32x512xf32> -> vector<32x512xf32>
    %90 = tpu.concatenate %89, %86 in 0 : vector<32x512xf32>, vector<32x512xf32> -> vector<64x512xf32>
    %91 = arith.truncf %90 : vector<64x512xf32> to vector<64x512xbf16>
    %c0_59 = arith.constant 0 : index
    %c0_60 = arith.constant 0 : index
    %92 = vector.load %arg5[%c0_59, %c0_60] : memref<32x64xbf16, #tpu.memory_space<vmem>>, vector<32x64xbf16>
    %cst_61 = arith.constant dense<0.000000e+00> : vector<32x512xf32>
    %93 = tpu.matmul %92, %91, %cst_61 {dimension_numbers = #tpu.dot_dimension_numbers<[1], [0], [0], [1], [0, 0, 1, 1], [], []>} : vector<32x64xbf16>, vector<64x512xbf16>, vector<32x512xf32> -> vector<32x512xf32>
    %c0_62 = arith.constant 0 : index
    %c0_63 = arith.constant 0 : index
    %94 = vector.load %arg6[%c0_62, %c0_63] : memref<32x1xf32, #tpu.memory_space<vmem>>, vector<32x1xf32>
    %95 = vector.broadcast %94 : vector<32x1xf32> to vector<32x512xf32>
    %96 = arith.addf %93, %95 : vector<32x512xf32>
    %c0_64 = arith.constant 0 : index
    %c0_65 = arith.constant 0 : index
    %97 = vector.load %arg9[%c0_64, %c0_65] : memref<1x1xf32, #tpu.memory_space<vmem>>, vector<1x1xf32>
    %cst_66 = arith.constant 0.000000e+00 : f32
    %98 = vector.broadcast %cst_66 : f32 to vector<32x512xf32>
    %99 = arith.cmpf oge, %96, %98 : vector<32x512xf32>
    %100 = vector.broadcast %97 : vector<1x1xf32> to vector<32x512xf32>
    %101 = arith.mulf %100, %96 : vector<32x512xf32>
    %102 = arith.select %99, %96, %101 : vector<32x512xi1>, vector<32x512xf32>
    %c0_67 = arith.constant 0 : index
    %c0_68 = arith.constant 0 : index
    %103 = vector.load %arg7[%c0_67, %c0_68] : memref<1x32xbf16, #tpu.memory_space<vmem>>, vector<1x32xbf16>
    %104 = arith.truncf %102 : vector<32x512xf32> to vector<32x512xbf16>
    %cst_69 = arith.constant dense<0.000000e+00> : vector<1x512xf32>
    %105 = tpu.matmul %103, %104, %cst_69 {dimension_numbers = #tpu.dot_dimension_numbers<[1], [0], [0], [1], [0, 0, 1, 1], [], []>} : vector<1x32xbf16>, vector<32x512xbf16>, vector<1x512xf32> -> vector<1x512xf32>
    %c0_70 = arith.constant 0 : index
    %c0_71 = arith.constant 0 : index
    %106 = vector.load %arg8[%c0_70, %c0_71] : memref<1x1xf32, #tpu.memory_space<vmem>>, vector<1x1xf32>
    %107 = vector.broadcast %106 : vector<1x1xf32> to vector<1x512xf32>
    %108 = arith.addf %105, %107 : vector<1x512xf32>
    %109 = arith.negf %108 : vector<1x512xf32>
    %110 = math.exp %109 : vector<1x512xf32>
    %cst_72 = arith.constant 1.000000e+00 : f32
    %111 = vector.broadcast %cst_72 : f32 to vector<1x512xf32>
    %112 = arith.addf %111, %110 : vector<1x512xf32>
    %113 = arith.divf %111, %112 : vector<1x512xf32>
    %114 = vector.broadcast %113 : vector<1x512xf32> to vector<32x512xf32>
    %115 = arith.mulf %86, %114 : vector<32x512xf32>
    %c0_73 = arith.constant 0 : index
    %c0_74 = arith.constant 0 : index
    %116 = vector.load %arg10[%c0_73, %c0_74] : memref<3x288xbf16, #tpu.memory_space<vmem>>, vector<3x288xbf16>
    %c511_i32_75 = arith.constant 511 : i32
    %117 = tpu.dynamic_rotate %115 by %c511_i32_75 dim 1 : vector<32x512xf32>, i32 -> vector<32x512xf32>
    %c510_i32_76 = arith.constant 510 : i32
    %118 = tpu.dynamic_rotate %115 by %c510_i32_76 dim 1 : vector<32x512xf32>, i32 -> vector<32x512xf32>
    %c496_i32_77 = arith.constant 496 : i32
    %119 = tpu.dynamic_rotate %115 by %c496_i32_77 dim 1 : vector<32x512xf32>, i32 -> vector<32x512xf32>
    %c495_i32_78 = arith.constant 495 : i32
    %120 = tpu.dynamic_rotate %115 by %c495_i32_78 dim 1 : vector<32x512xf32>, i32 -> vector<32x512xf32>
    %c494_i32_79 = arith.constant 494 : i32
    %121 = tpu.dynamic_rotate %115 by %c494_i32_79 dim 1 : vector<32x512xf32>, i32 -> vector<32x512xf32>
    %c480_i32_80 = arith.constant 480 : i32
    %122 = tpu.dynamic_rotate %115 by %c480_i32_80 dim 1 : vector<32x512xf32>, i32 -> vector<32x512xf32>
    %c479_i32_81 = arith.constant 479 : i32
    %123 = tpu.dynamic_rotate %115 by %c479_i32_81 dim 1 : vector<32x512xf32>, i32 -> vector<32x512xf32>
    %c478_i32_82 = arith.constant 478 : i32
    %124 = tpu.dynamic_rotate %115 by %c478_i32_82 dim 1 : vector<32x512xf32>, i32 -> vector<32x512xf32>
    %125 = tpu.concatenate %115, %117, %118, %119, %120, %121, %122, %123, %124 in 0 : vector<32x512xf32>, vector<32x512xf32>, vector<32x512xf32>, vector<32x512xf32>, vector<32x512xf32>, vector<32x512xf32>, vector<32x512xf32>, vector<32x512xf32>, vector<32x512xf32> -> vector<288x512xf32>
    %126 = arith.truncf %125 : vector<288x512xf32> to vector<288x512xbf16>
    %cst_83 = arith.constant dense<0.000000e+00> : vector<3x512xf32>
    %127 = tpu.matmul %116, %126, %cst_83 {dimension_numbers = #tpu.dot_dimension_numbers<[1], [0], [0], [1], [0, 0, 1, 1], [], []>} : vector<3x288xbf16>, vector<288x512xbf16>, vector<3x512xf32> -> vector<3x512xf32>
    %c0_84 = arith.constant 0 : index
    %c0_85 = arith.constant 0 : index
    %128 = vector.load %arg11[%c0_84, %c0_85] : memref<3x1xf32, #tpu.memory_space<vmem>>, vector<3x1xf32>
    %129 = vector.broadcast %128 : vector<3x1xf32> to vector<3x512xf32>
    %130 = arith.addf %127, %129 : vector<3x512xf32>
    %131 = math.tanh %130 : vector<3x512xf32>
    %c0_86 = arith.constant 0 : index
    %c0_87 = arith.constant 0 : index
    %132 = vector.load %arg13[%c0_86, %c0_87] : memref<3x512xf32, #tpu.memory_space<vmem>>, vector<3x512xf32>
    tpu.vector_store %arg13[%c0_86, %c0_87], %131 {strides = array<i32>} : memref<3x512xf32, #tpu.memory_space<vmem>>, vector<3x512xf32>,
    return
  }
}

</mosaic_0001>

<bundles_post_ra>
// kernel: generator_forward.1
= control target key start
LH: loop header
LB: loop body
LE: loop exit
PB: predicated region body
PF: predicated region fallthrough
CT: control target
= control target key end

     0   :  { %s12599_s0 = inlined_call_operand.vmem [shape: f32[8,512], index: 0, kind: input, shape index: {}]   ;;  %s12600_s1 = inlined_call_operand.vmem [shape: bf16[32,72], index: 1, kind: input, shape index: {}]   ;;  %s12601_s2 = inlined_call_operand.vmem [shape: f32[32,1], index: 2, kind: input, shape index: {}]   ;;  %s12602_s3 = inlined_call_operand.vmem [shape: bf16[3,32,288], index: 3, kind: input, shape index: {}]   ;;  %s12603_s4 = inlined_call_operand.vmem [shape: f32[3,32,1], index: 4, kind: input, shape index: {}]   ;;  %s12604_s5 = inlined_call_operand.vmem [shape: bf16[32,64], index: 5, kind: input, shape index: {}]   ;;  %s12605_s6 = inlined_call_operand.vmem [shape: f32[32,1], index: 6, kind: input, shape index: {}]   ;;  %s12606_s7 = inlined_call_operand.vmem [shape: bf16[1,32], index: 7, kind: input, shape index: {}]   ;;  %s12607_s8 = inlined_call_operand.<no memory space> [shape: f32[1,1], index: 8, kind: input, shape index: {}]   ;;  %s12608_s10 = inlined_call_operand.vmem [shape: bf16[3,288], index: 10, kind: input, shape index: {}]   ;;  %s12609_s11 = inlined_call_operand.vmem [shape: f32[3,1], index: 11, kind: input, shape index: {}]   ;;  %s12610_s12 = inlined_call_operand.hbm [shape: bf16[512,512], index: 12, kind: input, shape index: {}]   ;;  %s12611_s13 = inlined_call_operand.vmem [shape: f32[3,512], index: 13, kind: output, shape index: {}]   ;;  %s12612_s9 = inlined_call_operand.<no memory space> [shape: f32[1,1], index: 9, kind: input, shape index: {}]  }
   0x1   :  { %v18_v0 = vstv %s12607_s8  ;;  %v20_v1 = vstv %s12612_s9 }
   0x2   :  { %19 = vst [vmem:[#allocation2] sm:$0x1] %v18_v0 }
   0x3   :  { %21 = vst [vmem:[#allocation3] sm:$0x1] %v20_v1 }
   0x4   :  { %22 = vsyncpa [#allocation5], 0  ;;  %s51_s14 = sshll.u32 %s12610_s12, 4  ;;  %s7118_s15 = smov [#allocation4]   ;;  %s52_s14 = int_to_ptr.hbm [resolvable:$true] %s51_s14 }
   0x5   :  { %s53_s16 = sshll.u32 %s7118_s15, 4  ;;  %s7119_s17 = smov 256   ;;  %s54_s16 = int_to_ptr.vmem [resolvable:$true] %s53_s16 }
   0x6   :  { %s7120_s18 = smov 16  }
   0x7   :  { %59 = dma.hbm_to_vmem [thread:$0]  %s52_s14, 16384, %s54_s16, [#allocation5], %s7119_s17, %s7119_s17, %s7120_s18  }
   0x8   :  { %7116 = dma.done.wait [#allocation5], 16384  }
   0x9   :  { %7117 = vsyncadd [#allocation5], 4294950912  ;;  %v7212_v2 = vld [vmem:[%s12599_s0] sm:$0xff]  ;;  %v7217_v3 = vld [vmem:[%s12599_s0 + $0x8] sm:$0xff]  ;;  %s7121_s12 = smov 96   ;;  %s7122_s21 = smov 94   ;;  %v85_v9 = vlaneseq }
   0xa   :  { %v5714_v4 = vpack.i.bf16 %v7217_v3, %v7212_v2  ;;  %v7226_v5 = vld [vmem:[%s12599_s0 + $0x10] sm:$0xff]  ;;  %v7231_v6 = vld [vmem:[%s12599_s0 + $0x18] sm:$0xff]  ;;  %s7123_s26 = smov 95   ;;  %s7124_s27 = smov 111   ;;  %vm12613_vm3 = vcmask 1043456   ;;  %v73_v61 = vld [vmem:[%s12601_s2] sm:$0xff] }
   0xb   :  { %v5719_v7 = vpack.i.bf16 %v7231_v6, %v7226_v5  ;;  %s7125_s28 = smov 110   ;;  %s7126_s0 = smov 126   ;;  %v7249_v10 = vand.u32 127, %v85_v9  ;;  %v7129_v0 = vmov 0   ;;  %vm233_vm9 = vcmask 588800  }
   0xc   :  { %5715 = vrot.lane.b32.xlu1 %v5714_v4, %s7121_s12  ;;  %5705 = vrot.lane.b32.xlu0 %v5714_v4, %s7122_s21  ;;  %s7127_s29 = smov 112   ;;  %s7128_s30 = smov 127  }
   0xd   :  { %5725 = vrot.lane.b32.xlu2 %v5714_v4, %s7123_s26  ;;  %vm178_vm0 = vcmp.lt.s32.totalorder %v7249_v10, 94  ;;  %vm152_vm1 = vcmp.lt.s32.totalorder %v7249_v10, 96  ;;  %vm165_vm2 = vcmp.lt.s32.totalorder %v7249_v10, 95  ;;  %vm139_vm4 = vcmp.lt.s32.totalorder %v7249_v10, 110  ;;  %5784 = vset.pattern.permute.xlu1 %v7129_v0 }
   0xe   :  { %vm126_vm5 = vcmp.lt.s32.totalorder %v7249_v10, 111  ;;  %5786 = vset.pattern.permute.xlu0 %v7129_v0  ;;  %5785 = vset.pattern.permute.xlu2 %v7129_v0  ;;  %vm100_vm6 = vcmp.lt.s32.totalorder %v7249_v10, 126  ;;  %vm87_vm7 = vcmp.lt.s32.totalorder %v7249_v10, 127  ;;  %vm113_vm8 = vcmp.lt.s32.totalorder %v7249_v10, 112 }
  0x14   :  { %5720 = vrot.lane.b32.xlu1 %v5719_v7, %s7121_s12  ;;  %5710 = vrot.lane.b32.xlu0 %v5719_v7, %s7122_s21 }
  0x15   :  { %5730 = vrot.lane.b32.xlu2 %v5719_v7, %s7123_s26 }
  0x1c   :  { %5740 = vrot.lane.b32.xlu1 %v5719_v7, %s7124_s27  ;;  %5735 = vrot.lane.b32.xlu0 %v5714_v4, %s7124_s27 }
  0x1d   :  { %5745 = vrot.lane.b32.xlu2 %v5714_v4, %s7125_s28 }
  0x24   :  { %5755 = vrot.lane.b32.xlu1 %v5714_v4, %s7126_s0  ;;  %5750 = vrot.lane.b32.xlu0 %v5719_v7, %s7125_s28 }
  0x25   :  { %5760 = vrot.lane.b32.xlu2 %v5719_v7, %s7126_s0 }
  0x2c   :  { %5770 = vrot.lane.b32.xlu1 %v5719_v7, %s7127_s29  ;;  %5765 = vrot.lane.b32.xlu0 %v5714_v4, %s7127_s29 }
  0x2d   :  { %5775 = vrot.lane.b32.xlu2 %v5714_v4, %s7128_s30 }
  0x34   :  { %5780 = vrot.lane.b32.xlu0 %v5719_v7, %s7128_s30  ;;  %205 = vperm.xlu1 %5784, %v73_v61  }
  0x67   :  { %v5726_v8 = vpop.permute.xlu2 %5725 }
  0x68   :  { %v5728_v12 = vunpack.i.h.bf16 %v5726_v8  ;;  %v5727_v13 = vunpack.i.l.bf16 %v5726_v8 }
  0x6a   :  { %v168_v23 = vsel %vm165_vm2, %v5727_v13, %v5728_v12 }
  0x6f   :  { %v5731_v11 = vpop.permute.xlu2 %5730 }
  0x70   :  { %v5732_v25 = vunpack.i.l.bf16 %v5731_v11  ;;  %v5733_v32 = vunpack.i.h.bf16 %v5731_v11 }
  0x72   :  { %v167_v34 = vsel %vm165_vm2, %v5728_v12, %v5732_v25  ;;  %v166_v42 = vsel %vm165_vm2, %v5732_v25, %v5733_v32  ;;  %v169_v52 = vsel %vm165_vm2, %v5733_v32, %v5727_v13 }
  0x77   :  { %v5746_v31 = vpop.permute.xlu2 %5745 }
  0x78   :  { %v5748_v43 = vunpack.i.h.bf16 %v5746_v31  ;;  %v5747_v44 = vunpack.i.l.bf16 %v5746_v31 }
  0x7a   :  { %v142_v58 = vsel %vm139_vm4, %v5747_v44, %v5748_v43 }
  0x7e   :  { %v5716_v14 = vpop.permute.xlu1 %5715  ;;  %v5706_v15 = vpop.permute.xlu0 %5705 }
  0x7f   :  { %v5718_v16 = vunpack.i.h.bf16 %v5716_v14  ;;  %v5717_v17 = vunpack.i.l.bf16 %v5716_v14  ;;  %v5708_v18 = vunpack.i.h.bf16 %v5706_v15  ;;  %v5707_v19 = vunpack.i.l.bf16 %v5706_v15  ;;  %v5761_v59 = vpop.permute.xlu2 %5760 }
  0x81   :  { %v181_v20 = vsel %vm178_vm0, %v5707_v19, %v5708_v18  ;;  %v155_v22 = vsel %vm152_vm1, %v5717_v17, %v5718_v16 }
  0x82   :  { %v199_v21 = vpack.c.bf16 %v181_v20, %v181_v20  ;;  %v195_v26 = vpack.c.bf16 %v168_v23, %v155_v22  ;;  %v5763_v22 = vunpack.i.h.bf16 %v5761_v59  ;;  %v5762_v23 = vunpack.i.l.bf16 %v5761_v59 }
  0x84   :  { %v242_v24 = vsel %vm12613_vm3, %v199_v21, 0 }
  0x85   :  { %256 = vmatpush.bf16.msra.mxu0 %v242_v24 }
  0x86   :  { %v5721_v27 = vpop.permute.xlu1 %5720  ;;  %v5711_v28 = vpop.permute.xlu0 %5710 }
  0x87   :  { %v5713_v29 = vunpack.i.h.bf16 %v5711_v28  ;;  %v5712_v30 = vunpack.i.l.bf16 %v5711_v28  ;;  %v5722_v33 = vunpack.i.l.bf16 %v5721_v27  ;;  %v5723_v35 = vunpack.i.h.bf16 %v5721_v27 }
  0x89   :  { %257 = vmatpush.bf16.msra.mxu0 %v195_v26  ;;  %v180_v36 = vsel %vm178_vm0, %v5708_v18, %v5712_v30  ;;  %v179_v37 = vsel %vm178_vm0, %v5712_v30, %v5713_v29  ;;  %v182_v38 = vsel %vm178_vm0, %v5713_v29, %v5707_v19  ;;  %v153_v45 = vsel %vm152_vm1, %v5722_v33, %v5723_v35  ;;  %v5776_v18 = vpop.permute.xlu2 %5775 }
  0x8a   :  { %v200_v39 = vpack.c.bf16 %v180_v36, %v180_v36  ;;  %v201_v40 = vpack.c.bf16 %v179_v37, %v179_v37  ;;  %v202_v41 = vpack.c.bf16 %v182_v38, %v182_v38  ;;  %v154_v49 = vsel %vm152_vm1, %v5718_v16, %v5722_v33 }
  0x8b   :  { %v197_v50 = vpack.c.bf16 %v166_v42, %v153_v45  ;;  %v156_v51 = vsel %vm152_vm1, %v5723_v35, %v5717_v17  ;;  %v196_v57 = vpack.c.bf16 %v167_v34, %v154_v49  ;;  %v5778_v26 = vunpack.i.h.bf16 %v5776_v18 }
  0x8c   :  { %v245_v46 = vsel %vm12613_vm3, %v200_v39, 0  ;;  %v248_v47 = vsel %vm12613_vm3, %v201_v40, 0  ;;  %v251_v48 = vsel %vm12613_vm3, %v202_v41, 0  ;;  %v198_v60 = vpack.c.bf16 %v169_v52, %v156_v51  ;;  %v76_v39 = vld [vmem:[%s12601_s2 + $0x18] sm:$0xff]  ;;  %v75_v40 = vld [vmem:[%s12601_s2 + $0x10] sm:$0xff]  ;;  %v74_v41 = vld [vmem:[%s12601_s2 + $0x8] sm:$0xff] }
  0x8d   :  { %275 = vmatpush.bf16.msra.mxu1 %v245_v46  ;;  %294 = vmatpush.bf16.msra.mxu2 %v248_v47  ;;  %v5777_v27 = vunpack.i.l.bf16 %v5776_v18  ;;  %v101_v30 = vsel %vm100_vm6, %v5762_v23, %v5763_v22 }
  0x8e   :  { %313 = vmatpush.bf16.msra.mxu3 %v251_v48  ;;  %v5741_v53 = vpop.permute.xlu1 %5740  ;;  %v5736_v54 = vpop.permute.xlu0 %5735  ;;  %220 = vperm.xlu1 %5784, %v76_v39  }
  0x8f   :  { %v5738_v55 = vunpack.i.h.bf16 %v5736_v54  ;;  %v5737_v56 = vunpack.i.l.bf16 %v5736_v54  ;;  %v5742_v1 = vunpack.i.l.bf16 %v5741_v53  ;;  %v5743_v4 = vunpack.i.h.bf16 %v5741_v53  ;;  %215 = vperm.xlu0 %5786, %v75_v40   ;;  %210 = vperm.xlu2 %5785, %v74_v41   ;;  %v5538_v54 = vld [vmem:[%s12600_s1] sm:$0xff] }
  0x90   :  { %v90_v38 = vsel %vm87_vm7, %v5777_v27, %v5778_v26 }
  0x91   :  { %276 = vmatpush.bf16.msra.mxu1 %v196_v57  ;;  %295 = vmatpush.bf16.msra.mxu2 %v197_v50  ;;  %v129_v62 = vsel %vm126_vm5, %v5737_v56, %v5738_v55  ;;  %v128_v12 = vsel %vm126_vm5, %v5738_v55, %v5742_v1  ;;  %v127_v13 = vsel %vm126_vm5, %v5742_v1, %v5743_v4 }
  0x92   :  { %314 = vmatpush.bf16.msra.mxu3 %v198_v60  ;;  %v191_v63 = vpack.c.bf16 %v142_v58, %v129_v62  ;;  %v130_v16 = vsel %vm126_vm5, %v5743_v4, %v5737_v56  ;;  %v183_v50 = vpack.c.bf16 %v90_v38, %v7212_v2  ;;  %v5539_v60 = vld [vmem:[%s12600_s1 + $0x8] sm:$0xff] }
  0x94   :  { %258 = vmatpush.bf16.msra.mxu0 %v191_v63 }
  0x96   :  { %v5756_v7 = vpop.permute.xlu1 %5755  ;;  %v5751_v8 = vpop.permute.xlu0 %5750 }
  0x97   :  { %v5753_v9 = vunpack.i.h.bf16 %v5751_v8  ;;  %v5752_v11 = vunpack.i.l.bf16 %v5751_v8  ;;  %v5758_v24 = vunpack.i.h.bf16 %v5756_v7  ;;  %v5757_v25 = vunpack.i.l.bf16 %v5756_v7 }
  0x99   :  { %v141_v14 = vsel %vm139_vm4, %v5748_v43, %v5752_v11  ;;  %v140_v15 = vsel %vm139_vm4, %v5752_v11, %v5753_v9  ;;  %v143_v17 = vsel %vm139_vm4, %v5753_v9, %v5747_v44  ;;  %v103_v35 = vsel %vm100_vm6, %v5757_v25, %v5758_v24 }
  0x9a   :  { %v192_v19 = vpack.c.bf16 %v141_v14, %v128_v12  ;;  %v193_v20 = vpack.c.bf16 %v140_v15, %v127_v13  ;;  %v194_v21 = vpack.c.bf16 %v143_v17, %v130_v16  ;;  %v102_v36 = vsel %vm100_vm6, %v5758_v24, %v5762_v23 }
  0x9b   :  { %v104_v37 = vsel %vm100_vm6, %v5763_v22, %v5757_v25 }
  0x9c   :  { %277 = vmatpush.bf16.msra.mxu1 %v192_v19  ;;  %296 = vmatpush.bf16.msra.mxu2 %v193_v20 }
  0x9d   :  { %315 = vmatpush.bf16.msra.mxu3 %v194_v21 }
  0x9e   :  { %v5771_v28 = vpop.permute.xlu1 %5770  ;;  %v5766_v29 = vpop.permute.xlu0 %5765 }
  0x9f   :  { %v5773_v31 = vunpack.i.h.bf16 %v5771_v28  ;;  %v5772_v32 = vunpack.i.l.bf16 %v5771_v28  ;;  %v5768_v33 = vunpack.i.h.bf16 %v5766_v29  ;;  %v5767_v34 = vunpack.i.l.bf16 %v5766_v29 }
  0xa1   :  { %v116_v42 = vsel %vm113_vm8, %v5767_v34, %v5768_v33  ;;  %v115_v43 = vsel %vm113_vm8, %v5768_v33, %v5772_v32  ;;  %v114_v44 = vsel %vm113_vm8, %v5772_v32, %v5773_v31  ;;  %v117_v45 = vsel %vm113_vm8, %v5773_v31, %v5767_v34 }
  0xa2   :  { %v187_v46 = vpack.c.bf16 %v116_v42, %v103_v35  ;;  %v188_v47 = vpack.c.bf16 %v115_v43, %v102_v36  ;;  %v189_v48 = vpack.c.bf16 %v114_v44, %v101_v30  ;;  %v190_v49 = vpack.c.bf16 %v117_v45, %v104_v37 }
  0xa4   :  { %259 = vmatpush.bf16.msra.mxu0 %v187_v46  ;;  %278 = vmatpush.bf16.msra.mxu1 %v188_v47 }
  0xa5   :  { %297 = vmatpush.bf16.msra.mxu2 %v189_v48  ;;  %316 = vmatpush.bf16.msra.mxu3 %v190_v49 }
  0xa6   :  { %v5781_v51 = vpop.permute.xlu0 %5780 }
  0xa7   :  { %v5783_v52 = vunpack.i.h.bf16 %v5781_v51  ;;  %v5782_v53 = vunpack.i.l.bf16 %v5781_v51 }
  0xa8   :  { %260 = vmatpush.bf16.msra.mxu0 %v183_v50 }
  0xa9   :  { %v89_v55 = vsel %vm87_vm7, %v5778_v26, %v5782_v53  ;;  %v88_v56 = vsel %vm87_vm7, %v5782_v53, %v5783_v52  ;;  %v91_v2 = vsel %vm87_vm7, %v5783_v52, %v5777_v27 }
  0xaa   :  { %v184_v57 = vpack.c.bf16 %v89_v55, %v7217_v3  ;;  %v185_v58 = vpack.c.bf16 %v88_v56, %v7226_v5  ;;  %v186_v59 = vpack.c.bf16 %v91_v2, %v7231_v6  ;;  %v206_v5 = vpop.permute.xlu1 %205 }
  0xab   :  { %4870 = vmatmul.msk.bf16.vlgmr.msra.gmra.mxu0 %vm233_vm9, %v5538_v54 }
  0xac   :  { %279 = vmatpush.bf16.msra.mxu1 %v184_v57  ;;  %298 = vmatpush.bf16.msra.mxu2 %v185_v58 }
  0xad   :  { %317 = vmatpush.bf16.msra.mxu3 %v186_v59 }
  0xaf   :  { %4872 = vmatmul.msk.bf16.vlgmr.msra.gmra.mxu1 %vm233_vm9, %v5538_v54  ;;  %4874 = vmatmul.msk.bf16.vlgmr.msra.gmra.mxu2 %vm233_vm9, %v5538_v54 }
  0xb0   :  { %4876 = vmatmul.msk.bf16.vlgmr.msra.gmra.mxu3 %vm233_vm9, %v5538_v54 }
  0xbb   :  { %4871 = vmatmul.msk.bf16.gmra.mxu0 %vm233_vm9, %v5539_v60 }
  0xbf   :  { %4873 = vmatmul.msk.bf16.gmra.mxu1 %vm233_vm9, %v5539_v60  ;;  %4875 = vmatmul.msk.bf16.gmra.mxu2 %vm233_vm9, %v5539_v60 }
  0xc0   :  { %4877 = vmatmul.msk.bf16.gmra.mxu3 %vm233_vm9, %v5539_v60 }
  0xe9   :  { %v211_v62 = vpop.permute.xlu2 %210 }
 0x100   :  { %v221_v41 = vpop.permute.xlu1 %220 }
 0x101   :  { %v216_v33 = vpop.permute.xlu0 %215 }
 0x128   :  { %v262_v3 = vpop.f32.mrf.mxu0 }
 0x129   :  { %v263_v61 = vadd.f32 %v262_v3, %v206_v5 }
 0x12b   :  { %v345_v0 = vmul.f32 0.2, %v263_v61  ;;  %vm329_vm10 = vcmp.ge.f32.partialorder %v263_v61, 0.0 }
 0x12c   :  { %v281_v6 = vpop.f32.mrf.mxu1 }
 0x12d   :  { %v282_v1 = vadd.f32 %v281_v6, %v206_v5  ;;  %v361_v12 = vsel %vm329_vm10, %v263_v61, %v345_v0 }
 0x12f   :  { %v346_v13 = vmul.f32 0.2, %v282_v1  ;;  %vm330_vm12 = vcmp.ge.f32.partialorder %v282_v1, 0.0 }
 0x130   :  { %v264_v63 = vpop.f32.mrf.mxu0 }
 0x131   :  { %v265_v4 = vadd.f32 %v264_v63, %v211_v62  ;;  %v362_v21 = vsel %vm330_vm12, %v282_v1, %v346_v13 }
 0x132   :  { %v300_v7 = vpop.f32.mrf.mxu2 }
 0x133   :  { %vm333_vm11 = vcmp.ge.f32.partialorder %v265_v4, 0.0  ;;  %v349_v8 = vmul.f32 0.2, %v265_v4  ;;  %v319_v9 = vpop.f32.mrf.mxu3  ;;  %v301_v17 = vadd.f32 %v300_v7, %v206_v5 }
 0x134   :  { %v283_v11 = vpop.f32.mrf.mxu1  ;;  %v320_v19 = vadd.f32 %v319_v9, %v206_v5 }
 0x135   :  { %v365_v14 = vsel %vm333_vm11, %v265_v4, %v349_v8  ;;  %v284_v15 = vadd.f32 %v283_v11, %v211_v62  ;;  %vm331_vm14 = vcmp.ge.f32.partialorder %v301_v17, 0.0  ;;  %v347_v25 = vmul.f32 0.2, %v301_v17 }
 0x136   :  { %v7357_v16 = vpack.i.bf16 %v365_v14, %v361_v12  ;;  %vm332_vm15 = vcmp.ge.f32.partialorder %v320_v19, 0.0  ;;  %v348_v28 = vmul.f32 0.2, %v320_v19  ;;  %v7367_v34 = vpack.c.bf16 %v365_v14, %v361_v12 }
 0x137   :  { %vm334_vm13 = vcmp.ge.f32.partialorder %v284_v15, 0.0  ;;  %v350_v18 = vmul.f32 0.2, %v284_v15  ;;  %v363_v39 = vsel %vm331_vm14, %v301_v17, %v347_v25 }
 0x138   :  { %v267_v20 = vpop.f32.mrf.mxu0  ;;  %5808 = vrot.lane.b32.xlu0 %v7357_v16, %s7127_s29  ;;  %5788 = vrot.lane.b32.xlu2 %v7357_v16, %s7128_s30  ;;  %12975 = vst [vmem:[#allocation7_spill] sm:$0xff] %v7367_v34  ;;  %v364_v40 = vsel %vm332_vm15, %v320_v19, %v348_v28 }
 0x139   :  { %v366_v22 = vsel %vm334_vm13, %v284_v15, %v350_v18  ;;  %v268_v42 = vadd.f32 %v267_v20, %v216_v33 }
 0x13a   :  { %v302_v23 = vpop.f32.mrf.mxu2  ;;  %v7363_v24 = vpack.i.bf16 %v366_v22, %v362_v21  ;;  %v7369_v35 = vpack.c.bf16 %v366_v22, %v362_v21 }
 0x13b   :  { %v303_v26 = vadd.f32 %v302_v23, %v211_v62  ;;  %v321_v27 = vpop.f32.mrf.mxu3  ;;  %vm337_vm11 = vcmp.ge.f32.partialorder %v268_v42, 0.0  ;;  %v353_v50 = vmul.f32 0.2, %v268_v42 }
 0x13c   :  { %v322_v29 = vadd.f32 %v321_v27, %v211_v62  ;;  %v286_v30 = vpop.f32.mrf.mxu1  ;;  %5803 = vrot.lane.b32.xlu1 %v7363_v24, %s7126_s0  ;;  %12976 = vst [vmem:[#allocation8_spill] sm:$0xff] %v7369_v35 }
 0x13d   :  { %vm335_vm9 = vcmp.ge.f32.partialorder %v303_v26, 0.0  ;;  %v351_v31 = vmul.f32 0.2, %v303_v26  ;;  %v287_v43 = vadd.f32 %v286_v30, %v216_v33  ;;  %v369_v2 = vsel %vm337_vm11, %v268_v42, %v353_v50 }
 0x13e   :  { %vm336_vm10 = vcmp.ge.f32.partialorder %v322_v29, 0.0  ;;  %v352_v32 = vmul.f32 0.2, %v322_v29 }
 0x13f   :  { %v367_v36 = vsel %vm335_vm9, %v303_v26, %v351_v31  ;;  %v354_v52 = vmul.f32 0.2, %v287_v43  ;;  %vm338_vm12 = vcmp.ge.f32.partialorder %v287_v43, 0.0 }
 0x140   :  { %v368_v37 = vsel %vm336_vm10, %v322_v29, %v352_v32  ;;  %v269_v38 = vpop.f32.mrf.mxu0  ;;  %5833 = vrot.lane.b32.xlu0 %v7363_v24, %s7121_s12  ;;  %5793 = vrot.lane.b32.xlu2 %v7363_v24, %s7128_s30  ;;  %v7379_v48 = vpack.i.bf16 %v367_v36, %v363_v39  ;;  %v7393_v7 = vpack.c.bf16 %v367_v36, %v363_v39 }
 0x141   :  { %v270_v44 = vadd.f32 %v269_v38, %v221_v41  ;;  %v7377_v46 = vpack.i.bf16 %v368_v37, %v364_v40  ;;  %v370_v57 = vsel %vm338_vm12, %v287_v43, %v354_v52  ;;  %v7395_v8 = vpack.c.bf16 %v368_v37, %v364_v40 }
 0x142   :  { %v305_v45 = vpop.f32.mrf.mxu2  ;;  %12979 = vst [vmem:[#allocation11_spill] sm:$0xff] %v7393_v7 }
 0x143   :  { %v324_v47 = vpop.f32.mrf.mxu3  ;;  %v357_v53 = vmul.f32 0.2, %v270_v44  ;;  %v306_v54 = vadd.f32 %v305_v45, %v216_v33  ;;  %vm341_vm13 = vcmp.ge.f32.partialorder %v270_v44, 0.0  ;;  %12980 = vst [vmem:[#allocation12_spill] sm:$0xff] %v7395_v8 }
 0x144   :  { %v288_v49 = vpop.f32.mrf.mxu1  ;;  %5813 = vrot.lane.b32.xlu1 %v7363_v24, %s7127_s29  ;;  %v325_v55 = vadd.f32 %v324_v47, %v216_v33 }
 0x145   :  { %v289_v51 = vadd.f32 %v288_v49, %v221_v41  ;;  %v373_v58 = vsel %vm341_vm13, %v270_v44, %v357_v53  ;;  %vm339_vm15 = vcmp.ge.f32.partialorder %v306_v54, 0.0  ;;  %v355_v60 = vmul.f32 0.2, %v306_v54 }
 0x146   :  { %vm340_vm9 = vcmp.ge.f32.partialorder %v325_v55, 0.0  ;;  %v356_v61 = vmul.f32 0.2, %v325_v55  ;;  %v7389_v1 = vpack.c.bf16 %v373_v58, %v369_v2  ;;  %v5892_v19 = vpack.i.bf16 %v373_v58, %v369_v2 }
 0x147   :  { %v358_v56 = vmul.f32 0.2, %v289_v51  ;;  %vm342_vm14 = vcmp.ge.f32.partialorder %v289_v51, 0.0  ;;  %v371_v9 = vsel %vm339_vm15, %v306_v54, %v355_v60 }
 0x148   :  { %5843 = vrot.lane.b32.xlu0 %v7363_v24, %s7125_s28  ;;  %5798 = vrot.lane.b32.xlu2 %v7357_v16, %s7126_s0  ;;  %12977 = vst [vmem:[#allocation9_spill] sm:$0xff] %v7389_v1  ;;  %v372_v11 = vsel %vm340_vm9, %v325_v55, %v356_v61 }
 0x149   :  { %v374_v3 = vsel %vm342_vm14, %v289_v51, %v358_v56 }
 0x14a   :  { %v307_v59 = vpop.f32.mrf.mxu2  ;;  %v7391_v4 = vpack.c.bf16 %v374_v3, %v370_v57  ;;  %v5897_v18 = vpack.i.bf16 %v374_v3, %v370_v57  ;;  %v387_v3 = vld [vmem:[%s12603_s4 + $0x10] sm:$0xff] }
 0x14b   :  { %v308_v5 = vadd.f32 %v307_v59, %v221_v41  ;;  %v326_v6 = vpop.f32.mrf.mxu3  ;;  %v385_v59 = vld [vmem:[%s12603_s4] sm:$0xff] }
 0x14c   :  { %v327_v62 = vadd.f32 %v326_v6, %v221_v41  ;;  %5818 = vrot.lane.b32.xlu1 %v7357_v16, %s7123_s26  ;;  %12978 = vst [vmem:[#allocation10_spill] sm:$0xff] %v7391_v4 }
 0x14d   :  { %vm343_vm10 = vcmp.ge.f32.partialorder %v308_v5, 0.0  ;;  %v359_v63 = vmul.f32 0.2, %v308_v5 }
 0x14e   :  { %vm344_vm3 = vcmp.ge.f32.partialorder %v327_v62, 0.0  ;;  %v360_v0 = vmul.f32 0.2, %v327_v62 }
 0x14f   :  { %v375_v12 = vsel %vm343_vm10, %v308_v5, %v359_v63 }
 0x150   :  { %5863 = vrot.lane.b32.xlu0 %v7377_v46, %s7128_s30  ;;  %5823 = vrot.lane.b32.xlu2 %v7363_v24, %s7123_s26  ;;  %v376_v13 = vsel %vm344_vm3, %v327_v62, %v360_v0  ;;  %v7407_v15 = vpack.c.bf16 %v375_v12, %v371_v9  ;;  %v5982_v22 = vpack.i.bf16 %v375_v12, %v371_v9  ;;  %v388_v62 = vld [vmem:[%s12603_s4 + $0x18] sm:$0xff]  ;;  %vm895_vm3 = vcmask 261120  }
 0x151   :  { %v7405_v14 = vpack.i.bf16 %v376_v13, %v372_v11  ;;  %v7409_v17 = vpack.c.bf16 %v376_v13, %v372_v11 }
 0x152   :  { %12981 = vst [vmem:[#allocation13_spill] sm:$0xff] %v7407_v15 }
 0x153   :  { %12982 = vst [vmem:[#allocation14_spill] sm:$0xff] %v7409_v17 }
 0x154   :  { %5848 = vrot.lane.b32.xlu1 %v7357_v16, %s7124_s27 }
 0x158   :  { %5868 = vrot.lane.b32.xlu0 %v7379_v48, %s7126_s0  ;;  %5828 = vrot.lane.b32.xlu2 %v7357_v16, %s7121_s12 }
 0x15c   :  { %5858 = vrot.lane.b32.xlu1 %v7379_v48, %s7128_s30 }
 0x160   :  { %5883 = vrot.lane.b32.xlu0 %v7379_v48, %s7123_s26  ;;  %5838 = vrot.lane.b32.xlu2 %v7357_v16, %s7125_s28 }
 0x164   :  { %5878 = vrot.lane.b32.xlu1 %v7379_v48, %s7127_s29 }
 0x168   :  { %5898 = vrot.lane.b32.xlu0 %v5897_v18, %s7128_s30  ;;  %5853 = vrot.lane.b32.xlu2 %v7363_v24, %s7124_s27 }
 0x16c   :  { %5893 = vrot.lane.b32.xlu1 %v5892_v19, %s7128_s30 }
 0x170   :  { %5903 = vrot.lane.b32.xlu0 %v5892_v19, %s7126_s0  ;;  %5873 = vrot.lane.b32.xlu2 %v7377_v46, %s7126_s0 }
 0x174   :  { %5913 = vrot.lane.b32.xlu1 %v5892_v19, %s7127_s29 }
 0x178   :  { %5928 = vrot.lane.b32.xlu0 %v5897_v18, %s7123_s26  ;;  %5888 = vrot.lane.b32.xlu2 %v7379_v48, %s7121_s12 }
 0x17c   :  { %5938 = vrot.lane.b32.xlu1 %v5897_v18, %s7121_s12 }
 0x180   :  { %5933 = vrot.lane.b32.xlu0 %v5892_v19, %s7121_s12  ;;  %5908 = vrot.lane.b32.xlu2 %v5897_v18, %s7126_s0 }
 0x184   :  { %5953 = vrot.lane.b32.xlu1 %v5892_v19, %s7124_s27 }
 0x188   :  { %5948 = vrot.lane.b32.xlu0 %v5897_v18, %s7125_s28  ;;  %5918 = vrot.lane.b32.xlu2 %v5897_v18, %s7127_s29 }
 0x18c   :  { %5968 = vrot.lane.b32.xlu1 %v5897_v18, %s7122_s21 }
 0x190   :  { %5963 = vrot.lane.b32.xlu0 %v5892_v19, %s7122_s21  ;;  %5923 = vrot.lane.b32.xlu2 %v5892_v19, %s7123_s26 }
 0x192   :  { %v7443_v20 = vpop.permute.xlu2 %5788 }
 0x193   :  { %v12626_v36 = vunpack.i.h.bf16 %v7443_v20  ;;  %v12627_v37 = vunpack.i.l.bf16 %v7443_v20 }
 0x194   :  { %5978 = vrot.lane.b32.xlu1 %v7405_v14, %s7128_s30 }
 0x198   :  { %5988 = vrot.lane.b32.xlu0 %v7405_v14, %s7126_s0  ;;  %5943 = vrot.lane.b32.xlu2 %v5892_v19, %s7125_s28 }
 0x19a   :  { %v7450_v21 = vpop.permute.xlu2 %5793 }
 0x19c   :  { %5983 = vrot.lane.b32.xlu1 %v5982_v22, %s7126_s0 }
 0x1a0   :  { %5998 = vrot.lane.b32.xlu0 %v5982_v22, %s7123_s26  ;;  %5958 = vrot.lane.b32.xlu2 %v5897_v18, %s7124_s27 }
 0x1a2   :  { %v7455_v23 = vpop.permute.xlu2 %5798 }
 0x1a3   :  { %v12628_v50 = vunpack.i.h.bf16 %v7455_v23  ;;  %v5800_v51 = vunpack.i.l.bf16 %v7455_v23 }
 0x1a4   :  { %5993 = vrot.lane.b32.xlu1 %v5982_v22, %s7127_s29 }
 0x1a8   :  { %6003 = vrot.lane.b32.xlu0 %v7357_v16, %s7122_s21  ;;  %5973 = vrot.lane.b32.xlu2 %v5982_v22, %s7128_s30 }
 0x1aa   :  { %v7461_v25 = vpop.permute.xlu0 %5808  ;;  %v7463_v26 = vpop.permute.xlu2 %5823 }
 0x1ab   :  { %v12622_v63 = vunpack.i.h.bf16 %v7461_v25  ;;  %v12614_v0 = vunpack.i.l.bf16 %v7461_v25 }
 0x1ac   :  { %6008 = vrot.lane.b32.xlu1 %v7363_v24, %s7122_s21 }
 0x1ae   :  { %v7467_v27 = vpop.permute.xlu1 %5803 }
 0x1b0   :  { %6018 = vrot.lane.b32.xlu0 %v7377_v46, %s7127_s29  ;;  %6013 = vrot.lane.b32.xlu2 %v7379_v48, %s7125_s28 }
 0x1b2   :  { %v7473_v28 = vpop.permute.xlu0 %5833  ;;  %v7475_v16 = vpop.permute.xlu2 %5828 }
 0x1b3   :  { %12983 = vst [vmem:[#allocation15_spill] sm:$0xff] %v7475_v16 }
 0x1b4   :  { %6023 = vrot.lane.b32.xlu1 %v5982_v22, %s7121_s12 }
 0x1b6   :  { %v7478_v29 = vpop.permute.xlu1 %5813 }
 0x1b7   :  { %v12623_v61 = vunpack.i.h.bf16 %v7478_v29 }
 0x1b8   :  { %6038 = vrot.lane.b32.xlu0 %v7405_v14, %s7127_s29  ;;  %6033 = vrot.lane.b32.xlu2 %v5982_v22, %s7125_s28 }
 0x1ba   :  { %v7483_v24 = vpop.permute.xlu0 %5843  ;;  %v7485_v30 = vpop.permute.xlu2 %5838 }
 0x1bb   :  { %12984 = vst [vmem:[#allocation16_spill] sm:$0xff] %v7485_v30 }
 0x1bc   :  { %6028 = vrot.lane.b32.xlu1 %v7379_v48, %s7124_s27 }
 0x1be   :  { %v7489_v31 = vpop.permute.xlu1 %5818 }
 0x1bf   :  { %v12633_v19 = vunpack.i.h.bf16 %v7489_v31  ;;  %v12630_v43 = vunpack.i.l.bf16 %v7489_v31 }
 0x1c0   :  { %6063 = vrot.lane.b32.xlu0 %v7405_v14, %s7121_s12  ;;  %6048 = vrot.lane.b32.xlu2 %v7405_v14, %s7123_s26 }
 0x1c2   :  { %v7495_v32 = vpop.permute.xlu0 %5863  ;;  %v7497_v33 = vpop.permute.xlu2 %5853 }
 0x1c3   :  { %v12616_v38 = vunpack.i.h.bf16 %v7495_v32  ;;  %v12617_v39 = vunpack.i.l.bf16 %v7495_v32 }
 0x1c4   :  { %6043 = vrot.lane.b32.xlu1 %v5982_v22, %s7124_s27 }
 0x1c5   :  { %v7510_v40 = vsel %vm87_vm7, %v12617_v39, %v12627_v37  ;;  %v7518_v41 = vsel %vm87_vm7, %v12616_v38, %v12626_v36 }
 0x1c6   :  { %12985 = vst [vmem:[#allocation17_spill] sm:$0xff] %v7510_v40  ;;  %v7520_v42 = vpop.permute.xlu1 %5848  ;;  %v13009_v40 = vunpack.i.l.bf16 %v7463_v26 }
 0x1c7   :  { %12986 = vst [vmem:[#allocation18_spill] sm:$0xff] %v7518_v41 }
 0x1c8   :  { %12987 = vst [vmem:[#allocation19_spill] sm:$0xff] %v7520_v42  ;;  %6068 = vrot.lane.b32.xlu0 %v7379_v48, %s7122_s21  ;;  %6053 = vrot.lane.b32.xlu2 %v7377_v46, %s7123_s26 }
 0x1ca   :  { %v7528_v44 = vpop.permute.xlu0 %5868  ;;  %v7530_v45 = vpop.permute.xlu2 %5873 }
 0x1cb   :  { %v12619_v47 = vunpack.i.h.bf16 %v7530_v45  ;;  %v12620_v49 = vunpack.i.l.bf16 %v7530_v45 }
 0x1cc   :  { %6073 = vrot.lane.b32.xlu1 %v5982_v22, %s7122_s21  ;;  %v386_v22 = vld [vmem:[%s12603_s4 + $0x8] sm:$0xff] }
 0x1cd   :  { %v7545_v48 = vsel %vm100_vm6, %v12620_v49, %v5800_v51  ;;  %v7553_v53 = vsel %vm100_vm6, %v12619_v47, %v12628_v50 }
 0x1ce   :  { %v7537_v52 = vpop.permute.xlu1 %5858  ;;  %12988 = vst [vmem:[#allocation20_spill] sm:$0xff] %v7545_v48 }
 0x1d0   :  { %6088 = vrot.lane.b32.xlu0 %v7405_v14, %s7124_s27  ;;  %6058 = vrot.lane.b32.xlu2 %v7377_v46, %s7121_s12 }
 0x1d2   :  { %v7561_v55 = vpop.permute.xlu0 %5883  ;;  %v7563_v56 = vpop.permute.xlu2 %5888 }
 0x1d4   :  { %6078 = vrot.lane.b32.xlu1 %v7405_v14, %s7125_s28 }
 0x1d6   :  { %v7567_v2 = vpop.permute.xlu1 %5878 }
 0x1d8   :  { %6103 = vrot.lane.b32.xlu0 %v7377_v46, %s7122_s21  ;;  %6083 = vrot.lane.b32.xlu2 %v7377_v46, %s7125_s28 }
 0x1da   :  { %v7573_v57 = vpop.permute.xlu0 %5898  ;;  %v7575_v58 = vpop.permute.xlu2 %5908 }
 0x1dc   :  { %6093 = vrot.lane.b32.xlu1 %v7377_v46, %s7124_s27  ;;  %v12621_v46 = vunpack.i.l.bf16 %v7478_v29 }
 0x1de   :  { %v7582_v60 = vpop.permute.xlu1 %5893  ;;  %v525_v18 = vsel %vm113_vm8, %v12614_v0, %v12621_v46 }
 0x1e0   :  { %847 = vperm.xlu0 %5786, %v385_v59   ;;  %6098 = vrot.lane.b32.xlu2 %v7405_v14, %s7122_s21 }
 0x1e2   :  { %v7589_v5 = vpop.permute.xlu0 %5903  ;;  %v7591_v6 = vpop.permute.xlu2 %5918 }
 0x1e3   :  { %v12624_v11 = vunpack.i.h.bf16 %v7591_v6  ;;  %v12625_v12 = vunpack.i.l.bf16 %v7591_v6  ;;  %v12640_v54 = vunpack.i.h.bf16 %v7589_v5  ;;  %v12641_v0 = vunpack.i.l.bf16 %v7589_v5 }
 0x1e4   :  { %857 = vperm.xlu1 %5784, %v387_v3  }
 0x1e6   :  { %v7600_v9 = vpop.permute.xlu1 %5913 }
 0x1e7   :  { %v12618_v13 = vunpack.i.h.bf16 %v7600_v9  ;;  %v12615_v14 = vunpack.i.l.bf16 %v7600_v9 }
 0x1e8   :  { %862 = vperm.xlu2 %5785, %v388_v62   ;;  %v526_v62 = vsel %vm113_vm8, %v12622_v63, %v12623_v61  ;;  %v12635_v63 = vunpack.i.h.bf16 %v7463_v26  ;;  %v12637_v61 = vunpack.i.l.bf16 %v7463_v26 }
 0x1e9   :  { %v527_v59 = vsel %vm113_vm8, %v12615_v14, %v12625_v12  ;;  %v528_v3 = vsel %vm113_vm8, %v12618_v13, %v12624_v11  ;;  %v12636_v12 = vunpack.i.l.bf16 %v7467_v27 }
 0x1ea   :  { %v7637_v14 = vpop.permute.xlu0 %5928  ;;  %v7639_v38 = vpop.permute.xlu2 %5923  ;;  %v801_v39 = vpack.c.bf16 %v528_v3, %v527_v59  ;;  %v12631_v59 = vunpack.i.h.bf16 %v7575_v58  ;;  %v12632_v3 = vunpack.i.l.bf16 %v7575_v58 }
 0x1eb   :  { %v12638_v13 = vunpack.i.h.bf16 %v7637_v14  ;;  %v12639_v47 = vunpack.i.l.bf16 %v7637_v14  ;;  %v12634_v49 = vunpack.i.h.bf16 %v7639_v38  ;;  %v12629_v46 = vunpack.i.l.bf16 %v7639_v38 }
 0x1ec   :  { %852 = vperm.xlu1 %5784, %v386_v22   ;;  %902 = vmatpush.bf16.msrb.mxu0 %v801_v39  ;;  %v797_v39 = vpack.c.bf16 %v526_v62, %v525_v18  ;;  %v479_v11 = vsel %vm100_vm6, %v12641_v0, %v12632_v3  ;;  %v477_v18 = vsel %vm100_vm6, %v5800_v51, %v12636_v12  ;;  %v12989_v62 = vunpack.i.h.bf16 %v7467_v27 }
 0x1ed   :  { %v719_v36 = vsel %vm165_vm2, %v12629_v46, %v12639_v47  ;;  %v720_v37 = vsel %vm165_vm2, %v12634_v49, %v12638_v13  ;;  %v480_v46 = vsel %vm100_vm6, %v12640_v54, %v12631_v59  ;;  %v12650_v49 = vunpack.i.h.bf16 %v7582_v60 }
 0x1ee   :  { %v7663_v22 = vpop.permute.xlu1 %5938  ;;  %v833_v50 = vpack.c.bf16 %v720_v37, %v719_v36  ;;  %v717_v36 = vsel %vm165_vm2, %v12630_v43, %v12637_v61  ;;  %v718_v37 = vsel %vm165_vm2, %v12633_v19, %v12635_v63  ;;  %v12990_v43 = vunpack.i.h.bf16 %v7455_v23 }
 0x1ef   :  { %v12647_v19 = vunpack.i.l.bf16 %v7473_v28  ;;  %v12651_v63 = vunpack.i.l.bf16 %v7582_v60  ;;  %v793_v23 = vpack.c.bf16 %v480_v46, %v479_v11  ;;  %v829_v61 = vpack.c.bf16 %v718_v37, %v717_v36 }
 0x1f0   :  { %903 = vmatpush.bf16.msrb.mxu0 %v797_v39  ;;  %921 = vmatpush.bf16.msrb.mxu1 %v833_v50  ;;  %v478_v59 = vsel %vm100_vm6, %v12990_v43, %v12989_v62  ;;  %v12646_v39 = vunpack.i.l.bf16 %v7475_v16  ;;  %v12644_v43 = vunpack.i.h.bf16 %v7663_v22  ;;  %v12645_v62 = vunpack.i.l.bf16 %v7663_v22 }
 0x1f1   :  { %v12653_v54 = vunpack.i.h.bf16 %v7450_v21  ;;  %v12652_v0 = vunpack.i.l.bf16 %v7450_v21  ;;  %v12648_v50 = vunpack.i.h.bf16 %v7573_v57  ;;  %v12649_v3 = vunpack.i.l.bf16 %v7573_v57 }
 0x1f2   :  { %v7707_v51 = vpop.permute.xlu0 %5933  ;;  %v7709_v12 = vpop.permute.xlu2 %5943 }
 0x1f3   :  { %12991 = vst [vmem:[#allocation21_spill] sm:$0xff] %v7709_v12  ;;  %v12643_v13 = vunpack.i.h.bf16 %v7707_v51  ;;  %v12642_v47 = vunpack.i.l.bf16 %v7707_v51 }
 0x1f4   :  { %904 = vmatpush.bf16.msrb.mxu0 %v793_v23  ;;  %922 = vmatpush.bf16.msrb.mxu1 %v829_v61  ;;  %v789_v61 = vpack.c.bf16 %v478_v59, %v477_v18  ;;  %v431_v23 = vsel %vm87_vm7, %v12651_v63, %v12649_v3  ;;  %v669_v59 = vsel %vm152_vm1, %v12646_v39, %v12647_v19  ;;  %v12993_v18 = vunpack.i.h.bf16 %v7473_v28 }
 0x1f5   :  { %v671_v46 = vsel %vm152_vm1, %v12642_v47, %v12645_v62  ;;  %v672_v11 = vsel %vm152_vm1, %v12643_v13, %v12644_v43  ;;  %v432_v47 = vsel %vm87_vm7, %v12650_v49, %v12648_v50  ;;  %v12657_v13 = vunpack.i.l.bf16 %v7483_v24 }
 0x1f6   :  { %v7731_v36 = vpop.permute.xlu1 %5953  ;;  %v825_v37 = vpack.c.bf16 %v672_v11, %v671_v46  ;;  %v12994_v46 = vunpack.i.h.bf16 %v7475_v16  ;;  %v12655_v43 = vunpack.i.l.bf16 %v7485_v30  ;;  %v12995_v62 = vunpack.i.l.bf16 %v7443_v20 }
 0x1f7   :  { %12992 = vst [vmem:[#allocation22_spill] sm:$0xff] %v7731_v36  ;;  %v12996_v19 = vunpack.i.h.bf16 %v7443_v20  ;;  %v785_v3 = vpack.c.bf16 %v432_v47, %v431_v23  ;;  %v12654_v63 = vunpack.i.h.bf16 %v7709_v12  ;;  %v13023_v16 = vunpack.i.l.bf16 %v7467_v27 }
 0x1f8   :  { %v670_v11 = vsel %vm152_vm1, %v12994_v46, %v12993_v18  ;;  %905 = vmatpush.bf16.msrb.mxu0 %v789_v61  ;;  %923 = vmatpush.bf16.msrb.mxu1 %v825_v37  ;;  %v429_v39 = vsel %vm87_vm7, %v12995_v62, %v12652_v0  ;;  %v12660_v61 = vunpack.i.h.bf16 %v7483_v24  ;;  %v12659_v37 = vunpack.i.h.bf16 %v7485_v30 }
 0x1f9   :  { %v430_v18 = vsel %vm87_vm7, %v12996_v19, %v12653_v54  ;;  %v821_v49 = vpack.c.bf16 %v670_v11, %v669_v59  ;;  %v12656_v62 = vunpack.i.l.bf16 %v7709_v12  ;;  %v13008_v30 = vunpack.i.l.bf16 %v7561_v55 }
 0x1fa   :  { %v7773_v46 = vpop.permute.xlu0 %5948  ;;  %v7775_v50 = vpop.permute.xlu2 %5958  ;;  %v781_v19 = vpack.c.bf16 %v430_v18, %v429_v39  ;;  %v622_v11 = vsel %vm139_vm4, %v12659_v37, %v12660_v61  ;;  %v12662_v18 = vunpack.i.h.bf16 %v7731_v36  ;;  %v12675_v61 = vunpack.i.l.bf16 %v7497_v33 }
 0x1fb   :  { %v12658_v0 = vunpack.i.h.bf16 %v7773_v46  ;;  %v12665_v20 = vunpack.i.l.bf16 %v7773_v46  ;;  %v12664_v39 = vunpack.i.l.bf16 %v7775_v50  ;;  %v713_v41 = vsel %vm165_vm2, %v13009_v40, %v13008_v30  ;;  %v5543_v30 = vld [vmem:[%s12602_s3 + $0x1c] sm:$0xf] }
 0x1fc   :  { %906 = vmatpush.bf16.msrb.mxu0 %v785_v3  ;;  %924 = vmatpush.bf16.msrb.mxu1 %v821_v49  ;;  %v621_v49 = vsel %vm139_vm4, %v12655_v43, %v12657_v13  ;;  %v12663_v3 = vunpack.i.h.bf16 %v7775_v50  ;;  %v13012_v40 = vunpack.i.l.bf16 %v7591_v6 }
 0x1fd   :  { %v623_v54 = vsel %vm139_vm4, %v12656_v62, %v12665_v20  ;;  %v624_v47 = vsel %vm139_vm4, %v12654_v63, %v12658_v0  ;;  %v12661_v63 = vunpack.i.l.bf16 %v7731_v36  ;;  %v813_v43 = vpack.c.bf16 %v622_v11, %v621_v49 }
 0x1fe   :  { %v7801_v23 = vpop.permute.xlu1 %5968  ;;  %v817_v59 = vpack.c.bf16 %v624_v47, %v623_v54  ;;  %v12998_v36 = vunpack.i.h.bf16 %v7497_v33 }
 0x1ff   :  { %v575_v47 = vsel %vm126_vm5, %v12661_v63, %v12664_v39  ;;  %v12673_v49 = vunpack.i.h.bf16 %v7801_v23  ;;  %v4880_v63 = vld [vmem:[%s12602_s3] sm:$0xf] }
 0x200   :  { %907 = vmatpush.bf16.msrb.mxu0 %v781_v19  ;;  %925 = vmatpush.bf16.msrb.mxu1 %v817_v59  ;;  %v576_v19 = vsel %vm126_vm5, %v12662_v18, %v12663_v3  ;;  %v12668_v59 = vunpack.i.l.bf16 %v7801_v23  ;;  %v5541_v18 = vld [vmem:[%s12602_s3 + $0x8] sm:$0xf0]  ;;  %v12997_v3 = vunpack.i.l.bf16 %v7520_v42 }
 0x201   :  { %v809_v62 = vpack.c.bf16 %v576_v19, %v575_v47  ;;  %v7864_v8 = vor.u32 %v5541_v18, %v4880_v63  ;;  %v4882_v47 = vld [vmem:[%s12602_s3 + $0xc] sm:$0xf0]  ;;  %v13000_v63 = vunpack.i.l.bf16 %v7582_v60 }
 0x202   :  { %v7813_v0 = vpop.permute.xlu0 %5963  ;;  %v7815_v54 = vpop.permute.xlu2 %5973 }
 0x203   :  { %v12674_v11 = vunpack.i.h.bf16 %v7813_v0  ;;  %v12669_v37 = vunpack.i.l.bf16 %v7813_v0 }
 0x204   :  { %908 = vmatpush.bf16.msrb.mxu0 %v7389_v1  ;;  %926 = vmatpush.bf16.msrb.mxu1 %v813_v43  ;;  %v573_v1 = vsel %vm126_vm5, %v12997_v3, %v12675_v61  ;;  %v5540_v3 = vld [vmem:[%s12602_s3 + $0x4] sm:$0xf] }
 0x205   :  { %v767_v39 = vsel %vm178_vm0, %v12669_v37, %v12668_v59  ;;  %v768_v43 = vsel %vm178_vm0, %v12674_v11, %v12673_v49  ;;  %v12999_v49 = vunpack.i.h.bf16 %v7520_v42 }
 0x206   :  { %v7854_v20 = vpop.permute.xlu1 %5978  ;;  %v841_v13 = vpack.c.bf16 %v768_v43, %v767_v39 }
 0x207   :  { %v12676_v59 = vunpack.i.h.bf16 %v7854_v20  ;;  %v12677_v37 = vunpack.i.l.bf16 %v7854_v20  ;;  %v574_v39 = vsel %vm126_vm5, %v12999_v49, %v12998_v36  ;;  %v13002_v36 = vunpack.i.h.bf16 %v7582_v60 }
 0x208   :  { %909 = vmatpush.bf16.msrb.mxu0 %v7367_v34  ;;  %927 = vmatpush.bf16.msrb.mxu1 %v809_v62  ;;  %v7904_v60 = vor.u32 %v5540_v3, %v4882_v47  ;;  %v5544_v3 = vld [vmem:[%s12602_s3 + $0x20] sm:$0xf0]  ;;  %v13007_v47 = vunpack.i.h.bf16 %v7637_v14 }
 0x209   :  { %946 = vmatpush.bf16.msrb.mxu2 %v841_v13  ;;  %v7885_v18 = vsel %vm87_vm7, %v12677_v37, %v13000_v63  ;;  %v7893_v62 = vsel %vm87_vm7, %v12676_v59, %v13002_v36  ;;  %v805_v13 = vpack.c.bf16 %v574_v39, %v573_v1  ;;  %v13004_v36 = vunpack.i.l.bf16 %v7589_v5  ;;  %v4892_v37 = vld [vmem:[%s12602_s3 + $0x18] sm:$0xf] }
 0x20a   :  { %13001 = vst [vmem:[#allocation23_spill] sm:$0xff] %v7885_v18  ;;  %v7895_v19 = vpop.permute.xlu0 %5988  ;;  %v7897_v49 = vpop.permute.xlu2 %6013  ;;  %v13005_v1 = vunpack.i.h.bf16 %v7589_v5 }
 0x20b   :  { %13003 = vst [vmem:[#allocation24_spill] sm:$0xff] %v7893_v62  ;;  %v12678_v11 = vunpack.i.h.bf16 %v7895_v19  ;;  %v12679_v63 = vunpack.i.l.bf16 %v7895_v19  ;;  %910 = vmatmul.bf16.vlgmr.msrb.gmra.mxu0 %v7864_v8  ;;  %v13015_v62 = vunpack.i.l.bf16 %v7567_v2 }
 0x20c   :  { %928 = vmatpush.bf16.msrb.mxu1 %v805_v13 }
 0x20d   :  { %v7912_v61 = vsel %vm100_vm6, %v12679_v63, %v13004_v36  ;;  %v7920_v39 = vsel %vm100_vm6, %v12678_v11, %v13005_v1  ;;  %v13006_v11 = vunpack.i.l.bf16 %v7637_v14 }
 0x20e   :  { %v7922_v43 = vpop.permute.xlu1 %5983 }
 0x20f   :  { %929 = vmatmul.bf16.vlgmr.msrb.gmra.mxu1 %v7904_v60 }
 0x212   :  { %v7929_v36 = vpop.permute.xlu0 %5998  ;;  %v7931_v5 = vpop.permute.xlu2 %6033 }
 0x213   :  { %v12690_v59 = vunpack.i.h.bf16 %v7929_v36  ;;  %v12689_v1 = vunpack.i.l.bf16 %v7929_v36 }
 0x215   :  { %v715_v63 = vsel %vm165_vm2, %v13006_v11, %v12689_v1  ;;  %v716_v13 = vsel %vm165_vm2, %v13007_v47, %v12690_v59  ;;  %v13010_v11 = vunpack.i.h.bf16 %v7561_v55  ;;  %v13011_v1 = vunpack.i.h.bf16 %v7463_v26  ;;  %v4894_v26 = vld [vmem:[%s12602_s3 + $0x24] sm:$0xf0] }
 0x216   :  { %v7954_v42 = vpop.permute.xlu1 %5993  ;;  %v834_v17 = vpack.c.bf16 %v716_v13, %v715_v63  ;;  %v7971_v13 = vor.u32 %v5544_v3, %v4892_v37  ;;  %v13013_v37 = vunpack.i.h.bf16 %v7591_v6  ;;  %v12700_v47 = vunpack.i.l.bf16 %v7922_v43 }
 0x217   :  { %v714_v14 = vsel %vm165_vm2, %v13011_v1, %v13010_v11  ;;  %v12696_v59 = vunpack.i.h.bf16 %v7954_v42  ;;  %v12695_v63 = vunpack.i.l.bf16 %v7954_v42  ;;  %v12699_v11 = vunpack.i.h.bf16 %v7922_v43 }
 0x218   :  { %978 = vmatpush.bf16.msra.mxu0 %v834_v17  ;;  %v830_v3 = vpack.c.bf16 %v714_v14, %v713_v41  ;;  %v8006_v14 = vor.u32 %v5543_v30, %v4894_v26  ;;  %v13020_v26 = vunpack.i.h.bf16 %v7639_v38 }
 0x219   :  { %v523_v1 = vsel %vm113_vm8, %v13012_v40, %v12695_v63  ;;  %v524_v17 = vsel %vm113_vm8, %v13013_v37, %v12696_v59  ;;  %v13016_v40 = vunpack.i.l.bf16 %v7478_v29  ;;  %v13017_v37 = vunpack.i.h.bf16 %v7567_v2 }
 0x21a   :  { %v7993_v34 = vpop.permute.xlu0 %6003  ;;  %v7995_v12 = vpop.permute.xlu2 %6048  ;;  %v802_v18 = vpack.c.bf16 %v524_v17, %v523_v1  ;;  %v13018_v59 = vunpack.i.h.bf16 %v7478_v29 }
 0x21b   :  { %13014 = vst [vmem:[#allocation25_spill] sm:$0xff] %v7993_v34  ;;  %v521_v6 = vsel %vm113_vm8, %v13016_v40, %v13015_v62  ;;  %v12698_v63 = vunpack.i.h.bf16 %v7995_v12  ;;  %v12697_v41 = vunpack.i.l.bf16 %v7995_v12  ;;  %915 = vmatmul.bf16.gmra.mxu0 %v7971_v13  ;;  %v12710_v62 = vunpack.i.l.bf16 %v7528_v44 }
 0x21c   :  { %v522_v1 = vsel %vm113_vm8, %v13018_v59, %v13017_v37  ;;  %959 = vmatpush.bf16.msrb.mxu3 %v802_v18  ;;  %979 = vmatpush.bf16.msra.mxu0 %v830_v3  ;;  %v13019_v40 = vunpack.i.l.bf16 %v7639_v38  ;;  %v13021_v3 = vunpack.i.l.bf16 %v7575_v58  ;;  %v13022_v38 = vunpack.i.h.bf16 %v7575_v58  ;;  %v4888_v58 = vld [vmem:[%s12602_s3 + $0x8] sm:$0xf] }
 0x21d   :  { %v8030_v29 = vsel %vm165_vm2, %v12698_v63, %v13020_v26  ;;  %v798_v18 = vpack.c.bf16 %v522_v1, %v521_v6  ;;  %v12703_v6 = vunpack.i.l.bf16 %v7993_v34 }
 0x21e   :  { %v8022_v30 = vsel %vm165_vm2, %v12697_v41, %v13019_v40  ;;  %v8032_v59 = vpop.permute.xlu1 %6008  ;;  %v475_v37 = vsel %vm100_vm6, %v13021_v3, %v12700_v47  ;;  %v476_v40 = vsel %vm100_vm6, %v13022_v38, %v12699_v11  ;;  %v12708_v41 = vunpack.i.h.bf16 %v7993_v34  ;;  %v5542_v3 = vld [vmem:[%s12602_s3 + $0x10] sm:$0xf0] }
 0x21f   :  { %v12709_v1 = vunpack.i.h.bf16 %v8032_v59  ;;  %v12704_v63 = vunpack.i.l.bf16 %v8032_v59  ;;  %934 = vmatmul.bf16.gmra.mxu1 %v8006_v14  ;;  %v794_v17 = vpack.c.bf16 %v476_v40, %v475_v37  ;;  %v12716_v34 = vunpack.i.l.bf16 %v7815_v54 }
 0x220   :  { %960 = vmatpush.bf16.msrb.mxu3 %v798_v18  ;;  %v8083_v48 = vor.u32 %v5542_v3, %v4888_v58  ;;  %v12715_v40 = vunpack.i.h.bf16 %v7537_v52 }
 0x221   :  { %v765_v38 = vsel %vm178_vm0, %v12703_v6, %v12704_v63  ;;  %v766_v18 = vsel %vm178_vm0, %v12708_v41, %v12709_v1  ;;  %v473_v6 = vsel %vm100_vm6, %v13023_v16, %v12710_v62  ;;  %v12712_v63 = vunpack.i.h.bf16 %v7815_v54 }
 0x222   :  { %v8071_v26 = vpop.permute.xlu0 %6018  ;;  %v8073_v11 = vpop.permute.xlu2 %6053  ;;  %v837_v47 = vpack.c.bf16 %v766_v18, %v765_v38  ;;  %v13024_v41 = vunpack.i.h.bf16 %v7528_v44  ;;  %v13025_v1 = vunpack.i.h.bf16 %v7467_v27  ;;  %v12714_v16 = vunpack.i.l.bf16 %v7537_v52 }
 0x223   :  { %v12717_v18 = vunpack.i.l.bf16 %v7563_v56  ;;  %v13029_v38 = vunpack.i.h.bf16 %v7663_v22 }
 0x224   :  { %v474_v37 = vsel %vm100_vm6, %v13025_v1, %v13024_v41  ;;  %947 = vmatpush.bf16.msrb.mxu2 %v837_v47  ;;  %961 = vmatpush.bf16.msrb.mxu3 %v794_v17  ;;  %v13026_v47 = vunpack.i.l.bf16 %v7573_v57  ;;  %v13027_v17 = vunpack.i.h.bf16 %v7573_v57  ;;  %v13028_v1 = vunpack.i.l.bf16 %v7663_v22 }
 0x225   :  { %v790_v3 = vpack.c.bf16 %v474_v37, %v473_v6  ;;  %v13030_v57 = vunpack.i.l.bf16 %v7450_v21 }
 0x226   :  { %v8095_v58 = vpop.permute.xlu1 %6023  ;;  %v427_v41 = vsel %vm87_vm7, %v13026_v47, %v12716_v34  ;;  %v428_v6 = vsel %vm87_vm7, %v13027_v17, %v12712_v63  ;;  %v13031_v17 = vunpack.i.h.bf16 %v7450_v21  ;;  %v13034_v21 = vunpack.i.h.bf16 %v7473_v28 }
 0x227   :  { %v12713_v62 = vunpack.i.h.bf16 %v8095_v58  ;;  %v12711_v27 = vunpack.i.l.bf16 %v8095_v58  ;;  %4902 = vmatmul.msk.bf16.vlgmr.msrb.gmra.mxu2 %vm895_vm3, %v8083_v48  ;;  %v786_v63 = vpack.c.bf16 %v428_v6, %v427_v41  ;;  %v12719_v34 = vunpack.i.l.bf16 %v7931_v5 }
 0x228   :  { %962 = vmatpush.bf16.msrb.mxu3 %v790_v3  ;;  %v425_v3 = vsel %vm87_vm7, %v13030_v57, %v12714_v16  ;;  %v13033_v16 = vunpack.i.h.bf16 %v7563_v56 }
 0x229   :  { %v667_v37 = vsel %vm152_vm1, %v13028_v1, %v12711_v27  ;;  %v668_v47 = vsel %vm152_vm1, %v13029_v38, %v12713_v62  ;;  %v426_v1 = vsel %vm87_vm7, %v13031_v17, %v12715_v40  ;;  %v13032_v62 = vunpack.i.l.bf16 %v7473_v28 }
 0x22a   :  { %v8137_v27 = vpop.permute.xlu0 %6038  ;;  %v8139_v22 = vpop.permute.xlu2 %6058  ;;  %v826_v38 = vpack.c.bf16 %v668_v47, %v667_v37  ;;  %v666_v17 = vsel %vm152_vm1, %v13034_v21, %v13033_v16  ;;  %v13035_v16 = vunpack.i.h.bf16 %v7954_v42  ;;  %v13037_v28 = vunpack.i.l.bf16 %v7773_v46 }
 0x22b   :  { %v665_v57 = vsel %vm152_vm1, %v13032_v62, %v12717_v18  ;;  %v12718_v41 = vunpack.i.h.bf16 %v8137_v27  ;;  %v12720_v6 = vunpack.i.l.bf16 %v8137_v27  ;;  %v13036_v18 = vunpack.i.l.bf16 %v7954_v42 }
 0x22c   :  { %963 = vmatpush.bf16.msrb.mxu3 %v786_v63  ;;  %980 = vmatpush.bf16.msra.mxu0 %v826_v38  ;;  %v782_v38 = vpack.c.bf16 %v426_v1, %v425_v3  ;;  %v822_v62 = vpack.c.bf16 %v666_v17, %v665_v57  ;;  %v619_v40 = vsel %vm139_vm4, %v13037_v28, %v12719_v34  ;;  %v13041_v3 = vunpack.i.l.bf16 %v7567_v2 }
 0x22d   :  { %v520_v21 = vsel %vm113_vm8, %v13035_v16, %v12718_v41  ;;  %v519_v37 = vsel %vm113_vm8, %v13036_v18, %v12720_v6  ;;  %v13038_v16 = vunpack.i.h.bf16 %v7931_v5  ;;  %v13039_v41 = vunpack.i.h.bf16 %v7773_v46  ;;  %v4900_v46 = vld [vmem:[%s12602_s3 + $0x20] sm:$0xf] }
 0x22e   :  { %v8173_v63 = vpop.permute.xlu1 %6028  ;;  %v803_v47 = vpack.c.bf16 %v520_v21, %v519_v37  ;;  %v13040_v18 = vunpack.i.l.bf16 %v8071_v26  ;;  %v13042_v57 = vunpack.i.h.bf16 %v8071_v26  ;;  %v13043_v17 = vunpack.i.h.bf16 %v7567_v2 }
 0x22f   :  { %v620_v42 = vsel %vm139_vm4, %v13039_v41, %v13038_v16  ;;  %v5545_v41 = vld [vmem:[%s12602_s3 + $0x28] sm:$0xf0]  ;;  %v13045_v28 = vunpack.i.l.bf16 %v7483_v24  ;;  %v13046_v2 = vunpack.i.h.bf16 %v7897_v49  ;;  %v13052_v6 = vunpack.i.h.bf16 %v7995_v12 }
 0x230   :  { %964 = vmatpush.bf16.msrb.mxu3 %v782_v38  ;;  %981 = vmatpush.bf16.msra.mxu0 %v822_v62  ;;  %v517_v1 = vsel %vm113_vm8, %v13041_v3, %v13040_v18  ;;  %v518_v37 = vsel %vm113_vm8, %v13043_v17, %v13042_v57  ;;  %v13044_v62 = vunpack.i.l.bf16 %v7897_v49  ;;  %v13047_v38 = vunpack.i.h.bf16 %v7483_v24 }
 0x231   :  { %1016 = vmatpush.bf16.msra.mxu2 %v803_v47  ;;  %v13048_v18 = vunpack.i.l.bf16 %v7895_v19  ;;  %v13049_v3 = vunpack.i.l.bf16 %v7922_v43  ;;  %v13050_v24 = vunpack.i.h.bf16 %v7895_v19  ;;  %v13054_v57 = vunpack.i.l.bf16 %v7995_v12 }
 0x232   :  { %v617_v21 = vsel %vm139_vm4, %v13045_v28, %v13044_v62  ;;  %v618_v16 = vsel %vm139_vm4, %v13047_v38, %v13046_v2  ;;  %v8225_v34 = vpop.permute.xlu0 %6063  ;;  %v8227_v62 = vpop.permute.xlu2 %6083  ;;  %v818_v28 = vpack.c.bf16 %v620_v42, %v619_v40  ;;  %v13051_v2 = vunpack.i.h.bf16 %v7922_v43 }
 0x233   :  { %v471_v47 = vsel %vm100_vm6, %v13049_v3, %v13048_v18  ;;  %v13053_v18 = vunpack.i.h.bf16 %v7929_v36  ;;  %v13055_v17 = vunpack.i.l.bf16 %v7929_v36  ;;  %v799_v19 = vpack.c.bf16 %v518_v37, %v517_v1 }
 0x234   :  { %v472_v38 = vsel %vm100_vm6, %v13051_v2, %v13050_v24  ;;  %v8247_v42 = vor.u32 %v5545_v41, %v4900_v46  ;;  %965 = vmatpush.bf16.msrb.mxu3 %v7391_v4  ;;  %982 = vmatpush.bf16.msra.mxu0 %v818_v28  ;;  %v814_v43 = vpack.c.bf16 %v618_v16, %v617_v21  ;;  %v13056_v24 = vunpack.i.l.bf16 %v7530_v45 }
 0x235   :  { %v712_v3 = vsel %vm165_vm2, %v13053_v18, %v13052_v6  ;;  %v711_v40 = vsel %vm165_vm2, %v13055_v17, %v13054_v57  ;;  %1017 = vmatpush.bf16.msra.mxu2 %v799_v19  ;;  %v13057_v2 = vunpack.i.l.bf16 %v7528_v44  ;;  %v13058_v36 = vunpack.i.h.bf16 %v7530_v45 }
 0x236   :  { %v13059_v6 = vunpack.i.h.bf16 %v7528_v44  ;;  %v8262_v37 = vpop.permute.xlu1 %6043  ;;  %v795_v46 = vpack.c.bf16 %v472_v38, %v471_v47  ;;  %v835_v41 = vpack.c.bf16 %v712_v3, %v711_v40  ;;  %v13060_v21 = vunpack.i.l.bf16 %v8073_v11 }
 0x237   :  { %v469_v12 = vsel %vm100_vm6, %v13057_v2, %v13056_v24  ;;  %v13061_v16 = vunpack.i.l.bf16 %v7561_v55  ;;  %v13062_v17 = vunpack.i.h.bf16 %v8073_v11  ;;  %v13063_v45 = vunpack.i.h.bf16 %v7561_v55  ;;  %4903 = vmatmul.msk.bf16.gmra.mxu2 %vm895_vm3, %v8247_v42 }
 0x238   :  { %v470_v1 = vsel %vm100_vm6, %v13059_v6, %v13058_v36  ;;  %v12721_v28 = vunpack.i.h.bf16 %v8173_v63  ;;  %v12722_v18 = vunpack.i.l.bf16 %v8173_v63  ;;  %v6046_v47 = vunpack.i.h.bf16 %v8262_v37  ;;  %966 = vmatpush.bf16.msrb.mxu3 %v7369_v35  ;;  %983 = vmatpush.bf16.msra.mxu0 %v814_v43 }
 0x239   :  { %v709_v57 = vsel %vm165_vm2, %v13061_v16, %v13060_v21  ;;  %v710_v44 = vsel %vm165_vm2, %v13063_v45, %v13062_v17  ;;  %v6045_v38 = vunpack.i.l.bf16 %v8262_v37  ;;  %v6065_v3 = vunpack.i.l.bf16 %v8225_v34  ;;  %1018 = vmatpush.bf16.msra.mxu2 %v795_v46 }
 0x23a   :  { %v6066_v55 = vunpack.i.h.bf16 %v8225_v34  ;;  %v13064_v40 = vunpack.i.l.bf16 %v7775_v50  ;;  %v13065_v24 = vunpack.i.h.bf16 %v7775_v50  ;;  %v791_v36 = vpack.c.bf16 %v470_v1, %v469_v12  ;;  %v8297_v43 = vpop.permute.xlu0 %6068  ;;  %v6099_v6 = vpop.permute.xlu2 %6098  ;;  %v13108_v34 = vld [vmem:[#allocation20_spill] sm:$0xff] }
 0x23b   :  { %v13066_v21 = vunpack.i.l.bf16 %v7854_v20  ;;  %v13067_v16 = vunpack.i.l.bf16 %v7815_v54  ;;  %v13068_v45 = vunpack.i.h.bf16 %v7854_v20  ;;  %v13069_v50 = vunpack.i.h.bf16 %v7815_v54  ;;  %967 = vmatmul.bf16.vlgmr.msrb.gmra.mxu3 %v7864_v8 }
 0x23c   :  { %1035 = vmatpush.bf16.msra.mxu3 %v835_v41  ;;  %v571_v19 = vsel %vm126_vm5, %v13064_v40, %v6045_v38  ;;  %v572_v2 = vsel %vm126_vm5, %v13065_v24, %v6046_v47  ;;  %v831_v41 = vpack.c.bf16 %v710_v44, %v709_v57  ;;  %v6101_v12 = vunpack.i.h.bf16 %v6099_v6 }
 0x23d   :  { %v810_v46 = vpack.c.bf16 %v572_v2, %v571_v19  ;;  %v423_v17 = vsel %vm87_vm7, %v13067_v16, %v13066_v21  ;;  %v424_v40 = vsel %vm87_vm7, %v13069_v50, %v13068_v45  ;;  %v6100_v1 = vunpack.i.l.bf16 %v6099_v6  ;;  %1019 = vmatpush.bf16.msra.mxu2 %v791_v36 }
 0x23e   :  { %v13070_v57 = vunpack.i.l.bf16 %v7497_v33  ;;  %v13071_v20 = vunpack.i.h.bf16 %v7497_v33  ;;  %v6061_v19 = vunpack.i.h.bf16 %v8139_v22  ;;  %v6060_v24 = vunpack.i.l.bf16 %v8139_v22 }
 0x23f   :  { %984 = vmatpush.bf16.msra.mxu0 %v810_v46  ;;  %v13072_v2 = vunpack.i.l.bf16 %v8095_v58  ;;  %v13073_v21 = vunpack.i.h.bf16 %v7813_v0  ;;  %v13074_v16 = vunpack.i.l.bf16 %v7813_v0  ;;  %v13075_v46 = vunpack.i.h.bf16 %v8095_v58 }
 0x240   :  { %v569_v44 = vsel %vm126_vm5, %v13070_v57, %v12722_v18  ;;  %v570_v54 = vsel %vm126_vm5, %v13071_v20, %v12721_v28  ;;  %1036 = vmatpush.bf16.msra.mxu3 %v831_v41  ;;  %v6074_v57 = vpop.permute.xlu1 %6073  ;;  %v13077_v0 = vunpack.i.l.bf16 %v7537_v52  ;;  %v6071_v41 = vunpack.i.h.bf16 %v8297_v43 }
 0x241   :  { %v663_v6 = vsel %vm152_vm1, %v13072_v2, %v6065_v3  ;;  %v8336_v33 = vsel %vm178_vm0, %v6101_v12, %v13073_v21  ;;  %v8342_v45 = vsel %vm178_vm0, %v6100_v1, %v13074_v16  ;;  %v664_v50 = vsel %vm152_vm1, %v13075_v46, %v6066_v55 }
 0x242   :  { %v806_v20 = vpack.c.bf16 %v570_v54, %v569_v44  ;;  %v787_v2 = vpack.c.bf16 %v424_v40, %v423_v17  ;;  %v13076_v21 = vunpack.i.l.bf16 %v7495_v32  ;;  %v844_v36 = vpack.c.bf16 %v8336_v33, %v8342_v45  ;;  %v13122_v33 = vld [vmem:[#allocation18_spill] sm:$0xff]  ;;  %v13123_v45 = vld [vmem:[#allocation17_spill] sm:$0xff] }
 0x243   :  { %v6070_v58 = vunpack.i.l.bf16 %v8297_v43  ;;  %v6076_v28 = vunpack.i.h.bf16 %v6074_v57  ;;  %v6075_v18 = vunpack.i.l.bf16 %v6074_v57  ;;  %v827_v46 = vpack.c.bf16 %v664_v50, %v663_v6 }
 0x244   :  { %v421_v16 = vsel %vm87_vm7, %v13077_v0, %v13076_v21  ;;  %985 = vmatpush.bf16.msra.mxu0 %v806_v20  ;;  %v13078_v17 = vunpack.i.h.bf16 %v7495_v32  ;;  %v13079_v40 = vunpack.i.h.bf16 %v7537_v52  ;;  %v13080_v54 = vunpack.i.l.bf16 %v7563_v56  ;;  %1020 = vmatpush.bf16.msra.mxu2 %v787_v2 }
 0x245   :  { %v13081_v43 = vunpack.i.h.bf16 %v7563_v56  ;;  %v759_v32 = vsel %vm178_vm0, %v6075_v18, %v6100_v1  ;;  %v760_v52 = vsel %vm178_vm0, %v6076_v28, %v6101_v12  ;;  %v13082_v50 = vunpack.i.l.bf16 %v7801_v23  ;;  %1037 = vmatpush.bf16.msra.mxu3 %v827_v46  ;;  %v8390_v56 = vpop.permute.xlu0 %6088 }
 0x246   :  { %v422_v44 = vsel %vm87_vm7, %v13079_v40, %v13078_v17  ;;  %v661_v21 = vsel %vm152_vm1, %v13080_v54, %v6060_v24  ;;  %v13083_v20 = vunpack.i.h.bf16 %v7801_v23  ;;  %v843_v40 = vpack.c.bf16 %v760_v52, %v759_v32 }
 0x247   :  { %v662_v6 = vsel %vm152_vm1, %v13081_v43, %v6061_v19  ;;  %v763_v57 = vsel %vm178_vm0, %v13082_v50, %v6075_v18  ;;  %986 = vmatmul.bf16.vlgmr.msra.gmra.mxu0 %v7904_v60  ;;  %v783_v1 = vpack.c.bf16 %v422_v44, %v421_v16  ;;  %v13084_v12 = vunpack.i.l.bf16 %v8032_v59 }
 0x248   :  { %v764_v0 = vsel %vm178_vm0, %v13083_v20, %v6076_v28  ;;  %v13085_v18 = vunpack.i.h.bf16 %v8032_v59  ;;  %v13086_v28 = vunpack.i.h.bf16 %v7600_v9  ;;  %v13087_v2 = vunpack.i.h.bf16 %v8137_v27  ;;  %1060 = vmatpush.bf16.msrb.mxu0 %v843_v40  ;;  %v8415_v50 = vpop.permute.xlu1 %6078 }
 0x249   :  { %v842_v17 = vpack.c.bf16 %v764_v0, %v763_v57  ;;  %v761_v54 = vsel %vm178_vm0, %v13084_v12, %v6070_v58  ;;  %v13088_v43 = vunpack.i.l.bf16 %v7600_v9  ;;  %v13089_v16 = vunpack.i.l.bf16 %v8137_v27  ;;  %1021 = vmatpush.bf16.msra.mxu2 %v783_v1 }
 0x24a   :  { %v762_v23 = vsel %vm178_vm0, %v13085_v18, %v6071_v41  ;;  %v532_v46 = vsel %vm113_vm8, %v13087_v2, %v13086_v28  ;;  %v823_v59 = vpack.c.bf16 %v662_v6, %v661_v21  ;;  %v6086_v32 = vunpack.i.h.bf16 %v8227_v62 }
 0x24b   :  { %v531_v44 = vsel %vm113_vm8, %v13089_v16, %v13088_v43  ;;  %1003 = vmatpush.bf16.msra.mxu1 %v842_v17  ;;  %v6085_v52 = vunpack.i.l.bf16 %v8227_v62  ;;  %v838_v57 = vpack.c.bf16 %v762_v23, %v761_v54  ;;  %v13090_v20 = vunpack.i.l.bf16 %v7461_v25  ;;  %972 = vmatmul.bf16.gmra.mxu3 %v7971_v13 }
 0x24c   :  { %1038 = vmatpush.bf16.msra.mxu3 %v823_v59  ;;  %v13091_v9 = vunpack.i.l.bf16 %v8071_v26  ;;  %v6081_v0 = vunpack.i.h.bf16 %v8415_v50  ;;  %v6080_v21 = vunpack.i.l.bf16 %v8415_v50  ;;  %v804_v6 = vpack.c.bf16 %v532_v46, %v531_v44 }
 0x24d   :  { %v13092_v17 = vunpack.i.h.bf16 %v7461_v25  ;;  %v13093_v40 = vunpack.i.h.bf16 %v8071_v26  ;;  %1022 = vmatpush.bf16.msra.mxu2 %v7407_v15  ;;  %v13094_v12 = vunpack.i.l.bf16 %v7931_v5  ;;  %v13095_v18 = vunpack.i.h.bf16 %v7931_v5  ;;  %v6104_v25 = vpop.permute.xlu0 %6103 }
 0x24e   :  { %v529_v27 = vsel %vm113_vm8, %v13091_v9, %v13090_v20  ;;  %v13096_v2 = vunpack.i.l.bf16 %v7897_v49  ;;  %v13097_v43 = vunpack.i.h.bf16 %v7897_v49  ;;  %v6091_v16 = vunpack.i.h.bf16 %v8390_v56 }
 0x24f   :  { %v530_v1 = vsel %vm113_vm8, %v13093_v40, %v13092_v17  ;;  %1004 = vmatpush.bf16.msra.mxu1 %v838_v57  ;;  %v615_v54 = vsel %vm139_vm4, %v13094_v12, %v6080_v21  ;;  %v616_v23 = vsel %vm139_vm4, %v13095_v18, %v6081_v0  ;;  %v6090_v44 = vunpack.i.l.bf16 %v8390_v56 }
 0x250   :  { %v819_v28 = vpack.c.bf16 %v616_v23, %v615_v54  ;;  %v800_v26 = vpack.c.bf16 %v530_v1, %v529_v27  ;;  %v613_v46 = vsel %vm139_vm4, %v13096_v2, %v6085_v52  ;;  %v614_v5 = vsel %vm139_vm4, %v13097_v43, %v6086_v32  ;;  %v6094_v12 = vpop.permute.xlu1 %6093 }
 0x251   :  { %v6106_v59 = vunpack.i.h.bf16 %v6104_v25  ;;  %v6105_v50 = vunpack.i.l.bf16 %v6104_v25  ;;  %v13098_v57 = vunpack.i.l.bf16 %v7489_v31  ;;  %v13099_v20 = vunpack.i.l.bf16 %v8073_v11  ;;  %1023 = vmatpush.bf16.msra.mxu2 %v7393_v7 }
 0x252   :  { %4904 = vmatmul.msk.bf16.vlgmr.msra.gmra.mxu1 %vm895_vm3, %v8083_v48  ;;  %1039 = vmatpush.bf16.msra.mxu3 %v819_v28  ;;  %v13101_v17 = vunpack.i.h.bf16 %v8073_v11  ;;  %v13102_v1 = vpack.c.bf16 %v8030_v29, %v8022_v30  ;;  %v815_v54 = vpack.c.bf16 %v614_v5, %v613_v46  ;;  %v6096_v23 = vunpack.i.h.bf16 %v6094_v12 }
 0x253   :  { %1073 = vmatpush.bf16.msrb.mxu1 %v804_v6  ;;  %v721_v49 = vsel %vm165_vm2, %v13099_v20, %v13098_v57  ;;  %v757_v9 = vsel %vm178_vm0, %v6070_v58, %v6105_v50  ;;  %v758_v27 = vsel %vm178_vm0, %v6071_v41, %v6106_v59  ;;  %v13100_v6 = vunpack.i.h.bf16 %v7489_v31 }
 0x254   :  { %v839_v18 = vpack.c.bf16 %v758_v27, %v757_v9  ;;  %v6095_v25 = vunpack.i.l.bf16 %v6094_v12  ;;  %v567_v41 = vsel %vm126_vm5, %v6045_v38, %v6090_v44  ;;  %v568_v31 = vsel %vm126_vm5, %v6046_v47, %v6091_v16  ;;  %1024 = vmatmul.bf16.vlgmr.msra.gmra.mxu2 %v7864_v8  ;;  %v13116_v27 = vld [vmem:[#allocation24_spill] sm:$0xff] }
 0x255   :  { %v722_v40 = vsel %vm165_vm2, %v13101_v17, %v13100_v6  ;;  %1092 = vmatpush.bf16.msrb.mxu2 %v13102_v1  ;;  %v13103_v30 = vpack.c.bf16 %v7920_v39, %v7912_v61  ;;  %v13104_v29 = vunpack.i.l.bf16 %v7707_v51  ;;  %v13105_v37 = vunpack.i.h.bf16 %v7707_v51  ;;  %v13117_v6 = vld [vmem:[#allocation23_spill] sm:$0xff] }
 0x256   :  { %1040 = vmatpush.bf16.msra.mxu3 %v815_v54  ;;  %v832_v11 = vpack.c.bf16 %v722_v40, %v721_v49  ;;  %1061 = vmatpush.bf16.msrb.mxu0 %v839_v18  ;;  %v811_v58 = vpack.c.bf16 %v568_v31, %v567_v41  ;;  %v13106_v61 = vunpack.i.l.bf16 %v8173_v63  ;;  %v13107_v28 = vunpack.i.h.bf16 %v8173_v63  ;;  %v13125_v54 = vld [vmem:[#allocation16_spill] sm:$0xff] }
 0x257   :  { %1074 = vmatpush.bf16.msrb.mxu1 %v800_v26  ;;  %v675_v38 = vsel %vm152_vm1, %v6065_v3, %v13104_v29  ;;  %v676_v47 = vsel %vm152_vm1, %v6066_v55, %v13105_v37  ;;  %991 = vmatmul.bf16.gmra.mxu0 %v8006_v14  ;;  %v13109_v26 = vpack.c.bf16 %v7553_v53, %v13108_v34  ;;  %v13110_v55 = vld [vmem:[#allocation15_spill] sm:$0xff]  ;;  %v13113_v53 = vld [vmem:[#allocation25_spill] sm:$0xff]  ;;  %v13127_v18 = vunpack.i.h.bf16 %v13125_v54  ;;  %v13132_v37 = vld [vmem:[#allocation12_spill] sm:$0xff] }
 0x258   :  { %v565_v39 = vsel %vm126_vm5, %v13106_v61, %v6095_v25  ;;  %v566_v3 = vsel %vm126_vm5, %v13107_v28, %v6096_v23  ;;  %v828_v51 = vpack.c.bf16 %v676_v47, %v675_v38  ;;  %v13111_v2 = vunpack.i.l.bf16 %v13110_v55  ;;  %v13133_v47 = vld [vmem:[#allocation19_spill] sm:$0xff]  ;;  %v8603_v28 = vpop.permute.xlu0 %847 }
 0x259   :  { %1093 = vmatpush.bf16.msrb.mxu2 %v832_v11  ;;  %v13112_v43 = vunpack.i.h.bf16 %v13110_v55  ;;  %v807_v5 = vpack.c.bf16 %v566_v3, %v565_v39  ;;  %v13114_v20 = vunpack.i.l.bf16 %v13113_v53  ;;  %v13115_v9 = vunpack.i.h.bf16 %v13113_v53  ;;  %v13128_v11 = vld [vmem:[#allocation14_spill] sm:$0xff] }
 0x25a   :  { %1041 = vmatpush.bf16.msra.mxu3 %v811_v58  ;;  %v673_v46 = vsel %vm152_vm1, %v6060_v24, %v13111_v2  ;;  %v13118_v22 = vpack.c.bf16 %v13116_v27, %v13117_v6  ;;  %v626_v41 = vsel %vm139_vm4, %v6086_v32, %v13127_v18  ;;  %v13134_v58 = vunpack.i.l.bf16 %v13133_v47  ;;  %v8626_v27 = vpop.permute.xlu2 %862 }
 0x25b   :  { %1075 = vmatpush.bf16.msrb.mxu1 %v13103_v30  ;;  %v674_v63 = vsel %vm152_vm1, %v6061_v19, %v13112_v43  ;;  %v769_v49 = vsel %vm178_vm0, %v6105_v50, %v13114_v20  ;;  %v770_v24 = vsel %vm178_vm0, %v6106_v59, %v13115_v9  ;;  %v13119_v19 = vld [vmem:[#allocation21_spill] sm:$0xff]  ;;  %v13129_v30 = vld [vmem:[#allocation22_spill] sm:$0xff] }
 0x25c   :  { %v824_v57 = vpack.c.bf16 %v674_v63, %v673_v46  ;;  %v13120_v17 = vunpack.i.l.bf16 %v13119_v19  ;;  %v13121_v50 = vunpack.i.h.bf16 %v13119_v19  ;;  %v840_v59 = vpack.c.bf16 %v770_v24, %v769_v49 }
 0x25d   :  { %1094 = vmatpush.bf16.msrb.mxu2 %v828_v51  ;;  %v13130_v29 = vunpack.i.l.bf16 %v13129_v30  ;;  %v577_v61 = vsel %vm126_vm5, %v6095_v25, %v13134_v58  ;;  %v8601_v25 = vpop.permute.xlu1 %857 }
 0x25e   :  { %1042 = vmatpush.bf16.msra.mxu3 %v807_v5  ;;  %v627_v40 = vsel %vm139_vm4, %v6080_v21, %v13120_v17  ;;  %v628_v1 = vsel %vm139_vm4, %v6081_v0, %v13121_v50  ;;  %v13126_v21 = vunpack.i.l.bf16 %v13125_v54 }
 0x25f   :  { %1076 = vmatpush.bf16.msrb.mxu1 %v13109_v26  ;;  %v820_v12 = vpack.c.bf16 %v628_v1, %v627_v40  ;;  %v579_v38 = vsel %vm126_vm5, %v6090_v44, %v13130_v29  ;;  %v13135_v44 = vunpack.i.h.bf16 %v13133_v47 }
 0x260   :  { %v625_v0 = vsel %vm139_vm4, %v6085_v52, %v13126_v21  ;;  %v13131_v52 = vunpack.i.h.bf16 %v13129_v30 }
 0x261   :  { %1095 = vmatpush.bf16.msrb.mxu2 %v824_v57  ;;  %1043 = vmatmul.bf16.vlgmr.msra.gmra.mxu3 %v7904_v60  ;;  %v816_v31 = vpack.c.bf16 %v626_v41, %v625_v0  ;;  %v578_v56 = vsel %vm126_vm5, %v6096_v23, %v13135_v44 }
 0x262   :  { %1117 = vmatpush.bf16.msrb.mxu3 %v844_v36  ;;  %4905 = vmatmul.msk.bf16.gmra.mxu1 %vm895_vm3, %v8247_v42  ;;  %v13124_v36 = vpack.c.bf16 %v13122_v33, %v13123_v45  ;;  %v580_v62 = vsel %vm126_vm5, %v6091_v16, %v13131_v52  ;;  %v808_v39 = vpack.c.bf16 %v578_v56, %v577_v61 }
 0x263   :  { %1077 = vmatpush.bf16.msrb.mxu1 %v13118_v22  ;;  %v812_v32 = vpack.c.bf16 %v580_v62, %v579_v38 }
 0x264   :  { %1029 = vmatmul.bf16.gmra.mxu2 %v7971_v13 }
 0x265   :  { %1096 = vmatpush.bf16.msrb.mxu2 %v820_v12  ;;  %v8606_v34 = vpop.permute.xlu1 %852 }
 0x266   :  { %1118 = vmatpush.bf16.msrb.mxu3 %v840_v59 }
 0x267   :  { %1078 = vmatpush.bf16.msrb.mxu1 %v13124_v36  ;;  %4906 = vmatmul.msk.bf16.vlgmr.msrb.gmra.mxu0 %vm895_vm3, %v8083_v48 }
 0x269   :  { %1097 = vmatpush.bf16.msrb.mxu2 %v816_v31 }
 0x26b   :  { %1079 = vmatpush.bf16.msrb.mxu1 %v13128_v11 }
 0x26d   :  { %1098 = vmatpush.bf16.msrb.mxu2 %v812_v32 }
 0x26f   :  { %1080 = vmatpush.bf16.msrb.mxu1 %v13132_v37 }
 0x271   :  { %1099 = vmatpush.bf16.msrb.mxu2 %v808_v39  ;;  %1048 = vmatmul.bf16.gmra.mxu3 %v8006_v14 }
 0x272   :  { %1081 = vmatmul.bf16.vlgmr.msrb.gmra.mxu1 %v7864_v8 }
 0x274   :  { %1100 = vmatmul.bf16.vlgmr.msrb.gmra.mxu2 %v7904_v60 }
 0x277   :  { %4907 = vmatmul.msk.bf16.gmra.mxu0 %vm895_vm3, %v8247_v42 }
 0x281   :  { %4908 = vmatmul.msk.bf16.vlgmr.msrb.gmra.mxu3 %vm895_vm3, %v8083_v48 }
 0x282   :  { %1086 = vmatmul.bf16.gmra.mxu1 %v7971_v13 }
 0x284   :  { %1105 = vmatmul.bf16.gmra.mxu2 %v8006_v14 }
 0x288   :  { %v911_v16 = vpop.f32.mrf.mxu0 }
 0x289   :  { %v912_v51 = vadd.f32 %v911_v16, %v8603_v28 }
 0x28c   :  { %v930_v23 = vpop.f32.mrf.mxu1 }
 0x28d   :  { %v931_v13 = vadd.f32 %v930_v23, %v912_v51 }
 0x290   :  { %v913_v8 = vpop.f32.mrf.mxu0 }
 0x291   :  { %4909 = vmatmul.msk.bf16.gmra.mxu3 %vm895_vm3, %v8247_v42  ;;  %v914_v14 = vadd.f32 %v913_v8, %v8606_v34 }
 0x294   :  { %v932_v60 = vpop.f32.mrf.mxu1 }
 0x295   :  { %v933_v55 = vadd.f32 %v932_v60, %v914_v14 }
 0x298   :  { %v916_v48 = vpop.f32.mrf.mxu0 }
 0x299   :  { %v917_v24 = vadd.f32 %v916_v48, %v8601_v25 }
 0x29c   :  { %v935_v43 = vpop.f32.mrf.mxu1 }
 0x29d   :  { %v936_v6 = vadd.f32 %v935_v43, %v917_v24 }
 0x2a0   :  { %v918_v53 = vpop.f32.mrf.mxu0 }
 0x2a1   :  { %v919_v17 = vadd.f32 %v918_v53, %v8626_v27 }
 0x2a4   :  { %v937_v22 = vpop.f32.mrf.mxu1 }
 0x2a5   :  { %v938_v1 = vadd.f32 %v937_v22, %v919_v17 }
 0x2aa   :  { %v949_v3 = vpop.f32.mrf.mxu2 }
 0x2ab   :  { %v950_v26 = vadd.f32 %v949_v3, %v931_v13 }
 0x2ad   :  { %v1146_v2 = vmul.f32 0.2, %v950_v26  ;;  %vm1130_vm11 = vcmp.ge.f32.partialorder %v950_v26, 0.0 }
 0x2af   :  { %v8609_v5 = vsel %vm1130_vm11, %v950_v26, %v1146_v2 }
 0x2b2   :  { %v951_v42 = vpop.f32.mrf.mxu2 }
 0x2b3   :  { %v952_v46 = vadd.f32 %v951_v42, %v933_v55 }
 0x2b5   :  { %vm1134_vm12 = vcmp.ge.f32.partialorder %v952_v46, 0.0  ;;  %v1150_v63 = vmul.f32 0.2, %v952_v46 }
 0x2b7   :  { %v8611_v57 = vsel %vm1134_vm12, %v952_v46, %v1150_v63 }
 0x2b8   :  { %v8615_v20 = vpack.i.bf16 %v8611_v57, %v8609_v5 }
 0x2ba   :  { %v954_v49 = vpop.f32.mrf.mxu2  ;;  %6118 = vrot.lane.b32.xlu0 %v8615_v20, %s7128_s30  ;;  %6113 = vrot.lane.b32.xlu2 %v8615_v20, %s7126_s0 }
 0x2bb   :  { %6108 = vrot.lane.b32.xlu1 %v8615_v20, %s7127_s29  ;;  %v955_v40 = vadd.f32 %v954_v49, %v936_v6 }
 0x2bd   :  { %v1154_v12 = vmul.f32 0.2, %v955_v40  ;;  %vm1138_vm13 = vcmp.ge.f32.partialorder %v955_v40, 0.0 }
 0x2be   :  { %v968_v19 = vpop.f32.mrf.mxu3 }
 0x2bf   :  { %v8635_v54 = vsel %vm1138_vm13, %v955_v40, %v1154_v12  ;;  %v969_v31 = vadd.f32 %v968_v19, %v8603_v28 }
 0x2c2   :  { %v956_v59 = vpop.f32.mrf.mxu2  ;;  %6123 = vrot.lane.b32.xlu0 %v8615_v20, %s7123_s26  ;;  %6128 = vrot.lane.b32.xlu2 %v8615_v20, %s7121_s12 }
 0x2c3   :  { %v957_v33 = vadd.f32 %v956_v59, %v938_v1  ;;  %6133 = vrot.lane.b32.xlu1 %v8615_v20, %s7125_s28 }
 0x2c4   :  { %v987_v50 = vpop.f32.mrf.mxu0 }
 0x2c5   :  { %vm1142_vm14 = vcmp.ge.f32.partialorder %v957_v33, 0.0  ;;  %v1158_v45 = vmul.f32 0.2, %v957_v33  ;;  %v988_v38 = vadd.f32 %v987_v50, %v969_v31 }
 0x2c6   :  { %v970_v36 = vpop.f32.mrf.mxu3 }
 0x2c7   :  { %v8637_v21 = vsel %vm1142_vm14, %v957_v33, %v1158_v45  ;;  %v971_v29 = vadd.f32 %v970_v36, %v8606_v34 }
 0x2c8   :  { %v6147_v41 = vpack.i.bf16 %v8637_v21, %v8635_v54 }
 0x2ca   :  { %6148 = vrot.lane.b32.xlu0 %v6147_v41, %s7126_s0  ;;  %6138 = vrot.lane.b32.xlu2 %v8615_v20, %s7122_s21 }
 0x2cb   :  { %6153 = vrot.lane.b32.xlu1 %v6147_v41, %s7128_s30 }
 0x2cc   :  { %v989_v0 = vpop.f32.mrf.mxu0 }
 0x2cd   :  { %v990_v62 = vadd.f32 %v989_v0, %v971_v29 }
 0x2ce   :  { %v973_v52 = vpop.f32.mrf.mxu3 }
 0x2cf   :  { %v1006_v18 = vpop.f32.mrf.mxu1  ;;  %v974_v48 = vadd.f32 %v973_v52, %v8601_v25 }
 0x2d0   :  { %v1007_v32 = vadd.f32 %v1006_v18, %v988_v38 }
 0x2d2   :  { %6158 = vrot.lane.b32.xlu0 %v6147_v41, %s7123_s26  ;;  %6143 = vrot.lane.b32.xlu2 %v6147_v41, %s7127_s29  ;;  %v1147_v44 = vmul.f32 0.2, %v1007_v32  ;;  %vm1131_vm9 = vcmp.ge.f32.partialorder %v1007_v32, 0.0 }
 0x2d3   :  { %6163 = vrot.lane.b32.xlu1 %v6147_v41, %s7121_s12 }
 0x2d4   :  { %v992_v47 = vpop.f32.mrf.mxu0  ;;  %v8654_v8 = vsel %vm1131_vm9, %v1007_v32, %v1147_v44 }
 0x2d5   :  { %v993_v55 = vadd.f32 %v992_v47, %v974_v48 }
 0x2d6   :  { %v975_v23 = vpop.f32.mrf.mxu3 }
 0x2d7   :  { %v1008_v58 = vpop.f32.mrf.mxu1  ;;  %v1025_v39 = vpop.f32.mrf.mxu2  ;;  %v976_v14 = vadd.f32 %v975_v23, %v8626_v27 }
 0x2d8   :  { %v1009_v61 = vadd.f32 %v1008_v58, %v990_v62  ;;  %v1026_v53 = vadd.f32 %v1025_v39, %v8603_v28 }
 0x2da   :  { %vm1135_vm15 = vcmp.ge.f32.partialorder %v1009_v61, 0.0  ;;  %v1151_v56 = vmul.f32 0.2, %v1009_v61  ;;  %6168 = vrot.lane.b32.xlu0 %v6147_v41, %s7125_s28 }
 0x2dc   :  { %v8652_v16 = vsel %vm1135_vm15, %v1009_v61, %v1151_v56  ;;  %v994_v60 = vpop.f32.mrf.mxu0 }
 0x2dd   :  { %v8658_v51 = vpack.i.bf16 %v8652_v16, %v8654_v8  ;;  %v995_v2 = vadd.f32 %v994_v60, %v976_v14 }
 0x2df   :  { %v1011_v3 = vpop.f32.mrf.mxu1  ;;  %6183 = vrot.lane.b32.xlu2 %v8658_v51, %s7127_s29  ;;  %v1027_v26 = vpop.f32.mrf.mxu2  ;;  %6193 = vrot.lane.b32.xlu1 %v8658_v51, %s7128_s30 }
 0x2e0   :  { %v1012_v46 = vadd.f32 %v1011_v3, %v993_v55  ;;  %v1028_v17 = vadd.f32 %v1027_v26, %v8606_v34 }
 0x2e2   :  { %6173 = vrot.lane.b32.xlu0 %v6147_v41, %s7122_s21  ;;  %v1155_v24 = vmul.f32 0.2, %v1012_v46  ;;  %vm1139_vm11 = vcmp.ge.f32.partialorder %v1012_v46, 0.0 }
 0x2e4   :  { %v1044_v42 = vpop.f32.mrf.mxu3  ;;  %v1063_v63 = vpop.f32.mrf.mxu0  ;;  %v8678_v1 = vsel %vm1139_vm11, %v1012_v46, %v1155_v24 }
 0x2e5   :  { %v1045_v6 = vadd.f32 %v1044_v42, %v1026_v53 }
 0x2e7   :  { %v1013_v43 = vpop.f32.mrf.mxu1  ;;  %6208 = vrot.lane.b32.xlu2 %v8658_v51, %s7125_s28  ;;  %v1030_v19 = vpop.f32.mrf.mxu2  ;;  %6198 = vrot.lane.b32.xlu1 %v8658_v51, %s7123_s26  ;;  %v1064_v59 = vadd.f32 %v1063_v63, %v1045_v6 }
 0x2e8   :  { %v1014_v49 = vadd.f32 %v1013_v43, %v995_v2  ;;  %v1031_v58 = vadd.f32 %v1030_v19, %v8601_v25 }
 0x2e9   :  { %v1148_v18 = vmul.f32 0.2, %v1064_v59  ;;  %vm1132_vm13 = vcmp.ge.f32.partialorder %v1064_v59, 0.0 }
 0x2ea   :  { %vm1143_vm10 = vcmp.ge.f32.partialorder %v1014_v49, 0.0  ;;  %v1159_v22 = vmul.f32 0.2, %v1014_v49  ;;  %6178 = vrot.lane.b32.xlu0 %v6147_v41, %s7124_s27 }
 0x2eb   :  { %v8693_v62 = vsel %vm1132_vm13, %v1064_v59, %v1148_v18 }
 0x2ec   :  { %v8676_v40 = vsel %vm1143_vm10, %v1014_v49, %v1159_v22  ;;  %v1046_v50 = vpop.f32.mrf.mxu3  ;;  %v1065_v33 = vpop.f32.mrf.mxu0  ;;  %13136 = vst [vmem:[#allocation20_spill] sm:$0xff] %v8693_v62 }
 0x2ed   :  { %v1047_v12 = vadd.f32 %v1046_v50, %v1028_v17  ;;  %v8682_v45 = vpack.i.bf16 %v8676_v40, %v8678_v1 }
 0x2ef   :  { %v1066_v0 = vadd.f32 %v1065_v33, %v1047_v12  ;;  %6228 = vrot.lane.b32.xlu2 %v8682_v45, %s7128_s30  ;;  %v1032_v29 = vpop.f32.mrf.mxu2  ;;  %6223 = vrot.lane.b32.xlu1 %v8682_v45, %s7126_s0  ;;  %v1082_v61 = vpop.f32.mrf.mxu1 }
 0x2f0   :  { %v1033_v39 = vadd.f32 %v1032_v29, %v8626_v27  ;;  %v1083_v24 = vadd.f32 %v1082_v61, %v8603_v28 }
 0x2f1   :  { %vm1136_vm12 = vcmp.ge.f32.partialorder %v1066_v0, 0.0  ;;  %v1152_v31 = vmul.f32 0.2, %v1066_v0 }
 0x2f2   :  { %6188 = vrot.lane.b32.xlu0 %v8658_v51, %s7126_s0 }
 0x2f3   :  { %v8691_v38 = vsel %vm1136_vm12, %v1066_v0, %v1152_v31 }
 0x2f4   :  { %v1049_v52 = vpop.f32.mrf.mxu3  ;;  %v1068_v32 = vpop.f32.mrf.mxu0  ;;  %v8697_v41 = vpack.i.bf16 %v8691_v38, %v8693_v62 }
 0x2f5   :  { %v1050_v44 = vadd.f32 %v1049_v52, %v1031_v58 }
 0x2f7   :  { %6238 = vrot.lane.b32.xlu2 %v8682_v45, %s7121_s12  ;;  %6233 = vrot.lane.b32.xlu1 %v8682_v45, %s7123_s26  ;;  %v1101_v56 = vpop.f32.mrf.mxu2  ;;  %v1069_v60 = vadd.f32 %v1068_v32, %v1050_v44  ;;  %v1084_v42 = vpop.f32.mrf.mxu1 }
 0x2f8   :  { %v1085_v6 = vadd.f32 %v1084_v42, %v8606_v34  ;;  %v1102_v22 = vadd.f32 %v1101_v56, %v1083_v24 }
 0x2f9   :  { %v1156_v26 = vmul.f32 0.2, %v1069_v60  ;;  %vm1140_vm15 = vcmp.ge.f32.partialorder %v1069_v60, 0.0 }
 0x2fa   :  { %6203 = vrot.lane.b32.xlu0 %v8658_v51, %s7121_s12 }
 0x2fb   :  { %v8717_v63 = vsel %vm1140_vm15, %v1069_v60, %v1156_v26 }
 0x2fc   :  { %v1051_v23 = vpop.f32.mrf.mxu3  ;;  %v1070_v48 = vpop.f32.mrf.mxu0 }
 0x2fd   :  { %v1052_v3 = vadd.f32 %v1051_v23, %v1033_v39 }
 0x2ff   :  { %v1071_v14 = vadd.f32 %v1070_v48, %v1052_v3  ;;  %6258 = vrot.lane.b32.xlu2 %v8697_v41, %s7127_s29  ;;  %6243 = vrot.lane.b32.xlu1 %v8682_v45, %s7125_s28  ;;  %v1103_v46 = vpop.f32.mrf.mxu2  ;;  %v1087_v50 = vpop.f32.mrf.mxu1 }
 0x300   :  { %v1104_v19 = vadd.f32 %v1103_v46, %v1085_v6  ;;  %v1088_v32 = vadd.f32 %v1087_v50, %v8601_v25 }
 0x301   :  { %vm1144_vm14 = vcmp.ge.f32.partialorder %v1071_v14, 0.0  ;;  %v1160_v55 = vmul.f32 0.2, %v1071_v14 }
 0x302   :  { %6213 = vrot.lane.b32.xlu0 %v8682_v45, %s7127_s29 }
 0x303   :  { %v8715_v2 = vsel %vm1144_vm14, %v1071_v14, %v1160_v55 }
 0x304   :  { %v1120_v43 = vpop.f32.mrf.mxu3  ;;  %v8721_v53 = vpack.i.bf16 %v8715_v2, %v8717_v63 }
 0x305   :  { %v1121_v17 = vadd.f32 %v1120_v43, %v1102_v22 }
 0x307   :  { %6273 = vrot.lane.b32.xlu2 %v8697_v41, %s7128_s30  ;;  %6248 = vrot.lane.b32.xlu1 %v8682_v45, %s7122_s21  ;;  %v1106_v33 = vpop.f32.mrf.mxu2  ;;  %v1149_v0 = vmul.f32 0.2, %v1121_v17  ;;  %vm1133_vm10 = vcmp.ge.f32.partialorder %v1121_v17, 0.0  ;;  %v1089_v52 = vpop.f32.mrf.mxu1 }
 0x308   :  { %v1090_v61 = vadd.f32 %v1089_v52, %v8626_v27  ;;  %v1107_v44 = vadd.f32 %v1106_v33, %v1088_v32 }
 0x309   :  { %v8741_v18 = vsel %vm1133_vm10, %v1121_v17, %v1149_v0 }
 0x30a   :  { %6218 = vrot.lane.b32.xlu0 %v8658_v51, %s7122_s21  ;;  %13138 = vst [vmem:[#allocation25_spill] sm:$0xff] %v8741_v18 }
 0x30c   :  { %v1122_v59 = vpop.f32.mrf.mxu3 }
 0x30d   :  { %v1123_v12 = vadd.f32 %v1122_v59, %v1104_v19 }
 0x30f   :  { %vm1137_vm9 = vcmp.ge.f32.partialorder %v1123_v12, 0.0  ;;  %v1153_v28 = vmul.f32 0.2, %v1123_v12  ;;  %6288 = vrot.lane.b32.xlu2 %v8721_v53, %s7127_s29  ;;  %6253 = vrot.lane.b32.xlu1 %v8682_v45, %s7124_s27  ;;  %v1108_v58 = vpop.f32.mrf.mxu2 }
 0x310   :  { %v1109_v56 = vadd.f32 %v1108_v58, %v1090_v61 }
 0x311   :  { %v8737_v34 = vsel %vm1137_vm9, %v1123_v12, %v1153_v28 }
 0x312   :  { %13137 = vst [vmem:[#allocation15_spill] sm:$0xff] %v8737_v34  ;;  %6263 = vrot.lane.b32.xlu0 %v8697_v41, %s7126_s0 }
 0x314   :  { %v1125_v31 = vpop.f32.mrf.mxu3  ;;  %v8753_v45 = vpop.permute.xlu2 %6113 }
 0x315   :  { %v1126_v39 = vadd.f32 %v1125_v31, %v1107_v44 }
 0x317   :  { %6293 = vrot.lane.b32.xlu2 %v8721_v53, %s7126_s0  ;;  %6268 = vrot.lane.b32.xlu1 %v8697_v41, %s7123_s26  ;;  %v1157_v25 = vmul.f32 0.2, %v1126_v39  ;;  %vm1141_vm12 = vcmp.ge.f32.partialorder %v1126_v39, 0.0 }
 0x319   :  { %v8765_v14 = vsel %vm1141_vm12, %v1126_v39, %v1157_v25  ;;  %v4921_v39 = vld [vmem:[%s12603_s4 + $0x38] sm:$0xff] }
 0x31a   :  { %6278 = vrot.lane.b32.xlu0 %v8697_v41, %s7121_s12  ;;  %13141 = vst [vmem:[#allocation21_spill] sm:$0xff] %v8765_v14 }
 0x31c   :  { %v1127_v23 = vpop.f32.mrf.mxu3  ;;  %v8763_v48 = vpop.permute.xlu2 %6128 }
 0x31d   :  { %v1128_v60 = vadd.f32 %v1127_v23, %v1109_v56  ;;  %13140 = vst [vmem:[#allocation23_spill] sm:$0xff] %v8763_v48  ;;  %v13159_v7 = vunpack.i.h.bf16 %v8763_v48 }
 0x31f   :  { %vm1145_vm11 = vcmp.ge.f32.partialorder %v1128_v60, 0.0  ;;  %v1161_v3 = vmul.f32 0.2, %v1128_v60  ;;  %6323 = vrot.lane.b32.xlu2 %v8697_v41, %s7124_s27  ;;  %6283 = vrot.lane.b32.xlu1 %v8697_v41, %s7125_s28 }
 0x321   :  { %v8759_v27 = vsel %vm1145_vm11, %v1128_v60, %v1161_v3 }
 0x322   :  { %13139 = vst [vmem:[#allocation24_spill] sm:$0xff] %v8759_v27  ;;  %6298 = vrot.lane.b32.xlu0 %v8721_v53, %s7123_s26  ;;  %v6352_v22 = vpack.i.bf16 %v8759_v27, %v8765_v14 }
 0x324   :  { %v8775_v55 = vpop.permute.xlu2 %6138 }
 0x327   :  { %6333 = vrot.lane.b32.xlu2 %v8721_v53, %s7121_s12  ;;  %6308 = vrot.lane.b32.xlu1 %v8658_v51, %s7124_s27  ;;  %v6327_v51 = vpack.i.bf16 %v8737_v34, %v8741_v18 }
 0x32a   :  { %6303 = vrot.lane.b32.xlu0 %v8615_v20, %s7124_s27 }
 0x32c   :  { %v8783_v42 = vpop.permute.xlu0 %6118  ;;  %v8785_v46 = vpop.permute.xlu2 %6143 }
 0x32d   :  { %v8787_v43 = vpop.permute.xlu1 %6108 }
 0x32e   :  { %13142 = vst [vmem:[#allocation18_spill] sm:$0xff] %v8787_v43 }
 0x32f   :  { %6338 = vrot.lane.b32.xlu2 %v8721_v53, %s7125_s28  ;;  %6313 = vrot.lane.b32.xlu1 %v8721_v53, %s7128_s30 }
 0x332   :  { %6328 = vrot.lane.b32.xlu0 %v6327_v51, %s7123_s26 }
 0x334   :  { %v8795_v20 = vpop.permute.xlu0 %6123 }
 0x335   :  { %13143 = vst [vmem:[#allocation17_spill] sm:$0xff] %v8795_v20  ;;  %v8799_v6 = vpop.permute.xlu1 %6133  ;;  %v12727_v49 = vunpack.i.l.bf16 %v8795_v20 }
 0x336   :  { %13144 = vst [vmem:[#allocation16_spill] sm:$0xff] %v8799_v6 }
 0x337   :  { %6343 = vrot.lane.b32.xlu2 %v8721_v53, %s7124_s27  ;;  %6318 = vrot.lane.b32.xlu1 %v6327_v51, %s7127_s29 }
 0x339   :  { %v8797_v24 = vpop.permute.xlu2 %6183 }
 0x33a   :  { %6353 = vrot.lane.b32.xlu0 %v6352_v22, %s7123_s26  ;;  %v6186_v9 = vunpack.i.h.bf16 %v8797_v24 }
 0x33c   :  { %v8806_v19 = vpop.permute.xlu0 %6148 }
 0x33d   :  { %v8810_v50 = vpop.permute.xlu1 %6153  ;;  %v12759_v62 = vunpack.i.l.bf16 %v8806_v19 }
 0x33f   :  { %6348 = vrot.lane.b32.xlu2 %v6352_v22, %s7127_s29  ;;  %6363 = vrot.lane.b32.xlu1 %v6352_v22, %s7126_s0 }
 0x341   :  { %v8808_v17 = vpop.permute.xlu2 %6208 }
 0x342   :  { %6358 = vrot.lane.b32.xlu0 %v6327_v51, %s7126_s0 }
 0x344   :  { %v8815_v59 = vpop.permute.xlu0 %6158 }
 0x345   :  { %v8819_v33 = vpop.permute.xlu1 %6163  ;;  %v12723_v60 = vunpack.i.h.bf16 %v8815_v59  ;;  %v12725_v25 = vunpack.i.l.bf16 %v8815_v59 }
 0x346   :  { %13145 = vst [vmem:[#allocation22_spill] sm:$0xff] %v8819_v33  ;;  %v12731_v47 = vunpack.i.l.bf16 %v8819_v33 }
 0x347   :  { %6378 = vrot.lane.b32.xlu2 %v6352_v22, %s7121_s12  ;;  %6368 = vrot.lane.b32.xlu1 %v6327_v51, %s7121_s12 }
 0x349   :  { %v8817_v12 = vpop.permute.xlu2 %6228 }
 0x34a   :  { %6403 = vrot.lane.b32.xlu0 %v6352_v22, %s7125_s28 }
 0x34c   :  { %v8824_v0 = vpop.permute.xlu0 %6168 }
 0x34d   :  { %13146 = vst [vmem:[#allocation19_spill] sm:$0xff] %v8824_v0  ;;  %v13163_v27 = vunpack.i.l.bf16 %v8824_v0 }
 0x34f   :  { %6383 = vrot.lane.b32.xlu2 %v6352_v22, %s7128_s30  ;;  %6373 = vrot.lane.b32.xlu1 %v6327_v51, %s7128_s30 }
 0x351   :  { %v8826_v28 = vpop.permute.xlu2 %6238  ;;  %v8828_v31 = vpop.permute.xlu1 %6193 }
 0x352   :  { %6408 = vrot.lane.b32.xlu0 %v6352_v22, %s7124_s27 }
 0x354   :  { %v8834_v52 = vpop.permute.xlu0 %6173 }
 0x357   :  { %6388 = vrot.lane.b32.xlu2 %v6327_v51, %s7125_s28  ;;  %6393 = vrot.lane.b32.xlu1 %v8721_v53, %s7122_s21  ;;  %v4920_v53 = vld [vmem:[%s12603_s4 + $0x30] sm:$0xff] }
 0x359   :  { %v8836_v32 = vpop.permute.xlu2 %6258  ;;  %v8838_v58 = vpop.permute.xlu1 %6198 }
 0x35a   :  { %6413 = vrot.lane.b32.xlu0 %v8697_v41, %s7122_s21  ;;  %v12728_v29 = vunpack.i.l.bf16 %v8838_v58 }
 0x35c   :  { %v8844_v61 = vpop.permute.xlu0 %6178 }
 0x35f   :  { %6398 = vrot.lane.b32.xlu2 %v6327_v51, %s7124_s27  ;;  %6418 = vrot.lane.b32.xlu1 %v6352_v22, %s7122_s21 }
 0x361   :  { %v8846_v44 = vpop.permute.xlu2 %6273  ;;  %v8848_v56 = vpop.permute.xlu1 %6223 }
 0x362   :  { %1660 = vperm.xlu0 %5786, %v4920_v53  }
 0x364   :  { %v8857_v41 = vpop.permute.xlu0 %6188 }
 0x367   :  { %6423 = vrot.lane.b32.xlu2 %v6327_v51, %s7122_s21  ;;  %1665 = vperm.xlu1 %5784, %v4921_v39   ;;  %v4919_v51 = vld [vmem:[%s12603_s4 + $0x28] sm:$0xff]  ;;  %v4918_v39 = vld [vmem:[%s12603_s4 + $0x20] sm:$0xff] }
 0x369   :  { %v8859_v23 = vpop.permute.xlu2 %6288  ;;  %v8863_v3 = vpop.permute.xlu1 %6233 }
 0x36a   :  { %v12724_v26 = vunpack.i.h.bf16 %v8863_v3  ;;  %v12726_v53 = vunpack.i.l.bf16 %v8863_v3  ;;  %1655 = vperm.xlu0 %5786, %v4919_v51  }
 0x36c   :  { %v1523_v13 = vsel %vm165_vm2, %v12723_v60, %v12724_v26  ;;  %v1522_v36 = vsel %vm165_vm2, %v12725_v25, %v12726_v53  ;;  %v1520_v60 = vsel %vm165_vm2, %v12727_v49, %v12728_v29  ;;  %v13147_v26 = vunpack.i.h.bf16 %v8838_v58  ;;  %v8912_v22 = vpop.permute.xlu0 %6203 }
 0x36d   :  { %v1636_v30 = vpack.c.bf16 %v1523_v13, %v1522_v36  ;;  %v13148_v25 = vunpack.i.h.bf16 %v8795_v20  ;;  %v6185_v49 = vunpack.i.l.bf16 %v8797_v24  ;;  %v13149_v29 = vunpack.i.l.bf16 %v8826_v28 }
 0x36e   :  { %v13151_v36 = vunpack.i.h.bf16 %v8819_v33  ;;  %v12762_v33 = vunpack.i.h.bf16 %v8775_v55  ;;  %v12758_v20 = vunpack.i.h.bf16 %v8806_v19 }
 0x36f   :  { %1650 = vperm.xlu2 %5785, %v4918_v39   ;;  %v1521_v13 = vsel %vm165_vm2, %v13148_v25, %v13147_v26  ;;  %1723 = vmatpush.bf16.msra.mxu1 %v1636_v30  ;;  %v1474_v11 = vsel %vm152_vm1, %v12731_v47, %v13149_v29  ;;  %v13150_v25 = vunpack.i.h.bf16 %v8826_v28  ;;  %v12732_v39 = vunpack.i.l.bf16 %v8799_v6 }
 0x370   :  { %v1632_v30 = vpack.c.bf16 %v1521_v13, %v1520_v60  ;;  %v12737_v13 = vunpack.i.h.bf16 %v8799_v6  ;;  %v13152_v47 = vunpack.i.l.bf16 %v8787_v43  ;;  %v13157_v60 = vunpack.i.l.bf16 %v8763_v48 }
 0x371   :  { %v8914_v26 = vpop.permute.xlu2 %6293  ;;  %v8919_v51 = vpop.permute.xlu1 %6243  ;;  %v1475_v53 = vsel %vm152_vm1, %v13151_v36, %v13150_v25  ;;  %v13153_v36 = vunpack.i.h.bf16 %v8787_v43  ;;  %v13172_v48 = vunpack.i.l.bf16 %v8834_v52 }
 0x372   :  { %v8945_v37 = vsel %vm113_vm8, %v13152_v47, %v6185_v49  ;;  %v1628_v24 = vpack.c.bf16 %v1475_v53, %v1474_v11  ;;  %v13155_v47 = vunpack.i.h.bf16 %v8808_v17  ;;  %v13156_v53 = vunpack.i.l.bf16 %v8912_v22 }
 0x373   :  { %1724 = vmatpush.bf16.msra.mxu1 %v1632_v30  ;;  %v8951_v25 = vsel %vm113_vm8, %v13153_v36, %v6186_v9  ;;  %v13154_v30 = vunpack.i.l.bf16 %v8808_v17  ;;  %v13160_v11 = vunpack.i.l.bf16 %v8836_v32  ;;  %v13162_v18 = vunpack.i.l.bf16 %v8919_v51 }
 0x374   :  { %v8968_v29 = vsel %vm139_vm4, %v12737_v13, %v13155_v47  ;;  %v6214_v34 = vpop.permute.xlu0 %6213 }
 0x375   :  { %v8960_v15 = vsel %vm139_vm4, %v12732_v39, %v13154_v30  ;;  %v1472_v30 = vsel %vm152_vm1, %v13157_v60, %v13156_v53  ;;  %v13158_v39 = vunpack.i.h.bf16 %v8912_v22  ;;  %v1324_v35 = vsel %vm113_vm8, %v6185_v49, %v13160_v11 }
 0x376   :  { %v6226_v60 = vunpack.i.h.bf16 %v8848_v56  ;;  %v6225_v53 = vunpack.i.l.bf16 %v8848_v56  ;;  %v6216_v13 = vunpack.i.h.bf16 %v6214_v34  ;;  %v6215_v47 = vunpack.i.l.bf16 %v6214_v34 }
 0x377   :  { %v1473_v4 = vsel %vm152_vm1, %v13159_v7, %v13158_v39  ;;  %1725 = vmatpush.bf16.msra.mxu1 %v1628_v24  ;;  %v13161_v39 = vunpack.i.h.bf16 %v8836_v32  ;;  %v12746_v24 = vunpack.i.l.bf16 %v8859_v23  ;;  %v1426_v6 = vsel %vm139_vm4, %v13163_v27, %v13162_v18 }
 0x378   :  { %v1624_v49 = vpack.c.bf16 %v1473_v4, %v1472_v30  ;;  %v13166_v30 = vunpack.i.h.bf16 %v8859_v23  ;;  %v13167_v11 = vunpack.i.l.bf16 %v8785_v46  ;;  %v13168_v27 = vunpack.i.h.bf16 %v8785_v46 }
 0x379   :  { %v8994_v7 = vpop.permute.xlu2 %6323  ;;  %v1325_v36 = vsel %vm113_vm8, %v6186_v9, %v13161_v39  ;;  %v9001_v14 = vpop.permute.xlu1 %6248  ;;  %v13164_v9 = vunpack.i.h.bf16 %v8919_v51  ;;  %v13165_v39 = vunpack.i.h.bf16 %v8824_v0  ;;  %v1326_v4 = vsel %vm113_vm8, %v6215_v47, %v12746_v24 }
 0x37a   :  { %v1327_v56 = vsel %vm113_vm8, %v6216_v13, %v13166_v30  ;;  %v1330_v18 = vsel %vm113_vm8, %v13167_v11, %v6215_v47  ;;  %v13170_v24 = vunpack.i.h.bf16 %v8834_v52  ;;  %v13171_v30 = vunpack.i.l.bf16 %v9001_v14 }
 0x37b   :  { %v1427_v34 = vsel %vm139_vm4, %v13165_v39, %v13164_v9  ;;  %v1331_v9 = vsel %vm113_vm8, %v13168_v27, %v6216_v13  ;;  %1726 = vmatpush.bf16.msra.mxu1 %v1624_v49  ;;  %v13169_v39 = vunpack.i.h.bf16 %v9001_v14  ;;  %v1605_v43 = vpack.c.bf16 %v1327_v56, %v1326_v4 }
 0x37c   :  { %v1570_v47 = vsel %vm178_vm0, %v13172_v48, %v13171_v30  ;;  %v1604_v11 = vpack.c.bf16 %v1331_v9, %v1330_v18  ;;  %v12764_v13 = vunpack.i.l.bf16 %v8775_v55  ;;  %v1620_v49 = vpack.c.bf16 %v1427_v34, %v1426_v6  ;;  %v9058_v18 = vpop.permute.xlu0 %6218 }
 0x37d   :  { %v1571_v0 = vsel %vm178_vm0, %v13170_v24, %v13169_v39  ;;  %v12765_v24 = vunpack.i.h.bf16 %v8914_v26  ;;  %v12766_v39 = vunpack.i.l.bf16 %v8914_v26  ;;  %1761 = vmatpush.bf16.msra.mxu3 %v1605_v43  ;;  %v6231_v48 = vunpack.i.h.bf16 %v8817_v12 }
 0x37e   :  { %v1644_v27 = vpack.c.bf16 %v1571_v0, %v1570_v47  ;;  %1704 = vmatpush.bf16.msra.mxu0 %v1604_v11  ;;  %v1600_v56 = vpack.c.bf16 %v8951_v25, %v8945_v37  ;;  %v1616_v6 = vpack.c.bf16 %v8968_v29, %v8960_v15  ;;  %v1601_v0 = vpack.c.bf16 %v1325_v36, %v1324_v35 }
 0x37f   :  { %1727 = vmatpush.bf16.msra.mxu1 %v1620_v49  ;;  %v12767_v34 = vunpack.i.h.bf16 %v8844_v61  ;;  %v6190_v4 = vunpack.i.l.bf16 %v8857_v41  ;;  %v1282_v43 = vsel %vm100_vm6, %v12759_v62, %v6225_v53  ;;  %v1283_v37 = vsel %vm100_vm6, %v12758_v20, %v6226_v60  ;;  %v4932_v49 = vld [vmem:[%s12602_s3 + $0x38] sm:$0xf] }
 0x380   :  { %1748 = vmatpush.bf16.msra.mxu2 %v1644_v27  ;;  %v12763_v35 = vunpack.i.l.bf16 %v8844_v61  ;;  %v6191_v15 = vunpack.i.h.bf16 %v8857_v41  ;;  %v12760_v29 = vunpack.i.h.bf16 %v9058_v18  ;;  %v12761_v25 = vunpack.i.l.bf16 %v9058_v18  ;;  %v5548_v27 = vld [vmem:[%s12602_s3 + $0x40] sm:$0xf0] }
 0x381   :  { %v9060_v9 = vpop.permute.xlu2 %6333  ;;  %v9074_v36 = vpop.permute.xlu1 %6253  ;;  %1762 = vmatpush.bf16.msra.mxu3 %v1601_v0  ;;  %v1278_v11 = vsel %vm100_vm6, %v6225_v53, %v12766_v39  ;;  %v1279_v41 = vsel %vm100_vm6, %v6226_v60, %v12765_v24  ;;  %v1596_v0 = vpack.c.bf16 %v1283_v37, %v1282_v43  ;;  %v13173_v20 = vunpack.i.l.bf16 %v8753_v45 }
 0x382   :  { %v12774_v30 = vunpack.i.h.bf16 %v9074_v36  ;;  %v12775_v47 = vunpack.i.l.bf16 %v9074_v36  ;;  %1705 = vmatpush.bf16.msra.mxu0 %v1600_v56  ;;  %v6230_v56 = vunpack.i.l.bf16 %v8817_v12  ;;  %v1568_v53 = vsel %vm178_vm0, %v12764_v13, %v12761_v25 }
 0x383   :  { %1728 = vmatpush.bf16.msra.mxu1 %v1616_v6  ;;  %v1569_v60 = vsel %vm178_vm0, %v12762_v33, %v12760_v29  ;;  %v1280_v62 = vsel %vm100_vm6, %v13173_v20, %v6190_v4  ;;  %v1597_v25 = vpack.c.bf16 %v1279_v41, %v1278_v11  ;;  %v13174_v33 = vunpack.i.h.bf16 %v8753_v45 }
 0x384   :  { %v1378_v6 = vsel %vm126_vm5, %v12763_v35, %v12775_v47  ;;  %v1379_v43 = vsel %vm126_vm5, %v12767_v34, %v12774_v30  ;;  %v1640_v37 = vpack.c.bf16 %v1569_v60, %v1568_v53  ;;  %v9125_v13 = vor.u32 %v5548_v27, %v4932_v49  ;;  %v9129_v53 = vpop.permute.xlu0 %6263 }
 0x385   :  { %v1612_v29 = vpack.c.bf16 %v1379_v43, %v1378_v6  ;;  %v1281_v35 = vsel %vm100_vm6, %v13174_v33, %v6191_v15  ;;  %v12770_v24 = vunpack.i.h.bf16 %v8810_v50  ;;  %v12771_v39 = vunpack.i.l.bf16 %v8810_v50  ;;  %1763 = vmatpush.bf16.msra.mxu3 %v1597_v25 }
 0x386   :  { %1706 = vmatpush.bf16.msra.mxu0 %v1596_v0  ;;  %1749 = vmatpush.bf16.msra.mxu2 %v1640_v37  ;;  %v1592_v11 = vpack.c.bf16 %v1281_v35, %v1280_v62  ;;  %v12776_v25 = vunpack.i.h.bf16 %v8828_v31  ;;  %v12777_v41 = vunpack.i.l.bf16 %v8828_v31  ;;  %v12772_v62 = vunpack.i.h.bf16 %v9129_v53 }
 0x387   :  { %1729 = vmatpush.bf16.msra.mxu1 %v1612_v29  ;;  %v1234_v33 = vsel %vm87_vm7, %v12771_v39, %v6230_v56  ;;  %v1235_v29 = vsel %vm87_vm7, %v12770_v24, %v6231_v48  ;;  %v12773_v35 = vunpack.i.l.bf16 %v9129_v53  ;;  %v12768_v27 = vunpack.i.h.bf16 %v8783_v42 }
 0x388   :  { %v12769_v0 = vunpack.i.l.bf16 %v8783_v42  ;;  %v1277_v6 = vsel %vm100_vm6, %v6191_v15, %v12772_v62  ;;  %v1588_v43 = vpack.c.bf16 %v1235_v29, %v1234_v33 }
 0x389   :  { %v9131_v20 = vpop.permute.xlu2 %6338  ;;  %v9149_v49 = vpop.permute.xlu1 %6268  ;;  %4946 = vmatmul.msk.bf16.vlgmr.msra.gmra.mxu2 %vm895_vm3, %v9125_v13  ;;  %v1276_v60 = vsel %vm100_vm6, %v6190_v4, %v12773_v35  ;;  %v1233_v4 = vsel %vm87_vm7, %v12768_v27, %v12776_v25  ;;  %v13179_v25 = vunpack.i.l.bf16 %v8859_v23 }
 0x38a   :  { %1707 = vmatpush.bf16.msra.mxu0 %v1592_v11  ;;  %v1593_v37 = vpack.c.bf16 %v1277_v6, %v1276_v60  ;;  %v1232_v11 = vsel %vm87_vm7, %v12769_v0, %v12777_v41  ;;  %v4944_v60 = vld [vmem:[%s12602_s3 + $0x50] sm:$0xf]  ;;  %v5551_v6 = vld [vmem:[%s12602_s3 + $0x58] sm:$0xf0]  ;;  %v12783_v27 = vunpack.i.l.bf16 %v9149_v49  ;;  %v13181_v41 = vunpack.i.l.bf16 %v8785_v46 }
 0x38b   :  { %v1584_v33 = vpack.c.bf16 %v1233_v4, %v1232_v11  ;;  %v9193_v11 = vor.u32 %v5551_v6, %v4944_v60  ;;  %v13175_v4 = vpack.c.bf16 %v8637_v21, %v8635_v54  ;;  %v12781_v54 = vunpack.i.h.bf16 %v9060_v9 }
 0x38c   :  { %1764 = vmatpush.bf16.msra.mxu3 %v1593_v37  ;;  %v9175_v34 = vpop.permute.xlu0 %6278  ;;  %v5547_v37 = vld [vmem:[%s12602_s3 + $0x38] sm:$0xf0]  ;;  %v12780_v21 = vunpack.i.l.bf16 %v9060_v9 }
 0x38e   :  { %1708 = vmatpush.bf16.msra.mxu0 %v1588_v43  ;;  %v4924_v43 = vld [vmem:[%s12602_s3 + $0x30] sm:$0xf] }
 0x38f   :  { %v9202_v39 = vor.u32 %v5547_v37, %v4924_v43  ;;  %v13177_v43 = vunpack.i.l.bf16 %v8863_v3  ;;  %v13178_v37 = vunpack.i.h.bf16 %v8863_v3  ;;  %v13182_v3 = vunpack.i.h.bf16 %v8785_v46 }
 0x391   :  { %v9177_v15 = vpop.permute.xlu2 %6343  ;;  %v9179_v29 = vpop.permute.xlu1 %6283 }
 0x392   :  { %1709 = vmatpush.bf16.msra.mxu0 %v1584_v33  ;;  %v12782_v33 = vunpack.i.h.bf16 %v9149_v49 }
 0x394   :  { %v9200_v0 = vpop.permute.xlu0 %6298 }
 0x395   :  { %v12778_v62 = vunpack.i.h.bf16 %v9200_v0  ;;  %v12779_v35 = vunpack.i.l.bf16 %v9200_v0 }
 0x396   :  { %1710 = vmatpush.bf16.msra.mxu0 %v13175_v4  ;;  %v13176_v4 = vpack.c.bf16 %v8611_v57, %v8609_v5  ;;  %v13180_v57 = vunpack.i.h.bf16 %v8859_v23  ;;  %v13183_v23 = vunpack.i.l.bf16 %v8838_v58 }
 0x397   :  { %v1519_v47 = vsel %vm165_vm2, %v13178_v37, %v12778_v62 }
 0x399   :  { %v6349_v24 = vpop.permute.xlu2 %6348  ;;  %v9206_v6 = vpop.permute.xlu1 %6308  ;;  %4947 = vmatmul.msk.bf16.gmra.mxu2 %vm895_vm3, %v9193_v11 }
 0x39a   :  { %v6351_v30 = vunpack.i.h.bf16 %v6349_v24  ;;  %v6350_v60 = vunpack.i.l.bf16 %v6349_v24  ;;  %1711 = vmatpush.bf16.msra.mxu0 %v13176_v4  ;;  %v1518_v24 = vsel %vm165_vm2, %v13177_v43, %v12779_v35 }
 0x39b   :  { %v1637_v62 = vpack.c.bf16 %v1519_v47, %v1518_v24  ;;  %v13185_v47 = vunpack.i.l.bf16 %v8826_v28 }
 0x39c   :  { %v1322_v5 = vsel %vm113_vm8, %v13179_v25, %v6350_v60  ;;  %v1323_v4 = vsel %vm113_vm8, %v13180_v57, %v6351_v30  ;;  %v9239_v43 = vsel %vm113_vm8, %v6350_v60, %v13181_v41  ;;  %v9245_v37 = vsel %vm113_vm8, %v6351_v30, %v13182_v3 }
 0x39d   :  { %v1606_v35 = vpack.c.bf16 %v1323_v4, %v1322_v5  ;;  %1712 = vmatmul.bf16.vlgmr.msra.gmra.mxu0 %v9202_v39  ;;  %v1516_v25 = vsel %vm165_vm2, %v13183_v23, %v12783_v27  ;;  %v13184_v41 = vunpack.i.h.bf16 %v8838_v58  ;;  %v1470_v60 = vsel %vm152_vm1, %v13185_v47, %v12780_v21  ;;  %v9270_v58 = vpop.permute.xlu0 %6303 }
 0x39e   :  { %1780 = vmatpush.bf16.msrb.mxu0 %v1637_v62  ;;  %v12787_v5 = vunpack.i.l.bf16 %v9175_v34  ;;  %v13186_v62 = vunpack.i.h.bf16 %v8826_v28  ;;  %v6311_v3 = vunpack.i.h.bf16 %v9206_v6  ;;  %v12785_v23 = vunpack.i.l.bf16 %v9206_v6 }
 0x39f   :  { %v1517_v46 = vsel %vm165_vm2, %v13184_v41, %v12782_v33  ;;  %1818 = vmatpush.bf16.msrb.mxu2 %v1606_v35  ;;  %v12786_v41 = vunpack.i.h.bf16 %v9270_v58  ;;  %v12784_v47 = vunpack.i.l.bf16 %v9270_v58 }
 0x3a0   :  { %v1633_v4 = vpack.c.bf16 %v1517_v46, %v1516_v25  ;;  %v1471_v35 = vsel %vm152_vm1, %v13186_v62, %v12781_v54  ;;  %v5546_v62 = vld [vmem:[%s12602_s3 + $0x34] sm:$0xf]  ;;  %v4926_v54 = vld [vmem:[%s12602_s3 + $0x3c] sm:$0xf0]  ;;  %v12788_v25 = vunpack.i.l.bf16 %v9131_v20 }
 0x3a1   :  { %v9272_v57 = vpop.permute.xlu2 %6378  ;;  %v9284_v30 = vpop.permute.xlu1 %6313  ;;  %v1376_v27 = vsel %vm126_vm5, %v12784_v47, %v12785_v23  ;;  %v1629_v21 = vpack.c.bf16 %v1471_v35, %v1470_v60  ;;  %v13188_v35 = vunpack.i.h.bf16 %v9175_v34 }
 0x3a2   :  { %v12789_v46 = vunpack.i.h.bf16 %v9284_v30  ;;  %v12796_v28 = vunpack.i.l.bf16 %v9284_v30  ;;  %1781 = vmatpush.bf16.msrb.mxu0 %v1633_v4  ;;  %v1377_v4 = vsel %vm126_vm5, %v12786_v41, %v6311_v3  ;;  %v9322_v41 = vor.u32 %v5546_v62, %v4926_v54 }
 0x3a3   :  { %v1608_v24 = vpack.c.bf16 %v1377_v4, %v1376_v27  ;;  %v13187_v27 = vunpack.i.l.bf16 %v8912_v22  ;;  %v13193_v62 = vunpack.i.h.bf16 %v8828_v31 }
 0x3a4   :  { %v1230_v33 = vsel %vm87_vm7, %v6230_v56, %v12796_v28  ;;  %v1231_v47 = vsel %vm87_vm7, %v6231_v48, %v12789_v46  ;;  %v13189_v56 = vunpack.i.h.bf16 %v8912_v22  ;;  %v13190_v48 = vunpack.i.l.bf16 %v8846_v44  ;;  %v4936_v22 = vld [vmem:[%s12602_s3 + $0x48] sm:$0xf] }
 0x3a5   :  { %v1589_v23 = vpack.c.bf16 %v1231_v47, %v1230_v33  ;;  %v1468_v60 = vsel %vm152_vm1, %v13187_v27, %v12787_v5  ;;  %1730 = vmatpush.bf16.msra.mxu1 %v1608_v24  ;;  %v13191_v33 = vunpack.i.l.bf16 %v8828_v31  ;;  %v13192_v47 = vunpack.i.h.bf16 %v8846_v44  ;;  %v9354_v24 = vpop.permute.xlu0 %6328 }
 0x3a6   :  { %v1469_v12 = vsel %vm152_vm1, %v13189_v56, %v13188_v35  ;;  %1782 = vmatpush.bf16.msrb.mxu0 %v1629_v21  ;;  %v5550_v21 = vld [vmem:[%s12602_s3 + $0x50] sm:$0xf0]  ;;  %v13194_v31 = vunpack.i.l.bf16 %v8919_v51  ;;  %v13197_v46 = vunpack.i.l.bf16 %v8836_v32 }
 0x3a7   :  { %v1228_v54 = vsel %vm87_vm7, %v13191_v33, %v13190_v48  ;;  %v1229_v4 = vsel %vm87_vm7, %v13193_v62, %v13192_v47  ;;  %1765 = vmatpush.bf16.msra.mxu3 %v1589_v23  ;;  %v1625_v35 = vpack.c.bf16 %v1469_v12, %v1468_v60  ;;  %v13195_v48 = vunpack.i.h.bf16 %v9131_v20 }
 0x3a8   :  { %v1422_v56 = vsel %vm139_vm4, %v13194_v31, %v12788_v25  ;;  %v13196_v33 = vunpack.i.h.bf16 %v8919_v51  ;;  %v12794_v23 = vunpack.i.h.bf16 %v9179_v29  ;;  %v12795_v62 = vunpack.i.l.bf16 %v9179_v29  ;;  %1731 = vmatmul.bf16.vlgmr.msra.gmra.mxu1 %v9322_v41 }
 0x3a9   :  { %v9356_v27 = vpop.permute.xlu2 %6383  ;;  %v9372_v5 = vpop.permute.xlu1 %6318  ;;  %v1585_v60 = vpack.c.bf16 %v1229_v4, %v1228_v54  ;;  %v9375_v12 = vor.u32 %v5550_v21, %v4936_v22  ;;  %v13198_v4 = vunpack.i.h.bf16 %v8836_v32 }
 0x3aa   :  { %v1423_v47 = vsel %vm139_vm4, %v13196_v33, %v13195_v48  ;;  %v12790_v31 = vunpack.i.h.bf16 %v9372_v5  ;;  %v12791_v25 = vunpack.i.l.bf16 %v9372_v5  ;;  %1783 = vmatpush.bf16.msrb.mxu0 %v1625_v35  ;;  %v12792_v48 = vunpack.i.h.bf16 %v9177_v15 }
 0x3ab   :  { %1766 = vmatpush.bf16.msra.mxu3 %v1585_v60  ;;  %v1621_v51 = vpack.c.bf16 %v1423_v47, %v1422_v56  ;;  %v12793_v33 = vunpack.i.l.bf16 %v9177_v15  ;;  %v13199_v35 = vunpack.i.l.bf16 %v8808_v17  ;;  %v13201_v47 = vpack.c.bf16 %v8676_v40, %v8678_v1 }
 0x3ac   :  { %v1320_v54 = vsel %vm113_vm8, %v13197_v46, %v12791_v25  ;;  %v1321_v22 = vsel %vm113_vm8, %v13198_v4, %v12790_v31  ;;  %v13200_v46 = vunpack.i.h.bf16 %v8808_v17  ;;  %v6326_v1 = vunpack.i.h.bf16 %v8994_v7  ;;  %v4938_v31 = vld [vmem:[%s12602_s3 + $0x54] sm:$0xf0] }
 0x3ad   :  { %1717 = vmatmul.bf16.gmra.mxu0 %v9375_v12  ;;  %v1602_v21 = vpack.c.bf16 %v1321_v22, %v1320_v54  ;;  %v1420_v56 = vsel %vm139_vm4, %v13199_v35, %v12795_v62  ;;  %v9409_v60 = vpop.permute.xlu0 %6353  ;;  %v13202_v22 = vunpack.i.l.bf16 %v9074_v36  ;;  %v13206_v62 = vpack.c.bf16 %v8652_v16, %v8654_v8 }
 0x3ae   :  { %v1421_v32 = vsel %vm139_vm4, %v13200_v46, %v12794_v23  ;;  %1784 = vmatpush.bf16.msrb.mxu0 %v1621_v51  ;;  %v13203_v51 = vunpack.i.h.bf16 %v9074_v36  ;;  %v12797_v35 = vunpack.i.h.bf16 %v9409_v60  ;;  %v6380_v25 = vunpack.i.l.bf16 %v9272_v57 }
 0x3af   :  { %1767 = vmatpush.bf16.msra.mxu3 %v13201_v47  ;;  %1819 = vmatpush.bf16.msrb.mxu2 %v1602_v21  ;;  %v1617_v4 = vpack.c.bf16 %v1421_v32, %v1420_v56  ;;  %v1374_v17 = vsel %vm126_vm5, %v13202_v22, %v12793_v33  ;;  %v6325_v21 = vunpack.i.l.bf16 %v8994_v7  ;;  %v6355_v56 = vunpack.i.l.bf16 %v9409_v60 }
 0x3b0   :  { %v1375_v40 = vsel %vm126_vm5, %v13203_v51, %v12792_v48  ;;  %v6330_v47 = vunpack.i.l.bf16 %v9354_v24  ;;  %v5549_v51 = vld [vmem:[%s12602_s3 + $0x4c] sm:$0xf]  ;;  %v13204_v48 = vunpack.i.l.bf16 %v9200_v0  ;;  %v13207_v32 = vunpack.i.l.bf16 %v8914_v26 }
 0x3b1   :  { %v9411_v54 = vpop.permute.xlu2 %6388  ;;  %v9429_v46 = vpop.permute.xlu1 %6363  ;;  %v1613_v28 = vpack.c.bf16 %v1375_v40, %v1374_v17  ;;  %v9470_v8 = vor.u32 %v5549_v51, %v4938_v31  ;;  %v13212_v40 = vunpack.i.h.bf16 %v9149_v49 }
 0x3b2   :  { %v12798_v22 = vunpack.i.h.bf16 %v9429_v46  ;;  %v12799_v36 = vunpack.i.l.bf16 %v9429_v46  ;;  %1785 = vmatpush.bf16.msrb.mxu0 %v1617_v4  ;;  %v1514_v33 = vsel %vm165_vm2, %v13204_v48, %v6355_v56  ;;  %v13205_v4 = vunpack.i.h.bf16 %v9200_v0 }
 0x3b3   :  { %1768 = vmatpush.bf16.msra.mxu3 %v13206_v62  ;;  %v13208_v0 = vunpack.i.h.bf16 %v8914_v26  ;;  %v13209_v62 = vunpack.i.l.bf16 %v9206_v6  ;;  %v1373_v26 = vsel %vm126_vm5, %v6311_v3, %v6326_v1  ;;  %v12800_v3 = vunpack.i.h.bf16 %v9356_v27 }
 0x3b4   :  { %v1515_v23 = vsel %vm165_vm2, %v13205_v4, %v12797_v35  ;;  %v1274_v48 = vsel %vm100_vm6, %v13207_v32, %v12799_v36 }
 0x3b5   :  { %v1275_v4 = vsel %vm100_vm6, %v13208_v0, %v12798_v22  ;;  %v1638_v35 = vpack.c.bf16 %v1515_v23, %v1514_v33  ;;  %v1372_v17 = vsel %vm126_vm5, %v13209_v62, %v6325_v21  ;;  %v13210_v23 = vunpack.i.l.bf16 %v9149_v49  ;;  %v9498_v32 = vpop.permute.xlu0 %6358 }
 0x3b6   :  { %v1598_v16 = vpack.c.bf16 %v1275_v4, %v1274_v48  ;;  %1769 = vmatmul.bf16.vlgmr.msra.gmra.mxu3 %v9202_v39  ;;  %1786 = vmatpush.bf16.msrb.mxu0 %v1613_v28  ;;  %v13211_v33 = vunpack.i.h.bf16 %v9354_v24  ;;  %v1609_v51 = vpack.c.bf16 %v1373_v26, %v1372_v17  ;;  %v13213_v48 = vunpack.i.l.bf16 %v9060_v9 }
 0x3b7   :  { %v1512_v31 = vsel %vm165_vm2, %v13210_v23, %v6330_v47  ;;  %1837 = vmatpush.bf16.msrb.mxu3 %v1638_v35  ;;  %v13214_v49 = vunpack.i.h.bf16 %v9272_v57  ;;  %v13215_v4 = vunpack.i.h.bf16 %v9060_v9  ;;  %v12802_v62 = vunpack.i.h.bf16 %v9498_v32 }
 0x3b8   :  { %v1513_v6 = vsel %vm165_vm2, %v13212_v40, %v13211_v33  ;;  %1820 = vmatpush.bf16.msrb.mxu2 %v1598_v16  ;;  %v1466_v0 = vsel %vm152_vm1, %v13213_v48, %v6380_v25  ;;  %v12801_v16 = vunpack.i.l.bf16 %v9356_v27  ;;  %v12803_v17 = vunpack.i.l.bf16 %v9498_v32  ;;  %1736 = vmatmul.bf16.gmra.mxu1 %v9470_v8 }
 0x3b9   :  { %v9500_v28 = vpop.permute.xlu2 %6398  ;;  %v1467_v35 = vsel %vm152_vm1, %v13215_v4, %v13214_v49  ;;  %v9517_v26 = vpop.permute.xlu1 %6368  ;;  %v1634_v23 = vpack.c.bf16 %v1513_v6, %v1512_v31  ;;  %v13216_v49 = vunpack.i.l.bf16 %v9129_v53  ;;  %v13217_v31 = vunpack.i.h.bf16 %v9129_v53 }
 0x3ba   :  { %v6401_v33 = vunpack.i.h.bf16 %v9500_v28  ;;  %v6400_v40 = vunpack.i.l.bf16 %v9500_v28  ;;  %v12804_v9 = vunpack.i.h.bf16 %v9517_v26  ;;  %v12805_v48 = vunpack.i.l.bf16 %v9517_v26  ;;  %1787 = vmatpush.bf16.msrb.mxu0 %v1609_v51 }
 0x3bb   :  { %1838 = vmatpush.bf16.msrb.mxu3 %v1634_v23  ;;  %v1272_v4 = vsel %vm100_vm6, %v13216_v49, %v12803_v17  ;;  %v1273_v6 = vsel %vm100_vm6, %v13217_v31, %v12802_v62  ;;  %v1630_v36 = vpack.c.bf16 %v1467_v35, %v1466_v0  ;;  %v13218_v51 = vunpack.i.l.bf16 %v9284_v30 }
 0x3bc   :  { %v1594_v22 = vpack.c.bf16 %v1273_v6, %v1272_v4  ;;  %v13219_v49 = vunpack.i.h.bf16 %v9284_v30  ;;  %v13220_v0 = vunpack.i.l.bf16 %v9175_v34  ;;  %v13221_v4 = vunpack.i.h.bf16 %v9175_v34 }
 0x3bd   :  { %1788 = vmatmul.bf16.vlgmr.msrb.gmra.mxu0 %v9322_v41  ;;  %v1226_v23 = vsel %vm87_vm7, %v13218_v51, %v12801_v16  ;;  %v13222_v30 = vunpack.i.l.bf16 %v9270_v58  ;;  %v13223_v51 = vunpack.i.h.bf16 %v9270_v58  ;;  %v12811_v34 = vunpack.i.l.bf16 %v9411_v54 }
 0x3be   :  { %v1227_v53 = vsel %vm87_vm7, %v13219_v49, %v12800_v3  ;;  %v1464_v35 = vsel %vm152_vm1, %v13220_v0, %v12805_v48  ;;  %v1465_v31 = vsel %vm152_vm1, %v13221_v4, %v12804_v9  ;;  %1821 = vmatpush.bf16.msrb.mxu2 %v1594_v22  ;;  %v9579_v22 = vpop.permute.xlu0 %6403  ;;  %v13226_v48 = vunpack.i.l.bf16 %v8775_v55 }
 0x3bf   :  { %v9567_v6 = vsel %vm126_vm5, %v6400_v40, %v13222_v30  ;;  %v9575_v49 = vsel %vm126_vm5, %v6401_v33, %v13223_v51  ;;  %1839 = vmatpush.bf16.msrb.mxu3 %v1630_v36  ;;  %v1590_v4 = vpack.c.bf16 %v1227_v53, %v1226_v23  ;;  %v1626_v3 = vpack.c.bf16 %v1465_v31, %v1464_v35 }
 0x3c0   :  { %v12806_v30 = vunpack.i.h.bf16 %v9579_v22  ;;  %v12807_v58 = vunpack.i.l.bf16 %v9579_v22  ;;  %v12812_v36 = vunpack.i.h.bf16 %v9411_v54  ;;  %v13224_v23 = vunpack.i.l.bf16 %v9131_v20 }
 0x3c1   :  { %v9581_v0 = vpop.permute.xlu2 %6423  ;;  %v9587_v51 = vpop.permute.xlu1 %6373  ;;  %v13225_v35 = vunpack.i.h.bf16 %v9131_v20  ;;  %v13228_v20 = vunpack.i.l.bf16 %v8846_v44 }
 0x3c2   :  { %v12808_v16 = vunpack.i.h.bf16 %v9581_v0  ;;  %v6425_v62 = vunpack.i.l.bf16 %v9581_v0  ;;  %v12809_v17 = vunpack.i.h.bf16 %v9587_v51  ;;  %v12810_v9 = vunpack.i.l.bf16 %v9587_v51  ;;  %1822 = vmatpush.bf16.msrb.mxu2 %v1590_v4 }
 0x3c3   :  { %1840 = vmatpush.bf16.msrb.mxu3 %v1626_v3  ;;  %v1418_v53 = vsel %vm139_vm4, %v13224_v23, %v12807_v58  ;;  %v1419_v31 = vsel %vm139_vm4, %v13225_v35, %v12806_v30  ;;  %v13227_v4 = vunpack.i.h.bf16 %v8775_v55 }
 0x3c4   :  { %v9611_v3 = vsel %vm178_vm0, %v6425_v62, %v13226_v48  ;;  %v1224_v35 = vsel %vm87_vm7, %v13228_v20, %v12810_v9  ;;  %v13229_v48 = vunpack.i.h.bf16 %v8846_v44  ;;  %v1622_v30 = vpack.c.bf16 %v1419_v31, %v1418_v53 }
 0x3c5   :  { %v9619_v23 = vsel %vm178_vm0, %v12808_v16, %v13227_v4  ;;  %v13230_v16 = vunpack.i.l.bf16 %v9179_v29  ;;  %v13231_v44 = vunpack.i.h.bf16 %v9179_v29  ;;  %v13232_v9 = vunpack.i.l.bf16 %v8815_v59 }
 0x3c6   :  { %v1225_v55 = vsel %vm87_vm7, %v13229_v48, %v12809_v17  ;;  %v1643_v58 = vpack.c.bf16 %v9619_v23, %v9611_v3  ;;  %1774 = vmatmul.bf16.gmra.mxu3 %v9375_v12  ;;  %v9648_v31 = vpop.permute.xlu0 %6408  ;;  %v13275_v3 = vunpack.i.l.bf16 %v8753_v45  ;;  %v13276_v23 = vunpack.i.l.bf16 %v9498_v32 }
 0x3c7   :  { %v1586_v4 = vpack.c.bf16 %v1225_v55, %v1224_v35  ;;  %v1416_v20 = vsel %vm139_vm4, %v13230_v16, %v12811_v34  ;;  %v1417_v53 = vsel %vm139_vm4, %v13231_v44, %v12812_v36  ;;  %1841 = vmatpush.bf16.msrb.mxu3 %v1622_v30  ;;  %v6411_v35 = vunpack.i.h.bf16 %v9648_v31 }
 0x3c8   :  { %v6410_v48 = vunpack.i.l.bf16 %v9648_v31  ;;  %v1618_v17 = vpack.c.bf16 %v1417_v53, %v1416_v20  ;;  %v1526_v29 = vsel %vm165_vm2, %v6355_v56, %v13232_v9  ;;  %v13234_v30 = vunpack.i.h.bf16 %v9409_v60 }
 0x3c9   :  { %1823 = vmatpush.bf16.msrb.mxu2 %v1586_v4  ;;  %v6394_v55 = vpop.permute.xlu1 %6393  ;;  %v13233_v4 = vunpack.i.h.bf16 %v8815_v59  ;;  %v13235_v36 = vpack.c.bf16 %v8715_v2, %v8717_v63  ;;  %v13236_v20 = vunpack.i.l.bf16 %v9177_v15  ;;  %v13237_v59 = vunpack.i.h.bf16 %v9177_v15  ;;  %v13240_v15 = vld [vmem:[#allocation20_spill] sm:$0xff] }
 0x3ca   :  { %v6396_v16 = vunpack.i.h.bf16 %v6394_v55  ;;  %v6395_v34 = vunpack.i.l.bf16 %v6394_v55  ;;  %v13238_v9 = vunpack.i.l.bf16 %v9001_v14  ;;  %v13239_v63 = vunpack.i.h.bf16 %v9001_v14 }
 0x3cb   :  { %v1527_v44 = vsel %vm165_vm2, %v13234_v30, %v13233_v4  ;;  %1842 = vmatpush.bf16.msrb.mxu3 %v1618_v17  ;;  %v1370_v56 = vsel %vm126_vm5, %v13236_v20, %v6410_v48  ;;  %v1371_v60 = vsel %vm126_vm5, %v13237_v59, %v6411_v35  ;;  %v13241_v4 = vpack.c.bf16 %v8691_v38, %v13240_v15 }
 0x3cc   :  { %v1566_v2 = vsel %vm178_vm0, %v13238_v9, %v6395_v34  ;;  %v1567_v17 = vsel %vm178_vm0, %v13239_v63, %v6396_v16  ;;  %v1639_v55 = vpack.c.bf16 %v1527_v44, %v1526_v29  ;;  %v1368_v14 = vsel %vm126_vm5, %v6325_v21, %v6400_v40  ;;  %v13242_v44 = vld [vmem:[#allocation17_spill] sm:$0xff]  ;;  %v13246_v9 = vld [vmem:[#allocation22_spill] sm:$0xff] }
 0x3cd   :  { %1824 = vmatpush.bf16.msrb.mxu2 %v13235_v36  ;;  %v1614_v36 = vpack.c.bf16 %v1371_v60, %v1370_v56  ;;  %1793 = vmatmul.bf16.gmra.mxu0 %v9470_v8  ;;  %v1645_v53 = vpack.c.bf16 %v1567_v17, %v1566_v2  ;;  %v1369_v30 = vsel %vm126_vm5, %v6326_v1, %v6401_v33  ;;  %v13243_v38 = vunpack.i.l.bf16 %v13242_v44 }
 0x3ce   :  { %v6414_v29 = vpop.permute.xlu0 %6413  ;;  %v13244_v56 = vunpack.i.h.bf16 %v13242_v44  ;;  %v13245_v21 = vunpack.i.h.bf16 %v9354_v24  ;;  %v1610_v60 = vpack.c.bf16 %v1369_v30, %v1368_v14  ;;  %v13247_v2 = vunpack.i.l.bf16 %v13246_v9 }
 0x3cf   :  { %1805 = vmatpush.bf16.msrb.mxu1 %v1645_v53  ;;  %1843 = vmatpush.bf16.msrb.mxu3 %v1614_v36  ;;  %v1524_v20 = vsel %vm165_vm2, %v6330_v47, %v13243_v38  ;;  %v6416_v28 = vunpack.i.h.bf16 %v6414_v29  ;;  %v6415_v40 = vunpack.i.l.bf16 %v6414_v29  ;;  %v13248_v24 = vunpack.i.l.bf16 %v9058_v18 }
 0x3d0   :  { %v1525_v7 = vsel %vm165_vm2, %v13245_v21, %v13244_v56  ;;  %v1478_v47 = vsel %vm152_vm1, %v6380_v25, %v13247_v2  ;;  %v13249_v36 = vunpack.i.h.bf16 %v9058_v18  ;;  %v13251_v15 = vunpack.i.h.bf16 %v9272_v57  ;;  %v13255_v21 = vld [vmem:[#allocation18_spill] sm:$0xff] }
 0x3d1   :  { %1825 = vmatpush.bf16.msrb.mxu2 %v13241_v4  ;;  %v6419_v1 = vpop.permute.xlu1 %6418  ;;  %v1635_v63 = vpack.c.bf16 %v1525_v7, %v1524_v20  ;;  %v1564_v17 = vsel %vm178_vm0, %v13248_v24, %v6415_v40  ;;  %v13252_v25 = vunpack.i.h.bf16 %v8834_v52  ;;  %v13253_v29 = vunpack.i.l.bf16 %v8834_v52 }
 0x3d2   :  { %v6421_v33 = vunpack.i.h.bf16 %v6419_v1  ;;  %v6420_v59 = vunpack.i.l.bf16 %v6419_v1  ;;  %v1565_v53 = vsel %vm178_vm0, %v13249_v36, %v6416_v28  ;;  %v13256_v7 = vunpack.i.l.bf16 %v13255_v21 }
 0x3d3   :  { %1844 = vmatpush.bf16.msrb.mxu3 %v1610_v60  ;;  %v1641_v20 = vpack.c.bf16 %v1565_v53, %v1564_v17  ;;  %v13257_v1 = vunpack.i.l.bf16 %v9372_v5  ;;  %v13259_v60 = vunpack.i.h.bf16 %v9372_v5  ;;  %v13265_v5 = vpack.c.bf16 %v9245_v37, %v9239_v43 }
 0x3d4   :  { %1826 = vmatmul.bf16.vlgmr.msrb.gmra.mxu2 %v9202_v39  ;;  %v1575_v14 = vsel %vm178_vm0, %v6421_v33, %v13252_v25  ;;  %v1562_v30 = vsel %vm178_vm0, %v6395_v34, %v6420_v59  ;;  %v1563_v18 = vsel %vm178_vm0, %v6396_v16, %v6421_v33  ;;  %v1574_v44 = vsel %vm178_vm0, %v6420_v59, %v13253_v29 }
 0x3d5   :  { %1894 = vmatpush.bf16.msra.mxu2 %v1639_v55  ;;  %v13250_v55 = vunpack.i.h.bf16 %v13246_v9  ;;  %v1646_v57 = vpack.c.bf16 %v1563_v18, %v1562_v30  ;;  %v1647_v38 = vpack.c.bf16 %v1575_v14, %v1574_v44  ;;  %1806 = vmatpush.bf16.msrb.mxu1 %v1641_v20  ;;  %v1560_v34 = vsel %vm178_vm0, %v6415_v40, %v6425_v62  ;;  %v13279_v20 = vld [vmem:[#allocation16_spill] sm:$0xff] }
 0x3d6   :  { %1845 = vmatmul.bf16.vlgmr.msrb.gmra.mxu3 %v9322_v41  ;;  %v13254_v16 = vunpack.i.h.bf16 %v9581_v0  ;;  %v1332_v33 = vsel %vm113_vm8, %v13257_v1, %v13256_v7  ;;  %v13258_v59 = vunpack.i.h.bf16 %v13255_v21  ;;  %v13260_v0 = vld [vmem:[#allocation23_spill] sm:$0xff]  ;;  %v13266_v53 = vunpack.i.l.bf16 %v8806_v19 }
 0x3d7   :  { %v1479_v4 = vsel %vm152_vm1, %v13251_v15, %v13250_v55  ;;  %1862 = vmatpush.bf16.msra.mxu0 %v1646_v57  ;;  %1919 = vmatpush.bf16.msra.mxu3 %v1647_v38  ;;  %v13261_v40 = vunpack.i.l.bf16 %v13260_v0  ;;  %v13263_v2 = vunpack.i.h.bf16 %v13260_v0  ;;  %v13267_v55 = vunpack.i.l.bf16 %v9429_v46 }
 0x3d8   :  { %v1631_v56 = vpack.c.bf16 %v1479_v4, %v1478_v47  ;;  %v1561_v52 = vsel %vm178_vm0, %v6416_v28, %v13254_v16  ;;  %v1333_v62 = vsel %vm113_vm8, %v13259_v60, %v13258_v59  ;;  %v13262_v28 = vunpack.i.l.bf16 %v9517_v26  ;;  %4948 = vmatmul.msk.bf16.vlgmr.msrb.gmra.mxu1 %vm895_vm3, %v9125_v13  ;;  %v13270_v4 = vld [vmem:[#allocation19_spill] sm:$0xff] }
 0x3d9   :  { %1895 = vmatpush.bf16.msra.mxu2 %v1635_v63  ;;  %v13264_v47 = vunpack.i.h.bf16 %v9517_v26  ;;  %1875 = vmatpush.bf16.msra.mxu1 %v13265_v5  ;;  %v1642_v24 = vpack.c.bf16 %v1561_v52, %v1560_v34  ;;  %v1603_v17 = vpack.c.bf16 %v1333_v62, %v1332_v33  ;;  %v1286_v26 = vsel %vm100_vm6, %v13267_v55, %v13266_v53 }
 0x3da   :  { %v1476_v9 = vsel %vm152_vm1, %v13262_v28, %v13261_v40  ;;  %v13268_v43 = vunpack.i.h.bf16 %v8806_v19  ;;  %v13269_v37 = vunpack.i.h.bf16 %v9429_v46  ;;  %v13271_v25 = vunpack.i.l.bf16 %v13270_v4 }
 0x3db   :  { %v1477_v63 = vsel %vm152_vm1, %v13264_v47, %v13263_v2  ;;  %1863 = vmatpush.bf16.msra.mxu0 %v1642_v24  ;;  %1920 = vmatpush.bf16.msra.mxu3 %v1643_v58  ;;  %v13272_v14 = vunpack.i.l.bf16 %v9579_v22  ;;  %v13273_v18 = vunpack.i.h.bf16 %v13270_v4  ;;  %v13274_v29 = vunpack.i.h.bf16 %v9579_v22  ;;  %v13296_v24 = vld [vmem:[#allocation21_spill] sm:$0xff] }
 0x3dc   :  { %v1627_v36 = vpack.c.bf16 %v1477_v63, %v1476_v9  ;;  %v1287_v15 = vsel %vm100_vm6, %v13269_v37, %v13268_v43  ;;  %v1284_v44 = vsel %vm100_vm6, %v13276_v23, %v13275_v3  ;;  %v13277_v57 = vunpack.i.h.bf16 %v8753_v45 }
 0x3dd   :  { %1896 = vmatpush.bf16.msra.mxu2 %v1631_v56  ;;  %v1430_v30 = vsel %vm139_vm4, %v13272_v14, %v13271_v25  ;;  %v1431_v58 = vsel %vm139_vm4, %v13274_v29, %v13273_v18  ;;  %1876 = vmatpush.bf16.msra.mxu1 %v1603_v17  ;;  %v1599_v19 = vpack.c.bf16 %v1287_v15, %v1286_v26  ;;  %v13278_v22 = vunpack.i.h.bf16 %v9498_v32  ;;  %v13298_v17 = vld [vmem:[#allocation15_spill] sm:$0xff]  ;;  %v9900_v26 = vpop.permute.xlu2 %1650 }
 0x3de   :  { %4950 = vmatmul.msk.bf16.vlgmr.msra.gmra.mxu0 %vm895_vm3, %v9125_v13  ;;  %v1623_v46 = vpack.c.bf16 %v1431_v58, %v1430_v30  ;;  %v13280_v56 = vunpack.i.l.bf16 %v13279_v20  ;;  %v13281_v34 = vunpack.i.l.bf16 %v9411_v54  ;;  %v13282_v52 = vunpack.i.h.bf16 %v13279_v20 }
 0x3df   :  { %v1285_v38 = vsel %vm100_vm6, %v13278_v22, %v13277_v57  ;;  %v13283_v21 = vunpack.i.h.bf16 %v9411_v54  ;;  %v13284_v1 = vunpack.i.l.bf16 %v8810_v50  ;;  %v13285_v33 = vunpack.i.l.bf16 %v9356_v27  ;;  %v3876_v57 = vld [vmem:[%s12605_s6 + $0x10] sm:$0xff] }
 0x3e0   :  { %v1428_v16 = vsel %vm139_vm4, %v13281_v34, %v13280_v56  ;;  %v1595_v45 = vpack.c.bf16 %v1285_v38, %v1284_v44  ;;  %v13286_v60 = vunpack.i.h.bf16 %v8810_v50  ;;  %v13287_v54 = vunpack.i.h.bf16 %v9356_v27  ;;  %v9918_v56 = vpop.permute.xlu1 %1665 }
 0x3e1   :  { %1897 = vmatpush.bf16.msra.mxu2 %v1627_v36  ;;  %v1429_v7 = vsel %vm139_vm4, %v13283_v21, %v13282_v52  ;;  %1877 = vmatpush.bf16.msra.mxu1 %v1599_v19  ;;  %v1238_v59 = vsel %vm87_vm7, %v13285_v33, %v13284_v1  ;;  %v13288_v0 = vunpack.i.l.bf16 %v8844_v61  ;;  %v13289_v28 = vunpack.i.h.bf16 %v8844_v61  ;;  %v13299_v36 = vld [vmem:[#allocation25_spill] sm:$0xff] }
 0x3e2   :  { %v1619_v32 = vpack.c.bf16 %v1429_v7, %v1428_v16  ;;  %v1239_v62 = vsel %vm87_vm7, %v13287_v54, %v13286_v60  ;;  %v13290_v2 = vunpack.i.l.bf16 %v8783_v42  ;;  %v13291_v47 = vunpack.i.l.bf16 %v9587_v51 }
 0x3e3   :  { %v1382_v40 = vsel %vm126_vm5, %v6410_v48, %v13288_v0  ;;  %v1383_v9 = vsel %vm126_vm5, %v6411_v35, %v13289_v28  ;;  %v1591_v50 = vpack.c.bf16 %v1239_v62, %v1238_v59  ;;  %v13292_v61 = vunpack.i.h.bf16 %v8783_v42  ;;  %v13295_v42 = vld [vmem:[#allocation24_spill] sm:$0xff] }
 0x3e4   :  { %1831 = vmatmul.bf16.gmra.mxu2 %v9375_v12  ;;  %v1615_v27 = vpack.c.bf16 %v1383_v9, %v1382_v40  ;;  %v1236_v48 = vsel %vm87_vm7, %v13291_v47, %v13290_v2  ;;  %v13293_v31 = vunpack.i.h.bf16 %v9587_v51  ;;  %v13294_v5 = vpack.c.bf16 %v9575_v49, %v9567_v6  ;;  %v9898_v49 = vpop.permute.xlu0 %1660 }
 0x3e5   :  { %1898 = vmatpush.bf16.msra.mxu2 %v1623_v46  ;;  %1878 = vmatpush.bf16.msra.mxu1 %v1595_v45  ;;  %v13297_v51 = vpack.c.bf16 %v13295_v42, %v13296_v24  ;;  %v13300_v53 = vpack.c.bf16 %v13298_v17, %v13299_v36 }
 0x3e6   :  { %1850 = vmatmul.bf16.gmra.mxu3 %v9470_v8  ;;  %v1237_v35 = vsel %vm87_vm7, %v13293_v31, %v13292_v61 }
 0x3e7   :  { %v1587_v63 = vpack.c.bf16 %v1237_v35, %v1236_v48 }
 0x3e8   :  { %4949 = vmatmul.msk.bf16.gmra.mxu1 %vm895_vm3, %v9193_v11 }
 0x3e9   :  { %1899 = vmatpush.bf16.msra.mxu2 %v1619_v32  ;;  %1879 = vmatpush.bf16.msra.mxu1 %v1591_v50 }
 0x3ed   :  { %1900 = vmatpush.bf16.msra.mxu2 %v1615_v27  ;;  %1880 = vmatpush.bf16.msra.mxu1 %v1587_v63 }
 0x3ee   :  { %4951 = vmatmul.msk.bf16.gmra.mxu0 %vm895_vm3, %v9193_v11 }
 0x3f1   :  { %1901 = vmatpush.bf16.msra.mxu2 %v13294_v5  ;;  %1881 = vmatpush.bf16.msra.mxu1 %v13297_v51 }
 0x3f4   :  { %1902 = vmatmul.bf16.vlgmr.msra.gmra.mxu2 %v9322_v41 }
 0x3f5   :  { %1882 = vmatpush.bf16.msra.mxu1 %v13300_v53 }
 0x3f6   :  { %4952 = vmatmul.msk.bf16.vlgmr.msra.gmra.mxu3 %vm895_vm3, %v9125_v13 }
 0x3f8   :  { %1883 = vmatmul.bf16.vlgmr.msra.gmra.mxu1 %v9202_v39  ;;  %v9903_v39 = vpop.permute.xlu0 %1655 }
 0x404   :  { %1907 = vmatmul.bf16.gmra.mxu2 %v9470_v8 }
 0x406   :  { %4953 = vmatmul.msk.bf16.gmra.mxu3 %vm895_vm3, %v9193_v11 }
 0x408   :  { %1888 = vmatmul.bf16.gmra.mxu1 %v9375_v12 }
 0x40c   :  { %v1751_v55 = vpop.f32.mrf.mxu2 }
 0x414   :  { %v1753_v8 = vpop.f32.mrf.mxu2 }
 0x41a   :  { %v1713_v6 = vpop.f32.mrf.mxu0 }
 0x41b   :  { %v1714_v37 = vadd.f32 %v1713_v6, %v9900_v26 }
 0x41c   :  { %v1756_v3 = vpop.f32.mrf.mxu2 }
 0x422   :  { %v1715_v41 = vpop.f32.mrf.mxu0 }
 0x423   :  { %v1716_v4 = vadd.f32 %v1715_v41, %v9903_v39 }
 0x424   :  { %v1758_v7 = vpop.f32.mrf.mxu2 }
 0x425   :  { %v1732_v43 = vpop.f32.mrf.mxu1 }
 0x426   :  { %v1733_v13 = vadd.f32 %v1732_v43, %v1714_v37 }
 0x428   :  { %v1752_v11 = vadd.f32 %v1751_v55, %v1733_v13 }
 0x42a   :  { %v1718_v15 = vpop.f32.mrf.mxu0  ;;  %v1948_v14 = vmul.f32 0.2, %v1752_v11  ;;  %vm1932_vm13 = vcmp.ge.f32.partialorder %v1752_v11, 0.0 }
 0x42b   :  { %v1719_v44 = vadd.f32 %v1718_v15, %v9898_v49 }
 0x42c   :  { %v9906_v58 = vsel %vm1932_vm13, %v1752_v11, %v1948_v14 }
 0x42d   :  { %v1734_v25 = vpop.f32.mrf.mxu1 }
 0x42e   :  { %v1735_v12 = vadd.f32 %v1734_v25, %v1716_v4 }
 0x430   :  { %v1754_v30 = vadd.f32 %v1753_v8, %v1735_v12 }
 0x432   :  { %v1720_v18 = vpop.f32.mrf.mxu0  ;;  %vm1936_vm14 = vcmp.ge.f32.partialorder %v1754_v30, 0.0  ;;  %v1952_v29 = vmul.f32 0.2, %v1754_v30 }
 0x433   :  { %v1721_v34 = vadd.f32 %v1720_v18, %v9918_v56 }
 0x434   :  { %v9908_v19 = vsel %vm1936_vm14, %v1754_v30, %v1952_v29 }
 0x435   :  { %v1737_v46 = vpop.f32.mrf.mxu1  ;;  %v6442_v23 = vpack.i.bf16 %v9908_v19, %v9906_v58 }
 0x436   :  { %v1738_v22 = vadd.f32 %v1737_v46, %v1719_v44 }
 0x437   :  { %6443 = vrot.lane.b32.xlu1 %v6442_v23, %s7121_s12  ;;  %6433 = vrot.lane.b32.xlu0 %v6442_v23, %s7123_s26 }
 0x438   :  { %6428 = vrot.lane.b32.xlu2 %v6442_v23, %s7127_s29  ;;  %v1757_v16 = vadd.f32 %v1756_v3, %v1738_v22 }
 0x439   :  { %v1770_v38 = vpop.f32.mrf.mxu3 }
 0x43a   :  { %v1789_v20 = vpop.f32.mrf.mxu0  ;;  %v1956_v45 = vmul.f32 0.2, %v1757_v16  ;;  %vm1940_vm15 = vcmp.ge.f32.partialorder %v1757_v16, 0.0  ;;  %v1771_v2 = vadd.f32 %v1770_v38, %v9900_v26 }
 0x43c   :  { %v9924_v60 = vsel %vm1940_vm15, %v1757_v16, %v1956_v45  ;;  %v1790_v48 = vadd.f32 %v1789_v20, %v1771_v2 }
 0x43d   :  { %v1739_v52 = vpop.f32.mrf.mxu1 }
 0x43e   :  { %v1740_v21 = vadd.f32 %v1739_v52, %v1721_v34 }
 0x43f   :  { %6448 = vrot.lane.b32.xlu1 %v6442_v23, %s7128_s30  ;;  %6438 = vrot.lane.b32.xlu0 %v6442_v23, %s7126_s0 }
 0x440   :  { %v1759_v32 = vadd.f32 %v1758_v7, %v1740_v21  ;;  %6453 = vrot.lane.b32.xlu2 %v6442_v23, %s7125_s28 }
 0x441   :  { %v1772_v1 = vpop.f32.mrf.mxu3 }
 0x442   :  { %v1791_v33 = vpop.f32.mrf.mxu0  ;;  %vm1944_vm9 = vcmp.ge.f32.partialorder %v1759_v32, 0.0  ;;  %v1960_v59 = vmul.f32 0.2, %v1759_v32  ;;  %v1773_v61 = vadd.f32 %v1772_v1, %v9903_v39 }
 0x444   :  { %v9926_v54 = vsel %vm1944_vm9, %v1759_v32, %v1960_v59  ;;  %v1792_v24 = vadd.f32 %v1791_v33, %v1773_v61 }
 0x445   :  { %v6472_v62 = vpack.i.bf16 %v9926_v54, %v9924_v60 }
 0x447   :  { %6473 = vrot.lane.b32.xlu1 %v6472_v62, %s7123_s26  ;;  %6468 = vrot.lane.b32.xlu0 %v6472_v62, %s7127_s29 }
 0x448   :  { %6458 = vrot.lane.b32.xlu2 %v6442_v23, %s7122_s21 }
 0x449   :  { %v1775_v40 = vpop.f32.mrf.mxu3 }
 0x44a   :  { %v1794_v28 = vpop.f32.mrf.mxu0  ;;  %v1776_v12 = vadd.f32 %v1775_v40, %v9898_v49 }
 0x44c   :  { %v1795_v3 = vadd.f32 %v1794_v28, %v1776_v12 }
 0x44f   :  { %6478 = vrot.lane.b32.xlu1 %v6472_v62, %s7126_s0  ;;  %6493 = vrot.lane.b32.xlu0 %v6472_v62, %s7125_s28 }
 0x450   :  { %6463 = vrot.lane.b32.xlu2 %v6442_v23, %s7124_s27 }
 0x451   :  { %v1777_v9 = vpop.f32.mrf.mxu3 }
 0x452   :  { %v1796_v50 = vpop.f32.mrf.mxu0  ;;  %v1778_v23 = vadd.f32 %v1777_v9, %v9918_v56 }
 0x454   :  { %v1797_v7 = vadd.f32 %v1796_v50, %v1778_v23 }
 0x455   :  { %v1808_v47 = vpop.f32.mrf.mxu1 }
 0x456   :  { %v1809_v35 = vadd.f32 %v1808_v47, %v1790_v48 }
 0x457   :  { %v1827_v27 = vpop.f32.mrf.mxu2  ;;  %6498 = vrot.lane.b32.xlu1 %v6472_v62, %s7122_s21  ;;  %6503 = vrot.lane.b32.xlu0 %v6472_v62, %s7124_s27 }
 0x458   :  { %6483 = vrot.lane.b32.xlu2 %v6472_v62, %s7121_s12  ;;  %v1828_v5 = vadd.f32 %v1827_v27, %v9900_v26  ;;  %v1949_v36 = vmul.f32 0.2, %v1809_v35  ;;  %vm1933_vm10 = vcmp.ge.f32.partialorder %v1809_v35, 0.0 }
 0x459   :  { %v1846_v31 = vpop.f32.mrf.mxu3 }
 0x45a   :  { %v1847_v51 = vadd.f32 %v1846_v31, %v1828_v5  ;;  %v9946_v13 = vsel %vm1933_vm10, %v1809_v35, %v1949_v36 }
 0x45b   :  { %v1865_v63 = vpop.f32.mrf.mxu0 }
 0x45c   :  { %v1866_v43 = vadd.f32 %v1865_v63, %v1847_v51 }
 0x45d   :  { %v1810_v17 = vpop.f32.mrf.mxu1 }
 0x45e   :  { %v1811_v53 = vadd.f32 %v1810_v17, %v1792_v24  ;;  %v1950_v14 = vmul.f32 0.2, %v1866_v43  ;;  %vm1934_vm13 = vcmp.ge.f32.partialorder %v1866_v43, 0.0 }
 0x45f   :  { %v1829_v42 = vpop.f32.mrf.mxu2 }
 0x460   :  { %v1830_v6 = vadd.f32 %v1829_v42, %v9903_v39  ;;  %6488 = vrot.lane.b32.xlu2 %v6472_v62, %s7128_s30  ;;  %vm1937_vm11 = vcmp.ge.f32.partialorder %v1811_v53, 0.0  ;;  %v1953_v41 = vmul.f32 0.2, %v1811_v53  ;;  %v9961_v22 = vsel %vm1934_vm13, %v1866_v43, %v1950_v14 }
 0x461   :  { %v1848_v55 = vpop.f32.mrf.mxu3  ;;  %13302 = vst [vmem:[#allocation17_spill] sm:$0xff] %v9961_v22 }
 0x462   :  { %v1849_v37 = vadd.f32 %v1848_v55, %v1830_v6  ;;  %v9948_v15 = vsel %vm1937_vm11, %v1811_v53, %v1953_v41 }
 0x463   :  { %v1867_v8 = vpop.f32.mrf.mxu0  ;;  %v6512_v25 = vpack.i.bf16 %v9948_v15, %v9946_v13 }
 0x464   :  { %v1868_v4 = vadd.f32 %v1867_v8, %v1849_v37 }
 0x465   :  { %v1813_v18 = vpop.f32.mrf.mxu1  ;;  %6513 = vrot.lane.b32.xlu1 %v6512_v25, %s7123_s26  ;;  %6508 = vrot.lane.b32.xlu0 %v6512_v25, %s7127_s29 }
 0x466   :  { %vm1938_vm12 = vcmp.ge.f32.partialorder %v1868_v4, 0.0  ;;  %v1954_v30 = vmul.f32 0.2, %v1868_v4  ;;  %v1814_v20 = vadd.f32 %v1813_v18, %v1795_v3 }
 0x467   :  { %v1832_v11 = vpop.f32.mrf.mxu2 }
 0x468   :  { %v9957_v46 = vsel %vm1938_vm12, %v1868_v4, %v1954_v30  ;;  %6523 = vrot.lane.b32.xlu2 %v6512_v25, %s7121_s12  ;;  %v1833_v38 = vadd.f32 %v1832_v11, %v9898_v49  ;;  %v1957_v1 = vmul.f32 0.2, %v1814_v20  ;;  %vm1941_vm14 = vcmp.ge.f32.partialorder %v1814_v20, 0.0 }
 0x469   :  { %13301 = vst [vmem:[#allocation20_spill] sm:$0xff] %v9957_v46  ;;  %v1851_v44 = vpop.f32.mrf.mxu3  ;;  %v9966_v16 = vpack.i.bf16 %v9957_v46, %v9961_v22 }
 0x46a   :  { %v1852_v45 = vadd.f32 %v1851_v44, %v1833_v38  ;;  %v9974_v27 = vsel %vm1941_vm14, %v1814_v20, %v1957_v1 }
 0x46b   :  { %v1870_v34 = vpop.f32.mrf.mxu0 }
 0x46c   :  { %v1871_v62 = vadd.f32 %v1870_v34, %v1852_v45 }
 0x46d   :  { %v1815_v32 = vpop.f32.mrf.mxu1  ;;  %6518 = vrot.lane.b32.xlu1 %v6512_v25, %s7126_s0  ;;  %6533 = vrot.lane.b32.xlu0 %v6512_v25, %s7125_s28 }
 0x46e   :  { %v1816_v33 = vadd.f32 %v1815_v32, %v1797_v7  ;;  %v1958_v31 = vmul.f32 0.2, %v1871_v62  ;;  %vm1942_vm10 = vcmp.ge.f32.partialorder %v1871_v62, 0.0 }
 0x46f   :  { %v1834_v52 = vpop.f32.mrf.mxu2 }
 0x470   :  { %v1835_v59 = vadd.f32 %v1834_v52, %v9918_v56  ;;  %6528 = vrot.lane.b32.xlu2 %v6512_v25, %s7128_s30  ;;  %vm1945_vm15 = vcmp.ge.f32.partialorder %v1816_v33, 0.0  ;;  %v1961_v40 = vmul.f32 0.2, %v1816_v33  ;;  %v9988_v17 = vsel %vm1942_vm10, %v1871_v62, %v1958_v31 }
 0x471   :  { %v1853_v28 = vpop.f32.mrf.mxu3 }
 0x472   :  { %v1854_v9 = vadd.f32 %v1853_v28, %v1835_v59  ;;  %v9976_v50 = vsel %vm1945_vm15, %v1816_v33, %v1961_v40  ;;  %v4963_v28 = vld [vmem:[%s12603_s4 + $0x48] sm:$0xff] }
 0x473   :  { %v1872_v2 = vpop.f32.mrf.mxu0  ;;  %v6547_v48 = vpack.i.bf16 %v9976_v50, %v9974_v27 }
 0x474   :  { %v1873_v47 = vadd.f32 %v1872_v2, %v1854_v9 }
 0x475   :  { %v1884_v63 = vpop.f32.mrf.mxu1  ;;  %6548 = vrot.lane.b32.xlu1 %v6547_v48, %s7127_s29  ;;  %6538 = vrot.lane.b32.xlu0 %v6512_v25, %s7122_s21 }
 0x476   :  { %vm1946_vm9 = vcmp.ge.f32.partialorder %v1873_v47, 0.0  ;;  %v1962_v35 = vmul.f32 0.2, %v1873_v47  ;;  %v1885_v24 = vadd.f32 %v1884_v63, %v9900_v26 }
 0x477   :  { %v1903_v61 = vpop.f32.mrf.mxu2 }
 0x478   :  { %v9984_v42 = vsel %vm1946_vm9, %v1873_v47, %v1962_v35  ;;  %6553 = vrot.lane.b32.xlu2 %v6547_v48, %s7123_s26  ;;  %v1904_v6 = vadd.f32 %v1903_v61, %v1885_v24 }
 0x479   :  { %v1922_v51 = vpop.f32.mrf.mxu3 }
 0x47a   :  { %v1923_v43 = vadd.f32 %v1922_v51, %v1904_v6 }
 0x47c   :  { %v1951_v11 = vmul.f32 0.2, %v1923_v43  ;;  %vm1935_vm12 = vcmp.ge.f32.partialorder %v1923_v43, 0.0 }
 0x47d   :  { %v1886_v41 = vpop.f32.mrf.mxu1  ;;  %6573 = vrot.lane.b32.xlu1 %v6547_v48, %s7125_s28  ;;  %6543 = vrot.lane.b32.xlu0 %v6512_v25, %s7124_s27 }
 0x47e   :  { %v1887_v55 = vadd.f32 %v1886_v41, %v9903_v39  ;;  %v10001_v39 = vsel %vm1935_vm12, %v1923_v43, %v1951_v11 }
 0x47f   :  { %v1905_v53 = vpop.f32.mrf.mxu2  ;;  %13304 = vst [vmem:[#allocation18_spill] sm:$0xff] %v10001_v39 }
 0x480   :  { %6558 = vrot.lane.b32.xlu2 %v6547_v48, %s7126_s0  ;;  %v1906_v37 = vadd.f32 %v1905_v53, %v1887_v55 }
 0x481   :  { %v1924_v26 = vpop.f32.mrf.mxu3 }
 0x482   :  { %v1925_v8 = vadd.f32 %v1924_v26, %v1906_v37 }
 0x484   :  { %vm1939_vm11 = vcmp.ge.f32.partialorder %v1925_v8, 0.0  ;;  %v1955_v12 = vmul.f32 0.2, %v1925_v8 }
 0x485   :  { %v1889_v14 = vpop.f32.mrf.mxu1  ;;  %6583 = vrot.lane.b32.xlu1 %v6547_v48, %s7124_s27  ;;  %6563 = vrot.lane.b32.xlu0 %v6547_v48, %s7121_s12 }
 0x486   :  { %v9998_v30 = vsel %vm1939_vm11, %v1925_v8, %v1955_v12  ;;  %v1890_v25 = vadd.f32 %v1889_v14, %v9898_v49 }
 0x487   :  { %v1908_v4 = vpop.f32.mrf.mxu2  ;;  %13303 = vst [vmem:[#allocation22_spill] sm:$0xff] %v9998_v30  ;;  %v10006_v3 = vpack.i.bf16 %v9998_v30, %v10001_v39 }
 0x488   :  { %6578 = vrot.lane.b32.xlu2 %v6547_v48, %s7122_s21  ;;  %v1909_v44 = vadd.f32 %v1908_v4, %v1890_v25 }
 0x489   :  { %v1927_v18 = vpop.f32.mrf.mxu3 }
 0x48a   :  { %v1928_v49 = vadd.f32 %v1927_v18, %v1909_v44 }
 0x48c   :  { %v1959_v1 = vmul.f32 0.2, %v1928_v49  ;;  %vm1943_vm14 = vcmp.ge.f32.partialorder %v1928_v49, 0.0 }
 0x48d   :  { %v1891_v38 = vpop.f32.mrf.mxu1  ;;  %6588 = vrot.lane.b32.xlu1 %v9966_v16, %s7127_s29  ;;  %6568 = vrot.lane.b32.xlu0 %v6547_v48, %s7128_s30 }
 0x48e   :  { %v1892_v34 = vadd.f32 %v1891_v38, %v9918_v56  ;;  %v6612_v56 = vpack.i.bf16 %v9984_v42, %v9988_v17  ;;  %v10027_v62 = vsel %vm1943_vm14, %v1928_v49, %v1959_v1 }
 0x48f   :  { %v1910_v20 = vpop.f32.mrf.mxu2  ;;  %13305 = vst [vmem:[#allocation23_spill] sm:$0xff] %v10027_v62 }
 0x490   :  { %6593 = vrot.lane.b32.xlu2 %v9966_v16, %s7126_s0  ;;  %v1911_v52 = vadd.f32 %v1910_v20, %v1892_v34 }
 0x491   :  { %v1929_v7 = vpop.f32.mrf.mxu3 }
 0x492   :  { %v10016_v45 = vpop.permute.xlu2 %6428  ;;  %v1930_v32 = vadd.f32 %v1929_v7, %v1911_v52 }
 0x493   :  { %v12831_v0 = vunpack.i.l.bf16 %v10016_v45 }
 0x494   :  { %vm1947_vm13 = vcmp.ge.f32.partialorder %v1930_v32, 0.0  ;;  %v1963_v33 = vmul.f32 0.2, %v1930_v32 }
 0x495   :  { %6603 = vrot.lane.b32.xlu1 %v9966_v16, %s7123_s26  ;;  %6598 = vrot.lane.b32.xlu0 %v9966_v16, %s7128_s30 }
 0x496   :  { %v10024_v59 = vsel %vm1947_vm13, %v1930_v32, %v1963_v33 }
 0x497   :  { %v6682_v63 = vpack.i.bf16 %v10024_v59, %v10027_v62 }
 0x498   :  { %6613 = vrot.lane.b32.xlu2 %v6612_v56, %s7127_s29 }
 0x49a   :  { %v10029_v40 = vpop.permute.xlu2 %6453 }
 0x49b   :  { %v13330_v22 = vunpack.i.l.bf16 %v10029_v40 }
 0x49d   :  { %6608 = vrot.lane.b32.xlu1 %v9966_v16, %s7121_s12  ;;  %6618 = vrot.lane.b32.xlu0 %v6612_v56, %s7126_s0 }
 0x4a0   :  { %6643 = vrot.lane.b32.xlu2 %v10006_v3, %s7123_s26 }
 0x4a2   :  { %v10038_v9 = vpop.permute.xlu2 %6458 }
 0x4a3   :  { %13306 = vst [vmem:[#allocation19_spill] sm:$0xff] %v10038_v9 }
 0x4a5   :  { %6623 = vrot.lane.b32.xlu1 %v6612_v56, %s7128_s30  ;;  %6638 = vrot.lane.b32.xlu0 %v10006_v3, %s7127_s29 }
 0x4a8   :  { %6653 = vrot.lane.b32.xlu2 %v10006_v3, %s7121_s12 }
 0x4a9   :  { %v10045_v2 = vpop.permute.xlu1 %6443  ;;  %v10047_v47 = vpop.permute.xlu0 %6433 }
 0x4aa   :  { %v10049_v48 = vpop.permute.xlu2 %6463  ;;  %v12825_v34 = vunpack.i.h.bf16 %v10047_v47  ;;  %v12826_v49 = vunpack.i.l.bf16 %v10047_v47 }
 0x4ab   :  { %13307 = vst [vmem:[#allocation16_spill] sm:$0xff] %v10049_v48 }
 0x4ad   :  { %6628 = vrot.lane.b32.xlu1 %v6612_v56, %s7123_s26  ;;  %6648 = vrot.lane.b32.xlu0 %v10006_v3, %s7126_s0 }
 0x4b0   :  { %6678 = vrot.lane.b32.xlu2 %v10006_v3, %s7125_s28 }
 0x4b1   :  { %v10056_v61 = vpop.permute.xlu1 %6448  ;;  %v10058_v31 = vpop.permute.xlu0 %6438 }
 0x4b2   :  { %v10060_v35 = vpop.permute.xlu2 %6483 }
 0x4b5   :  { %6633 = vrot.lane.b32.xlu1 %v6612_v56, %s7121_s12  ;;  %6668 = vrot.lane.b32.xlu0 %v10006_v3, %s7128_s30 }
 0x4b8   :  { %6683 = vrot.lane.b32.xlu2 %v6682_v63, %s7123_s26 }
 0x4b9   :  { %v10070_v51 = vpop.permute.xlu1 %6473  ;;  %v10072_v53 = vpop.permute.xlu0 %6468 }
 0x4ba   :  { %v10068_v24 = vpop.permute.xlu2 %6488  ;;  %v12820_v4 = vunpack.i.h.bf16 %v10070_v51  ;;  %v12819_v11 = vunpack.i.l.bf16 %v10070_v51  ;;  %v12823_v29 = vunpack.i.h.bf16 %v10072_v53 }
 0x4bd   :  { %6658 = vrot.lane.b32.xlu1 %v6682_v63, %s7127_s29  ;;  %6688 = vrot.lane.b32.xlu0 %v6682_v63, %s7126_s0 }
 0x4c0   :  { %6693 = vrot.lane.b32.xlu2 %v6682_v63, %s7121_s12 }
 0x4c1   :  { %v10079_v41 = vpop.permute.xlu1 %6478  ;;  %v10081_v55 = vpop.permute.xlu0 %6493 }
 0x4c2   :  { %v10077_v6 = vpop.permute.xlu2 %6523 }
 0x4c5   :  { %6663 = vrot.lane.b32.xlu1 %v6612_v56, %s7125_s28  ;;  %6698 = vrot.lane.b32.xlu0 %v6682_v63, %s7128_s30 }
 0x4c8   :  { %6708 = vrot.lane.b32.xlu2 %v6682_v63, %s7125_s28 }
 0x4c9   :  { %v10091_v37 = vpop.permute.xlu1 %6498  ;;  %v10093_v26 = vpop.permute.xlu0 %6503 }
 0x4ca   :  { %v10086_v43 = vpop.permute.xlu2 %6528  ;;  %13308 = vst [vmem:[#allocation24_spill] sm:$0xff] %v10091_v37  ;;  %v12813_v23 = vunpack.i.h.bf16 %v10091_v37 }
 0x4cb   :  { %13309 = vst [vmem:[#allocation21_spill] sm:$0xff] %v10093_v26 }
 0x4cd   :  { %6673 = vrot.lane.b32.xlu1 %v9966_v16, %s7125_s28  ;;  %6703 = vrot.lane.b32.xlu0 %v6612_v56, %s7124_s27 }
 0x4d0   :  { %6713 = vrot.lane.b32.xlu2 %v6612_v56, %s7122_s21  ;;  %v4964_v56 = vld [vmem:[%s12603_s4 + $0x50] sm:$0xff] }
 0x4d2   :  { %v10096_v8 = vpop.permute.xlu2 %6553 }
 0x4d3   :  { %v12815_v12 = vunpack.i.h.bf16 %v10096_v8  ;;  %v12818_v14 = vunpack.i.l.bf16 %v10096_v8 }
 0x4d5   :  { %v2325_v25 = vsel %vm165_vm2, %v12820_v4, %v12815_v12  ;;  %v2324_v18 = vsel %vm165_vm2, %v12819_v11, %v12818_v14  ;;  %6723 = vrot.lane.b32.xlu1 %v6682_v63, %s7124_s27  ;;  %6718 = vrot.lane.b32.xlu0 %v9966_v16, %s7124_s27  ;;  %v12833_v4 = vunpack.i.h.bf16 %v10016_v45 }
 0x4d6   :  { %v2438_v44 = vpack.c.bf16 %v2325_v25, %v2324_v18 }
 0x4d7   :  { %v10117_v38 = vpop.permute.xlu1 %6513  ;;  %v10119_v20 = vpop.permute.xlu0 %6508 }
 0x4d8   :  { %6733 = vrot.lane.b32.xlu2 %v9966_v16, %s7122_s21  ;;  %2525 = vmatpush.bf16.msrb.mxu1 %v2438_v44  ;;  %v12821_v52 = vunpack.i.h.bf16 %v10117_v38  ;;  %v12824_v7 = vunpack.i.l.bf16 %v10117_v38 }
 0x4da   :  { %v10127_v32 = vpop.permute.xlu2 %6558  ;;  %v2322_v1 = vsel %vm165_vm2, %v12826_v49, %v12824_v7  ;;  %v2323_v16 = vsel %vm165_vm2, %v12825_v34, %v12821_v52  ;;  %v7067_v7 = vld [vmem:[#allocation3] ss:$0 sm:$0xff] }
 0x4db   :  { %v2434_v33 = vpack.c.bf16 %v2323_v16, %v2322_v1  ;;  %v12816_v1 = vunpack.i.l.bf16 %v10091_v37  ;;  %v12836_v49 = vunpack.i.h.bf16 %v10127_v32 }
 0x4dd   :  { %6728 = vrot.lane.b32.xlu1 %v10006_v3, %s7124_s27  ;;  %6738 = vrot.lane.b32.xlu0 %v6682_v63, %s7122_s21  ;;  %v4965_v63 = vld [vmem:[%s12603_s4 + $0x58] sm:$0xff] }
 0x4de   :  { %2526 = vmatpush.bf16.msrb.mxu1 %v2434_v33 }
 0x4df   :  { %v10147_v25 = vpop.permute.xlu1 %6518  ;;  %v10149_v18 = vpop.permute.xlu0 %6533 }
 0x4e0   :  { %2462 = vperm.xlu2 %5785, %v4964_v56  }
 0x4e2   :  { %v10151_v44 = vpop.permute.xlu2 %6578 }
 0x4e3   :  { %v12814_v16 = vunpack.i.h.bf16 %v10151_v44  ;;  %v12817_v21 = vunpack.i.l.bf16 %v10151_v44 }
 0x4e5   :  { %v2373_v33 = vsel %vm178_vm0, %v12813_v23, %v12814_v16  ;;  %v2372_v56 = vsel %vm178_vm0, %v12816_v1, %v12817_v21  ;;  %6743 = vrot.lane.b32.xlu1 %v10006_v3, %s7122_s21  ;;  %2467 = vperm.xlu0 %5786, %v4965_v63   ;;  %v12822_v23 = vunpack.i.l.bf16 %v10072_v53  ;;  %v12828_v3 = vunpack.i.l.bf16 %v10038_v9 }
 0x4e6   :  { %v2446_v36 = vpack.c.bf16 %v2373_v33, %v2372_v56  ;;  %v12827_v33 = vunpack.i.h.bf16 %v10038_v9  ;;  %v12837_v63 = vunpack.i.h.bf16 %v10119_v20  ;;  %v12838_v56 = vunpack.i.l.bf16 %v10119_v20 }
 0x4e7   :  { %v6549_v16 = vpop.permute.xlu1 %6548  ;;  %v10179_v5 = vpop.permute.xlu0 %6538  ;;  %v13314_v9 = vunpack.i.h.bf16 %v10045_v2 }
 0x4e8   :  { %2457 = vperm.xlu2 %5785, %v4963_v28   ;;  %2550 = vmatpush.bf16.msrb.mxu2 %v2446_v36  ;;  %v6551_v12 = vunpack.i.h.bf16 %v6549_v16  ;;  %v6550_v1 = vunpack.i.l.bf16 %v6549_v16  ;;  %v12829_v21 = vunpack.i.h.bf16 %v10179_v5  ;;  %v12830_v14 = vunpack.i.l.bf16 %v10179_v5  ;;  %v4962_v16 = vld [vmem:[%s12603_s4 + $0x40] sm:$0xff] }
 0x4ea   :  { %v10187_v11 = vpop.permute.xlu2 %6593  ;;  %v2132_v36 = vsel %vm113_vm8, %v12822_v23, %v6550_v1  ;;  %v2133_v28 = vsel %vm113_vm8, %v12823_v29, %v6551_v12  ;;  %v2370_v23 = vsel %vm178_vm0, %v12828_v3, %v12830_v14  ;;  %v2371_v29 = vsel %vm178_vm0, %v12827_v33, %v12829_v21 }
 0x4eb   :  { %v2406_v52 = vpack.c.bf16 %v2133_v28, %v2132_v36  ;;  %v2442_v34 = vpack.c.bf16 %v2371_v29, %v2370_v23  ;;  %v12834_v36 = vunpack.i.l.bf16 %v10127_v32  ;;  %v2130_v28 = vsel %vm113_vm8, %v12831_v0, %v12838_v56 }
 0x4ec   :  { %v2131_v29 = vsel %vm113_vm8, %v12833_v4, %v12837_v63  ;;  %v12835_v23 = vunpack.i.h.bf16 %v10079_v41  ;;  %v12842_v21 = vunpack.i.h.bf16 %v10147_v25  ;;  %v12843_v14 = vunpack.i.l.bf16 %v10147_v25  ;;  %v4055_v63 = vld [vmem:[#allocation2] sm:$0x1] }
 0x4ed   :  { %2452 = vperm.xlu1 %5784, %v4962_v16   ;;  %3890 = vperm.xlu0 %5786, %v3876_v57   ;;  %v12832_v57 = vunpack.i.l.bf16 %v10079_v41  ;;  %v2402_v3 = vpack.c.bf16 %v2131_v29, %v2130_v28  ;;  %v3877_v29 = vld [vmem:[%s12605_s6 + $0x18] sm:$0xff] }
 0x4ee   :  { %2506 = vmatpush.bf16.msrb.mxu0 %v2406_v52  ;;  %2551 = vmatpush.bf16.msrb.mxu2 %v2442_v34  ;;  %v2085_v52 = vsel %vm100_vm6, %v12835_v23, %v12836_v49 }
 0x4ef   :  { %v10233_v16 = vpop.permute.xlu1 %6573  ;;  %v10235_v33 = vpop.permute.xlu0 %6543  ;;  %v2084_v34 = vsel %vm100_vm6, %v12832_v57, %v12834_v36  ;;  %v3874_v57 = vld [vmem:[%s12605_s6] sm:$0xff]  ;;  %v12840_v36 = vunpack.i.l.bf16 %v10058_v31 }
 0x4f0   :  { %4011 = vperm.xlu2 %5785, %v7067_v7   ;;  %v2398_v49 = vpack.c.bf16 %v2085_v52, %v2084_v34 }
 0x4f1   :  { %v2082_v4 = vsel %vm100_vm6, %v12840_v36, %v12843_v14  ;;  %v13312_v14 = vunpack.i.l.bf16 %v10045_v2 }
 0x4f2   :  { %v10239_v0 = vpop.permute.xlu2 %6613  ;;  %2507 = vmatpush.bf16.msrb.mxu0 %v2402_v3 }
 0x4f3   :  { %v12839_v7 = vunpack.i.h.bf16 %v10239_v0  ;;  %v12841_v28 = vunpack.i.l.bf16 %v10239_v0 }
 0x4f5   :  { %v2129_v23 = vsel %vm113_vm8, %v6551_v12, %v12839_v7  ;;  %v2128_v3 = vsel %vm113_vm8, %v6550_v1, %v12841_v28  ;;  %3895 = vperm.xlu1 %5784, %v3877_v29   ;;  %3880 = vperm.xlu0 %5786, %v3874_v57   ;;  %v13310_v12 = vunpack.i.h.bf16 %v10058_v31  ;;  %v4976_v1 = vld [vmem:[%s12602_s3 + $0x68] sm:$0xf] }
 0x4f6   :  { %v2407_v56 = vpack.c.bf16 %v2129_v23, %v2128_v3  ;;  %v5554_v23 = vld [vmem:[%s12602_s3 + $0x70] sm:$0xf0]  ;;  %2508 = vmatpush.bf16.msrb.mxu0 %v2398_v49  ;;  %v12849_v3 = vunpack.i.h.bf16 %v10060_v35 }
 0x4f7   :  { %v2083_v7 = vsel %vm100_vm6, %v13310_v12, %v12842_v21  ;;  %v10291_v52 = vor.u32 %v5554_v23, %v4976_v1  ;;  %v12845_v12 = vunpack.i.l.bf16 %v10060_v35  ;;  %v10297_v28 = vpop.permute.xlu1 %6583  ;;  %v10299_v21 = vpop.permute.xlu0 %6563 }
 0x4f8   :  { %4058 = vperm.xlu2 %5785, %v4055_v63   ;;  %2563 = vmatpush.bf16.msrb.mxu3 %v2407_v56  ;;  %v12848_v49 = vunpack.i.h.bf16 %v10299_v21  ;;  %v12844_v1 = vunpack.i.l.bf16 %v10299_v21  ;;  %v2394_v23 = vpack.c.bf16 %v2083_v7, %v2082_v4  ;;  %v3875_v4 = vld [vmem:[%s12605_s6 + $0x8] sm:$0xff]  ;;  %v13311_v56 = vunpack.i.l.bf16 %v10077_v6 }
 0x4f9   :  { %4990 = vmatmul.msk.bf16.vlgmr.msrb.gmra.mxu2 %vm895_vm3, %v10291_v52 }
 0x4fa   :  { %v10310_v63 = vpop.permute.xlu2 %6643  ;;  %2509 = vmatpush.bf16.msrb.mxu0 %v2394_v23  ;;  %v2276_v7 = vsel %vm152_vm1, %v12845_v12, %v12844_v1  ;;  %v2277_v57 = vsel %vm152_vm1, %v12849_v3, %v12848_v49  ;;  %v2274_v1 = vsel %vm152_vm1, %v13312_v14, %v13311_v56  ;;  %v13313_v12 = vunpack.i.h.bf16 %v10077_v6 }
 0x4fb   :  { %v2430_v29 = vpack.c.bf16 %v2277_v57, %v2276_v7  ;;  %v13315_v3 = vunpack.i.l.bf16 %v10047_v47  ;;  %v13316_v34 = vunpack.i.l.bf16 %v10310_v63  ;;  %v13318_v7 = vunpack.i.h.bf16 %v10047_v47 }
 0x4fc   :  { %v2275_v49 = vsel %vm152_vm1, %v13314_v9, %v13313_v12  ;;  %v13319_v36 = vunpack.i.h.bf16 %v10310_v63  ;;  %v13321_v23 = vunpack.i.l.bf16 %v10233_v16  ;;  %v13323_v9 = vunpack.i.h.bf16 %v10233_v16 }
 0x4fd   :  { %v10350_v57 = vsel %vm165_vm2, %v13316_v34, %v13315_v3  ;;  %3885 = vperm.xlu1 %5784, %v3875_v4   ;;  %2527 = vmatpush.bf16.msrb.mxu1 %v2430_v29  ;;  %v13324_v12 = vunpack.i.h.bf16 %v10081_v55  ;;  %v2426_v47 = vpack.c.bf16 %v2275_v49, %v2274_v1  ;;  %v13325_v56 = vunpack.i.l.bf16 %v10086_v43 }
 0x4fe   :  { %13317 = vst [vmem:[#allocation15_spill] sm:$0xff] %v10350_v57  ;;  %v10358_v14 = vsel %vm165_vm2, %v13319_v36, %v13318_v7  ;;  %v13322_v36 = vunpack.i.l.bf16 %v10081_v55  ;;  %v13326_v57 = vunpack.i.l.bf16 %v10056_v61  ;;  %v13337_v49 = vunpack.i.l.bf16 %v10119_v20 }
 0x4ff   :  { %13320 = vst [vmem:[#allocation25_spill] sm:$0xff] %v10358_v14  ;;  %v2229_v29 = vsel %vm139_vm4, %v13324_v12, %v13323_v9  ;;  %v10380_v34 = vpop.permute.xlu1 %6588  ;;  %v10382_v3 = vpop.permute.xlu0 %6568  ;;  %v13328_v14 = vunpack.i.h.bf16 %v10056_v61  ;;  %v13332_v12 = vunpack.i.h.bf16 %v10029_v40 }
 0x500   :  { %v2228_v7 = vsel %vm139_vm4, %v13322_v36, %v13321_v23  ;;  %v2034_v23 = vsel %vm87_vm7, %v13326_v57, %v13325_v56  ;;  %v13327_v36 = vunpack.i.h.bf16 %v10086_v43  ;;  %v12858_v1 = vunpack.i.l.bf16 %v10382_v3 }
 0x501   :  { %2528 = vmatpush.bf16.msrb.mxu1 %v2426_v47  ;;  %v2422_v57 = vpack.c.bf16 %v2229_v29, %v2228_v7  ;;  %v13329_v56 = vunpack.i.l.bf16 %v10149_v18  ;;  %v13333_v47 = vunpack.i.l.bf16 %v10068_v24  ;;  %v13335_v29 = vunpack.i.h.bf16 %v10068_v24 }
 0x502   :  { %v2035_v9 = vsel %vm87_vm7, %v13328_v14, %v13327_v36  ;;  %v10401_v30 = vpop.permute.xlu2 %6653  ;;  %v13331_v36 = vunpack.i.h.bf16 %v10149_v18  ;;  %v13336_v39 = vunpack.i.l.bf16 %v10380_v34  ;;  %v13338_v37 = vunpack.i.h.bf16 %v10380_v34 }
 0x503   :  { %v2226_v14 = vsel %vm139_vm4, %v13330_v22, %v13329_v56  ;;  %v2036_v7 = vsel %vm87_vm7, %v13333_v47, %v12858_v1  ;;  %v13334_v22 = vunpack.i.h.bf16 %v10382_v3  ;;  %v13339_v47 = vunpack.i.h.bf16 %v10119_v20 }
 0x504   :  { %v2227_v4 = vsel %vm139_vm4, %v13332_v12, %v13331_v36  ;;  %v2126_v46 = vsel %vm113_vm8, %v13337_v49, %v13336_v39  ;;  %v13340_v39 = vunpack.i.l.bf16 %v10045_v2  ;;  %v13341_v49 = vunpack.i.l.bf16 %v10401_v30 }
 0x505   :  { %v2037_v56 = vsel %vm87_vm7, %v13335_v29, %v13334_v22  ;;  %v2127_v1 = vsel %vm113_vm8, %v13339_v47, %v13338_v37  ;;  %v4988_v22 = vld [vmem:[%s12602_s3 + $0x80] sm:$0xf]  ;;  %v13343_v37 = vunpack.i.h.bf16 %v10045_v2  ;;  %v13344_v47 = vunpack.i.h.bf16 %v10401_v30  ;;  %2529 = vmatpush.bf16.msrb.mxu1 %v2422_v57 }
 0x506   :  { %v2390_v36 = vpack.c.bf16 %v2037_v56, %v2036_v7  ;;  %v5557_v7 = vld [vmem:[%s12602_s3 + $0x88] sm:$0xf0]  ;;  %v2403_v29 = vpack.c.bf16 %v2127_v1, %v2126_v46  ;;  %v10456_v20 = vsel %vm152_vm1, %v13341_v49, %v13340_v39  ;;  %v12860_v1 = vunpack.i.h.bf16 %v10093_v26 }
 0x507   :  { %v10448_v56 = vor.u32 %v5557_v7, %v4988_v22  ;;  %13342 = vst [vmem:[#allocation26_spill] sm:$0xff] %v10456_v20  ;;  %v10464_v12 = vsel %vm152_vm1, %v13344_v47, %v13343_v37  ;;  %v12859_v22 = vunpack.i.l.bf16 %v10093_v26  ;;  %v10472_v39 = vpop.permute.xlu1 %6603  ;;  %v10474_v49 = vpop.permute.xlu0 %6598  ;;  %v2386_v37 = vpack.c.bf16 %v2035_v9, %v2034_v23 }
 0x508   :  { %13345 = vst [vmem:[#allocation27_spill] sm:$0xff] %v10464_v12  ;;  %2510 = vmatpush.bf16.msrb.mxu0 %v2390_v36  ;;  %2564 = vmatpush.bf16.msrb.mxu3 %v2403_v29  ;;  %v2418_v47 = vpack.c.bf16 %v2227_v4, %v2226_v14  ;;  %v12862_v36 = vunpack.i.l.bf16 %v10472_v39  ;;  %v13346_v46 = vunpack.i.l.bf16 %v10297_v28  ;;  %v13347_v7 = vunpack.i.h.bf16 %v10297_v28 }
 0x509   :  { %4991 = vmatmul.msk.bf16.gmra.mxu2 %vm895_vm3, %v10448_v56  ;;  %v12861_v4 = vunpack.i.l.bf16 %v10049_v48  ;;  %v12863_v9 = vunpack.i.h.bf16 %v10049_v48  ;;  %v13348_v57 = vunpack.i.l.bf16 %v10235_v33  ;;  %v13351_v14 = vunpack.i.h.bf16 %v10117_v38 }
 0x50a   :  { %v2180_v29 = vsel %vm126_vm5, %v12859_v22, %v13346_v46  ;;  %v2181_v2 = vsel %vm126_vm5, %v12860_v1, %v13347_v7  ;;  %v10493_v23 = vpop.permute.xlu2 %6678  ;;  %2530 = vmatpush.bf16.msrb.mxu1 %v2418_v47  ;;  %v13349_v1 = vunpack.i.l.bf16 %v10117_v38  ;;  %v13350_v47 = vunpack.i.h.bf16 %v10472_v39 }
 0x50b   :  { %v12864_v46 = vunpack.i.l.bf16 %v10493_v23  ;;  %v2414_v22 = vpack.c.bf16 %v2181_v2, %v2180_v29  ;;  %v2178_v7 = vsel %vm126_vm5, %v12861_v4, %v13348_v57  ;;  %v13352_v29 = vunpack.i.h.bf16 %v10235_v33  ;;  %v5553_v4 = vld [vmem:[%s12602_s3 + $0x68] sm:$0xf0] }
 0x50c   :  { %2511 = vmatpush.bf16.msrb.mxu0 %v2386_v37  ;;  %v10510_v37 = vsel %vm165_vm2, %v13349_v1, %v12862_v36  ;;  %v10518_v2 = vsel %vm165_vm2, %v13351_v14, %v13350_v47  ;;  %v4968_v1 = vld [vmem:[%s12602_s3 + $0x60] sm:$0xf]  ;;  %v13353_v38 = vunpack.i.l.bf16 %v10029_v40  ;;  %v13355_v47 = vunpack.i.h.bf16 %v10029_v40  ;;  %v4970_v40 = vld [vmem:[%s12602_s3 + $0x6c] sm:$0xf0] }
 0x50d   :  { %v2179_v57 = vsel %vm126_vm5, %v12863_v9, %v13352_v29  ;;  %v13356_v36 = vunpack.i.h.bf16 %v10493_v23  ;;  %v13358_v9 = vpack.c.bf16 %v9926_v54, %v9924_v60  ;;  %v10569_v26 = vor.u32 %v5553_v4, %v4968_v1 }
 0x50e   :  { %v10537_v14 = vsel %vm139_vm4, %v12864_v46, %v13353_v38  ;;  %2531 = vmatpush.bf16.msrb.mxu1 %v2414_v22  ;;  %v5552_v38 = vld [vmem:[%s12602_s3 + $0x64] sm:$0xf]  ;;  %v13361_v4 = vunpack.i.h.bf16 %v10127_v32 }
 0x50f   :  { %13354 = vst [vmem:[#allocation28_spill] sm:$0xff] %v10537_v14  ;;  %v10545_v29 = vsel %vm139_vm4, %v13356_v36, %v13355_v47  ;;  %v10563_v54 = vpop.permute.xlu1 %6608  ;;  %v10565_v22 = vpop.permute.xlu0 %6618  ;;  %v10571_v20 = vor.u32 %v5552_v38, %v4970_v40  ;;  %v13359_v36 = vpack.c.bf16 %v9908_v19, %v9906_v58  ;;  %v13362_v58 = vunpack.i.l.bf16 %v10187_v11 }
 0x510   :  { %13357 = vst [vmem:[#allocation29_spill] sm:$0xff] %v10545_v29  ;;  %2512 = vmatpush.bf16.msrb.mxu0 %v13358_v9  ;;  %v2410_v9 = vpack.c.bf16 %v2179_v57, %v2178_v7  ;;  %v12871_v46 = vunpack.i.h.bf16 %v10565_v22  ;;  %v12872_v48 = vunpack.i.l.bf16 %v10565_v22  ;;  %v13360_v7 = vunpack.i.l.bf16 %v10127_v32 }
 0x511   :  { %v13363_v19 = vunpack.i.l.bf16 %v10147_v25  ;;  %v13364_v40 = vunpack.i.h.bf16 %v10070_v51  ;;  %v13374_v14 = vunpack.i.h.bf16 %v10086_v43 }
 0x512   :  { %v6684_v12 = vpop.permute.xlu2 %6683  ;;  %2532 = vmatpush.bf16.msrb.mxu1 %v2410_v9  ;;  %v2080_v57 = vsel %vm100_vm6, %v13360_v7, %v12872_v48  ;;  %v2081_v1 = vsel %vm100_vm6, %v13361_v4, %v12871_v46  ;;  %v13366_v9 = vunpack.i.l.bf16 %v10070_v51  ;;  %v13368_v7 = vunpack.i.h.bf16 %v10187_v11 }
 0x513   :  { %v6686_v47 = vunpack.i.h.bf16 %v6684_v12  ;;  %v6685_v60 = vunpack.i.l.bf16 %v6684_v12  ;;  %v2399_v38 = vpack.c.bf16 %v2081_v1, %v2080_v57  ;;  %v2078_v12 = vsel %vm100_vm6, %v13363_v19, %v13362_v58 }
 0x514   :  { %2513 = vmatpush.bf16.msrb.mxu0 %v13359_v36  ;;  %v13369_v57 = vunpack.i.h.bf16 %v10147_v25 }
 0x515   :  { %v10598_v36 = vsel %vm165_vm2, %v6686_v47, %v13364_v40  ;;  %v10604_v32 = vsel %vm165_vm2, %v6685_v60, %v13366_v9  ;;  %2533 = vmatmul.bf16.vlgmr.msrb.gmra.mxu1 %v10571_v20  ;;  %2565 = vmatpush.bf16.msrb.mxu3 %v2399_v38  ;;  %v12874_v9 = vunpack.i.l.bf16 %v10474_v49  ;;  %v13373_v38 = vunpack.i.h.bf16 %v10474_v49 }
 0x516   :  { %13365 = vst [vmem:[#allocation30_spill] sm:$0xff] %v10598_v36  ;;  %v2079_v4 = vsel %vm100_vm6, %v13369_v57, %v13368_v7  ;;  %v13370_v57 = vunpack.i.l.bf16 %v10382_v3  ;;  %v13380_v36 = vunpack.i.l.bf16 %v10096_v8 }
 0x517   :  { %13367 = vst [vmem:[#allocation31_spill] sm:$0xff] %v10604_v32  ;;  %2514 = vmatmul.bf16.vlgmr.msrb.gmra.mxu0 %v10569_v26  ;;  %v10616_v51 = vpop.permute.xlu1 %6623  ;;  %v10618_v58 = vpop.permute.xlu0 %6638  ;;  %v2395_v19 = vpack.c.bf16 %v2079_v4, %v2078_v12  ;;  %v13371_v4 = vunpack.i.h.bf16 %v10382_v3  ;;  %v4980_v3 = vld [vmem:[%s12602_s3 + $0x78] sm:$0xf] }
 0x518   :  { %v12875_v46 = vunpack.i.h.bf16 %v10616_v51  ;;  %v12876_v25 = vunpack.i.l.bf16 %v10616_v51 }
 0x519   :  { %2566 = vmatpush.bf16.msrb.mxu3 %v2395_v19  ;;  %v13372_v19 = vunpack.i.l.bf16 %v10086_v43 }
 0x51a   :  { %v10624_v48 = vpop.permute.xlu2 %6693  ;;  %v2032_v12 = vsel %vm87_vm7, %v13370_v57, %v12876_v25  ;;  %v2033_v1 = vsel %vm87_vm7, %v13371_v4, %v12875_v46  ;;  %v2031_v57 = vsel %vm87_vm7, %v13374_v14, %v13373_v38  ;;  %v5556_v14 = vld [vmem:[%s12602_s3 + $0x80] sm:$0xf0]  ;;  %v5555_v38 = vld [vmem:[%s12602_s3 + $0x7c] sm:$0xf] }
 0x51b   :  { %v2391_v40 = vpack.c.bf16 %v2033_v1, %v2032_v12  ;;  %v2030_v7 = vsel %vm87_vm7, %v13372_v19, %v12874_v9  ;;  %v13375_v1 = vunpack.i.l.bf16 %v10060_v35  ;;  %v13376_v12 = vunpack.i.l.bf16 %v10624_v48 }
 0x51c   :  { %v13378_v19 = vunpack.i.h.bf16 %v10060_v35  ;;  %v13379_v9 = vunpack.i.h.bf16 %v10624_v48  ;;  %v10684_v25 = vor.u32 %v5556_v14, %v4980_v3  ;;  %v13381_v35 = vunpack.i.h.bf16 %v10096_v8 }
 0x51d   :  { %v10661_v4 = vsel %vm152_vm1, %v13376_v12, %v13375_v1  ;;  %2567 = vmatpush.bf16.msrb.mxu3 %v2391_v40  ;;  %v4982_v1 = vld [vmem:[%s12602_s3 + $0x84] sm:$0xf0]  ;;  %v13382_v8 = vpack.c.bf16 %v9976_v50, %v9974_v27  ;;  %v6611_v27 = vunpack.i.h.bf16 %v10563_v54 }
 0x51e   :  { %13377 = vst [vmem:[#allocation32_spill] sm:$0xff] %v10661_v4  ;;  %v10669_v43 = vsel %vm152_vm1, %v13379_v9, %v13378_v19  ;;  %v2387_v9 = vpack.c.bf16 %v2031_v57, %v2030_v7  ;;  %v10686_v29 = vor.u32 %v5555_v38, %v4982_v1  ;;  %v13384_v38 = vunpack.i.h.bf16 %v10081_v55 }
 0x51f   :  { %v6629_v12 = vpop.permute.xlu1 %6628  ;;  %v10682_v46 = vpop.permute.xlu0 %6648  ;;  %v13385_v1 = vunpack.i.l.bf16 %v10310_v63 }
 0x520   :  { %v6631_v40 = vunpack.i.h.bf16 %v6629_v12  ;;  %v6630_v19 = vunpack.i.l.bf16 %v6629_v12 }
 0x521   :  { %2568 = vmatpush.bf16.msrb.mxu3 %v2387_v9  ;;  %v13388_v9 = vunpack.i.h.bf16 %v10472_v39 }
 0x522   :  { %v10688_v32 = vpop.permute.xlu2 %6708  ;;  %v2320_v62 = vsel %vm165_vm2, %v13380_v36, %v6630_v19  ;;  %v2321_v4 = vsel %vm165_vm2, %v13381_v35, %v6631_v40  ;;  %v2316_v14 = vsel %vm165_vm2, %v6630_v19, %v6685_v60  ;;  %v2317_v36 = vsel %vm165_vm2, %v6631_v40, %v6686_v47 }
 0x523   :  { %v2439_v7 = vpack.c.bf16 %v2321_v4, %v2320_v62  ;;  %v12882_v57 = vunpack.i.h.bf16 %v10688_v32  ;;  %v6710_v3 = vunpack.i.l.bf16 %v10688_v32  ;;  %v13383_v62 = vunpack.i.l.bf16 %v10081_v55 }
 0x524   :  { %v13386_v35 = vunpack.i.l.bf16 %v10472_v39  ;;  %v13387_v55 = vunpack.i.h.bf16 %v10310_v63  ;;  %v13390_v63 = vpack.c.bf16 %v10518_v2, %v10510_v37  ;;  %v13393_v37 = vunpack.i.l.bf16 %v10151_v44 }
 0x525   :  { %2538 = vmatmul.bf16.gmra.mxu1 %v10686_v29  ;;  %2569 = vmatpush.bf16.msrb.mxu3 %v13382_v8  ;;  %v10715_v4 = vsel %vm139_vm4, %v6710_v3, %v13383_v62  ;;  %v10723_v47 = vsel %vm139_vm4, %v12882_v57, %v13384_v38  ;;  %v2440_v8 = vpack.c.bf16 %v2317_v36, %v2316_v14  ;;  %v13392_v36 = vunpack.i.h.bf16 %v10299_v21 }
 0x526   :  { %2582 = vmatpush.bf16.msra.mxu0 %v2439_v7  ;;  %v2314_v12 = vsel %vm165_vm2, %v13386_v35, %v13385_v1  ;;  %v2315_v40 = vsel %vm165_vm2, %v13388_v9, %v13387_v55  ;;  %v2425_v19 = vpack.c.bf16 %v10723_v47, %v10715_v4  ;;  %v6610_v7 = vunpack.i.l.bf16 %v10563_v54 }
 0x527   :  { %2519 = vmatmul.bf16.gmra.mxu0 %v10684_v25  ;;  %v6634_v50 = vpop.permute.xlu1 %6633  ;;  %v10726_v60 = vpop.permute.xlu0 %6668  ;;  %v13389_v1 = vpack.c.bf16 %v9948_v15, %v9946_v13  ;;  %v13391_v54 = vunpack.i.l.bf16 %v10299_v21  ;;  %v13394_v55 = vunpack.i.h.bf16 %v10151_v44  ;;  %v13395_v21 = vunpack.i.l.bf16 %v10077_v6 }
 0x528   :  { %v6636_v62 = vunpack.i.h.bf16 %v6634_v50  ;;  %v6635_v38 = vunpack.i.l.bf16 %v6634_v50  ;;  %v2436_v50 = vpack.c.bf16 %v2315_v40, %v2314_v12  ;;  %v13396_v40 = vunpack.i.h.bf16 %v10077_v6 }
 0x529   :  { %2570 = vmatpush.bf16.msrb.mxu3 %v13389_v1  ;;  %v2270_v12 = vsel %vm152_vm1, %v13395_v21, %v6610_v7  ;;  %v13399_v6 = vunpack.i.l.bf16 %v10401_v30 }
 0x52a   :  { %v10743_v57 = vpop.permute.xlu2 %6713  ;;  %2583 = vmatpush.bf16.msra.mxu0 %v13390_v63  ;;  %v2272_v14 = vsel %vm152_vm1, %v13391_v54, %v6635_v38  ;;  %v2273_v13 = vsel %vm152_vm1, %v13392_v36, %v6636_v62  ;;  %v13397_v63 = vunpack.i.l.bf16 %v10624_v48  ;;  %v13398_v54 = vunpack.i.h.bf16 %v10624_v48 }
 0x52b   :  { %v6716_v39 = vunpack.i.h.bf16 %v10743_v57  ;;  %v6715_v35 = vunpack.i.l.bf16 %v10743_v57  ;;  %v2431_v15 = vpack.c.bf16 %v2273_v13, %v2272_v14  ;;  %v6641_v36 = vunpack.i.h.bf16 %v10618_v58 }
 0x52c   :  { %2571 = vmatmul.bf16.vlgmr.msrb.gmra.mxu3 %v10569_v26  ;;  %v2268_v44 = vsel %vm152_vm1, %v6635_v38, %v13397_v63  ;;  %v2269_v14 = vsel %vm152_vm1, %v6636_v62, %v13398_v54  ;;  %v6640_v13 = vunpack.i.l.bf16 %v10618_v58 }
 0x52d   :  { %2639 = vmatpush.bf16.msra.mxu3 %v2440_v8  ;;  %v2368_v2 = vsel %vm178_vm0, %v13393_v37, %v6715_v35  ;;  %v2369_v9 = vsel %vm178_vm0, %v13394_v55, %v6716_v39  ;;  %v2271_v8 = vsel %vm152_vm1, %v13396_v40, %v6611_v27  ;;  %v13400_v37 = vunpack.i.h.bf16 %v10401_v30 }
 0x52e   :  { %v2447_v1 = vpack.c.bf16 %v2369_v9, %v2368_v2  ;;  %2584 = vmatpush.bf16.msra.mxu0 %v2431_v15  ;;  %v2266_v15 = vsel %vm152_vm1, %v6610_v7, %v13399_v6  ;;  %v2427_v55 = vpack.c.bf16 %v2271_v8, %v2270_v12  ;;  %v2432_v21 = vpack.c.bf16 %v2269_v14, %v2268_v44 }
 0x52f   :  { %v2267_v38 = vsel %vm152_vm1, %v6611_v27, %v13400_v37  ;;  %v6659_v2 = vpop.permute.xlu1 %6658  ;;  %v6689_v48 = vpop.permute.xlu0 %6688  ;;  %v13402_v30 = vunpack.i.h.bf16 %v10239_v0  ;;  %v13403_v12 = vunpack.i.l.bf16 %v10380_v34  ;;  %v13406_v37 = vunpack.i.l.bf16 %v10072_v53 }
 0x530   :  { %2607 = vmatpush.bf16.msra.mxu1 %v2447_v1  ;;  %v6661_v62 = vunpack.i.h.bf16 %v6659_v2  ;;  %v6660_v9 = vunpack.i.l.bf16 %v6659_v2  ;;  %v2428_v58 = vpack.c.bf16 %v2267_v38, %v2266_v15  ;;  %v13404_v1 = vunpack.i.h.bf16 %v10380_v34 }
 0x531   :  { %2640 = vmatpush.bf16.msra.mxu3 %v2436_v50  ;;  %v13401_v50 = vunpack.i.l.bf16 %v10239_v0  ;;  %v2122_v8 = vsel %vm113_vm8, %v13403_v12, %v6640_v13  ;;  %v13405_v0 = vunpack.i.l.bf16 %v10016_v45  ;;  %v6650_v15 = vunpack.i.l.bf16 %v10682_v46 }
 0x532   :  { %v10800_v40 = vpop.permute.xlu2 %6733  ;;  %2585 = vmatpush.bf16.msra.mxu0 %v2427_v55  ;;  %v2125_v27 = vsel %vm113_vm8, %v13402_v30, %v6661_v62  ;;  %v2123_v63 = vsel %vm113_vm8, %v13404_v1, %v6641_v36  ;;  %v2136_v34 = vsel %vm113_vm8, %v6660_v9, %v13406_v37  ;;  %v13407_v38 = vunpack.i.h.bf16 %v10072_v53 }
 0x533   :  { %v2124_v7 = vsel %vm113_vm8, %v13401_v50, %v6660_v9  ;;  %v6736_v54 = vunpack.i.h.bf16 %v10800_v40  ;;  %v6735_v14 = vunpack.i.l.bf16 %v10800_v40  ;;  %v2134_v6 = vsel %vm113_vm8, %v6640_v13, %v13405_v0 }
 0x534   :  { %v2408_v44 = vpack.c.bf16 %v2125_v27, %v2124_v7  ;;  %v2137_v2 = vsel %vm113_vm8, %v6661_v62, %v13407_v38  ;;  %v13408_v55 = vunpack.i.h.bf16 %v10016_v45  ;;  %v6691_v50 = vunpack.i.h.bf16 %v6689_v48 }
 0x535   :  { %2641 = vmatpush.bf16.msra.mxu3 %v2432_v21  ;;  %v6690_v7 = vunpack.i.l.bf16 %v6689_v48  ;;  %v13409_v13 = vunpack.i.l.bf16 %v10179_v5  ;;  %v13410_v53 = vunpack.i.h.bf16 %v10179_v5  ;;  %v2409_v48 = vpack.c.bf16 %v2137_v2, %v2136_v34 }
 0x536   :  { %v2135_v21 = vsel %vm113_vm8, %v6641_v36, %v13408_v55  ;;  %2620 = vmatpush.bf16.msra.mxu2 %v2408_v44  ;;  %v6651_v36 = vunpack.i.h.bf16 %v10682_v46  ;;  %v2404_v12 = vpack.c.bf16 %v2123_v63, %v2122_v8  ;;  %v13411_v5 = vunpack.i.l.bf16 %v10565_v22 }
 0x537   :  { %v2366_v9 = vsel %vm178_vm0, %v13409_v13, %v6735_v14  ;;  %v2367_v45 = vsel %vm178_vm0, %v13410_v53, %v6736_v54  ;;  %v6664_v30 = vpop.permute.xlu1 %6663  ;;  %v6699_v27 = vpop.permute.xlu0 %6698  ;;  %v2405_v1 = vpack.c.bf16 %v2135_v21, %v2134_v6  ;;  %v13412_v55 = vunpack.i.h.bf16 %v10565_v22 }
 0x538   :  { %v2443_v62 = vpack.c.bf16 %v2367_v45, %v2366_v9  ;;  %v6666_v44 = vunpack.i.h.bf16 %v6664_v30  ;;  %v6665_v0 = vunpack.i.l.bf16 %v6664_v30  ;;  %v6701_v37 = vunpack.i.h.bf16 %v6699_v27 }
 0x539   :  { %2642 = vmatpush.bf16.msra.mxu3 %v2428_v58  ;;  %v6700_v38 = vunpack.i.l.bf16 %v6699_v27  ;;  %v2076_v58 = vsel %vm100_vm6, %v13411_v5, %v6690_v7  ;;  %v2077_v46 = vsel %vm100_vm6, %v13412_v55, %v6691_v50  ;;  %v13413_v8 = vunpack.i.l.bf16 %v10187_v11 }
 0x53a   :  { %2608 = vmatpush.bf16.msra.mxu1 %v2443_v62  ;;  %2621 = vmatpush.bf16.msra.mxu2 %v2404_v12  ;;  %v13414_v6 = vunpack.i.l.bf16 %v10233_v16  ;;  %v13415_v2 = vunpack.i.h.bf16 %v10233_v16  ;;  %v2220_v22 = vsel %vm139_vm4, %v6665_v0, %v6710_v3  ;;  %v13416_v13 = vunpack.i.h.bf16 %v10688_v32 }
 0x53b   :  { %v2074_v63 = vsel %vm100_vm6, %v13413_v8, %v6650_v15  ;;  %v13417_v16 = vunpack.i.l.bf16 %v10079_v41  ;;  %v2400_v32 = vpack.c.bf16 %v2077_v46, %v2076_v58  ;;  %v13419_v30 = vunpack.i.h.bf16 %v10079_v41 }
 0x53c   :  { %v2224_v34 = vsel %vm139_vm4, %v13414_v6, %v6665_v0  ;;  %v2225_v21 = vsel %vm139_vm4, %v13415_v2, %v6666_v44  ;;  %v2221_v9 = vsel %vm139_vm4, %v6666_v44, %v13416_v13  ;;  %2576 = vmatmul.bf16.gmra.mxu3 %v10684_v25  ;;  %v13420_v12 = vunpack.i.l.bf16 %v10068_v24 }
 0x53d   :  { %4992 = vmatmul.msk.bf16.vlgmr.msra.gmra.mxu1 %vm895_vm3, %v10291_v52  ;;  %v2423_v53 = vpack.c.bf16 %v2225_v21, %v2224_v34  ;;  %v2424_v45 = vpack.c.bf16 %v2221_v9, %v2220_v22  ;;  %v2088_v62 = vsel %vm100_vm6, %v6690_v7, %v13417_v16  ;;  %v2089_v27 = vsel %vm100_vm6, %v6691_v50, %v13419_v30 }
 0x53e   :  { %2677 = vmatpush.bf16.msrb.mxu1 %v2409_v48  ;;  %v13418_v48 = vunpack.i.h.bf16 %v10187_v11  ;;  %v2040_v44 = vsel %vm87_vm7, %v6700_v38, %v13420_v12  ;;  %v13421_v7 = vunpack.i.h.bf16 %v10068_v24  ;;  %2622 = vmatpush.bf16.msra.mxu2 %v2400_v32  ;;  %v13422_v41 = vunpack.i.l.bf16 %v10058_v31 }
 0x53f   :  { %2586 = vmatpush.bf16.msra.mxu0 %v2423_v53  ;;  %2643 = vmatpush.bf16.msra.mxu3 %v2424_v45  ;;  %v6671_v58 = vunpack.i.h.bf16 %v10726_v60  ;;  %v6670_v55 = vunpack.i.l.bf16 %v10726_v60  ;;  %v6674_v46 = vpop.permute.xlu1 %6673  ;;  %v6704_v24 = vpop.permute.xlu0 %6703  ;;  %v2401_v8 = vpack.c.bf16 %v2089_v27, %v2088_v62  ;;  %v13423_v6 = vunpack.i.h.bf16 %v10058_v31 }
 0x540   :  { %v2075_v3 = vsel %vm100_vm6, %v13418_v48, %v6651_v36  ;;  %v2041_v11 = vsel %vm87_vm7, %v6701_v37, %v13421_v7  ;;  %v2086_v50 = vsel %vm100_vm6, %v6650_v15, %v13422_v41  ;;  %v6676_v34 = vunpack.i.h.bf16 %v6674_v46 }
 0x541   :  { %v2393_v0 = vpack.c.bf16 %v2041_v11, %v2040_v44  ;;  %v2396_v5 = vpack.c.bf16 %v2075_v3, %v2074_v63  ;;  %v6675_v2 = vunpack.i.l.bf16 %v6674_v46  ;;  %v6706_v63 = vunpack.i.h.bf16 %v6704_v24 }
 0x542   :  { %2678 = vmatpush.bf16.msrb.mxu1 %v2405_v1  ;;  %v2087_v1 = vsel %vm100_vm6, %v6651_v36, %v13423_v6  ;;  %v6705_v21 = vunpack.i.l.bf16 %v6704_v24  ;;  %v13424_v22 = vunpack.i.l.bf16 %v10616_v51  ;;  %v13425_v60 = vunpack.i.h.bf16 %v10616_v51 }
 0x543   :  { %2623 = vmatpush.bf16.msra.mxu2 %v2396_v5  ;;  %v13426_v31 = vunpack.i.l.bf16 %v10149_v18  ;;  %v13427_v9 = vunpack.i.h.bf16 %v10149_v18  ;;  %v13428_v45 = vunpack.i.l.bf16 %v10493_v23  ;;  %v13429_v51 = vunpack.i.h.bf16 %v10493_v23 }
 0x544   :  { %v2028_v15 = vsel %vm87_vm7, %v13424_v22, %v6700_v38  ;;  %v2029_v13 = vsel %vm87_vm7, %v13425_v60, %v6701_v37  ;;  %v2397_v16 = vpack.c.bf16 %v2087_v1, %v2086_v50  ;;  %v13430_v3 = vunpack.i.l.bf16 %v10474_v49 }
 0x545   :  { %v2222_v36 = vsel %vm139_vm4, %v13426_v31, %v6675_v2  ;;  %v2223_v53 = vsel %vm139_vm4, %v13427_v9, %v6676_v34  ;;  %v2218_v38 = vsel %vm139_vm4, %v6675_v2, %v13428_v45  ;;  %v2219_v37 = vsel %vm139_vm4, %v6676_v34, %v13429_v51  ;;  %v5240_v31 = vld [vmem:[#allocation4 + $0x1e0] sm:$0xf] }
 0x546   :  { %2679 = vmatpush.bf16.msrb.mxu1 %v2401_v8  ;;  %v2419_v62 = vpack.c.bf16 %v2223_v53, %v2222_v36  ;;  %v2420_v48 = vpack.c.bf16 %v2219_v37, %v2218_v38  ;;  %v2026_v18 = vsel %vm87_vm7, %v13430_v3, %v6670_v55  ;;  %v2392_v32 = vpack.c.bf16 %v2029_v13, %v2028_v15  ;;  %v13439_v51 = vld [vmem:[#allocation23_spill] sm:$0xff] }
 0x547   :  { %v13431_v30 = vunpack.i.l.bf16 %v10297_v28  ;;  %v13432_v12 = vunpack.i.h.bf16 %v10297_v28  ;;  %v13433_v44 = vunpack.i.h.bf16 %v10474_v49  ;;  %v10951_v11 = vpop.permute.xlu1 %6723  ;;  %v6719_v5 = vpop.permute.xlu0 %6718  ;;  %v13434_v46 = vunpack.i.l.bf16 %v10056_v61 }
 0x548   :  { %2587 = vmatpush.bf16.msra.mxu0 %v2419_v62  ;;  %2624 = vmatpush.bf16.msra.mxu2 %v2392_v32  ;;  %v13435_v24 = vunpack.i.h.bf16 %v10056_v61  ;;  %v6726_v8 = vunpack.i.h.bf16 %v10951_v11  ;;  %v6725_v6 = vunpack.i.l.bf16 %v10951_v11  ;;  %v6721_v1 = vunpack.i.h.bf16 %v6719_v5  ;;  %v13444_v32 = vld [vmem:[#allocation20_spill] sm:$0xff] }
 0x549   :  { %v2176_v27 = vsel %vm126_vm5, %v13431_v30, %v6705_v21  ;;  %v2177_v23 = vsel %vm126_vm5, %v13432_v12, %v6706_v63  ;;  %v2027_v7 = vsel %vm87_vm7, %v13433_v44, %v6671_v58  ;;  %2644 = vmatpush.bf16.msra.mxu3 %v2420_v48  ;;  %v2038_v28 = vsel %vm87_vm7, %v6670_v55, %v13434_v46  ;;  %v13445_v30 = vld [vmem:[#allocation17_spill] sm:$0xff]  ;;  %v13448_v44 = vld [vmem:[#allocation31_spill] sm:$0xff]  ;;  %v13470_v11 = vld [vmem:[#allocation16_spill] sm:$0xff] }
 0x54a   :  { %2680 = vmatpush.bf16.msrb.mxu1 %v2397_v16  ;;  %v2415_v41 = vpack.c.bf16 %v2177_v23, %v2176_v27  ;;  %v2388_v50 = vpack.c.bf16 %v2027_v7, %v2026_v18  ;;  %v2039_v49 = vsel %vm87_vm7, %v6671_v58, %v13435_v24  ;;  %v6720_v34 = vunpack.i.l.bf16 %v6719_v5  ;;  %v13447_v23 = vld [vmem:[#allocation30_spill] sm:$0xff]  ;;  %v5224_v24 = vld [vmem:[#allocation4 + $0x1c0] sm:$0xf] }
 0x54b   :  { %v13436_v2 = vunpack.i.l.bf16 %v10235_v33  ;;  %v13437_v55 = vunpack.i.h.bf16 %v10235_v33  ;;  %v2172_v58 = vsel %vm126_vm5, %v6705_v21, %v6725_v6  ;;  %v2389_v15 = vpack.c.bf16 %v2039_v49, %v2038_v28  ;;  %v5620_v21 = vld [vmem:[#allocation4 + $0x1ec] sm:$0xf0]  ;;  %v13450_v5 = vld [vmem:[#allocation22_spill] sm:$0xff]  ;;  %v5112_v28 = vld [vmem:[#allocation4 + $0xe0] sm:$0xf] }
 0x54c   :  { %2588 = vmatpush.bf16.msra.mxu0 %v2415_v41  ;;  %2625 = vmatpush.bf16.msra.mxu2 %v2388_v50  ;;  %v13438_v33 = vpack.c.bf16 %v9984_v42, %v9988_v17  ;;  %v13440_v37 = vpack.c.bf16 %v10024_v59, %v13439_v51  ;;  %v5241_v42 = vor.u32 %v5620_v21, %v5240_v31  ;;  %v13441_v17 = vld [vmem:[#allocation24_spill] sm:$0xff]  ;;  %v13451_v41 = vld [vmem:[#allocation18_spill] sm:$0xff]  ;;  %v5616_v49 = vld [vmem:[#allocation4 + $0x1cc] sm:$0xf0] }
 0x54d   :  { %v2174_v22 = vsel %vm126_vm5, %v13436_v2, %v6720_v34  ;;  %v2175_v61 = vsel %vm126_vm5, %v13437_v55, %v6721_v1  ;;  %4993 = vmatmul.msk.bf16.gmra.mxu1 %vm895_vm3, %v10448_v56  ;;  %v13442_v16 = vunpack.i.h.bf16 %v13441_v17  ;;  %v13443_v18 = vunpack.i.l.bf16 %v13441_v17  ;;  %v5588_v2 = vld [vmem:[#allocation4 + $0xec] sm:$0xf0] }
 0x54e   :  { %2681 = vmatpush.bf16.msrb.mxu1 %v2393_v0  ;;  %v2173_v0 = vsel %vm126_vm5, %v6706_v63, %v6726_v8  ;;  %v2411_v60 = vpack.c.bf16 %v2175_v61, %v2174_v22  ;;  %v13446_v27 = vpack.c.bf16 %v13444_v32, %v13445_v30  ;;  %v13449_v7 = vpack.c.bf16 %v13447_v23, %v13448_v44  ;;  %v5684_v22 = vld [vmem:[#allocation4 + $0x3ec] sm:$0xf0]  ;;  %v13454_v61 = vld [vmem:[#allocation15_spill] sm:$0xff]  ;;  %v13462_v44 = vld [vmem:[#allocation26_spill] sm:$0xff] }
 0x54f   :  { %v2416_v13 = vpack.c.bf16 %v2173_v0, %v2172_v58  ;;  %v10984_v36 = vpop.permute.xlu1 %6728  ;;  %v6739_v9 = vpop.permute.xlu0 %6738  ;;  %v13452_v50 = vpack.c.bf16 %v13450_v5, %v13451_v41  ;;  %v13453_v55 = vld [vmem:[#allocation25_spill] sm:$0xff]  ;;  %v5192_v32 = vld [vmem:[#allocation4 + $0x180] sm:$0xf] }
 0x550   :  { %2589 = vmatpush.bf16.msra.mxu0 %v2411_v60  ;;  %2626 = vmatpush.bf16.msra.mxu2 %v13438_v33  ;;  %v6731_v63 = vunpack.i.h.bf16 %v10984_v36  ;;  %v6730_v53 = vunpack.i.l.bf16 %v10984_v36  ;;  %v6741_v45 = vunpack.i.h.bf16 %v6739_v9  ;;  %v6740_v38 = vunpack.i.l.bf16 %v6739_v9  ;;  %v5208_v33 = vld [vmem:[#allocation4 + $0x1a0] sm:$0xf]  ;;  %v5612_v31 = vld [vmem:[#allocation4 + $0x1ac] sm:$0xf0] }
 0x551   :  { %2645 = vmatpush.bf16.msra.mxu3 %v2416_v13  ;;  %v13455_v58 = vpack.c.bf16 %v13453_v55, %v13454_v61  ;;  %v5225_v60 = vor.u32 %v5616_v49, %v5224_v24  ;;  %v5113_v13 = vor.u32 %v5588_v2, %v5112_v28  ;;  %v5608_v30 = vld [vmem:[#allocation4 + $0x18c] sm:$0xf0]  ;;  %v13461_v23 = vld [vmem:[#allocation27_spill] sm:$0xff] }
 0x552   :  { %2682 = vmatpush.bf16.msrb.mxu1 %v2389_v15  ;;  %v2377_v62 = vsel %vm178_vm0, %v6741_v45, %v13442_v16  ;;  %v2364_v48 = vsel %vm178_vm0, %v6715_v35, %v6740_v38  ;;  %v2365_v3 = vsel %vm178_vm0, %v6716_v39, %v6741_v45  ;;  %v2376_v59 = vsel %vm178_vm0, %v6740_v38, %v13443_v18  ;;  %v13456_v38 = vld [vmem:[#allocation19_spill] sm:$0xff]  ;;  %v5680_v18 = vld [vmem:[#allocation4 + $0x3cc] sm:$0xf0] }
 0x553   :  { %2590 = vmatmul.bf16.vlgmr.msra.gmra.mxu0 %v10571_v20  ;;  %v2448_v12 = vpack.c.bf16 %v2365_v3, %v2364_v48  ;;  %v2170_v57 = vsel %vm126_vm5, %v6720_v34, %v6730_v53  ;;  %v2449_v39 = vpack.c.bf16 %v2377_v62, %v2376_v59  ;;  %v2171_v35 = vsel %vm126_vm5, %v6721_v1, %v6731_v63  ;;  %v5496_v34 = vld [vmem:[#allocation4 + $0x3e0] sm:$0xf]  ;;  %v5604_v41 = vld [vmem:[#allocation4 + $0x16c] sm:$0xf0] }
 0x554   :  { %2627 = vmatpush.bf16.msra.mxu2 %v13446_v27  ;;  %v2412_v46 = vpack.c.bf16 %v2171_v35, %v2170_v57  ;;  %v5497_v21 = vor.u32 %v5684_v22, %v5496_v34  ;;  %v13457_v51 = vunpack.i.l.bf16 %v13456_v38  ;;  %v5096_v16 = vld [vmem:[#allocation4 + $0xc0] sm:$0xf]  ;;  %v5209_v59 = vor.u32 %v5612_v31, %v5208_v33  ;;  %v5576_v24 = vld [vmem:[#allocation4 + $0x8c] sm:$0xf0] }
 0x555   :  { %2664 = vmatpush.bf16.msrb.mxu0 %v2448_v12  ;;  %v5480_v3 = vld [vmem:[#allocation4 + $0x3c0] sm:$0xf]  ;;  %v5193_v35 = vor.u32 %v5608_v30, %v5192_v32  ;;  %v5600_v34 = vld [vmem:[#allocation4 + $0x14c] sm:$0xf0] }
 0x556   :  { %2683 = vmatpush.bf16.msrb.mxu1 %v13440_v37  ;;  %2646 = vmatpush.bf16.msra.mxu3 %v2412_v46  ;;  %v5080_v12 = vld [vmem:[#allocation4 + $0xa0] sm:$0xf]  ;;  %v5672_v55 = vld [vmem:[#allocation4 + $0x38c] sm:$0xf0] }
 0x557   :  { %2628 = vmatmul.bf16.vlgmr.msra.gmra.mxu2 %v10569_v26  ;;  %v6744_v1 = vpop.permute.xlu1 %6743  ;;  %v5464_v57 = vld [vmem:[#allocation4 + $0x3a0] sm:$0xf]  ;;  %v13464_v61 = vld [vmem:[#allocation21_spill] sm:$0xff] }
 0x558   :  { %2696 = vmatpush.bf16.msrb.mxu2 %v13449_v7  ;;  %v6746_v0 = vunpack.i.h.bf16 %v6744_v1  ;;  %v6745_v15 = vunpack.i.l.bf16 %v6744_v1  ;;  %v5580_v7 = vld [vmem:[#allocation4 + $0xac] sm:$0xf0]  ;;  %v5176_v5 = vld [vmem:[#allocation4 + $0x160] sm:$0xf]  ;;  %v13466_v4 = vunpack.i.h.bf16 %v13464_v61 }
 0x559   :  { %2647 = vmatmul.bf16.vlgmr.msra.gmra.mxu3 %v10571_v20  ;;  %v5064_v28 = vld [vmem:[#allocation4 + $0x80] sm:$0xf]  ;;  %v5177_v49 = vor.u32 %v5604_v41, %v5176_v5  ;;  %v5572_v33 = vld [vmem:[#allocation4 + $0x6c] sm:$0xf0] }
 0x55a   :  { %2684 = vmatpush.bf16.msrb.mxu1 %v13452_v50  ;;  %2721 = vmatpush.bf16.msrb.mxu3 %v2449_v39  ;;  %v2362_v9 = vsel %vm178_vm0, %v6735_v14, %v6745_v15  ;;  %v2363_v45 = vsel %vm178_vm0, %v6736_v54, %v6746_v0  ;;  %v2374_v37 = vsel %vm178_vm0, %v6745_v15, %v13457_v51  ;;  %v13459_v14 = vld [vmem:[#allocation32_spill] sm:$0xff]  ;;  %v5584_v54 = vld [vmem:[#allocation4 + $0xcc] sm:$0xf0]  ;;  %v5160_v2 = vld [vmem:[#allocation4 + $0x140] sm:$0xf] }
 0x55b   :  { %v13460_v62 = vpack.c.bf16 %v10669_v43, %v13459_v14  ;;  %v2444_v40 = vpack.c.bf16 %v2363_v45, %v2362_v9  ;;  %v5097_v27 = vor.u32 %v5584_v54, %v5096_v16  ;;  %v13463_v43 = vpack.c.bf16 %v13461_v23, %v13462_v44  ;;  %v5676_v39 = vld [vmem:[#allocation4 + $0x3ac] sm:$0xf0]  ;;  %v5448_v22 = vld [vmem:[#allocation4 + $0x380] sm:$0xf]  ;;  %v13468_v15 = vld [vmem:[#allocation28_spill] sm:$0xff] }
 0x55c   :  { %2697 = vmatpush.bf16.msrb.mxu2 %v13455_v58  ;;  %v5081_v50 = vor.u32 %v5580_v7, %v5080_v12  ;;  %v5465_v46 = vor.u32 %v5676_v39, %v5464_v57  ;;  %v13465_v58 = vunpack.i.l.bf16 %v13464_v61  ;;  %v2185_v47 = vsel %vm126_vm5, %v6726_v8, %v13466_v4  ;;  %v5596_v45 = vld [vmem:[#allocation4 + $0x12c] sm:$0xf0]  ;;  %v5368_v14 = vld [vmem:[#allocation4 + $0x2e0] sm:$0xf]  ;;  %v5618_v44 = vld [vmem:[#allocation4 + $0x1e4] sm:$0xf] }
 0x55d   :  { %2685 = vmatmul.bf16.vlgmr.msrb.gmra.mxu1 %v10569_v26  ;;  %2665 = vmatpush.bf16.msrb.mxu0 %v2444_v40  ;;  %v5481_v26 = vor.u32 %v5680_v18, %v5480_v3  ;;  %v5161_v31 = vor.u32 %v5600_v34, %v5160_v2  ;;  %v13471_v8 = vunpack.i.l.bf16 %v13470_v11  ;;  %v5668_v16 = vld [vmem:[#allocation4 + $0x36c] sm:$0xf0]  ;;  %v5032_v40 = vld [vmem:[#allocation4 + $0x40] sm:$0xf] }
 0x55e   :  { %3569 = vmatpush.bf16.msra.mxu1 %v5241_v42  ;;  %v13458_v42 = vunpack.i.h.bf16 %v13456_v38  ;;  %v2184_v1 = vsel %vm126_vm5, %v6725_v6, %v13465_v58  ;;  %v5144_v6 = vld [vmem:[#allocation4 + $0x120] sm:$0xf]  ;;  %v5592_v36 = vld [vmem:[#allocation4 + $0x10c] sm:$0xf0] }
 0x55f   :  { %v2417_v9 = vpack.c.bf16 %v2185_v47, %v2184_v1  ;;  %v5432_v38 = vld [vmem:[#allocation4 + $0x360] sm:$0xf]  ;;  %v2182_v51 = vsel %vm126_vm5, %v6730_v53, %v13471_v8  ;;  %v5145_v54 = vor.u32 %v5596_v45, %v5144_v6  ;;  %v5564_v12 = vld [vmem:[#allocation4 + $0x2c] sm:$0xf0]  ;;  %v5682_v47 = vld [vmem:[#allocation4 + $0x3e4] sm:$0xf] }
 0x560   :  { %v2375_v17 = vsel %vm178_vm0, %v6746_v0, %v13458_v42  ;;  %2698 = vmatpush.bf16.msrb.mxu2 %v13460_v62  ;;  %v13467_v0 = vld [vmem:[#allocation29_spill] sm:$0xff]  ;;  %v5433_v3 = vor.u32 %v5668_v16, %v5432_v38  ;;  %v5416_v30 = vld [vmem:[#allocation4 + $0x340] sm:$0xf]  ;;  %v13473_v45 = vld [vmem:[#allocation8_spill] sm:$0xff] }
 0x561   :  { %v2445_v48 = vpack.c.bf16 %v2375_v17, %v2374_v37  ;;  %3550 = vmatpush.bf16.msra.mxu0 %v5113_v13  ;;  %v5048_v13 = vld [vmem:[#allocation4 + $0x60] sm:$0xf]  ;;  %v13472_v37 = vunpack.i.h.bf16 %v13470_v11  ;;  %v5652_v62 = vld [vmem:[#allocation4 + $0x2ec] sm:$0xf0]  ;;  %v5210_v6 = vld [vmem:[#allocation4 + $0x1b0] sm:$0xf0] }
 0x562   :  { %3570 = vmatpush.bf16.msra.mxu1 %v5225_v60  ;;  %v13469_v60 = vpack.c.bf16 %v13467_v0, %v13468_v15  ;;  %v5049_v17 = vor.u32 %v5572_v33, %v5048_v13  ;;  %v5369_v18 = vor.u32 %v5652_v62, %v5368_v14  ;;  %v5660_v5 = vld [vmem:[#allocation4 + $0x32c] sm:$0xf0]  ;;  %v5000_v41 = vld [vmem:[#allocation4] sm:$0xf]  ;;  %v5582_v15 = vld [vmem:[#allocation4 + $0xc4] sm:$0xf] }
 0x563   :  { %2722 = vmatpush.bf16.msrb.mxu3 %v2445_v48  ;;  %2595 = vmatmul.bf16.gmra.mxu0 %v10686_v29  ;;  %v2183_v42 = vsel %vm126_vm5, %v6731_v63, %v13472_v37  ;;  %v5568_v48 = vld [vmem:[#allocation4 + $0x4c] sm:$0xf0]  ;;  %v5016_v63 = vld [vmem:[#allocation4 + $0x20] sm:$0xf]  ;;  %v5678_v11 = vld [vmem:[#allocation4 + $0x3c4] sm:$0xf] }
 0x564   :  { %2699 = vmatpush.bf16.msrb.mxu2 %v13463_v43  ;;  %v2413_v53 = vpack.c.bf16 %v2183_v42, %v2182_v51  ;;  %v5033_v32 = vor.u32 %v5568_v48, %v5032_v40  ;;  %v5242_v43 = vld [vmem:[#allocation4 + $0x1f0] sm:$0xf0]  ;;  %v5017_v57 = vor.u32 %v5564_v12, %v5016_v63  ;;  %v5644_v34 = vld [vmem:[#allocation4 + $0x2ac] sm:$0xf0]  ;;  %v5384_v58 = vld [vmem:[#allocation4 + $0x300] sm:$0xf] }
 0x565   :  { %3551 = vmatpush.bf16.msra.mxu0 %v5097_v27  ;;  %v5664_v27 = vld [vmem:[#allocation4 + $0x34c] sm:$0xf0]  ;;  %v5320_v33 = vld [vmem:[#allocation4 + $0x280] sm:$0xf]  ;;  %v5482_v8 = vld [vmem:[#allocation4 + $0x3d0] sm:$0xf0] }
 0x566   :  { %3571 = vmatpush.bf16.msra.mxu1 %v5209_v59  ;;  %v5128_v59 = vld [vmem:[#allocation4 + $0x100] sm:$0xf]  ;;  %v5417_v7 = vor.u32 %v5664_v27, %v5416_v30  ;;  %v5656_v1 = vld [vmem:[#allocation4 + $0x30c] sm:$0xf0]  ;;  %v5578_v37 = vld [vmem:[#allocation4 + $0xa4] sm:$0xf] }
 0x567   :  { %3607 = vmatpush.bf16.msra.mxu3 %v5497_v21  ;;  %2633 = vmatmul.bf16.gmra.mxu2 %v10684_v25  ;;  %v5449_v21 = vor.u32 %v5672_v55, %v5448_v22  ;;  %v5129_v23 = vor.u32 %v5592_v36, %v5128_v59  ;;  %v5614_v22 = vld [vmem:[#allocation4 + $0x1c4] sm:$0xf]  ;;  %v5226_v55 = vld [vmem:[#allocation4 + $0x1d0] sm:$0xf0]  ;;  %v5304_v16 = vld [vmem:[#allocation4 + $0x260] sm:$0xf] }
 0x568   :  { %2700 = vmatpush.bf16.msrb.mxu2 %v2425_v19  ;;  %v5065_v19 = vor.u32 %v5576_v24, %v5064_v28  ;;  %v5586_v28 = vld [vmem:[#allocation4 + $0xe4] sm:$0xf]  ;;  %v5114_v24 = vld [vmem:[#allocation4 + $0xf0] sm:$0xf0]  ;;  %v5229_v13 = vor.u32 %v5614_v22, %v5226_v55  ;;  %v5636_v14 = vld [vmem:[#allocation4 + $0x26c] sm:$0xf0] }
 0x569   :  { %3552 = vmatpush.bf16.msra.mxu0 %v5081_v50  ;;  %2652 = vmatmul.bf16.gmra.mxu3 %v10686_v29  ;;  %v5560_v50 = vld [vmem:[#allocation4 + $0xc] sm:$0xf0]  ;;  %v5117_v4 = vor.u32 %v5586_v28, %v5114_v24  ;;  %v5082_v42 = vld [vmem:[#allocation4 + $0xb0] sm:$0xf0]  ;;  %v5606_v62 = vld [vmem:[#allocation4 + $0x184] sm:$0xf] }
 0x56a   :  { %3572 = vmatpush.bf16.msra.mxu1 %v5193_v35  ;;  %v5400_v35 = vld [vmem:[#allocation4 + $0x320] sm:$0xf]  ;;  %v5001_v61 = vor.u32 %v5560_v50, %v5000_v41  ;;  %v5194_v40 = vld [vmem:[#allocation4 + $0x190] sm:$0xf0]  ;;  %v5085_v48 = vor.u32 %v5578_v37, %v5082_v42  ;;  %v5632_v63 = vld [vmem:[#allocation4 + $0x24c] sm:$0xf0] }
 0x56b   :  { %3608 = vmatpush.bf16.msra.mxu3 %v5481_v26  ;;  %v5352_v26 = vld [vmem:[#allocation4 + $0x2c0] sm:$0xf]  ;;  %v5401_v2 = vor.u32 %v5660_v5, %v5400_v35  ;;  %v5066_v59 = vld [vmem:[#allocation4 + $0x90] sm:$0xf0]  ;;  %v5197_v36 = vor.u32 %v5606_v62, %v5194_v40  ;;  %v5602_v27 = vld [vmem:[#allocation4 + $0x164] sm:$0xf] }
 0x56c   :  { %2701 = vmatpush.bf16.msrb.mxu2 %v13469_v60  ;;  %v5098_v60 = vld [vmem:[#allocation4 + $0xd0] sm:$0xf0]  ;;  %v5598_v5 = vld [vmem:[#allocation4 + $0x144] sm:$0xf]  ;;  %v5624_v22 = vld [vmem:[#allocation4 + $0x20c] sm:$0xf0] }
 0x56d   :  { %3553 = vmatpush.bf16.msra.mxu0 %v5065_v19  ;;  %2690 = vmatmul.bf16.gmra.mxu1 %v10684_v25  ;;  %v5648_v25 = vld [vmem:[#allocation4 + $0x2cc] sm:$0xf0]  ;;  %v5498_v19 = vld [vmem:[#allocation4 + $0x3f0] sm:$0xf0]  ;;  %v5101_v38 = vor.u32 %v5582_v15, %v5098_v60  ;;  %v5566_v24 = vld [vmem:[#allocation4 + $0x44] sm:$0xf] }
 0x56e   :  { %3573 = vmatpush.bf16.msra.mxu1 %v5177_v49  ;;  %v5353_v39 = vor.u32 %v5648_v25, %v5352_v26  ;;  %v5336_v49 = vld [vmem:[#allocation4 + $0x2a0] sm:$0xf]  ;;  %v5178_v12 = vld [vmem:[#allocation4 + $0x170] sm:$0xf0]  ;;  %v5562_v15 = vld [vmem:[#allocation4 + $0x24] sm:$0xf] }
 0x56f   :  { %3609 = vmatpush.bf16.msra.mxu3 %v5465_v46  ;;  %v5245_v46 = vor.u32 %v5618_v44, %v5242_v43  ;;  %v5337_v0 = vor.u32 %v5644_v34, %v5336_v49  ;;  %v5050_v44 = vld [vmem:[#allocation4 + $0x70] sm:$0xf0]  ;;  %v5272_v43 = vld [vmem:[#allocation4 + $0x220] sm:$0xf]  ;;  %v5248_v42 = vld [vmem:[#allocation4 + $0x1e8] sm:$0xf] }
 0x570   :  { %2702 = vmatpush.bf16.msrb.mxu2 %v2417_v9  ;;  %v5610_v9 = vld [vmem:[#allocation4 + $0x1a4] sm:$0xf]  ;;  %v5450_v35 = vld [vmem:[#allocation4 + $0x390] sm:$0xf0]  ;;  %v5256_v34 = vld [vmem:[#allocation4 + $0x200] sm:$0xf] }
 0x571   :  { %3554 = vmatpush.bf16.msra.mxu0 %v5049_v17  ;;  %v5213_v17 = vor.u32 %v5610_v9, %v5210_v6  ;;  %v5162_v41 = vld [vmem:[#allocation4 + $0x150] sm:$0xf0]  ;;  %v5590_v9 = vld [vmem:[#allocation4 + $0x104] sm:$0xf] }
 0x572   :  { %3574 = vmatpush.bf16.msra.mxu1 %v5161_v31  ;;  %v5640_v31 = vld [vmem:[#allocation4 + $0x28c] sm:$0xf0]  ;;  %v5034_v49 = vld [vmem:[#allocation4 + $0x50] sm:$0xf0] }
 0x573   :  { %3610 = vmatpush.bf16.msra.mxu3 %v5449_v21  ;;  %4994 = vmatmul.msk.bf16.vlgmr.msrb.gmra.mxu0 %vm895_vm3, %v10291_v52  ;;  %v5501_v21 = vor.u32 %v5682_v47, %v5498_v19  ;;  %v5321_v51 = vor.u32 %v5640_v31, %v5320_v33  ;;  %v5434_v55 = vld [vmem:[#allocation4 + $0x370] sm:$0xf0]  ;;  %v5650_v47 = vld [vmem:[#allocation4 + $0x2e4] sm:$0xf] }
 0x574   :  { %2703 = vmatpush.bf16.msrb.mxu2 %v2413_v53  ;;  %v5466_v53 = vld [vmem:[#allocation4 + $0x3b0] sm:$0xf0]  ;;  %v5662_v33 = vld [vmem:[#allocation4 + $0x344] sm:$0xf] }
 0x575   :  { %3555 = vmatpush.bf16.msra.mxu0 %v5033_v32  ;;  %v5288_v32 = vld [vmem:[#allocation4 + $0x240] sm:$0xf]  ;;  %v5370_v19 = vld [vmem:[#allocation4 + $0x2f0] sm:$0xf0] }
 0x576   :  { %3575 = vmatpush.bf16.msra.mxu1 %v5145_v54  ;;  %v5674_v54 = vld [vmem:[#allocation4 + $0x3a4] sm:$0xf]  ;;  %v5289_v25 = vor.u32 %v5632_v63, %v5288_v32  ;;  %v5018_v60 = vld [vmem:[#allocation4 + $0x30] sm:$0xf0]  ;;  %v5373_v31 = vor.u32 %v5650_v47, %v5370_v19  ;;  %v5104_v63 = vld [vmem:[#allocation4 + $0xc8] sm:$0xf] }
 0x577   :  { %3611 = vmatpush.bf16.msra.mxu3 %v5433_v3  ;;  %2704 = vmatmul.bf16.vlgmr.msrb.gmra.mxu2 %v10571_v20  ;;  %v5385_v20 = vor.u32 %v5656_v1, %v5384_v58  ;;  %v5305_v3 = vor.u32 %v5636_v14, %v5304_v16  ;;  %v5469_v30 = vor.u32 %v5674_v54, %v5466_v53  ;;  %v5146_v58 = vld [vmem:[#allocation4 + $0x130] sm:$0xf0]  ;;  %v13474_v1 = vld [vmem:[#allocation10_spill] sm:$0xff]  ;;  %v5120_v14 = vld [vmem:[#allocation4 + $0xe8] sm:$0xf] }
 0x578   :  { %3588 = vmatpush.bf16.msra.mxu2 %v5369_v18  ;;  %v5574_v18 = vld [vmem:[#allocation4 + $0x84] sm:$0xf]  ;;  %v5021_v6 = vor.u32 %v5562_v15, %v5018_v60  ;;  %v5002_v37 = vld [vmem:[#allocation4 + $0x10] sm:$0xf0]  ;;  %v5200_v15 = vld [vmem:[#allocation4 + $0x188] sm:$0xf] }
 0x579   :  { %3556 = vmatpush.bf16.msra.mxu0 %v5017_v57  ;;  %4996 = vmatmul.msk.bf16.vlgmr.msrb.gmra.mxu3 %vm895_vm3, %v10291_v52  ;;  %v5485_v52 = vor.u32 %v5678_v11, %v5482_v8  ;;  %v5069_v26 = vor.u32 %v5574_v18, %v5066_v59  ;;  %v5628_v57 = vld [vmem:[#allocation4 + $0x22c] sm:$0xf0]  ;;  %v5646_v11 = vld [vmem:[#allocation4 + $0x2c4] sm:$0xf]  ;;  %v5354_v8 = vld [vmem:[#allocation4 + $0x2d0] sm:$0xf0] }
 0x57a   :  { %3576 = vmatpush.bf16.msra.mxu1 %v5129_v23  ;;  %v5570_v23 = vld [vmem:[#allocation4 + $0x64] sm:$0xf]  ;;  %v5402_v53 = vld [vmem:[#allocation4 + $0x330] sm:$0xf0]  ;;  %v5609_v60 = vld [vmem:[#allocation4 + $0x194] sm:$0xf0] }
 0x57b   :  { %3612 = vmatpush.bf16.msra.mxu3 %v5417_v7  ;;  %v5181_v7 = vor.u32 %v5602_v27, %v5178_v12  ;;  %v5053_v50 = vor.u32 %v5570_v23, %v5050_v44  ;;  %v5658_v54 = vld [vmem:[#allocation4 + $0x324] sm:$0xf]  ;;  %v5585_v12 = vld [vmem:[#allocation4 + $0xd4] sm:$0xf0] }
 0x57c   :  { %3589 = vmatpush.bf16.msra.mxu2 %v5353_v39  ;;  %v5670_v39 = vld [vmem:[#allocation4 + $0x384] sm:$0xf]  ;;  %v5405_v27 = vor.u32 %v5658_v54, %v5402_v53  ;;  %v5274_v54 = vld [vmem:[#allocation4 + $0x230] sm:$0xf0]  ;;  %v5456_v53 = vld [vmem:[#allocation4 + $0x388] sm:$0xf] }
 0x57d   :  { %3557 = vmatpush.bf16.msra.mxu0 %v5001_v61  ;;  %3577 = vmatmul.bf16.vlgmr.msra.gmra.mxu1 %v13473_v45  ;;  %v5453_v28 = vor.u32 %v5670_v39, %v5450_v35  ;;  %v5594_v61 = vld [vmem:[#allocation4 + $0x124] sm:$0xf]  ;;  %v5322_v35 = vld [vmem:[#allocation4 + $0x290] sm:$0xf0] }
 0x57e   :  { %3645 = vmatpush.bf16.msrb.mxu1 %v5245_v46  ;;  %v5273_v46 = vor.u32 %v5628_v57, %v5272_v43  ;;  %v5642_v59 = vld [vmem:[#allocation4 + $0x2a4] sm:$0xf]  ;;  %v5386_v43 = vld [vmem:[#allocation4 + $0x310] sm:$0xf0]  ;;  %v5685_v57 = vld [vmem:[#allocation4 + $0x3f4] sm:$0xf0] }
 0x57f   :  { %3613 = vmatpush.bf16.msra.mxu3 %v5401_v2  ;;  %v5165_v2 = vor.u32 %v5598_v5, %v5162_v41  ;;  %v5654_v44 = vld [vmem:[#allocation4 + $0x304] sm:$0xf]  ;;  %v5105_v5 = vor.u32 %v5585_v12, %v5104_v63  ;;  %v5168_v63 = vld [vmem:[#allocation4 + $0x148] sm:$0xf] }
 0x580   :  { %3590 = vmatpush.bf16.msra.mxu2 %v5337_v0  ;;  %v5257_v0 = vor.u32 %v5624_v22, %v5256_v34  ;;  %v5638_v39 = vld [vmem:[#allocation4 + $0x284] sm:$0xf]  ;;  %v5581_v34 = vld [vmem:[#allocation4 + $0xb4] sm:$0xf0] }
 0x581   :  { %3626 = vmatpush.bf16.msrb.mxu0 %v5117_v4  ;;  %v5037_v4 = vor.u32 %v5566_v24, %v5034_v49  ;;  %v13477_v24 = vld [vmem:[#allocation12_spill] sm:$0xff]  ;;  %v5325_v22 = vor.u32 %v5638_v39, %v5322_v35  ;;  %v5669_v39 = vld [vmem:[#allocation4 + $0x374] sm:$0xf0] }
 0x582   :  { %3646 = vmatpush.bf16.msrb.mxu1 %v5229_v13 }
 0x583   :  { %3614 = vmatpush.bf16.msra.mxu3 %v5385_v20  ;;  %4995 = vmatmul.msk.bf16.gmra.mxu0 %vm895_vm3, %v10448_v56  ;;  %v5149_v20 = vor.u32 %v5594_v61, %v5146_v58  ;;  %v5681_v61 = vld [vmem:[#allocation4 + $0x3d4] sm:$0xf0]  ;;  %v5634_v58 = vld [vmem:[#allocation4 + $0x264] sm:$0xf] }
 0x584   :  { %3591 = vmatpush.bf16.msra.mxu2 %v5321_v51  ;;  %v13475_v51 = vld [vmem:[#allocation7_spill] sm:$0xff] }
 0x585   :  { %3627 = vmatpush.bf16.msrb.mxu0 %v5101_v38  ;;  %v5130_v38 = vld [vmem:[#allocation4 + $0x110] sm:$0xf0] }
 0x586   :  { %3647 = vmatpush.bf16.msrb.mxu1 %v5213_v17  ;;  %v5621_v17 = vld [vmem:[#allocation4 + $0x1f4] sm:$0xf0]  ;;  %v5133_v40 = vor.u32 %v5590_v9, %v5130_v38  ;;  %v5630_v9 = vld [vmem:[#allocation4 + $0x244] sm:$0xf]  ;;  %v13478_v38 = vld [vmem:[#allocation9_spill] sm:$0xff] }
 0x587   :  { %3683 = vmatpush.bf16.msrb.mxu3 %v5501_v21  ;;  %2709 = vmatmul.bf16.gmra.mxu2 %v10686_v29  ;;  %v5666_v29 = vld [vmem:[#allocation4 + $0x364] sm:$0xf]  ;;  %v5249_v18 = vor.u32 %v5621_v17, %v5248_v42  ;;  %v5605_v42 = vld [vmem:[#allocation4 + $0x174] sm:$0xf0] }
 0x588   :  { %3592 = vmatpush.bf16.msra.mxu2 %v5305_v3  ;;  %v5437_v13 = vor.u32 %v5666_v29, %v5434_v55  ;;  %v5558_v21 = vld [vmem:[#allocation4 + $0x4] sm:$0xf]  ;;  %v5488_v29 = vld [vmem:[#allocation4 + $0x3c8] sm:$0xf] }
 0x589   :  { %3628 = vmatpush.bf16.msrb.mxu0 %v5085_v48  ;;  %4997 = vmatmul.msk.bf16.gmra.mxu3 %vm895_vm3, %v10448_v56  ;;  %v5418_v56 = vld [vmem:[#allocation4 + $0x350] sm:$0xf0]  ;;  %v5357_v48 = vor.u32 %v5646_v11, %v5354_v8  ;;  %v5005_v3 = vor.u32 %v5558_v21, %v5002_v37  ;;  %v5677_v21 = vld [vmem:[#allocation4 + $0x3b4] sm:$0xf0]  ;;  %v5201_v11 = vor.u32 %v5609_v60, %v5200_v15  ;;  %v5184_v37 = vld [vmem:[#allocation4 + $0x168] sm:$0xf] }
 0x58a   :  { %3648 = vmatpush.bf16.msrb.mxu1 %v5197_v36  ;;  %v5421_v16 = vor.u32 %v5662_v33, %v5418_v56  ;;  %v5338_v36 = vld [vmem:[#allocation4 + $0x2b0] sm:$0xf0]  ;;  %v5577_v33 = vld [vmem:[#allocation4 + $0x94] sm:$0xf0]  ;;  %v5472_v56 = vld [vmem:[#allocation4 + $0x3a8] sm:$0xf] }
 0x58b   :  { %3684 = vmatpush.bf16.msrb.mxu3 %v5485_v52  ;;  %v5589_v52 = vld [vmem:[#allocation4 + $0xf4] sm:$0xf0]  ;;  %v5341_v23 = vor.u32 %v5642_v59, %v5338_v36  ;;  %v5473_v17 = vor.u32 %v5677_v21, %v5472_v56  ;;  %v13479_v36 = vld [vmem:[#allocation13_spill] sm:$0xff]  ;;  %v5587_v21 = vld [vmem:[#allocation4 + $0xec] sm:$0xf] }
 0x58c   :  { %3593 = vmatpush.bf16.msra.mxu2 %v5289_v25  ;;  %v5121_v32 = vor.u32 %v5589_v52, %v5120_v14  ;;  %v5617_v25 = vld [vmem:[#allocation4 + $0x1d4] sm:$0xf0] }
 0x58d   :  { %3629 = vmatpush.bf16.msrb.mxu0 %v5069_v26  ;;  %3582 = vmatmul.bf16.gmra.mxu1 %v13474_v1  ;;  %v5232_v26 = vld [vmem:[#allocation4 + $0x1c8] sm:$0xf]  ;;  %v5573_v14 = vld [vmem:[#allocation4 + $0x74] sm:$0xf0] }
 0x58e   :  { %3649 = vmatpush.bf16.msrb.mxu1 %v5181_v7  ;;  %v5504_v7 = vld [vmem:[#allocation4 + $0x3e8] sm:$0xf]  ;;  %v5233_v41 = vor.u32 %v5617_v25, %v5232_v26  ;;  %v5569_v25 = vld [vmem:[#allocation4 + $0x54] sm:$0xf0] }
 0x58f   :  { %3685 = vmatpush.bf16.msrb.mxu3 %v5469_v30  ;;  %v13476_v30 = vld [vmem:[#allocation11_spill] sm:$0xff]  ;;  %v5505_v49 = vor.u32 %v5685_v57, %v5504_v7  ;;  %v5040_v26 = vld [vmem:[#allocation4 + $0x48] sm:$0xf]  ;;  %v5258_v57 = vld [vmem:[#allocation4 + $0x210] sm:$0xf0] }
 0x590   :  { %3594 = vmatpush.bf16.msra.mxu2 %v5273_v46  ;;  %v5216_v46 = vld [vmem:[#allocation4 + $0x1a8] sm:$0xf]  ;;  %v5622_v7 = vld [vmem:[#allocation4 + $0x204] sm:$0xf]  ;;  %v5649_v15 = vld [vmem:[#allocation4 + $0x2d4] sm:$0xf0] }
 0x591   :  { %3630 = vmatpush.bf16.msrb.mxu0 %v5053_v50  ;;  %v5389_v50 = vor.u32 %v5654_v44, %v5386_v43  ;;  %v5440_v43 = vld [vmem:[#allocation4 + $0x368] sm:$0xf]  ;;  %v5561_v56 = vld [vmem:[#allocation4 + $0x14] sm:$0xf0] }
 0x592   :  { %3650 = vmatpush.bf16.msrb.mxu1 %v5165_v2  ;;  %v11100_v62 = vpop.f32.mrf.mxu1  ;;  %v5088_v2 = vld [vmem:[#allocation4 + $0xa8] sm:$0xf] }
 0x593   :  { %3686 = vmatpush.bf16.msrb.mxu3 %v5453_v28  ;;  %3558 = vmatmul.bf16.vlgmr.msra.gmra.mxu0 %v13475_v51  ;;  %v5613_v28 = vld [vmem:[#allocation4 + $0x1b4] sm:$0xf0] }
 0x594   :  { %3595 = vmatpush.bf16.msra.mxu2 %v5257_v0  ;;  %v11104_v55 = vpop.f32.mrf.mxu0  ;;  %v5217_v19 = vor.u32 %v5613_v28, %v5216_v46  ;;  %v5089_v0 = vor.u32 %v5581_v34, %v5088_v2  ;;  %v5152_v46 = vld [vmem:[#allocation4 + $0x128] sm:$0xf]  ;;  %v5597_v28 = vld [vmem:[#allocation4 + $0x134] sm:$0xf0] }
 0x595   :  { %3631 = vmatpush.bf16.msrb.mxu0 %v5037_v4  ;;  %v5306_v4 = vld [vmem:[#allocation4 + $0x270] sm:$0xf0]  ;;  %v5024_v2 = vld [vmem:[#allocation4 + $0x28] sm:$0xf]  ;;  %v5565_v34 = vld [vmem:[#allocation4 + $0x34] sm:$0xf0] }
 0x596   :  { %3651 = vmatpush.bf16.msrb.mxu1 %v5149_v20  ;;  %v5072_v20 = vld [vmem:[#allocation4 + $0x88] sm:$0xf] }
 0x597   :  { %3687 = vmatpush.bf16.msrb.mxu3 %v5437_v13  ;;  %3596 = vmatmul.bf16.vlgmr.msra.gmra.mxu2 %v13476_v30  ;;  %v5489_v13 = vor.u32 %v5681_v61, %v5488_v29  ;;  %v5073_v8 = vor.u32 %v5577_v33, %v5072_v20  ;;  %v5441_v29 = vor.u32 %v5669_v39, %v5440_v43  ;;  %v5424_v61 = vld [vmem:[#allocation4 + $0x348] sm:$0xf]  ;;  %v5506_v43 = vld [vmem:[#allocation4 + $0x3f8] sm:$0xf0]  ;;  %v11127_v39 = vpop.permute.xlu2 %2462 }
 0x598   :  { %3664 = vmatpush.bf16.msrb.mxu2 %v5373_v31  ;;  %v5309_v31 = vor.u32 %v5634_v58, %v5306_v4  ;;  %v5665_v4 = vld [vmem:[#allocation4 + $0x354] sm:$0xf0]  ;;  %v5008_v20 = vld [vmem:[#allocation4 + $0x8] sm:$0xf] }
 0x599   :  { %3632 = vmatpush.bf16.msrb.mxu0 %v5021_v6  ;;  %3615 = vmatmul.bf16.vlgmr.msra.gmra.mxu3 %v13477_v24  ;;  %v5290_v6 = vld [vmem:[#allocation4 + $0x250] sm:$0xf0]  ;;  %v5136_v33 = vld [vmem:[#allocation4 + $0x108] sm:$0xf] }
 0x59a   :  { %3652 = vmatpush.bf16.msrb.mxu1 %v5133_v40  ;;  %v11107_v47 = vpop.f32.mrf.mxu1  ;;  %v5293_v52 = vor.u32 %v5630_v9, %v5290_v6  ;;  %v11110_v40 = vpop.f32.mrf.mxu2  ;;  %v5122_v9 = vld [vmem:[#allocation4 + $0xf8] sm:$0xf0] }
 0x59b   :  { %3688 = vmatpush.bf16.msrb.mxu3 %v5421_v16  ;;  %v5056_v16 = vld [vmem:[#allocation4 + $0x68] sm:$0xf] }
 0x59c   :  { %3665 = vmatpush.bf16.msrb.mxu2 %v5357_v48  ;;  %v5626_v48 = vld [vmem:[#allocation4 + $0x224] sm:$0xf]  ;;  %v11112_v59 = vpop.f32.mrf.mxu0 }
 0x59d   :  { %3633 = vmatpush.bf16.msrb.mxu0 %v5005_v3  ;;  %3653 = vmatmul.bf16.vlgmr.msrb.gmra.mxu1 %v13473_v45  ;;  %v5673_v3 = vld [vmem:[#allocation4 + $0x394] sm:$0xf0] }
 0x59e   :  { %3721 = vmatpush.bf16.msra.mxu1 %v5249_v18  ;;  %v5185_v18 = vor.u32 %v5605_v42, %v5184_v37  ;;  %v5457_v44 = vor.u32 %v5673_v3, %v5456_v53  ;;  %v5619_v42 = vld [vmem:[#allocation4 + $0x1ec] sm:$0xf]  ;;  %v5009_v53 = vor.u32 %v5561_v56, %v5008_v20  ;;  %v5125_v3 = vor.u32 %v5587_v21, %v5122_v9  ;;  %v5218_v20 = vld [vmem:[#allocation4 + $0x1b8] sm:$0xf0]  ;;  %v11136_v56 = vpop.permute.xlu0 %2467 }
 0x59f   :  { %3689 = vmatpush.bf16.msrb.mxu3 %v5405_v27  ;;  %v5601_v27 = vld [vmem:[#allocation4 + $0x154] sm:$0xf0]  ;;  %v5575_v21 = vld [vmem:[#allocation4 + $0x8c] sm:$0xf]  ;;  %v5074_v9 = vld [vmem:[#allocation4 + $0x98] sm:$0xf0] }
 0x5a0   :  { %3666 = vmatpush.bf16.msrb.mxu2 %v5341_v23  ;;  %v5277_v23 = vor.u32 %v5626_v48, %v5274_v54  ;;  %v5169_v35 = vor.u32 %v5601_v27, %v5168_v63  ;;  %v5344_v48 = vld [vmem:[#allocation4 + $0x2a8] sm:$0xf]  ;;  %v5645_v54 = vld [vmem:[#allocation4 + $0x2b4] sm:$0xf0]  ;;  %v5583_v63 = vld [vmem:[#allocation4 + $0xcc] sm:$0xf] }
 0x5a1   :  { %3702 = vmatpush.bf16.msra.mxu0 %v5121_v32  ;;  %v5057_v32 = vor.u32 %v5573_v14, %v5056_v16  ;;  %v5661_v14 = vld [vmem:[#allocation4 + $0x334] sm:$0xf0]  ;;  %v5106_v27 = vld [vmem:[#allocation4 + $0xd8] sm:$0xf0] }
 0x5a2   :  { %3722 = vmatpush.bf16.msra.mxu1 %v5233_v41  ;;  %v11115_v12 = vpop.f32.mrf.mxu1  ;;  %v5653_v41 = vld [vmem:[#allocation4 + $0x2f4] sm:$0xf0]  ;;  %v11119_v60 = vpop.f32.mrf.mxu2 }
 0x5a3   :  { %3690 = vmatpush.bf16.msrb.mxu3 %v5389_v50  ;;  %3563 = vmatmul.bf16.gmra.mxu0 %v13478_v38  ;;  %v5041_v50 = vor.u32 %v5569_v25, %v5040_v26  ;;  %v5345_v26 = vor.u32 %v5645_v54, %v5344_v48  ;;  %v5392_v25 = vld [vmem:[#allocation4 + $0x308] sm:$0xf]  ;;  %v5571_v48 = vld [vmem:[#allocation4 + $0x6c] sm:$0xf] }
 0x5a4   :  { %3667 = vmatpush.bf16.msrb.mxu2 %v5325_v22  ;;  %v5261_v22 = vor.u32 %v5622_v7, %v5258_v57  ;;  %v11121_v6 = vpop.f32.mrf.mxu0  ;;  %v5615_v7 = vld [vmem:[#allocation4 + $0x1cc] sm:$0xf]  ;;  %v5234_v57 = vld [vmem:[#allocation4 + $0x1d8] sm:$0xf0] }
 0x5a5   :  { %3703 = vmatpush.bf16.msra.mxu0 %v5105_v5  ;;  %v5376_v5 = vld [vmem:[#allocation4 + $0x2e8] sm:$0xf]  ;;  %v5607_v54 = vld [vmem:[#allocation4 + $0x18c] sm:$0xf] }
 0x5a6   :  { %3723 = vmatpush.bf16.msra.mxu1 %v5217_v19  ;;  %v5377_v58 = vor.u32 %v5653_v41, %v5376_v5  ;;  %v5153_v19 = vor.u32 %v5597_v28, %v5152_v46  ;;  %v5328_v5 = vld [vmem:[#allocation4 + $0x288] sm:$0xf]  ;;  %v5641_v41 = vld [vmem:[#allocation4 + $0x294] sm:$0xf0] }
 0x5a7   :  { %3759 = vmatpush.bf16.msra.mxu3 %v5505_v49  ;;  %3601 = vmatmul.bf16.gmra.mxu2 %v13479_v36  ;;  %v13480_v49 = vld [vmem:[#allocation14_spill] sm:$0xff] }
 0x5a8   :  { %3668 = vmatpush.bf16.msrb.mxu2 %v5309_v31  ;;  %v5593_v31 = vld [vmem:[#allocation4 + $0x114] sm:$0xf0] }
 0x5a9   :  { %3704 = vmatpush.bf16.msra.mxu0 %v5089_v0  ;;  %3620 = vmatmul.bf16.gmra.mxu3 %v13480_v49  ;;  %v5360_v0 = vld [vmem:[#allocation4 + $0x2c8] sm:$0xf] }
 0x5aa   :  { %3724 = vmatpush.bf16.msra.mxu1 %v5201_v11  ;;  %v5425_v11 = vor.u32 %v5665_v4, %v5424_v61  ;;  %v5361_v37 = vor.u32 %v5649_v15, %v5360_v0  ;;  %v11123_v16 = vpop.f32.mrf.mxu1  ;;  %v5237_v61 = vor.u32 %v5615_v7, %v5234_v57  ;;  %v5679_v4 = vld [vmem:[#allocation4 + $0x3cc] sm:$0xf]  ;;  %v5329_v0 = vor.u32 %v5641_v41, %v5328_v5 }
 0x5ab   :  { %3760 = vmatpush.bf16.msra.mxu3 %v5489_v13  ;;  %v5025_v13 = vor.u32 %v5565_v34, %v5024_v2  ;;  %v5579_v2 = vld [vmem:[#allocation4 + $0xac] sm:$0xf]  ;;  %v5090_v34 = vld [vmem:[#allocation4 + $0xb8] sm:$0xf0] }
 0x5ac   :  { %3669 = vmatpush.bf16.msrb.mxu2 %v5293_v52  ;;  %v5137_v52 = vor.u32 %v5593_v31, %v5136_v33  ;;  %v5611_v15 = vld [vmem:[#allocation4 + $0x1ac] sm:$0xf]  ;;  %v5312_v33 = vld [vmem:[#allocation4 + $0x268] sm:$0xf]  ;;  %v5637_v31 = vld [vmem:[#allocation4 + $0x274] sm:$0xf0] }
 0x5ad   :  { %3705 = vmatpush.bf16.msra.mxu0 %v5073_v8  ;;  %3658 = vmatmul.bf16.gmra.mxu1 %v13474_v1  ;;  %v5408_v8 = vld [vmem:[#allocation4 + $0x328] sm:$0xf]  ;;  %v5671_v57 = vld [vmem:[#allocation4 + $0x38c] sm:$0xf] }
 0x5ae   :  { %3725 = vmatpush.bf16.msra.mxu1 %v5185_v18  ;;  %v5603_v41 = vld [vmem:[#allocation4 + $0x16c] sm:$0xf] }
 0x5af   :  { %3761 = vmatpush.bf16.msra.mxu3 %v5473_v17  ;;  %v5250_v17 = vld [vmem:[#allocation4 + $0x1f8] sm:$0xf0]  ;;  %v11131_v46 = vpop.f32.mrf.mxu3 }
 0x5b0   :  { %3670 = vmatpush.bf16.msrb.mxu2 %v5277_v23  ;;  %v5253_v18 = vor.u32 %v5619_v42, %v5250_v17  ;;  %v5657_v23 = vld [vmem:[#allocation4 + $0x314] sm:$0xf0]  ;;  %v5675_v42 = vld [vmem:[#allocation4 + $0x3ac] sm:$0xf]  ;;  %v5474_v17 = vld [vmem:[#allocation4 + $0x3b8] sm:$0xf0] }
 0x5b1   :  { %3706 = vmatpush.bf16.msra.mxu0 %v5057_v32  ;;  %v5409_v32 = vor.u32 %v5661_v14, %v5408_v8  ;;  %v5393_v28 = vor.u32 %v5657_v23, %v5392_v25  ;;  %v5313_v14 = vor.u32 %v5637_v31, %v5312_v33  ;;  %v5477_v23 = vor.u32 %v5675_v42, %v5474_v17 }
 0x5b2   :  { %3726 = vmatpush.bf16.msra.mxu1 %v5169_v35  ;;  %v5109_v35 = vor.u32 %v5583_v63, %v5106_v27  ;;  %v11140_v63 = vpop.permute.xlu2 %2457  ;;  %v2521_v27 = vadd.f32 %v11121_v6, %v11127_v39 }
 0x5b3   :  { %3762 = vmatpush.bf16.msra.mxu3 %v5457_v44  ;;  %3634 = vmatmul.bf16.vlgmr.msrb.gmra.mxu0 %v13475_v51  ;;  %v5683_v44 = vld [vmem:[#allocation4 + $0x3ec] sm:$0xf]  ;;  %v2518_v5 = vadd.f32 %v11112_v59, %v11140_v63 }
 0x5b4   :  { %3671 = vmatpush.bf16.msrb.mxu2 %v5261_v22 }
 0x5b5   :  { %3707 = vmatpush.bf16.msra.mxu0 %v5041_v50  ;;  %v11129_v50 = vpop.f32.mrf.mxu2  ;;  %v2537_v33 = vadd.f32 %v11107_v47, %v2518_v5 }
 0x5b6   :  { %3727 = vmatpush.bf16.msra.mxu1 %v5153_v19  ;;  %v5490_v19 = vld [vmem:[#allocation4 + $0x3d8] sm:$0xf0] }
 0x5b7   :  { %3763 = vmatpush.bf16.msra.mxu3 %v5441_v29  ;;  %3672 = vmatmul.bf16.vlgmr.msrb.gmra.mxu2 %v13476_v30  ;;  %v5509_v29 = vor.u32 %v5683_v44, %v5506_v43  ;;  %v5493_v8 = vor.u32 %v5679_v4, %v5490_v19  ;;  %v11148_v43 = vpop.f32.mrf.mxu3 }
 0x5b8   :  { %3740 = vmatpush.bf16.msra.mxu2 %v5377_v58  ;;  %v2522_v58 = vpop.f32.mrf.mxu0 }
 0x5b9   :  { %3708 = vmatpush.bf16.msra.mxu0 %v5025_v13  ;;  %3691 = vmatmul.bf16.vlgmr.msrb.gmra.mxu3 %v13477_v24  ;;  %v5093_v13 = vor.u32 %v5579_v2, %v5090_v34  ;;  %v11152_v2 = vpop.permute.xlu1 %2452  ;;  %v5567_v34 = vld [vmem:[#allocation4 + $0x4c] sm:$0xf] }
 0x5ba   :  { %3728 = vmatpush.bf16.msra.mxu1 %v5137_v52  ;;  %v11133_v22 = vpop.f32.mrf.mxu1  ;;  %v5077_v52 = vor.u32 %v5575_v21, %v5074_v9  ;;  %v5599_v21 = vld [vmem:[#allocation4 + $0x14c] sm:$0xf] }
 0x5bb   :  { %3764 = vmatpush.bf16.msra.mxu3 %v5425_v11  ;;  %v2523_v11 = vadd.f32 %v2522_v58, %v11136_v56  ;;  %v2540_v58 = vadd.f32 %v11115_v12, %v2521_v27  ;;  %v5563_v12 = vld [vmem:[#allocation4 + $0x2c] sm:$0xf]  ;;  %v5378_v27 = vld [vmem:[#allocation4 + $0x2f8] sm:$0xf0] }
 0x5bc   :  { %3741 = vmatpush.bf16.msra.mxu2 %v5361_v37  ;;  %v5221_v37 = vor.u32 %v5611_v15, %v5218_v20  ;;  %v5629_v15 = vld [vmem:[#allocation4 + $0x234] sm:$0xf0]  ;;  %v5442_v20 = vld [vmem:[#allocation4 + $0x378] sm:$0xf0] }
 0x5bd   :  { %3709 = vmatpush.bf16.msra.mxu0 %v5009_v53  ;;  %3729 = vmatmul.bf16.vlgmr.msra.gmra.mxu1 %v13473_v45  ;;  %v5202_v53 = vld [vmem:[#allocation4 + $0x198] sm:$0xf0]  ;;  %v2560_v44 = vpop.f32.mrf.mxu2 }
 0x5be   :  { %3797 = vmatpush.bf16.msrb.mxu1 %v5253_v18  ;;  %v5296_v18 = vld [vmem:[#allocation4 + $0x248] sm:$0xf]  ;;  %v5205_v7 = vor.u32 %v5607_v54, %v5202_v53  ;;  %v5663_v54 = vld [vmem:[#allocation4 + $0x34c] sm:$0xf]  ;;  %v5426_v53 = vld [vmem:[#allocation4 + $0x358] sm:$0xf0] }
 0x5bf   :  { %3765 = vmatpush.bf16.msra.mxu3 %v5409_v32  ;;  %v5633_v32 = vld [vmem:[#allocation4 + $0x254] sm:$0xf0] }
 0x5c0   :  { %3742 = vmatpush.bf16.msra.mxu2 %v5345_v26  ;;  %v2542_v26 = vadd.f32 %v11123_v16, %v2523_v11  ;;  %v5297_v16 = vor.u32 %v5633_v32, %v5296_v18  ;;  %v5026_v11 = vld [vmem:[#allocation4 + $0x38] sm:$0xf0]  ;;  %v2556_v18 = vadd.f32 %v11119_v60, %v2537_v33  ;;  %v5429_v60 = vor.u32 %v5663_v54, %v5426_v53 }
 0x5c1   :  { %3778 = vmatpush.bf16.msrb.mxu0 %v5125_v3  ;;  %v5058_v3 = vld [vmem:[#allocation4 + $0x78] sm:$0xf0] }
 0x5c2   :  { %3798 = vmatpush.bf16.msrb.mxu1 %v5237_v61  ;;  %v11145_v25 = vpop.f32.mrf.mxu1  ;;  %v5061_v6 = vor.u32 %v5571_v48, %v5058_v3  ;;  %v2516_v61 = vadd.f32 %v11104_v55, %v11152_v2  ;;  %v2561_v4 = vadd.f32 %v2560_v44, %v2542_v26  ;;  %v5170_v55 = vld [vmem:[#allocation4 + $0x158] sm:$0xf0]  ;;  %v5625_v48 = vld [vmem:[#allocation4 + $0x214] sm:$0xf0]  ;;  %v5595_v3 = vld [vmem:[#allocation4 + $0x12c] sm:$0xf]  ;;  %v11165_v26 = vpop.f32.mrf.mxu3 }
 0x5c3   :  { %3766 = vmatpush.bf16.msra.mxu3 %v5393_v28  ;;  %3639 = vmatmul.bf16.gmra.mxu0 %v13478_v38  ;;  %v5186_v28 = vld [vmem:[#allocation4 + $0x178] sm:$0xf0]  ;;  %v5173_v47 = vor.u32 %v5599_v21, %v5170_v55  ;;  %v5559_v44 = vld [vmem:[#allocation4 + $0xc] sm:$0xf]  ;;  %vm2738_vm10 = vcmp.ge.f32.partialorder %v2556_v18, 0.0 }
 0x5c4   :  { %3743 = vmatpush.bf16.msra.mxu2 %v5329_v0  ;;  %v5280_v0 = vld [vmem:[#allocation4 + $0x228] sm:$0xf]  ;;  %v5189_v59 = vor.u32 %v5603_v41, %v5186_v28  ;;  %v2762_v42 = vmul.f32 0.2, %v2561_v4  ;;  %v5154_v32 = vld [vmem:[#allocation4 + $0x138] sm:$0xf0] }
 0x5c5   :  { %3779 = vmatpush.bf16.msrb.mxu0 %v5109_v35  ;;  %v5458_v35 = vld [vmem:[#allocation4 + $0x398] sm:$0xf0]  ;;  %v5281_v9 = vor.u32 %v5629_v15, %v5280_v0  ;;  %vm2746_vm15 = vcmp.ge.f32.partialorder %v2561_v4, 0.0 }
 0x5c6   :  { %3799 = vmatpush.bf16.msrb.mxu1 %v5221_v37  ;;  %v5461_v19 = vor.u32 %v5671_v57, %v5458_v35  ;;  %v2559_v37 = vadd.f32 %v11129_v50, %v2540_v58  ;;  %v5651_v50 = vld [vmem:[#allocation4 + $0x2ec] sm:$0xf]  ;;  %v5410_v41 = vld [vmem:[#allocation4 + $0x338] sm:$0xf0] }
 0x5c7   :  { %3835 = vmatpush.bf16.msrb.mxu3 %v5509_v29  ;;  %v5042_v29 = vld [vmem:[#allocation4 + $0x58] sm:$0xf0]  ;;  %3677 = vmatmul.bf16.gmra.mxu2 %v13479_v36  ;;  %v5381_v28 = vor.u32 %v5651_v50, %v5378_v27  ;;  %v5591_v58 = vld [vmem:[#allocation4 + $0x10c] sm:$0xf] }
 0x5c8   :  { %3744 = vmatpush.bf16.msra.mxu2 %v5313_v14  ;;  %v5045_v31 = vor.u32 %v5567_v34, %v5042_v29  ;;  %v2758_v35 = vmul.f32 0.2, %v2559_v37  ;;  %vm2742_vm9 = vcmp.ge.f32.partialorder %v2559_v37, 0.0  ;;  %v2754_v34 = vmul.f32 0.2, %v2556_v18 }
 0x5c9   :  { %3780 = vmatpush.bf16.msrb.mxu0 %v5093_v13  ;;  %v5667_v13 = vld [vmem:[#allocation4 + $0x36c] sm:$0xf]  ;;  %3696 = vmatmul.bf16.gmra.mxu3 %v13480_v49  ;;  %v11172_v29 = vsel %vm2746_vm15, %v2561_v4, %v2762_v42  ;;  %v5362_v0 = vld [vmem:[#allocation4 + $0x2d8] sm:$0xf0] }
 0x5ca   :  { %3800 = vmatpush.bf16.msrb.mxu1 %v5205_v7  ;;  %v11161_v17 = vpop.f32.mrf.mxu1  ;;  %v5445_v14 = vor.u32 %v5667_v13, %v5442_v20  ;;  %v5010_v7 = vld [vmem:[#allocation4 + $0x18] sm:$0xf0]  ;;  %v11183_v55 = vsel %vm2738_vm10, %v2556_v18, %v2754_v34  ;;  %v2579_v42 = vpop.f32.mrf.mxu3 }
 0x5cb   :  { %3836 = vmatpush.bf16.msrb.mxu3 %v5493_v8  ;;  %v2535_v8 = vadd.f32 %v11100_v62, %v2516_v61  ;;  %v5029_v62 = vor.u32 %v5563_v12, %v5026_v11  ;;  %v5013_v61 = vor.u32 %v5559_v44, %v5010_v7  ;;  %v5394_v21 = vld [vmem:[#allocation4 + $0x318] sm:$0xf0]  ;;  %v5643_v12 = vld [vmem:[#allocation4 + $0x2ac] sm:$0xf] }
 0x5cc   :  { %3745 = vmatpush.bf16.msra.mxu2 %v5297_v16  ;;  %v5659_v16 = vld [vmem:[#allocation4 + $0x32c] sm:$0xf]  ;;  %v5346_v11 = vld [vmem:[#allocation4 + $0x2b8] sm:$0xf0] }
 0x5cd   :  { %3781 = vmatpush.bf16.msrb.mxu0 %v5077_v52  ;;  %v5264_v52 = vld [vmem:[#allocation4 + $0x208] sm:$0xf]  ;;  %3734 = vmatmul.bf16.gmra.mxu1 %v13474_v1  ;;  %v2554_v57 = vadd.f32 %v11110_v40, %v2535_v8  ;;  %v5647_v40 = vld [vmem:[#allocation4 + $0x2cc] sm:$0xf]  ;;  %v5413_v20 = vor.u32 %v5659_v16, %v5410_v41  ;;  %v5330_v54 = vld [vmem:[#allocation4 + $0x298] sm:$0xf0] }
 0x5ce   :  { %3801 = vmatpush.bf16.msrb.mxu1 %v5189_v59  ;;  %v11175_v59 = vsel %vm2742_vm9, %v2559_v37, %v2758_v35  ;;  %v5631_v7 = vld [vmem:[#allocation4 + $0x24c] sm:$0xf]  ;;  %v2575_v35 = vadd.f32 %v11148_v43, %v11140_v63  ;;  %v5282_v34 = vld [vmem:[#allocation4 + $0x238] sm:$0xf0] }
 0x5cf   :  { %3837 = vmatpush.bf16.msrb.mxu3 %v5477_v23  ;;  %v5265_v23 = vor.u32 %v5625_v48, %v5264_v52  ;;  %v2750_v15 = vmul.f32 0.2, %v2554_v57  ;;  %vm2734_vm11 = vcmp.ge.f32.partialorder %v2554_v57, 0.0  ;;  %v3866_v4 = vpack.c.bf16 %v11172_v29, %v11175_v59 }
 0x5d0   :  { %3746 = vmatpush.bf16.msra.mxu2 %v5281_v9  ;;  %v11169_v5 = vpop.f32.mrf.mxu0  ;;  %v5365_v9 = vor.u32 %v5647_v40, %v5362_v0  ;;  %v5349_v48 = vor.u32 %v5643_v12, %v5346_v11 }
 0x5d1   :  { %3782 = vmatpush.bf16.msrb.mxu0 %v5061_v6  ;;  %v5157_v6 = vor.u32 %v5595_v3, %v5154_v32  ;;  %v11185_v8 = vsel %vm2734_vm11, %v2554_v57, %v2750_v15  ;;  %v5314_v32 = vld [vmem:[#allocation4 + $0x278] sm:$0xf0] }
 0x5d2   :  { %3802 = vmatpush.bf16.msrb.mxu1 %v5173_v47  ;;  %v11177_v13 = vpop.f32.mrf.mxu1  ;;  %v3862_v52 = vpack.c.bf16 %v11183_v55, %v11185_v8  ;;  %v5639_v47 = vld [vmem:[#allocation4 + $0x28c] sm:$0xf]  ;;  %v5298_v57 = vld [vmem:[#allocation4 + $0x258] sm:$0xf0] }
 0x5d3   :  { %3838 = vmatpush.bf16.msrb.mxu3 %v5461_v19  ;;  %v5138_v19 = vld [vmem:[#allocation4 + $0x118] sm:$0xf0]  ;;  %3710 = vmatmul.bf16.vlgmr.msra.gmra.mxu0 %v13475_v51  ;;  %v5333_v18 = vor.u32 %v5639_v47, %v5330_v54 }
 0x5d4   :  { %3747 = vmatpush.bf16.msra.mxu2 %v5265_v23  ;;  %v5141_v33 = vor.u32 %v5591_v58, %v5138_v19  ;;  %v2578_v23 = vadd.f32 %v11165_v26, %v11127_v39  ;;  %v5301_v26 = vor.u32 %v5631_v7, %v5298_v57 }
 0x5d5   :  { %3783 = vmatpush.bf16.msrb.mxu0 %v5045_v31  ;;  %v5655_v31 = vld [vmem:[#allocation4 + $0x30c] sm:$0xf] }
 0x5d6   :  { %3803 = vmatpush.bf16.msrb.mxu1 %v5157_v6  ;;  %v5397_v37 = vor.u32 %v5655_v31, %v5394_v21 }
 0x5d7   :  { %3839 = vmatpush.bf16.msrb.mxu3 %v5445_v14  ;;  %3748 = vmatmul.bf16.vlgmr.msra.gmra.mxu2 %v13476_v30 }
 0x5d8   :  { %3816 = vmatpush.bf16.msrb.mxu2 %v5381_v28  ;;  %v2593_v14 = vpop.f32.mrf.mxu0  ;;  %v5627_v28 = vld [vmem:[#allocation4 + $0x22c] sm:$0xf] }
 0x5d9   :  { %3784 = vmatpush.bf16.msrb.mxu0 %v5029_v62  ;;  %3767 = vmatmul.bf16.vlgmr.msra.gmra.mxu3 %v13477_v24  ;;  %v5635_v62 = vld [vmem:[#allocation4 + $0x26c] sm:$0xf]  ;;  %v2594_v41 = vadd.f32 %v2593_v14, %v2575_v35 }
 0x5da   :  { %3804 = vmatpush.bf16.msrb.mxu1 %v5141_v33  ;;  %v11190_v53 = vpop.f32.mrf.mxu2  ;;  %v11192_v3 = vpop.f32.mrf.mxu1  ;;  %v5317_v44 = vor.u32 %v5635_v62, %v5314_v32 }
 0x5db   :  { %3840 = vmatpush.bf16.msrb.mxu3 %v5429_v60  ;;  %v2613_v0 = vadd.f32 %v11145_v25, %v2594_v41 }
 0x5dc   :  { %3817 = vmatpush.bf16.msrb.mxu2 %v5365_v9  ;;  %v11196_v50 = vpop.f32.mrf.mxu3 }
 0x5dd   :  { %3785 = vmatpush.bf16.msrb.mxu0 %v5013_v61  ;;  %3805 = vmatmul.bf16.vlgmr.msrb.gmra.mxu1 %v13473_v45  ;;  %v2573_v45 = vadd.f32 %v11131_v46, %v11152_v2  ;;  %v2580_v61 = vadd.f32 %v2579_v42, %v11136_v56  ;;  %v5285_v46 = vor.u32 %v5627_v28, %v5282_v34  ;;  %vm2739_vm14 = vcmp.ge.f32.partialorder %v2613_v0, 0.0 }
 0x5df   :  { %3841 = vmatpush.bf16.msrb.mxu3 %v5413_v20  ;;  %v2592_v58 = vadd.f32 %v11169_v5, %v2573_v45  ;;  %v5623_v20 = vld [vmem:[#allocation4 + $0x20c] sm:$0xf] }
 0x5e0   :  { %3818 = vmatpush.bf16.msrb.mxu2 %v5349_v48  ;;  %v2596_v27 = vpop.f32.mrf.mxu0 }
 0x5e1   :  { %3919 = vmatpush.bf16.msra.mxu0 %v3866_v4  ;;  %v2597_v60 = vadd.f32 %v2596_v27, %v2578_v23  ;;  %v2611_v33 = vadd.f32 %v11133_v22, %v2592_v58 }
 0x5e2   :  { %v2631_v6 = vpop.f32.mrf.mxu2  ;;  %v11202_v16 = vpop.f32.mrf.mxu1 }
 0x5e3   :  { %3842 = vmatpush.bf16.msrb.mxu3 %v5397_v37  ;;  %3715 = vmatmul.bf16.gmra.mxu0 %v13478_v38  ;;  %v2616_v43 = vadd.f32 %v11161_v17, %v2597_v60  ;;  %v2755_v17 = vmul.f32 0.2, %v2613_v0  ;;  %v2751_v11 = vmul.f32 0.2, %v2611_v33  ;;  %vm2735_vm15 = vcmp.ge.f32.partialorder %v2611_v33, 0.0 }
 0x5e4   :  { %3819 = vmatpush.bf16.msrb.mxu2 %v5333_v18  ;;  %v2650_v19 = vpop.f32.mrf.mxu3  ;;  %v2632_v7 = vadd.f32 %v2631_v6, %v11140_v63 }
 0x5e5   :  { %3920 = vmatpush.bf16.msra.mxu0 %v3862_v52  ;;  %v2759_v31 = vmul.f32 0.2, %v2616_v43  ;;  %vm2743_vm12 = vcmp.ge.f32.partialorder %v2616_v43, 0.0 }
 0x5e6   :  { %v2651_v60 = vadd.f32 %v2650_v19, %v2632_v7 }
 0x5e7   :  { %5688 = vmatpush.bf16.msra.mxu3 %v3866_v4  ;;  %3753 = vmatmul.bf16.gmra.mxu2 %v13479_v36  ;;  %v5266_v4 = vld [vmem:[#allocation4 + $0x218] sm:$0xf0]  ;;  %v11218_v37 = vsel %vm2743_vm12, %v2616_v43, %v2759_v31 }
 0x5e8   :  { %3820 = vmatpush.bf16.msrb.mxu2 %v5317_v44  ;;  %v2598_v40 = vpop.f32.mrf.mxu0  ;;  %v5269_v25 = vor.u32 %v5623_v20, %v5266_v4 }
 0x5e9   :  { %v2599_v15 = vadd.f32 %v2598_v40, %v2580_v61  ;;  %3772 = vmatmul.bf16.gmra.mxu3 %v13480_v49 }
 0x5ea   :  { %v2634_v9 = vpop.f32.mrf.mxu2  ;;  %v11214_v5 = vpop.f32.mrf.mxu1 }
 0x5eb   :  { %5689 = vmatpush.bf16.msra.mxu3 %v3862_v52  ;;  %v2618_v21 = vadd.f32 %v11177_v13, %v2599_v15  ;;  %v11224_v52 = vsel %vm2739_vm14, %v2613_v0, %v2755_v17 }
 0x5ec   :  { %3821 = vmatpush.bf16.msrb.mxu2 %v5301_v26  ;;  %v2653_v13 = vpop.f32.mrf.mxu3 }
 0x5ed   :  { %vm2747_vm13 = vcmp.ge.f32.partialorder %v2618_v21, 0.0  ;;  %v2763_v12 = vmul.f32 0.2, %v2618_v21  ;;  %3810 = vmatmul.bf16.gmra.mxu1 %v13474_v1  ;;  %v11229_v1 = vsel %vm2735_vm15, %v2611_v33, %v2751_v11 }
 0x5ee   :  { %v3863_v54 = vpack.c.bf16 %v11224_v52, %v11229_v1 }
 0x5ef   :  { %v11220_v22 = vsel %vm2747_vm13, %v2618_v21, %v2763_v12 }
 0x5f0   :  { %3822 = vmatpush.bf16.msrb.mxu2 %v5285_v46  ;;  %v2667_v42 = vpop.f32.mrf.mxu0  ;;  %v3867_v14 = vpack.c.bf16 %v11220_v22, %v11218_v37 }
 0x5f2   :  { %3938 = vmatpush.bf16.msra.mxu1 %v3867_v14  ;;  %v2636_v48 = vpop.f32.mrf.mxu2  ;;  %v11226_v47 = vpop.f32.mrf.mxu1 }
 0x5f3   :  { %3786 = vmatmul.bf16.vlgmr.msrb.gmra.mxu0 %v13475_v51  ;;  %v2635_v51 = vadd.f32 %v2634_v9, %v11127_v39  ;;  %v2637_v45 = vadd.f32 %v2636_v48, %v11136_v56  ;;  %v2694_v7 = vadd.f32 %v11226_v47, %v11136_v56 }
 0x5f4   :  { %3823 = vmatpush.bf16.msrb.mxu2 %v5269_v25  ;;  %v2655_v18 = vpop.f32.mrf.mxu3 }
 0x5f5   :  { %v2654_v57 = vadd.f32 %v2653_v13, %v2635_v51  ;;  %v2656_v26 = vadd.f32 %v2655_v18, %v2637_v45  ;;  %v2689_v45 = vadd.f32 %v11202_v16, %v11140_v63 }
 0x5f6   :  { %3939 = vmatpush.bf16.msra.mxu1 %v3863_v54 }
 0x5f7   :  { %3824 = vmatmul.bf16.vlgmr.msrb.gmra.mxu2 %v13476_v30  ;;  %v2630_v30 = vadd.f32 %v11190_v53, %v11152_v2 }
 0x5f8   :  { %v2669_v62 = vpop.f32.mrf.mxu0 }
 0x5f9   :  { %3843 = vmatmul.bf16.vlgmr.msrb.gmra.mxu3 %v13477_v24  ;;  %v2649_v24 = vadd.f32 %v11196_v50, %v2630_v30  ;;  %v2670_v28 = vadd.f32 %v2669_v62, %v2651_v60 }
 0x5fa   :  { %v11234_v32 = vpop.f32.mrf.mxu2  ;;  %v11236_v27 = vpop.f32.mrf.mxu1 }
 0x5fb   :  { %v2668_v58 = vadd.f32 %v2667_v42, %v2649_v24  ;;  %vm2740_vm11 = vcmp.ge.f32.partialorder %v2670_v28, 0.0 }
 0x5fc   :  { %v11239_v23 = vpop.f32.mrf.mxu3 }
 0x5fd   :  { %v2752_v0 = vmul.f32 0.2, %v2668_v58  ;;  %vm2736_vm12 = vcmp.ge.f32.partialorder %v2668_v58, 0.0 }
 0x5ff   :  { %v11258_v31 = vsel %vm2736_vm12, %v2668_v58, %v2752_v0 }
 0x600   :  { %v2672_v44 = vpop.f32.mrf.mxu0 }
 0x601   :  { %v2673_v41 = vadd.f32 %v2672_v44, %v2654_v57  ;;  %v2692_v57 = vadd.f32 %v11214_v5, %v11127_v39 }
 0x602   :  { %v2707_v35 = vpop.f32.mrf.mxu2  ;;  %v3580_v34 = vpop.f32.mrf.mxu1 }
 0x603   :  { %3791 = vmatmul.bf16.gmra.mxu0 %v13478_v38  ;;  %v2760_v43 = vmul.f32 0.2, %v2673_v41  ;;  %vm2744_vm9 = vcmp.ge.f32.partialorder %v2673_v41, 0.0  ;;  %v2756_v38 = vmul.f32 0.2, %v2670_v28  ;;  %v2708_v58 = vadd.f32 %v2707_v35, %v2689_v45 }
 0x604   :  { %v2726_v61 = vpop.f32.mrf.mxu3 }
 0x605   :  { %v11249_v15 = vsel %vm2744_vm9, %v2673_v41, %v2760_v43  ;;  %v11256_v46 = vsel %vm2740_vm11, %v2670_v28, %v2756_v38  ;;  %v2727_v39 = vadd.f32 %v2726_v61, %v2708_v58 }
 0x606   :  { %v3864_v21 = vpack.c.bf16 %v11256_v46, %v11258_v31 }
 0x607   :  { %3829 = vmatmul.bf16.gmra.mxu2 %v13479_v36  ;;  %vm2741_vm15 = vcmp.ge.f32.partialorder %v2727_v39, 0.0 }
 0x608   :  { %v2674_v6 = vpop.f32.mrf.mxu0 }
 0x609   :  { %v2675_v40 = vadd.f32 %v2674_v6, %v2656_v26  ;;  %3848 = vmatmul.bf16.gmra.mxu3 %v13480_v49  ;;  %v2687_v6 = vadd.f32 %v11192_v3, %v11152_v2 }
 0x60a   :  { %v2710_v19 = vpop.f32.mrf.mxu2  ;;  %v3583_v33 = vpop.f32.mrf.mxu1 }
 0x60b   :  { %vm2748_vm10 = vcmp.ge.f32.partialorder %v2675_v40, 0.0  ;;  %v2764_v53 = vmul.f32 0.2, %v2675_v40  ;;  %v2711_v41 = vadd.f32 %v2710_v19, %v2692_v57  ;;  %v2706_v47 = vadd.f32 %v11234_v32, %v2687_v6 }
 0x60c   :  { %v2729_v20 = vpop.f32.mrf.mxu3  ;;  %v2757_v32 = vmul.f32 0.2, %v2727_v39 }
 0x60d   :  { %v11251_v50 = vsel %vm2748_vm10, %v2675_v40, %v2764_v53  ;;  %v2730_v43 = vadd.f32 %v2729_v20, %v2711_v41  ;;  %vm3908_vm10 = vcmask 523264  }
 0x60e   :  { %v3868_v36 = vpack.c.bf16 %v11251_v50, %v11249_v15 }
 0x60f   :  { %v2761_v2 = vmul.f32 0.2, %v2730_v43  ;;  %vm2745_vm14 = vcmp.ge.f32.partialorder %v2730_v43, 0.0 }
 0x610   :  { %v3559_v4 = vpop.f32.mrf.mxu0  ;;  %3957 = vmatpush.bf16.msra.mxu2 %v3868_v36 }
 0x611   :  { %v3579_v5 = vadd.f32 %v11236_v27, %v3559_v4 }
 0x612   :  { %v2712_v9 = vpop.f32.mrf.mxu2  ;;  %v3585_v49 = vpop.f32.mrf.mxu1 }
 0x613   :  { %v2713_v30 = vadd.f32 %v2712_v9, %v2694_v7  ;;  %v11281_v9 = vsel %vm2745_vm14, %v2730_v43, %v2761_v2 }
 0x614   :  { %3958 = vmatpush.bf16.msra.mxu2 %v3864_v21  ;;  %v2731_v17 = vpop.f32.mrf.mxu3  ;;  %v2725_v21 = vadd.f32 %v11239_v23, %v2706_v47 }
 0x615   :  { %v2732_v24 = vadd.f32 %v2731_v17, %v2713_v30 }
 0x616   :  { %v2753_v4 = vmul.f32 0.2, %v2725_v21  ;;  %vm2737_vm9 = vcmp.ge.f32.partialorder %v2725_v21, 0.0 }
 0x617   :  { %v2765_v63 = vmul.f32 0.2, %v2732_v24  ;;  %vm2749_vm13 = vcmp.ge.f32.partialorder %v2732_v24, 0.0 }
 0x618   :  { %v3561_v12 = vpop.f32.mrf.mxu0 }
 0x619   :  { %v3581_v40 = vadd.f32 %v3580_v34, %v3561_v12  ;;  %v11279_v61 = vsel %vm2749_vm13, %v2732_v24, %v2765_v63 }
 0x61a   :  { %v3597_v25 = vpop.f32.mrf.mxu2  ;;  %v11262_v14 = vpop.f32.mrf.mxu1  ;;  %v3869_v23 = vpack.c.bf16 %v11279_v61, %v11281_v9 }
 0x61b   :  { %v3598_v3 = vadd.f32 %v3597_v25, %v3579_v5  ;;  %v11288_v25 = vld [vmem:[%s12604_s5] sm:$0xff] }
 0x61c   :  { %v3616_v11 = vpop.f32.mrf.mxu3 }
 0x61d   :  { %v3617_v27 = vadd.f32 %v3616_v11, %v3598_v3  ;;  %v11293_v11 = vld [vmem:[%s12604_s5 + $0x8] sm:$0xff] }
 0x620   :  { %v3564_v13 = vpop.f32.mrf.mxu0 }
 0x621   :  { %v3584_v26 = vadd.f32 %v3583_v33, %v3564_v13  ;;  %v11295_v13 = vsel %vm2741_vm15, %v2727_v39, %v2757_v32 }
 0x622   :  { %v3599_v42 = vpop.f32.mrf.mxu2  ;;  %v11264_v62 = vpop.f32.mrf.mxu1 }
 0x623   :  { %v3600_v16 = vadd.f32 %v3599_v42, %v3581_v40 }
 0x624   :  { %v3618_v48 = vpop.f32.mrf.mxu3 }
 0x625   :  { %v3619_v35 = vadd.f32 %v3618_v48, %v3600_v16 }
 0x627   :  { %v3854_v17 = vpack.c.bf16 %v3619_v35, %v3617_v27 }
 0x628   :  { %v3566_v54 = vpop.f32.mrf.mxu0 }
 0x629   :  { %v3586_v28 = vadd.f32 %v3585_v49, %v3566_v54  ;;  %v11297_v54 = vsel %vm2737_vm9, %v2725_v21, %v2753_v4 }
 0x62a   :  { %v3602_v18 = vpop.f32.mrf.mxu2  ;;  %v3659_v19 = vpop.f32.mrf.mxu1 }
 0x62b   :  { %v3603_v38 = vadd.f32 %v3602_v18, %v3584_v26  ;;  %v3865_v18 = vpack.c.bf16 %v11295_v13, %v11297_v54 }
 0x62c   :  { %v3621_v44 = vpop.f32.mrf.mxu3 }
 0x62d   :  { %v3622_v36 = vadd.f32 %v3621_v44, %v3603_v38 }
 0x630   :  { %v11266_v51 = vpop.f32.mrf.mxu0 }
 0x632   :  { %v3604_v60 = vpop.f32.mrf.mxu2  ;;  %v3661_v42 = vpop.f32.mrf.mxu1 }
 0x633   :  { %v3605_v56 = vadd.f32 %v3604_v60, %v3586_v28 }
 0x634   :  { %v3623_v53 = vpop.f32.mrf.mxu3 }
 0x635   :  { %v3624_v33 = vadd.f32 %v3623_v53, %v3605_v56  ;;  %v3655_v56 = vadd.f32 %v11262_v14, %v11266_v51 }
 0x637   :  { %v3858_v34 = vpack.c.bf16 %v3624_v33, %v3622_v36 }
 0x638   :  { %v3637_v0 = vpop.f32.mrf.mxu0 }
 0x639   :  { %3921 = vmatpush.bf16.msra.mxu0 %v3858_v34  ;;  %5690 = vmatpush.bf16.msra.mxu3 %v3858_v34  ;;  %v3657_v28 = vadd.f32 %v11264_v62, %v3637_v0 }
 0x63a   :  { %v3673_v20 = vpop.f32.mrf.mxu2  ;;  %v3730_v30 = vpop.f32.mrf.mxu1 }
 0x63b   :  { %v3674_v53 = vadd.f32 %v3673_v20, %v3655_v56 }
 0x63c   :  { %v3692_v12 = vpop.f32.mrf.mxu3 }
 0x63d   :  { %3922 = vmatpush.bf16.msra.mxu0 %v3854_v17  ;;  %5691 = vmatpush.bf16.msra.mxu3 %v3854_v17  ;;  %v3693_v33 = vadd.f32 %v3692_v12, %v3674_v53 }
 0x640   :  { %v3640_v49 = vpop.f32.mrf.mxu0  ;;  %5518 = vmatmul.msk.bf16.vlgmr.msra.gmra.mxu0 %vm3908_vm10, %v11288_v25  ;;  %5519 = vmatmul.msk.bf16.vlgmr.msra.gmra.mxu3 %vm3908_vm10, %v11293_v11 }
 0x641   :  { %3976 = vmatpush.bf16.msrb.mxu3 %v3869_v23  ;;  %v3660_v24 = vadd.f32 %v3659_v19, %v3640_v49 }
 0x642   :  { %v3675_v48 = vpop.f32.mrf.mxu2  ;;  %v3732_v6 = vpop.f32.mrf.mxu1 }
 0x643   :  { %v3676_v47 = vadd.f32 %v3675_v48, %v3657_v28 }
 0x644   :  { %v3694_v44 = vpop.f32.mrf.mxu3 }
 0x645   :  { %3977 = vmatpush.bf16.msrb.mxu3 %v3865_v18  ;;  %v3695_v63 = vadd.f32 %v3694_v44, %v3676_v47 }
 0x647   :  { %v3855_v19 = vpack.c.bf16 %v3695_v63, %v3693_v33 }
 0x648   :  { %v3642_v7 = vpop.f32.mrf.mxu0 }
 0x649   :  { %v3662_v26 = vadd.f32 %v3661_v42, %v3642_v7 }
 0x64a   :  { %v3678_v57 = vpop.f32.mrf.mxu2  ;;  %v3735_v0 = vpop.f32.mrf.mxu1 }
 0x64b   :  { %v3679_v58 = vadd.f32 %v3678_v57, %v3660_v24 }
 0x64c   :  { %v3697_v60 = vpop.f32.mrf.mxu3 }
 0x64d   :  { %v3698_v39 = vadd.f32 %v3697_v60, %v3679_v58 }
 0x650   :  { %v3711_v45 = vpop.f32.mrf.mxu0 }
 0x651   :  { %v3731_v48 = vadd.f32 %v3730_v30, %v3711_v45 }
 0x652   :  { %v3680_v41 = vpop.f32.mrf.mxu2  ;;  %v3737_v35 = vpop.f32.mrf.mxu1 }
 0x653   :  { %v3681_v43 = vadd.f32 %v3680_v41, %v3662_v26 }
 0x654   :  { %v3699_v40 = vpop.f32.mrf.mxu3 }
 0x655   :  { %v3700_v5 = vadd.f32 %v3699_v40, %v3681_v43 }
 0x657   :  { %v3859_v16 = vpack.c.bf16 %v3700_v5, %v3698_v39 }
 0x658   :  { %v3713_v38 = vpop.f32.mrf.mxu0 }
 0x659   :  { %3940 = vmatpush.bf16.msra.mxu1 %v3859_v16  ;;  %v3733_v23 = vadd.f32 %v3732_v6, %v3713_v38 }
 0x65a   :  { %v3749_v36 = vpop.f32.mrf.mxu2  ;;  %v3806_v17 = vpop.f32.mrf.mxu1 }
 0x65b   :  { %v3750_v57 = vadd.f32 %v3749_v36, %v3731_v48 }
 0x65c   :  { %v3768_v21 = vpop.f32.mrf.mxu3 }
 0x65d   :  { %3941 = vmatpush.bf16.msra.mxu1 %v3855_v19  ;;  %v3769_v26 = vadd.f32 %v3768_v21, %v3750_v57 }
 0x660   :  { %v3716_v62 = vpop.f32.mrf.mxu0  ;;  %5520 = vmatmul.msk.bf16.vlgmr.msra.gmra.mxu1 %vm3908_vm10, %v11288_v25 }
 0x661   :  { %v3736_v27 = vadd.f32 %v3735_v0, %v3716_v62 }
 0x662   :  { %v3751_v2 = vpop.f32.mrf.mxu2  ;;  %v3808_v43 = vpop.f32.mrf.mxu1 }
 0x663   :  { %v3752_v18 = vadd.f32 %v3751_v2, %v3733_v23 }
 0x664   :  { %v3770_v3 = vpop.f32.mrf.mxu3 }
 0x665   :  { %v3771_v60 = vadd.f32 %v3770_v3, %v3752_v18 }
 0x667   :  { %v3856_v58 = vpack.c.bf16 %v3771_v60, %v3769_v26 }
 0x668   :  { %v3718_v14 = vpop.f32.mrf.mxu0 }
 0x669   :  { %v3738_v4 = vadd.f32 %v3737_v35, %v3718_v14 }
 0x66a   :  { %v3754_v51 = vpop.f32.mrf.mxu2  ;;  %v3811_v45 = vpop.f32.mrf.mxu1 }
 0x66b   :  { %v3755_v12 = vadd.f32 %v3754_v51, %v3736_v27 }
 0x66c   :  { %v3773_v34 = vpop.f32.mrf.mxu3 }
 0x66d   :  { %v3774_v44 = vadd.f32 %v3773_v34, %v3755_v12 }
 0x670   :  { %v3787_v32 = vpop.f32.mrf.mxu0  ;;  %5521 = vmatmul.msk.bf16.gmra.mxu1 %vm3908_vm10, %v11293_v11 }
 0x671   :  { %v3807_v62 = vadd.f32 %v3806_v17, %v3787_v32  ;;  %v11322_v32 = vpop.permute.xlu0 %3890 }
 0x672   :  { %v3756_v20 = vpop.f32.mrf.mxu2  ;;  %v3813_v5 = vpop.f32.mrf.mxu1 }
 0x673   :  { %v3757_v49 = vadd.f32 %v3756_v20, %v3738_v4  ;;  %v11320_v4 = vpop.permute.xlu1 %3895 }
 0x674   :  { %v3775_v42 = vpop.f32.mrf.mxu3 }
 0x675   :  { %v3776_v7 = vadd.f32 %v3775_v42, %v3757_v49  ;;  %v11327_v42 = vpop.permute.xlu2 %4011 }
 0x677   :  { %v3860_v41 = vpack.c.bf16 %v3776_v7, %v3774_v44 }
 0x678   :  { %v3789_v28 = vpop.f32.mrf.mxu0 }
 0x679   :  { %3959 = vmatpush.bf16.msra.mxu2 %v3860_v41  ;;  %v3809_v36 = vadd.f32 %v3808_v43, %v3789_v28  ;;  %v11330_v18 = vpop.permute.xlu0 %3880 }
 0x67a   :  { %v3825_v24 = vpop.f32.mrf.mxu2 }
 0x67b   :  { %v3826_v14 = vadd.f32 %v3825_v24, %v3807_v62  ;;  %v11325_v49 = vpop.permute.xlu1 %3885 }
 0x67c   :  { %v3844_v40 = vpop.f32.mrf.mxu3 }
 0x67d   :  { %3960 = vmatpush.bf16.msra.mxu2 %v3856_v58  ;;  %v3845_v34 = vadd.f32 %v3844_v40, %v3826_v14 }
 0x680   :  { %5522 = vmatmul.msk.bf16.vlgmr.msra.gmra.mxu2 %vm3908_vm10, %v11288_v25  ;;  %v3792_v6 = vpop.f32.mrf.mxu0 }
 0x681   :  { %v3812_v63 = vadd.f32 %v3811_v45, %v3792_v6 }
 0x682   :  { %v3827_v56 = vpop.f32.mrf.mxu2 }
 0x683   :  { %v3828_v0 = vadd.f32 %v3827_v56, %v3809_v36  ;;  %v11341_v56 = vld [vmem:[%s12606_s7] sm:$0x1] }
 0x684   :  { %v3846_v30 = vpop.f32.mrf.mxu3 }
 0x685   :  { %v3847_v51 = vadd.f32 %v3846_v30, %v3828_v0 }
 0x687   :  { %v3857_v20 = vpack.c.bf16 %v3847_v51, %v3845_v34 }
 0x688   :  { %v3794_v39 = vpop.f32.mrf.mxu0 }
 0x689   :  { %v3814_v16 = vadd.f32 %v3813_v5, %v3794_v39 }
 0x68a   :  { %v3830_v38 = vpop.f32.mrf.mxu2 }
 0x68b   :  { %v3831_v33 = vadd.f32 %v3830_v38, %v3812_v63 }
 0x68c   :  { %v3849_v47 = vpop.f32.mrf.mxu3 }
 0x68d   :  { %v3850_v2 = vadd.f32 %v3849_v47, %v3831_v33 }
 0x690   :  { %5523 = vmatmul.msk.bf16.gmra.mxu2 %vm3908_vm10, %v11293_v11 }
 0x692   :  { %v3832_v53 = vpop.f32.mrf.mxu2 }
 0x693   :  { %v3833_v19 = vadd.f32 %v3832_v53, %v3814_v16 }
 0x694   :  { %v3851_v21 = vpop.f32.mrf.mxu3 }
 0x695   :  { %v3852_v3 = vadd.f32 %v3851_v21, %v3833_v19 }
 0x697   :  { %v3861_v35 = vpack.c.bf16 %v3852_v3, %v3850_v2 }
 0x699   :  { %3978 = vmatpush.bf16.msrb.mxu3 %v3861_v35 }
 0x69d   :  { %3979 = vmatpush.bf16.msrb.mxu3 %v3857_v20 }
 0x6a0   :  { %5524 = vmatmul.msk.bf16.vlgmr.msrb.gmra.mxu3 %vm3908_vm10, %v11288_v25 }
 0x6b0   :  { %5525 = vmatmul.msk.bf16.gmra.mxu3 %vm3908_vm10, %v11293_v11 }
 0x6bd   :  { %v3924_v27 = vpop.f32.mrf.mxu0 }
 0x6be   :  { %v3925_v11 = vadd.f32 %v3924_v27, %v11330_v18 }
 0x6c0   :  { %v4014_v41 = vmul.f32 %v11327_v42, %v3925_v11  ;;  %vm3992_vm14 = vcmp.ge.f32.partialorder %v3925_v11, 0.0 }
 0x6c2   :  { %v4030_v43 = vsel %vm3992_vm14, %v3925_v11, %v4014_v41 }
 0x6c3   :  { %v3929_v17 = vpop.f32.mrf.mxu3 }
 0x6c4   :  { %v3930_v12 = vadd.f32 %v3929_v17, %v11322_v32 }
 0x6c5   :  { %v3926_v23 = vpop.f32.mrf.mxu0 }
 0x6c6   :  { %v3927_v48 = vadd.f32 %v3926_v23, %v11325_v49  ;;  %v4022_v44 = vmul.f32 %v11327_v42, %v3930_v12  ;;  %vm4000_vm11 = vcmp.ge.f32.partialorder %v3930_v12, 0.0 }
 0x6c8   :  { %v4018_v57 = vmul.f32 %v11327_v42, %v3927_v48  ;;  %vm3996_vm13 = vcmp.ge.f32.partialorder %v3927_v48, 0.0  ;;  %v4038_v24 = vsel %vm4000_vm11, %v3930_v12, %v4022_v44 }
 0x6ca   :  { %v4034_v58 = vsel %vm3996_vm13, %v3927_v48, %v4018_v57 }
 0x6cb   :  { %v3931_v25 = vpop.f32.mrf.mxu3  ;;  %v4047_v40 = vpack.c.bf16 %v4034_v58, %v4030_v43 }
 0x6cc   :  { %v3932_v7 = vadd.f32 %v3931_v25, %v11320_v4 }
 0x6ce   :  { %vm4004_vm12 = vcmp.ge.f32.partialorder %v3932_v7, 0.0  ;;  %v4026_v60 = vmul.f32 %v11327_v42, %v3932_v7 }
 0x6d0   :  { %v4042_v26 = vsel %vm4004_vm12, %v3932_v7, %v4026_v60 }
 0x6d1   :  { %v4051_v28 = vpack.c.bf16 %v4042_v26, %v4038_v24 }
 0x6d3   :  { %4071 = vmatpush.bf16.msrb.mxu0 %v4051_v28 }
 0x6d7   :  { %4072 = vmatpush.bf16.msrb.mxu0 %v4047_v40 }
 0x6da   :  { %5526 = vmatmul.msk.bf16.vlgmr.msrb.gmra.mxu0 %vm895_vm3, %v11341_v56 }
 0x6dd   :  { %v3943_v6 = vpop.f32.mrf.mxu1 }
 0x6de   :  { %v3944_v5 = vadd.f32 %v3943_v6, %v11330_v18 }
 0x6e0   :  { %v4015_v33 = vmul.f32 %v11327_v42, %v3944_v5  ;;  %vm3993_vm11 = vcmp.ge.f32.partialorder %v3944_v5, 0.0 }
 0x6e2   :  { %v4031_v2 = vsel %vm3993_vm11, %v3944_v5, %v4015_v33 }
 0x6e5   :  { %v3945_v30 = vpop.f32.mrf.mxu1 }
 0x6e6   :  { %v3946_v47 = vadd.f32 %v3945_v30, %v11325_v49 }
 0x6e8   :  { %v4019_v16 = vmul.f32 %v11327_v42, %v3946_v47  ;;  %vm3997_vm10 = vcmp.ge.f32.partialorder %v3946_v47, 0.0 }
 0x6ea   :  { %v4035_v0 = vsel %vm3997_vm10, %v3946_v47, %v4019_v16 }
 0x6eb   :  { %v4048_v3 = vpack.c.bf16 %v4035_v0, %v4031_v2 }
 0x6ed   :  { %v3948_v45 = vpop.f32.mrf.mxu1 }
 0x6ee   :  { %v3949_v38 = vadd.f32 %v3948_v45, %v11322_v32 }
 0x6f0   :  { %v4023_v53 = vmul.f32 %v11327_v42, %v3949_v38  ;;  %vm4001_vm15 = vcmp.ge.f32.partialorder %v3949_v38, 0.0 }
 0x6f2   :  { %v4039_v19 = vsel %vm4001_vm15, %v3949_v38, %v4023_v53 }
 0x6f5   :  { %v3950_v39 = vpop.f32.mrf.mxu1 }
 0x6f6   :  { %v3951_v63 = vadd.f32 %v3950_v39, %v11320_v4 }
 0x6f8   :  { %vm4005_vm9 = vcmp.ge.f32.partialorder %v3951_v63, 0.0  ;;  %v4027_v36 = vmul.f32 %v11327_v42, %v3951_v63 }
 0x6fa   :  { %v4043_v21 = vsel %vm4005_vm9, %v3951_v63, %v4027_v36 }
 0x6fb   :  { %v4052_v62 = vpack.c.bf16 %v4043_v21, %v4039_v19 }
 0x6fd   :  { %4084 = vmatpush.bf16.msrb.mxu1 %v4052_v62 }
 0x701   :  { %4085 = vmatpush.bf16.msrb.mxu1 %v4048_v3 }
 0x703   :  { %v3962_v14 = vpop.f32.mrf.mxu2 }
 0x704   :  { %5527 = vmatmul.msk.bf16.vlgmr.msrb.gmra.mxu1 %vm895_vm3, %v11341_v56  ;;  %v3963_v17 = vadd.f32 %v3962_v14, %v11330_v18 }
 0x706   :  { %v4016_v11 = vmul.f32 %v11327_v42, %v3963_v17  ;;  %vm3994_vm15 = vcmp.ge.f32.partialorder %v3963_v17, 0.0 }
 0x708   :  { %v4032_v24 = vsel %vm3994_vm15, %v3963_v17, %v4016_v11 }
 0x70b   :  { %v3964_v51 = vpop.f32.mrf.mxu2 }
 0x70c   :  { %v3965_v20 = vadd.f32 %v3964_v51, %v11325_v49 }
 0x70e   :  { %v4020_v48 = vmul.f32 %v11327_v42, %v3965_v20  ;;  %vm3998_vm14 = vcmp.ge.f32.partialorder %v3965_v20, 0.0 }
 0x710   :  { %v4036_v60 = vsel %vm3998_vm14, %v3965_v20, %v4020_v48 }
 0x711   :  { %v4049_v26 = vpack.c.bf16 %v4036_v60, %v4032_v24 }
 0x713   :  { %v3967_v35 = vpop.f32.mrf.mxu2 }
 0x714   :  { %v3968_v34 = vadd.f32 %v3967_v35, %v11322_v32 }
 0x716   :  { %v4024_v23 = vmul.f32 %v11327_v42, %v3968_v34  ;;  %vm4002_vm12 = vcmp.ge.f32.partialorder %v3968_v34, 0.0 }
 0x718   :  { %v4040_v44 = vsel %vm4002_vm12, %v3968_v34, %v4024_v23 }
 0x71b   :  { %v3969_v27 = vpop.f32.mrf.mxu2 }
 0x71c   :  { %v3970_v12 = vadd.f32 %v3969_v27, %v11320_v4 }
 0x71e   :  { %vm4006_vm13 = vcmp.ge.f32.partialorder %v3970_v12, 0.0  ;;  %v4028_v25 = vmul.f32 %v11327_v42, %v3970_v12 }
 0x720   :  { %v4044_v7 = vsel %vm4006_vm13, %v3970_v12, %v4028_v25 }
 0x721   :  { %v4053_v57 = vpack.c.bf16 %v4044_v7, %v4040_v44 }
 0x723   :  { %v3981_v41 = vpop.f32.mrf.mxu3  ;;  %4097 = vmatpush.bf16.msrb.mxu2 %v4053_v57 }
 0x724   :  { %v3982_v30 = vadd.f32 %v3981_v41, %v11330_v18 }
 0x726   :  { %v4017_v5 = vmul.f32 %v11327_v42, %v3982_v30  ;;  %vm3995_vm12 = vcmp.ge.f32.partialorder %v3982_v30, 0.0 }
 0x727   :  { %4098 = vmatpush.bf16.msrb.mxu2 %v4049_v26 }
 0x728   :  { %v4033_v18 = vsel %vm3995_vm12, %v3982_v30, %v4017_v5 }
 0x72a   :  { %5528 = vmatmul.msk.bf16.vlgmr.msrb.gmra.mxu2 %vm895_vm3, %v11341_v56 }
 0x72b   :  { %v3983_v28 = vpop.f32.mrf.mxu3 }
 0x72c   :  { %v3984_v40 = vadd.f32 %v3983_v28, %v11325_v49 }
 0x72e   :  { %v4021_v47 = vmul.f32 %v11327_v42, %v3984_v40  ;;  %vm3999_vm11 = vcmp.ge.f32.partialorder %v3984_v40, 0.0 }
 0x730   :  { %v4037_v63 = vsel %vm3999_vm11, %v3984_v40, %v4021_v47 }
 0x731   :  { %v4050_v16 = vpack.c.bf16 %v4037_v63, %v4033_v18 }
 0x733   :  { %v3986_v58 = vpop.f32.mrf.mxu3 }
 0x734   :  { %v3987_v43 = vadd.f32 %v3986_v58, %v11322_v32 }
 0x736   :  { %v4025_v45 = vmul.f32 %v11327_v42, %v3987_v43  ;;  %vm4003_vm9 = vcmp.ge.f32.partialorder %v3987_v43, 0.0 }
 0x738   :  { %v4041_v53 = vsel %vm4003_vm9, %v3987_v43, %v4025_v45 }
 0x73b   :  { %v3988_v6 = vpop.f32.mrf.mxu3 }
 0x73c   :  { %v3989_v38 = vadd.f32 %v3988_v6, %v11320_v4  ;;  %v4059_v4 = vpop.permute.xlu2 %4058 }
 0x73d   :  { %v11375_v36 = vperm.slane %v4059_v4, 0 }
 0x73e   :  { %vm4007_vm10 = vcmp.ge.f32.partialorder %v3989_v38, 0.0  ;;  %v4029_v39 = vmul.f32 %v11327_v42, %v3989_v38 }
 0x740   :  { %v4045_v32 = vsel %vm4007_vm10, %v3989_v38, %v4029_v39 }
 0x741   :  { %v4054_v49 = vpack.c.bf16 %v4045_v32, %v4041_v53 }
 0x743   :  { %4110 = vmatpush.bf16.msra.mxu3 %v4054_v49 }
 0x747   :  { %4111 = vmatpush.bf16.msra.mxu3 %v4050_v16 }
 0x74a   :  { %5529 = vmatmul.msk.bf16.vlgmr.msra.gmra.mxu3 %vm895_vm3, %v11341_v56 }
 0x757   :  { %v4074_v33 = vpop.f32.mrf.mxu0 }
 0x758   :  { %v4075_v19 = vadd.f32 %v4074_v33, %v11375_v36 }
 0x75a   :  { %v5530_v21 = vmul.f32 -1.442695, %v4075_v19 }
 0x75c   :  { %7068 = vpow2.f32 %v5530_v21 }
 0x75f   :  { %v4076_v42 = vpop.f32.mrf.mxu0 }
 0x762   :  { %v7069_v62 = vpop.eup %7068 }
 0x763   :  { %v4129_v0 = vadd.f32 1.0, %v7069_v62 }
 0x765   :  { %7070 = vrcp.f32 %v4129_v0  ;;  %v4144_v51 = vand.u32 2147483648, %v4129_v0  ;;  %v4142_v34 = vand.u32 2147483647, %v4129_v0  ;;  %vm4138_vm14 = vweird.f32 %v4129_v0 }
 0x767   :  { %v4145_v20 = vor.u32 1.1754944e-38, %v4144_v51  ;;  %vm4143_vm9 = vcmp.eq.f32.partialorder %v4142_v34, 8.507059e+37 }
 0x76b   :  { %v7071_v2 = vpop.eup %7070 }
 0x76c   :  { %v4134_v3 = vmul.f32 %v7071_v2, %v4129_v0  ;;  %vm4139_vm13 = vweird.f32 %v7071_v2 }
 0x76d   :  { %vm4140_vm15 = vmor %vm4138_vm14, %vm4139_vm13 }
 0x76e   :  { %v4135_v14 = vsub.f32 1.0, %v4134_v3 }
 0x770   :  { %v4136_v35 = vmul.f32 %v7071_v2, %v4135_v14 }
 0x772   :  { %v4137_v56 = vadd.f32 %v7071_v2, %v4136_v35 }
 0x774   :  { %v4141_v27 = vsel %vm4140_vm15, %v7071_v2, %v4137_v56 }
 0x775   :  { %v4146_v17 = vsel %vm4143_vm9, %v4145_v20, %v4141_v27 }
 0x776   :  { %v4193_v23 = vperm.slane %v4146_v17, 0 }
 0x778   :  { %v11379_v12 = vmul.f32 %v4193_v23, %v11185_v8  ;;  %v11382_v48 = vmul.f32 %v4193_v23, %v11183_v55  ;;  %v11385_v25 = vmul.f32 %v4193_v23, %v11175_v59  ;;  %v11388_v11 = vmul.f32 %v4193_v23, %v11172_v29 }
 0x77a   :  { %v6752_v44 = vpack.i.bf16 %v11388_v11, %v11385_v25  ;;  %v6757_v7 = vpack.i.bf16 %v11382_v48, %v11379_v12  ;;  %v6777_v41 = vpack.i.bf16 %v11385_v25, %v11379_v12 }
 0x77c   :  { %6753 = vrot.lane.b32.xlu1 %v6752_v44, %s7128_s30  ;;  %6758 = vrot.lane.b32.xlu2 %v6757_v7, %s7126_s0 }
 0x77d   :  { %6748 = vrot.lane.b32.xlu0 %v6757_v7, %s7128_s30 }
 0x781   :  { %v4087_v29 = vpop.f32.mrf.mxu1 }
 0x782   :  { %v4088_v8 = vadd.f32 %v4087_v29, %v11375_v36 }
 0x784   :  { %v5531_v57 = vmul.f32 -1.442695, %v4088_v8  ;;  %6768 = vrot.lane.b32.xlu1 %v6757_v7, %s7127_s29  ;;  %6773 = vrot.lane.b32.xlu2 %v6752_v44, %s7127_s29 }
 0x785   :  { %6763 = vrot.lane.b32.xlu0 %v6752_v44, %s7126_s0 }
 0x786   :  { %7072 = vpow2.f32 %v5531_v57 }
 0x789   :  { %v4089_v60 = vpop.f32.mrf.mxu1 }
 0x78c   :  { %v7073_v24 = vpop.eup %7072  ;;  %6783 = vrot.lane.b32.xlu1 %v6752_v44, %s7123_s26  ;;  %6808 = vrot.lane.b32.xlu2 %v6752_v44, %s7125_s28 }
 0x78d   :  { %v4130_v26 = vadd.f32 1.0, %v7073_v24  ;;  %6778 = vrot.lane.b32.xlu0 %v6777_v41, %s7124_s27 }
 0x78f   :  { %7074 = vrcp.f32 %v4130_v26  ;;  %v4159_v40 = vand.u32 2147483648, %v4130_v26  ;;  %v4157_v30 = vand.u32 2147483647, %v4130_v26  ;;  %vm4153_vm11 = vweird.f32 %v4130_v26 }
 0x791   :  { %v4160_v38 = vor.u32 1.1754944e-38, %v4159_v40  ;;  %vm4158_vm13 = vcmp.eq.f32.partialorder %v4157_v30, 8.507059e+37 }
 0x794   :  { %6818 = vrot.lane.b32.xlu1 %v6757_v7, %s7125_s28  ;;  %6813 = vrot.lane.b32.xlu2 %v6757_v7, %s7122_s21 }
 0x795   :  { %v7075_v28 = vpop.eup %7074  ;;  %6788 = vrot.lane.b32.xlu0 %v6757_v7, %s7123_s26 }
 0x796   :  { %v4149_v58 = vmul.f32 %v7075_v28, %v4130_v26  ;;  %vm4154_vm10 = vweird.f32 %v7075_v28 }
 0x797   :  { %vm4155_vm12 = vmor %vm4153_vm11, %vm4154_vm10 }
 0x798   :  { %v4150_v43 = vsub.f32 1.0, %v4149_v58 }
 0x79a   :  { %v4151_v6 = vmul.f32 %v7075_v28, %v4150_v43 }
 0x79c   :  { %v4152_v45 = vadd.f32 %v7075_v28, %v4151_v6 }
 0x79d   :  { %6793 = vrot.lane.b32.xlu0 %v6752_v44, %s7121_s12 }
 0x79e   :  { %v4156_v47 = vsel %vm4155_vm12, %v7075_v28, %v4152_v45 }
 0x79f   :  { %v4161_v39 = vsel %vm4158_vm13, %v4160_v38, %v4156_v47 }
 0x7a0   :  { %v4194_v5 = vperm.slane %v4161_v39, 0 }
 0x7a2   :  { %v11415_v53 = vmul.f32 %v4194_v5, %v11229_v1  ;;  %v11418_v32 = vmul.f32 %v4194_v5, %v11224_v52  ;;  %v11421_v49 = vmul.f32 %v4194_v5, %v11218_v37  ;;  %v11424_v63 = vmul.f32 %v4194_v5, %v11220_v22 }
 0x7a4   :  { %v11428_v18 = vpack.i.bf16 %v11418_v32, %v11415_v53  ;;  %v6847_v22 = vpack.i.bf16 %v11424_v63, %v11421_v49  ;;  %v6892_v2 = vpack.i.bf16 %v11421_v49, %v11388_v11 }
 0x7a5   :  { %6798 = vrot.lane.b32.xlu0 %v6757_v7, %s7121_s12 }
 0x7a6   :  { %6833 = vrot.lane.b32.xlu1 %v11428_v18, %s7126_s0  ;;  %6823 = vrot.lane.b32.xlu2 %v11428_v18, %s7128_s30 }
 0x7ad   :  { %6803 = vrot.lane.b32.xlu0 %v6752_v44, %s7122_s21  ;;  %v4100_v1 = vpop.f32.mrf.mxu2 }
 0x7ae   :  { %v4101_v16 = vadd.f32 %v4100_v1, %v11375_v36  ;;  %6848 = vrot.lane.b32.xlu1 %v6847_v22, %s7127_s29  ;;  %6838 = vrot.lane.b32.xlu2 %v6847_v22, %s7126_s0 }
 0x7b0   :  { %v5532_v4 = vmul.f32 -1.442695, %v4101_v16 }
 0x7b2   :  { %7076 = vpow2.f32 %v5532_v4 }
 0x7b5   :  { %6828 = vrot.lane.b32.xlu0 %v6847_v22, %s7128_s30  ;;  %v4102_v33 = vpop.f32.mrf.mxu2 }
 0x7b6   :  { %6858 = vrot.lane.b32.xlu1 %v11428_v18, %s7123_s26  ;;  %6853 = vrot.lane.b32.xlu2 %v6847_v22, %s7123_s26 }
 0x7b8   :  { %v7077_v19 = vpop.eup %7076 }
 0x7b9   :  { %v4131_v21 = vadd.f32 1.0, %v7077_v19 }
 0x7bb   :  { %7078 = vrcp.f32 %v4131_v21  ;;  %v4174_v3 = vand.u32 2147483648, %v4131_v21  ;;  %v4172_v51 = vand.u32 2147483647, %v4131_v21  ;;  %vm4168_vm15 = vweird.f32 %v4131_v21 }
 0x7bd   :  { %6843 = vrot.lane.b32.xlu0 %v11428_v18, %s7127_s29  ;;  %v4175_v34 = vor.u32 1.1754944e-38, %v4174_v3  ;;  %vm4173_vm10 = vcmp.eq.f32.partialorder %v4172_v51, 8.507059e+37 }
 0x7be   :  { %6863 = vrot.lane.b32.xlu1 %v6847_v22, %s7121_s12  ;;  %6888 = vrot.lane.b32.xlu2 %v11428_v18, %s7125_s28 }
 0x7c1   :  { %v7079_v42 = vpop.eup %7078 }
 0x7c2   :  { %v4164_v62 = vmul.f32 %v7079_v42, %v4131_v21  ;;  %vm4169_vm14 = vweird.f32 %v7079_v42 }
 0x7c3   :  { %vm4170_vm9 = vmor %vm4168_vm15, %vm4169_vm14 }
 0x7c4   :  { %v4165_v0 = vsub.f32 1.0, %v4164_v62 }
 0x7c5   :  { %6878 = vrot.lane.b32.xlu0 %v6847_v22, %s7125_s28 }
 0x7c6   :  { %v4166_v14 = vmul.f32 %v7079_v42, %v4165_v0  ;;  %6868 = vrot.lane.b32.xlu1 %v11428_v18, %s7121_s12  ;;  %6893 = vrot.lane.b32.xlu2 %v6892_v2, %s7124_s27 }
 0x7c8   :  { %v4167_v35 = vadd.f32 %v7079_v42, %v4166_v14 }
 0x7ca   :  { %v4171_v56 = vsel %vm4170_vm9, %v7079_v42, %v4167_v35 }
 0x7cb   :  { %v4176_v20 = vsel %vm4173_vm10, %v4175_v34, %v4171_v56 }
 0x7cc   :  { %v4195_v27 = vperm.slane %v4176_v20, 0 }
 0x7cd   :  { %6883 = vrot.lane.b32.xlu0 %v11428_v18, %s7122_s21  ;;  %v4113_v17 = vpop.f32.mrf.mxu3 }
 0x7ce   :  { %v11463_v23 = vmul.f32 %v4195_v27, %v11249_v15  ;;  %v11466_v44 = vmul.f32 %v4195_v27, %v11251_v50  ;;  %6873 = vrot.lane.b32.xlu1 %v6847_v22, %s7122_s21  ;;  %v4114_v7 = vadd.f32 %v4113_v17, %v11375_v36  ;;  %v11471_v29 = vmul.f32 %v4195_v27, %v11258_v31 }
 0x7cf   :  { %v11474_v8 = vmul.f32 %v4195_v27, %v11256_v46  ;;  %v6897_v15 = vpack.i.bf16 %v11382_v48, %v11424_v63 }
 0x7d0   :  { %v11478_v57 = vpack.i.bf16 %v11466_v44, %v11463_v23  ;;  %v5533_v60 = vmul.f32 -1.442695, %v4114_v7 }
 0x7d1   :  { %v11486_v50 = vpack.i.bf16 %v11474_v8, %v11471_v29 }
 0x7d2   :  { %6908 = vrot.lane.b32.xlu2 %v11478_v57, %s7128_s30  ;;  %7080 = vpow2.f32 %v5533_v60 }
 0x7d5   :  { %6898 = vrot.lane.b32.xlu0 %v6897_v15, %s7124_s27  ;;  %v4115_v36 = vpop.f32.mrf.mxu3 }
 0x7d6   :  { %6903 = vrot.lane.b32.xlu1 %v11486_v50, %s7128_s30  ;;  %v11495_v26 = vpop.permute.xlu2 %6758 }
 0x7d8   :  { %v7081_v41 = vpop.eup %7080 }
 0x7d9   :  { %v4132_v24 = vadd.f32 1.0, %v7081_v41 }
 0x7da   :  { %6923 = vrot.lane.b32.xlu2 %v11486_v50, %s7127_s29 }
 0x7db   :  { %7082 = vrcp.f32 %v4132_v24  ;;  %v4189_v6 = vand.u32 2147483648, %v4132_v24  ;;  %v4187_v45 = vand.u32 2147483647, %v4132_v24  ;;  %vm4183_vm12 = vweird.f32 %v4132_v24 }
 0x7dd   :  { %6913 = vrot.lane.b32.xlu0 %v11486_v50, %s7126_s0  ;;  %v4190_v47 = vor.u32 1.1754944e-38, %v4189_v6  ;;  %vm4188_vm14 = vcmp.eq.f32.partialorder %v4187_v45, 8.507059e+37 }
 0x7de   :  { %6918 = vrot.lane.b32.xlu1 %v11478_v57, %s7126_s0  ;;  %v11505_v43 = vpop.permute.xlu2 %6773 }
 0x7df   :  { %v12887_v6 = vunpack.i.h.bf16 %v11505_v43 }
 0x7e1   :  { %v7083_v28 = vpop.eup %7082 }
 0x7e2   :  { %6933 = vrot.lane.b32.xlu2 %v11478_v57, %s7123_s26  ;;  %v4179_v58 = vmul.f32 %v7083_v28, %v4132_v24  ;;  %vm4184_vm11 = vweird.f32 %v7083_v28 }
 0x7e3   :  { %vm4185_vm13 = vmor %vm4183_vm12, %vm4184_vm11 }
 0x7e4   :  { %v4180_v40 = vsub.f32 1.0, %v4179_v58 }
 0x7e5   :  { %6928 = vrot.lane.b32.xlu0 %v11478_v57, %s7127_s29 }
 0x7e6   :  { %6948 = vrot.lane.b32.xlu1 %v11486_v50, %s7121_s12  ;;  %v4181_v30 = vmul.f32 %v7083_v28, %v4180_v40  ;;  %v11515_v1 = vpop.permute.xlu2 %6808 }
 0x7e7   :  { %13481 = vst [vmem:[#allocation23_spill] sm:$0xff] %v11515_v1 }
 0x7e8   :  { %v4182_v38 = vadd.f32 %v7083_v28, %v4181_v30 }
 0x7ea   :  { %6938 = vrot.lane.b32.xlu2 %v11486_v50, %s7123_s26  ;;  %v4186_v39 = vsel %vm4185_vm13, %v7083_v28, %v4182_v38 }
 0x7eb   :  { %v4191_v5 = vsel %vm4188_vm14, %v4190_v47, %v4186_v39 }
 0x7ec   :  { %v4196_v22 = vperm.slane %v4191_v5, 0 }
 0x7ed   :  { %6953 = vrot.lane.b32.xlu0 %v11478_v57, %s7125_s28 }
 0x7ee   :  { %6958 = vrot.lane.b32.xlu1 %v11478_v57, %s7122_s21  ;;  %v11522_v4 = vmul.f32 %v4196_v22, %v11297_v54  ;;  %v11525_v33 = vmul.f32 %v4196_v22, %v11295_v13  ;;  %v11528_v19 = vmul.f32 %v4196_v22, %v11281_v9  ;;  %v11531_v21 = vmul.f32 %v4196_v22, %v11279_v61  ;;  %v11533_v42 = vpop.permute.xlu1 %6753  ;;  %v11547_v61 = vpop.permute.xlu2 %6813 }
 0x7ef   :  { %v11519_v16 = vpop.permute.xlu0 %6748  ;;  %13486 = vst [vmem:[#allocation31_spill] sm:$0xff] %v11547_v61 }
 0x7f0   :  { %13482 = vst [vmem:[#allocation24_spill] sm:$0xff] %v11522_v4  ;;  %v6982_v62 = vpack.i.bf16 %v11525_v33, %v11522_v4  ;;  %v6977_v2 = vpack.i.bf16 %v11531_v21, %v11528_v19 }
 0x7f1   :  { %13483 = vst [vmem:[#allocation20_spill] sm:$0xff] %v11525_v33 }
 0x7f2   :  { %13484 = vst [vmem:[#allocation17_spill] sm:$0xff] %v11528_v19  ;;  %6943 = vrot.lane.b32.xlu2 %v11478_v57, %s7121_s12  ;;  %v13501_v19 = vunpack.i.h.bf16 %v11547_v61 }
 0x7f3   :  { %13485 = vst [vmem:[#allocation30_spill] sm:$0xff] %v11531_v21 }
 0x7f5   :  { %6968 = vrot.lane.b32.xlu0 %v11486_v50, %s7122_s21 }
 0x7f6   :  { %6963 = vrot.lane.b32.xlu1 %v11486_v50, %s7125_s28  ;;  %v11552_v0 = vpop.permute.xlu1 %6768 }
 0x7f7   :  { %v11545_v9 = vpop.permute.xlu0 %6763  ;;  %v12893_v31 = vunpack.i.h.bf16 %v11552_v0  ;;  %v12892_v46 = vunpack.i.l.bf16 %v11552_v0 }
 0x7fa   :  { %6983 = vrot.lane.b32.xlu2 %v6982_v62, %s7126_s0 }
 0x7fd   :  { %6973 = vrot.lane.b32.xlu0 %v6982_v62, %s7128_s30 }
 0x7fe   :  { %6978 = vrot.lane.b32.xlu1 %v6977_v2, %s7128_s30  ;;  %v11564_v51 = vpop.permute.xlu1 %6783 }
 0x7ff   :  { %v11558_v3 = vpop.permute.xlu0 %6778  ;;  %v12884_v17 = vunpack.i.h.bf16 %v11564_v51  ;;  %v12883_v7 = vunpack.i.l.bf16 %v11564_v51 }
 0x800   :  { %v11560_v14 = vpop.permute.xlu2 %6823 }
 0x802   :  { %7003 = vrot.lane.b32.xlu2 %v6977_v2, %s7127_s29 }
 0x805   :  { %6988 = vrot.lane.b32.xlu0 %v6977_v2, %s7126_s0 }
 0x806   :  { %6993 = vrot.lane.b32.xlu1 %v6982_v62, %s7127_s29  ;;  %v11578_v20 = vpop.permute.xlu1 %6818 }
 0x807   :  { %v11567_v35 = vpop.permute.xlu0 %6788  ;;  %13487 = vst [vmem:[#allocation22_spill] sm:$0xff] %v11578_v20  ;;  %v13496_v4 = vunpack.i.h.bf16 %v11578_v20 }
 0x808   :  { %v11569_v34 = vpop.permute.xlu2 %6838 }
 0x809   :  { %v12904_v37 = vunpack.i.h.bf16 %v11569_v34 }
 0x80a   :  { %7008 = vrot.lane.b32.xlu2 %v11478_v57, %s7124_s27 }
 0x80d   :  { %7023 = vrot.lane.b32.xlu0 %v6982_v62, %s7123_s26 }
 0x80e   :  { %6998 = vrot.lane.b32.xlu1 %v11428_v18, %s7124_s27 }
 0x80f   :  { %v11576_v56 = vpop.permute.xlu0 %6793 }
 0x810   :  { %v11580_v27 = vpop.permute.xlu2 %6853 }
 0x811   :  { %v12905_v60 = vunpack.i.h.bf16 %v11580_v27  ;;  %v12906_v15 = vunpack.i.l.bf16 %v11580_v27 }
 0x812   :  { %7018 = vrot.lane.b32.xlu2 %v6977_v2, %s7123_s26 }
 0x813   :  { %v4545_v18 = vsel %vm165_vm2, %v12884_v17, %v12905_v60  ;;  %v4544_v57 = vsel %vm165_vm2, %v12883_v7, %v12906_v15  ;;  %v12900_v7 = vunpack.i.l.bf16 %v11569_v34 }
 0x814   :  { %v4658_v36 = vpack.c.bf16 %v4545_v18, %v4544_v57  ;;  %v12886_v57 = vunpack.i.h.bf16 %v11567_v35 }
 0x815   :  { %7033 = vrot.lane.b32.xlu0 %v6982_v62, %s7121_s12 }
 0x816   :  { %7013 = vrot.lane.b32.xlu1 %v11486_v50, %s7124_s27  ;;  %4698 = vmatpush.bf16.msra.mxu1 %v4658_v36  ;;  %v12888_v50 = vunpack.i.l.bf16 %v11505_v43  ;;  %v12885_v36 = vunpack.i.l.bf16 %v11567_v35 }
 0x817   :  { %v11602_v41 = vpop.permute.xlu0 %6798 }
 0x818   :  { %v11604_v24 = vpop.permute.xlu1 %6833  ;;  %v11606_v28 = vpop.permute.xlu2 %6888 }
 0x81a   :  { %7028 = vrot.lane.b32.xlu2 %v6977_v2, %s7121_s12 }
 0x81d   :  { %7048 = vrot.lane.b32.xlu0 %v6982_v62, %s7122_s21 }
 0x81e   :  { %7038 = vrot.lane.b32.xlu1 %v6977_v2, %s7122_s21 }
 0x81f   :  { %v11611_v58 = vpop.permute.xlu0 %6803 }
 0x820   :  { %v11613_v40 = vpop.permute.xlu1 %6848  ;;  %v11632_v5 = vpop.permute.xlu2 %6893 }
 0x821   :  { %v12890_v30 = vunpack.i.h.bf16 %v11613_v40  ;;  %v12889_v45 = vunpack.i.l.bf16 %v11613_v40 }
 0x822   :  { %7043 = vrot.lane.b32.xlu2 %v6977_v2, %s7125_s28 }
 0x823   :  { %v4352_v38 = vsel %vm113_vm8, %v12888_v50, %v12889_v45  ;;  %v4353_v47 = vsel %vm113_vm8, %v12887_v6, %v12890_v30  ;;  %v12903_v45 = vunpack.i.h.bf16 %v11545_v9 }
 0x824   :  { %v4626_v39 = vpack.c.bf16 %v4353_v47, %v4352_v38  ;;  %v4670_v38 = vld [vmem:[%s12609_s11] sm:$0x7] }
 0x825   :  { %7063 = vrot.lane.b32.xlu0 %v6982_v62, %s7124_s27 }
 0x826   :  { %7053 = vrot.lane.b32.xlu1 %v6982_v62, %s7125_s28  ;;  %4685 = vmatpush.bf16.msra.mxu0 %v4626_v39 }
 0x827   :  { %v11636_v22 = vpop.permute.xlu0 %6828 }
 0x828   :  { %v11638_v18 = vpop.permute.xlu1 %6858 }
 0x829   :  { %v12891_v13 = vunpack.i.h.bf16 %v11638_v18  ;;  %v12902_v54 = vunpack.i.l.bf16 %v11638_v18 }
 0x82a   :  { %7058 = vrot.lane.b32.xlu2 %v6977_v2, %s7124_s27 }
 0x82b   :  { %v4542_v62 = vsel %vm165_vm2, %v12885_v36, %v12902_v54  ;;  %v4543_v47 = vsel %vm165_vm2, %v12886_v57, %v12891_v13  ;;  %v12899_v36 = vunpack.i.l.bf16 %v11545_v9 }
 0x82c   :  { %v11660_v39 = vpop.permute.xlu2 %6908  ;;  %v4654_v2 = vpack.c.bf16 %v4543_v47, %v4542_v62  ;;  %v12896_v62 = vunpack.i.h.bf16 %v11576_v56  ;;  %v12895_v47 = vunpack.i.l.bf16 %v11576_v56 }
 0x82e   :  { %4673 = vperm.xlu1 %5784, %v4670_v38   ;;  %4699 = vmatpush.bf16.msra.mxu1 %v4654_v2  ;;  %v4213_v38 = vld [vmem:[%s12608_s10] sm:$0x3f] }
 0x82f   :  { %v11665_v17 = vpop.permute.xlu0 %6843  ;;  %4677 = vst [vmem:[#allocation1] ss:$4 sm:$0xff] %v4213_v38 }
 0x830   :  { %v12894_v52 = vunpack.i.h.bf16 %v11665_v17  ;;  %v12897_v57 = vunpack.i.l.bf16 %v11665_v17  ;;  %v11671_v6 = vpop.permute.xlu1 %6863 }
 0x831   :  { %v12898_v2 = vunpack.i.h.bf16 %v11671_v6  ;;  %v12901_v50 = vunpack.i.l.bf16 %v11671_v6 }
 0x832   :  { %v4350_v30 = vsel %vm113_vm8, %v12892_v46, %v12897_v57  ;;  %v4351_v59 = vsel %vm113_vm8, %v12893_v31, %v12894_v52  ;;  %v12907_v31 = vunpack.i.l.bf16 %v11604_v24  ;;  %v12910_v57 = vunpack.i.h.bf16 %v11495_v26 }
 0x833   :  { %v4622_v13 = vpack.c.bf16 %v4351_v59, %v4350_v30  ;;  %v4496_v38 = vsel %vm152_vm1, %v12895_v47, %v12901_v50  ;;  %v4497_v46 = vsel %vm152_vm1, %v12896_v62, %v12898_v2  ;;  %v4304_v59 = vsel %vm100_vm6, %v12899_v36, %v12900_v7 }
 0x834   :  { %v12909_v30 = vunpack.i.h.bf16 %v11604_v24  ;;  %v11713_v52 = vpop.permute.xlu2 %6923  ;;  %v4650_v47 = vpack.c.bf16 %v4497_v46, %v4496_v38  ;;  %v4305_v62 = vsel %vm100_vm6, %v12903_v45, %v12904_v37  ;;  %v12908_v2 = vunpack.i.l.bf16 %v11495_v26 }
 0x835   :  { %4686 = vmatpush.bf16.msra.mxu0 %v4622_v13  ;;  %v12913_v46 = vunpack.i.h.bf16 %v11602_v41  ;;  %v12911_v38 = vunpack.i.l.bf16 %v11602_v41  ;;  %v4618_v55 = vpack.c.bf16 %v4305_v62, %v4304_v59  ;;  %v12916_v45 = vunpack.i.l.bf16 %v11636_v22 }
 0x836   :  { %4700 = vmatpush.bf16.msra.mxu1 %v4650_v47  ;;  %v4302_v47 = vsel %vm100_vm6, %v12908_v2, %v12907_v31  ;;  %v4303_v62 = vsel %vm100_vm6, %v12910_v57, %v12909_v30  ;;  %v12915_v7 = vunpack.i.l.bf16 %v11533_v42  ;;  %v12920_v50 = vunpack.i.l.bf16 %v11560_v14 }
 0x837   :  { %v11728_v54 = vpop.permute.xlu0 %6878  ;;  %v4614_v30 = vpack.c.bf16 %v4303_v62, %v4302_v47  ;;  %v13488_v62 = vunpack.i.h.bf16 %v11636_v22  ;;  %v13493_v31 = vunpack.i.h.bf16 %v11519_v16 }
 0x838   :  { %v11732_v37 = vpop.permute.xlu1 %6868  ;;  %v12918_v59 = vunpack.i.h.bf16 %v11728_v54  ;;  %v12917_v60 = vunpack.i.l.bf16 %v11728_v54  ;;  %v4256_v47 = vsel %vm87_vm7, %v12915_v7, %v12916_v45  ;;  %v13491_v7 = vunpack.i.h.bf16 %v11515_v1 }
 0x839   :  { %v12914_v15 = vunpack.i.h.bf16 %v11732_v37  ;;  %v12912_v36 = vunpack.i.l.bf16 %v11732_v37  ;;  %4687 = vmatpush.bf16.msra.mxu0 %v4618_v55 }
 0x83a   :  { %v4449_v45 = vsel %vm139_vm4, %v13491_v7, %v12918_v59  ;;  %v13494_v59 = vunpack.i.l.bf16 %v11606_v28 }
 0x83b   :  { %v4494_v57 = vsel %vm152_vm1, %v12911_v38, %v12912_v36  ;;  %v4495_v55 = vsel %vm152_vm1, %v12913_v46, %v12914_v15  ;;  %v13489_v38 = vunpack.i.h.bf16 %v11533_v42  ;;  %v12919_v46 = vunpack.i.l.bf16 %v11519_v16 }
 0x83c   :  { %v11768_v2 = vpop.permute.xlu2 %6933  ;;  %v4646_v13 = vpack.c.bf16 %v4495_v55, %v4494_v57  ;;  %v12923_v15 = vunpack.i.l.bf16 %v11578_v20  ;;  %v13490_v57 = vunpack.i.l.bf16 %v11515_v1  ;;  %v13499_v20 = vunpack.i.l.bf16 %v11547_v61 }
 0x83d   :  { %v4257_v36 = vsel %vm87_vm7, %v13489_v38, %v13488_v62  ;;  %4688 = vmatpush.bf16.msra.mxu0 %v4614_v30  ;;  %v13529_v1 = vunpack.i.l.bf16 %v11604_v24 }
 0x83e   :  { %v4448_v55 = vsel %vm139_vm4, %v13490_v57, %v12917_v60  ;;  %4701 = vmatpush.bf16.msra.mxu1 %v4646_v13  ;;  %v4610_v30 = vpack.c.bf16 %v4257_v36, %v4256_v47  ;;  %v4254_v57 = vsel %vm87_vm7, %v12919_v46, %v12920_v50  ;;  %v13492_v60 = vunpack.i.h.bf16 %v11560_v14 }
 0x83f   :  { %v11797_v62 = vpop.permute.xlu0 %6883  ;;  %v4446_v36 = vsel %vm139_vm4, %v12923_v15, %v13494_v59  ;;  %v4642_v46 = vpack.c.bf16 %v4449_v45, %v4448_v55  ;;  %v13495_v50 = vunpack.i.h.bf16 %v11606_v28  ;;  %v12943_v47 = vunpack.i.h.bf16 %v11632_v5 }
 0x840   :  { %v4255_v7 = vsel %vm87_vm7, %v13493_v31, %v13492_v60  ;;  %v11819_v38 = vpop.permute.xlu1 %6873  ;;  %v12928_v33 = vunpack.i.l.bf16 %v11797_v62 }
 0x841   :  { %v4447_v31 = vsel %vm139_vm4, %v13496_v4, %v13495_v50  ;;  %v12929_v59 = vunpack.i.h.bf16 %v11819_v38  ;;  %v12926_v15 = vunpack.i.l.bf16 %v11819_v38  ;;  %4689 = vmatpush.bf16.msra.mxu0 %v4610_v30  ;;  %v13497_v4 = vunpack.i.l.bf16 %v11611_v58 }
 0x842   :  { %4702 = vmatpush.bf16.msra.mxu1 %v4642_v46  ;;  %v13498_v30 = vunpack.i.h.bf16 %v11611_v58  ;;  %v4606_v45 = vpack.c.bf16 %v4255_v7, %v4254_v57  ;;  %v4638_v46 = vpack.c.bf16 %v4447_v31, %v4446_v36  ;;  %v13502_v7 = vunpack.i.l.bf16 %v11768_v2 }
 0x843   :  { %v4592_v50 = vsel %vm178_vm0, %v13497_v4, %v12926_v15  ;;  %v4590_v4 = vsel %vm178_vm0, %v13499_v20, %v12928_v33  ;;  %v13500_v15 = vunpack.i.h.bf16 %v11797_v62  ;;  %v13503_v36 = vunpack.i.l.bf16 %v11580_v27 }
 0x844   :  { %v4593_v13 = vsel %vm178_vm0, %v13498_v30, %v12929_v59  ;;  %v11847_v55 = vpop.permute.xlu2 %6938  ;;  %v13504_v31 = vunpack.i.h.bf16 %v11768_v2  ;;  %v12930_v33 = vunpack.i.l.bf16 %v11632_v5 }
 0x845   :  { %v4666_v60 = vpack.c.bf16 %v4593_v13, %v4592_v50  ;;  %4690 = vmatpush.bf16.msra.mxu0 %v4606_v45  ;;  %v4591_v57 = vsel %vm178_vm0, %v13501_v19, %v13500_v15  ;;  %v4540_v13 = vsel %vm165_vm2, %v13503_v36, %v13502_v7  ;;  %v13505_v45 = vunpack.i.h.bf16 %v11580_v27 }
 0x846   :  { %v12936_v50 = vunpack.i.h.bf16 %v11847_v55  ;;  %v12937_v30 = vunpack.i.l.bf16 %v11847_v55  ;;  %4703 = vmatpush.bf16.msra.mxu1 %v4638_v46  ;;  %v12931_v15 = vunpack.i.h.bf16 %v11558_v3  ;;  %v4662_v27 = vpack.c.bf16 %v4591_v57, %v4590_v4 }
 0x847   :  { %v4541_v20 = vsel %vm165_vm2, %v13505_v45, %v13504_v31  ;;  %4717 = vmatpush.bf16.msra.mxu2 %v4666_v60  ;;  %v11876_v19 = vpop.permute.xlu0 %6898  ;;  %v13506_v31 = vpack.c.bf16 %v11388_v11, %v11385_v25  ;;  %v13507_v25 = vunpack.i.l.bf16 %v11638_v18  ;;  %v13508_v4 = vunpack.i.h.bf16 %v11638_v18 }
 0x848   :  { %v12938_v7 = vunpack.i.l.bf16 %v11876_v19  ;;  %v11881_v36 = vpop.permute.xlu1 %6903  ;;  %v4659_v59 = vpack.c.bf16 %v4541_v20, %v4540_v13  ;;  %v4400_v60 = vsel %vm126_vm5, %v12931_v15, %v12943_v47 }
 0x849   :  { %4691 = vmatpush.bf16.msra.mxu0 %v13506_v31  ;;  %v4538_v11 = vsel %vm165_vm2, %v13507_v25, %v12937_v30  ;;  %v4539_v57 = vsel %vm165_vm2, %v13508_v4, %v12936_v50  ;;  %v13509_v31 = vpack.c.bf16 %v11382_v48, %v11379_v12  ;;  %v11917_v25 = vld.sshfl [vmem:[#allocation1] sm:$0xff pattern:$0x73625140] }
 0x84a   :  { %v4401_v46 = vsel %vm126_vm5, %v12930_v33, %v12938_v7  ;;  %v4655_v33 = vpack.c.bf16 %v4539_v57, %v4538_v11  ;;  %v13517_v7 = vunpack.i.h.bf16 %v11665_v17 }
 0x84b   :  { %4718 = vmatpush.bf16.msra.mxu2 %v4662_v27  ;;  %v4634_v13 = vpack.c.bf16 %v4401_v46, %v4400_v60  ;;  %v13511_v46 = vunpack.i.h.bf16 %v11671_v6 }
 0x84c   :  { %v11910_v45 = vpop.permute.xlu2 %6943 }
 0x84d   :  { %v12932_v20 = vunpack.i.h.bf16 %v11910_v45  ;;  %v12933_v27 = vunpack.i.l.bf16 %v11910_v45  ;;  %4692 = vmatpush.bf16.msra.mxu0 %v13509_v31  ;;  %4704 = vmatpush.bf16.msra.mxu1 %v4634_v13  ;;  %v12942_v13 = vunpack.i.h.bf16 %v11713_v52  ;;  %v12941_v31 = vunpack.i.l.bf16 %v11713_v52 }
 0x84f   :  { %4737 = vmatpush.bf16.msrb.mxu2 %v4659_v59  ;;  %v11919_v18 = vpop.permute.xlu0 %6913  ;;  %v13510_v59 = vunpack.i.l.bf16 %v11671_v6  ;;  %v4493_v12 = vsel %vm152_vm1, %v13511_v46, %v12932_v20  ;;  %v13513_v46 = vunpack.i.h.bf16 %v11495_v26 }
 0x850   :  { %4693 = vmatmul.bf16.vlgmr.msra.gmra.mxu0 %v11917_v25  ;;  %v11934_v48 = vpop.permute.xlu1 %6918  ;;  %v13528_v21 = vunpack.i.l.bf16 %v11919_v18 }
 0x851   :  { %v4492_v60 = vsel %vm152_vm1, %v13510_v59, %v12933_v27  ;;  %v13512_v59 = vunpack.i.l.bf16 %v11495_v26  ;;  %v13514_v26 = vunpack.i.h.bf16 %v11613_v40  ;;  %v13516_v27 = vunpack.i.l.bf16 %v11665_v17 }
 0x852   :  { %v4651_v11 = vpack.c.bf16 %v4493_v12, %v4492_v60  ;;  %v4298_v61 = vsel %vm100_vm6, %v13529_v1, %v13528_v21  ;;  %v13534_v21 = vunpack.i.h.bf16 %v11660_v39 }
 0x853   :  { %4738 = vmatpush.bf16.msrb.mxu2 %v4655_v33  ;;  %v4346_v30 = vsel %vm113_vm8, %v13516_v27, %v12941_v31  ;;  %v13519_v27 = vunpack.i.h.bf16 %v11732_v37  ;;  %v12949_v31 = vunpack.i.h.bf16 %v11934_v48 }
 0x854   :  { %v11936_v33 = vpop.permute.xlu2 %6983 }
 0x855   :  { %v12935_v4 = vunpack.i.h.bf16 %v11936_v33  ;;  %v12934_v57 = vunpack.i.l.bf16 %v11936_v33 }
 0x857   :  { %4739 = vmatpush.bf16.msrb.mxu2 %v4651_v11  ;;  %v11942_v6 = vpop.permute.xlu0 %6928  ;;  %v11950_v60 = vsel %vm100_vm6, %v12934_v57, %v13512_v59  ;;  %v11958_v12 = vsel %vm100_vm6, %v12935_v4, %v13513_v46  ;;  %v13515_v4 = vunpack.i.l.bf16 %v11613_v40 }
 0x858   :  { %v12939_v11 = vunpack.i.h.bf16 %v11942_v6  ;;  %v12940_v15 = vunpack.i.l.bf16 %v11942_v6  ;;  %v11962_v20 = vpop.permute.xlu1 %6948 }
 0x859   :  { %v12945_v59 = vunpack.i.h.bf16 %v11962_v20  ;;  %v12944_v57 = vunpack.i.l.bf16 %v11962_v20 }
 0x85a   :  { %v4349_v46 = vsel %vm113_vm8, %v13514_v26, %v12939_v11  ;;  %v4348_v50 = vsel %vm113_vm8, %v13515_v4, %v12940_v15  ;;  %v4347_v26 = vsel %vm113_vm8, %v13517_v7, %v12942_v13  ;;  %v12948_v11 = vunpack.i.l.bf16 %v11934_v48 }
 0x85b   :  { %v4627_v40 = vpack.c.bf16 %v4349_v46, %v4348_v50  ;;  %v13518_v4 = vunpack.i.l.bf16 %v11732_v37  ;;  %v4491_v17 = vsel %vm152_vm1, %v13519_v27, %v12945_v59  ;;  %v13520_v37 = vunpack.i.l.bf16 %v11505_v43 }
 0x85c   :  { %v12006_v7 = vpop.permute.xlu2 %7003 }
 0x85d   :  { %v4490_v15 = vsel %vm152_vm1, %v13518_v4, %v12944_v57  ;;  %v12946_v50 = vunpack.i.h.bf16 %v12006_v7  ;;  %v12947_v46 = vunpack.i.l.bf16 %v12006_v7  ;;  %4724 = vmatpush.bf16.msrb.mxu3 %v4627_v40  ;;  %v4623_v4 = vpack.c.bf16 %v4347_v26, %v4346_v30 }
 0x85e   :  { %v4647_v13 = vpack.c.bf16 %v4491_v17, %v4490_v15  ;;  %v13521_v15 = vunpack.i.h.bf16 %v11505_v43  ;;  %v13522_v30 = vunpack.i.l.bf16 %v11569_v34  ;;  %v13524_v57 = vunpack.i.l.bf16 %v11728_v54 }
 0x85f   :  { %v12018_v27 = vsel %vm113_vm8, %v12947_v46, %v13520_v37 }
 0x860   :  { %4740 = vmatpush.bf16.msrb.mxu2 %v4647_v13  ;;  %v12026_v40 = vsel %vm113_vm8, %v12946_v50, %v13521_v15  ;;  %v12028_v13 = vpop.permute.xlu0 %6953  ;;  %v4300_v26 = vsel %vm100_vm6, %v13522_v30, %v12948_v11  ;;  %v12040_v59 = vpop.permute.xlu1 %6958  ;;  %v13523_v15 = vunpack.i.h.bf16 %v11569_v34  ;;  %v12050_v11 = vld.sshfl [vmem:[#allocation1 + $0x10] sm:$0xff pattern:$0x73625140] }
 0x861   :  { %v12951_v43 = vunpack.i.h.bf16 %v12028_v13  ;;  %v12950_v37 = vunpack.i.l.bf16 %v12028_v13  ;;  %v12958_v46 = vunpack.i.h.bf16 %v12040_v59  ;;  %v12957_v30 = vunpack.i.l.bf16 %v12040_v59  ;;  %4725 = vmatpush.bf16.msrb.mxu3 %v4623_v4  ;;  %5534 = vmatmul.msk.bf16.vlgmr.msra.gmra.mxu2 %vm895_vm3, %v12050_v11 }
 0x862   :  { %v4301_v50 = vsel %vm100_vm6, %v13523_v15, %v12949_v31  ;;  %v13525_v15 = vunpack.i.h.bf16 %v11728_v54  ;;  %v13526_v31 = vunpack.i.l.bf16 %v11819_v38 }
 0x863   :  { %v4444_v34 = vsel %vm139_vm4, %v13524_v57, %v12950_v37  ;;  %v13527_v57 = vunpack.i.h.bf16 %v11819_v38  ;;  %v4619_v37 = vpack.c.bf16 %v4301_v50, %v4300_v26 }
 0x864   :  { %v4445_v4 = vsel %vm139_vm4, %v13525_v15, %v12951_v43  ;;  %v4588_v17 = vsel %vm178_vm0, %v13526_v31, %v12957_v30  ;;  %v12080_v43 = vpop.permute.xlu2 %7008  ;;  %v13530_v31 = vunpack.i.h.bf16 %v11919_v18  ;;  %v13531_v30 = vunpack.i.h.bf16 %v11604_v24 }
 0x865   :  { %v4589_v54 = vsel %vm178_vm0, %v13527_v57, %v12958_v46  ;;  %v4643_v47 = vpack.c.bf16 %v4445_v4, %v4444_v34  ;;  %4726 = vmatpush.bf16.msrb.mxu3 %v4619_v37  ;;  %v13533_v34 = vunpack.i.l.bf16 %v11636_v22  ;;  %v13535_v24 = vunpack.i.h.bf16 %v11636_v22 }
 0x866   :  { %v4667_v15 = vpack.c.bf16 %v4589_v54, %v4588_v17  ;;  %v4299_v38 = vsel %vm100_vm6, %v13531_v30, %v13530_v31  ;;  %v13532_v17 = vunpack.i.l.bf16 %v11660_v39  ;;  %v12965_v37 = vunpack.i.l.bf16 %v11881_v36 }
 0x867   :  { %4741 = vmatpush.bf16.msrb.mxu2 %v4643_v47  ;;  %v4615_v26 = vpack.c.bf16 %v4299_v38, %v4298_v61  ;;  %v4253_v30 = vsel %vm87_vm7, %v13535_v24, %v13534_v21  ;;  %v12963_v47 = vunpack.i.h.bf16 %v11881_v36  ;;  %v13536_v38 = vunpack.i.l.bf16 %v11797_v62 }
 0x868   :  { %4756 = vmatpush.bf16.msrb.mxu0 %v4667_v15  ;;  %v12094_v50 = vpop.permute.xlu0 %6968  ;;  %v4252_v1 = vsel %vm87_vm7, %v13533_v34, %v13532_v17  ;;  %v12112_v57 = vpop.permute.xlu1 %6963  ;;  %v12960_v15 = vunpack.i.l.bf16 %v12080_v43  ;;  %v13537_v34 = vunpack.i.h.bf16 %v11797_v62 }
 0x869   :  { %v12964_v61 = vunpack.i.h.bf16 %v12094_v50  ;;  %v12959_v4 = vunpack.i.l.bf16 %v12094_v50  ;;  %v12961_v31 = vunpack.i.h.bf16 %v12112_v57  ;;  %v12962_v22 = vunpack.i.l.bf16 %v12112_v57  ;;  %4727 = vmatpush.bf16.msrb.mxu3 %v4615_v26 }
 0x86a   :  { %v4611_v24 = vpack.c.bf16 %v4253_v30, %v4252_v1  ;;  %v13538_v26 = vunpack.i.l.bf16 %v11606_v28  ;;  %v13540_v1 = vunpack.i.l.bf16 %v11560_v14 }
 0x86b   :  { %v4586_v17 = vsel %vm178_vm0, %v13536_v38, %v12959_v4  ;;  %v4587_v21 = vsel %vm178_vm0, %v13537_v34, %v12964_v61  ;;  %v13539_v38 = vunpack.i.h.bf16 %v11606_v28  ;;  %v13542_v28 = vunpack.i.h.bf16 %v11632_v5 }
 0x86c   :  { %v4663_v46 = vpack.c.bf16 %v4587_v21, %v4586_v17  ;;  %v4442_v54 = vsel %vm139_vm4, %v13538_v26, %v12962_v22  ;;  %v4250_v30 = vsel %vm87_vm7, %v13540_v1, %v12965_v37  ;;  %v13541_v17 = vunpack.i.h.bf16 %v11560_v14  ;;  %v12166_v14 = vpop.permute.xlu2 %7018 }
 0x86d   :  { %v4443_v4 = vsel %vm139_vm4, %v13539_v38, %v12961_v31  ;;  %4728 = vmatpush.bf16.msrb.mxu3 %v4611_v24  ;;  %v13544_v21 = vunpack.i.l.bf16 %v11876_v19  ;;  %v13552_v31 = vunpack.i.h.bf16 %v11942_v6 }
 0x86e   :  { %v4639_v62 = vpack.c.bf16 %v4443_v4, %v4442_v54  ;;  %v4251_v34 = vsel %vm87_vm7, %v13541_v17, %v12963_v47  ;;  %4757 = vmatpush.bf16.msrb.mxu0 %v4663_v46  ;;  %v4396_v4 = vsel %vm126_vm5, %v13542_v28, %v12960_v15  ;;  %v13543_v54 = vunpack.i.h.bf16 %v12080_v43 }
 0x86f   :  { %v4607_v46 = vpack.c.bf16 %v4251_v34, %v4250_v30  ;;  %v12967_v17 = vunpack.i.h.bf16 %v12166_v14  ;;  %v12966_v28 = vunpack.i.l.bf16 %v12166_v14  ;;  %v13546_v30 = vunpack.i.h.bf16 %v11768_v2 }
 0x870   :  { %v4397_v26 = vsel %vm126_vm5, %v13544_v21, %v13543_v54  ;;  %4742 = vmatpush.bf16.msrb.mxu2 %v4639_v62  ;;  %v12168_v38 = vpop.permute.xlu0 %6973  ;;  %v12170_v24 = vpop.permute.xlu1 %6978  ;;  %v13545_v54 = vunpack.i.l.bf16 %v11768_v2  ;;  %v12969_v2 = vunpack.i.l.bf16 %v11558_v3  ;;  %v13551_v15 = vunpack.i.h.bf16 %v12006_v7 }
 0x871   :  { %v4635_v1 = vpack.c.bf16 %v4397_v26, %v4396_v4  ;;  %5535 = vmatmul.msk.bf16.vlgmr.msrb.gmra.mxu0 %vm895_vm3, %v12050_v11  ;;  %4729 = vmatpush.bf16.msrb.mxu3 %v4607_v46  ;;  %v4537_v34 = vsel %vm165_vm2, %v13546_v30, %v12967_v17  ;;  %v13547_v4 = vpack.c.bf16 %v11424_v63, %v11421_v49  ;;  %v12968_v30 = vunpack.i.h.bf16 %v11876_v19 }
 0x872   :  { %v4536_v62 = vsel %vm165_vm2, %v13545_v54, %v12966_v28  ;;  %v4345_v22 = vsel %vm113_vm8, %v13552_v31, %v13551_v15  ;;  %v13553_v17 = vunpack.i.l.bf16 %v11847_v55 }
 0x873   :  { %v4660_v26 = vpack.c.bf16 %v4537_v34, %v4536_v62 }
 0x874   :  { %4743 = vmatpush.bf16.msrb.mxu2 %v4635_v1  ;;  %v13548_v1 = vpack.c.bf16 %v11418_v32, %v11415_v53  ;;  %v12198_v54 = vpop.permute.xlu2 %7028 }
 0x875   :  { %4730 = vmatpush.bf16.msrb.mxu3 %v13547_v4  ;;  %v12970_v63 = vunpack.i.h.bf16 %v12198_v54  ;;  %v12971_v62 = vunpack.i.l.bf16 %v12198_v54  ;;  %v13549_v4 = vunpack.i.l.bf16 %v12006_v7 }
 0x878   :  { %v12191_v21 = vpop.permute.xlu0 %6988  ;;  %v12193_v46 = vpop.permute.xlu1 %6993 }
 0x879   :  { %4731 = vmatpush.bf16.msrb.mxu3 %v13548_v1  ;;  %v6996_v37 = vunpack.i.h.bf16 %v12193_v46  ;;  %v6995_v28 = vunpack.i.l.bf16 %v12193_v46 }
 0x87c   :  { %4732 = vmatmul.bf16.vlgmr.msrb.gmra.mxu3 %v11917_v25 }
 0x87d   :  { %4776 = vmatpush.bf16.msra.mxu3 %v4660_v26  ;;  %v13550_v26 = vunpack.i.l.bf16 %v11942_v6  ;;  %v13554_v6 = vunpack.i.h.bf16 %v11847_v55 }
 0x87f   :  { %v4344_v1 = vsel %vm113_vm8, %v13550_v26, %v13549_v4  ;;  %v13556_v26 = vunpack.i.h.bf16 %v11910_v45 }
 0x880   :  { %v12203_v49 = vpop.permute.xlu0 %7023  ;;  %v6999_v32 = vpop.permute.xlu1 %6998 }
 0x881   :  { %v12972_v34 = vunpack.i.h.bf16 %v12203_v49  ;;  %v12973_v53 = vunpack.i.l.bf16 %v12203_v49  ;;  %v7001_v47 = vunpack.i.h.bf16 %v6999_v32  ;;  %v7000_v61 = vunpack.i.l.bf16 %v6999_v32 }
 0x883   :  { %v4534_v4 = vsel %vm165_vm2, %v13553_v17, %v12973_v53  ;;  %v4535_v7 = vsel %vm165_vm2, %v13554_v6, %v12972_v34  ;;  %v4398_v31 = vsel %vm126_vm5, %v12969_v2, %v7000_v61  ;;  %v4399_v46 = vsel %vm126_vm5, %v12968_v30, %v7001_v47  ;;  %v12259_v30 = vld.sshfl [vmem:[#allocation1 + $0x8] sm:$0xff pattern:$0x73625140] }
 0x884   :  { %v4656_v15 = vpack.c.bf16 %v4535_v7, %v4534_v4  ;;  %v4630_v32 = vpack.c.bf16 %v4399_v46, %v4398_v31  ;;  %v13555_v17 = vunpack.i.l.bf16 %v11910_v45  ;;  %v4489_v4 = vsel %vm152_vm1, %v13556_v26, %v12970_v63  ;;  %v12255_v7 = vpop.permute.xlu2 %7043 }
 0x885   :  { %v4628_v6 = vpack.c.bf16 %v4345_v22, %v4344_v1  ;;  %v6991_v31 = vunpack.i.h.bf16 %v12191_v21  ;;  %v6990_v46 = vunpack.i.l.bf16 %v12191_v21  ;;  %v13558_v45 = vunpack.i.h.bf16 %v11713_v52 }
 0x886   :  { %v4488_v55 = vsel %vm152_vm1, %v13555_v17, %v12971_v62  ;;  %4777 = vmatpush.bf16.msra.mxu3 %v4656_v15  ;;  %4705 = vmatpush.bf16.msra.mxu1 %v4630_v32  ;;  %v13557_v17 = vunpack.i.l.bf16 %v11713_v52  ;;  %v12974_v21 = vunpack.i.l.bf16 %v12255_v7  ;;  %v13561_v53 = vunpack.i.l.bf16 %v11934_v48 }
 0x887   :  { %v4343_v22 = vsel %vm113_vm8, %v13558_v45, %v6996_v37  ;;  %v4652_v15 = vpack.c.bf16 %v4489_v4, %v4488_v55  ;;  %v13559_v55 = vunpack.i.l.bf16 %v11962_v20 }
 0x888   :  { %v4342_v2 = vsel %vm113_vm8, %v13557_v17, %v6995_v28  ;;  %v12269_v1 = vpop.permute.xlu0 %7033  ;;  %v12275_v62 = vpop.permute.xlu1 %7013 }
 0x889   :  { %v7036_v32 = vunpack.i.h.bf16 %v12269_v1  ;;  %v7035_v63 = vunpack.i.l.bf16 %v12269_v1  ;;  %v7016_v17 = vunpack.i.h.bf16 %v12275_v62  ;;  %v7015_v52 = vunpack.i.l.bf16 %v12275_v62  ;;  %4706 = vmatmul.bf16.vlgmr.msra.gmra.mxu1 %v12259_v30 }
 0x88a   :  { %4763 = vmatpush.bf16.msrb.mxu1 %v4628_v6  ;;  %4778 = vmatpush.bf16.msra.mxu3 %v4652_v15  ;;  %v4624_v45 = vpack.c.bf16 %v4343_v22, %v4342_v2  ;;  %v13560_v6 = vunpack.i.h.bf16 %v11962_v20  ;;  %v4296_v15 = vsel %vm100_vm6, %v13561_v53, %v6990_v46  ;;  %v13562_v2 = vunpack.i.h.bf16 %v11934_v48 }
 0x88b   :  { %v4486_v4 = vsel %vm152_vm1, %v13559_v55, %v7035_v63  ;;  %v4394_v20 = vsel %vm126_vm5, %v7000_v61, %v7015_v52  ;;  %v4395_v55 = vsel %vm126_vm5, %v7001_v47, %v7016_v17  ;;  %v13563_v48 = vunpack.i.l.bf16 %v12028_v13 }
 0x88c   :  { %v4487_v34 = vsel %vm152_vm1, %v13560_v6, %v7036_v32  ;;  %v4297_v22 = vsel %vm100_vm6, %v13562_v2, %v6991_v31  ;;  %v4631_v6 = vpack.c.bf16 %v4395_v55, %v4394_v20  ;;  %v13566_v2 = vunpack.i.l.bf16 %v11936_v33 }
 0x88d   :  { %v4648_v26 = vpack.c.bf16 %v4487_v34, %v4486_v4  ;;  %v4440_v53 = vsel %vm139_vm4, %v13563_v48, %v12974_v21  ;;  %v13564_v34 = vunpack.i.h.bf16 %v12255_v7  ;;  %v4620_v4 = vpack.c.bf16 %v4297_v22, %v4296_v15 }
 0x88e   :  { %4764 = vmatpush.bf16.msrb.mxu1 %v4624_v45  ;;  %v13565_v45 = vunpack.i.h.bf16 %v12028_v13  ;;  %v13567_v47 = vunpack.i.l.bf16 %v11919_v18  ;;  %v13568_v55 = vunpack.i.h.bf16 %v11936_v33  ;;  %v13569_v48 = vunpack.i.h.bf16 %v11919_v18  ;;  %4744 = vmatpush.bf16.msrb.mxu2 %v4631_v6 }
 0x88f   :  { %4779 = vmatpush.bf16.msra.mxu3 %v4648_v26  ;;  %v6981_v13 = vunpack.i.h.bf16 %v12170_v24  ;;  %v13570_v15 = vpack.c.bf16 %v12026_v40, %v12018_v27  ;;  %v13571_v33 = vunpack.i.l.bf16 %v11552_v0  ;;  %v6975_v6 = vunpack.i.l.bf16 %v12168_v38 }
 0x890   :  { %v4441_v61 = vsel %vm139_vm4, %v13565_v45, %v13564_v34  ;;  %v4294_v20 = vsel %vm100_vm6, %v13567_v47, %v13566_v2  ;;  %v4295_v21 = vsel %vm100_vm6, %v13569_v48, %v13568_v55  ;;  %v6980_v34 = vunpack.i.l.bf16 %v12170_v24  ;;  %v12334_v26 = vpop.permute.xlu0 %7048 }
 0x891   :  { %v4644_v22 = vpack.c.bf16 %v4441_v61, %v4440_v53  ;;  %v4354_v18 = vsel %vm113_vm8, %v6995_v28, %v13571_v33  ;;  %v13572_v45 = vunpack.i.h.bf16 %v11552_v0  ;;  %v6976_v24 = vunpack.i.h.bf16 %v12168_v38  ;;  %4745 = vmatmul.bf16.vlgmr.msrb.gmra.mxu2 %v12259_v30 }
 0x892   :  { %4765 = vmatpush.bf16.msrb.mxu1 %v4620_v4  ;;  %4802 = vmatpush.bf16.msra.mxu2 %v13570_v15  ;;  %v12349_v4 = vpop.permute.xlu1 %7038  ;;  %v4616_v47 = vpack.c.bf16 %v4295_v21, %v4294_v20  ;;  %v7051_v27 = vunpack.i.h.bf16 %v12334_v26  ;;  %v7050_v40 = vunpack.i.l.bf16 %v12334_v26  ;;  %v13574_v55 = vunpack.i.h.bf16 %v11660_v39 }
 0x893   :  { %v4355_v2 = vsel %vm113_vm8, %v6996_v37, %v13572_v45  ;;  %v7041_v53 = vunpack.i.h.bf16 %v12349_v4  ;;  %v7040_v28 = vunpack.i.l.bf16 %v12349_v4  ;;  %4780 = vmatpush.bf16.msra.mxu3 %v4644_v22  ;;  %v13573_v37 = vunpack.i.l.bf16 %v11660_v39 }
 0x894   :  { %v4625_v0 = vpack.c.bf16 %v4355_v2, %v4354_v18  ;;  %v4249_v21 = vsel %vm87_vm7, %v13574_v55, %v6981_v13  ;;  %v13575_v20 = vunpack.i.l.bf16 %v12040_v59  ;;  %v13576_v15 = vunpack.i.h.bf16 %v12040_v59 }
 0x895   :  { %v4248_v61 = vsel %vm87_vm7, %v13573_v37, %v6980_v34  ;;  %v13577_v33 = vunpack.i.l.bf16 %v11545_v9  ;;  %v13578_v39 = vunpack.i.h.bf16 %v11545_v9  ;;  %v13579_v2 = vunpack.i.h.bf16 %v11564_v51 }
 0x896   :  { %v4584_v48 = vsel %vm178_vm0, %v13575_v20, %v7040_v28  ;;  %v4585_v22 = vsel %vm178_vm0, %v13576_v15, %v7041_v53  ;;  %4766 = vmatpush.bf16.msrb.mxu1 %v4616_v47  ;;  %v13580_v4 = vunpack.i.h.bf16 %v12166_v14  ;;  %v13581_v37 = vunpack.i.l.bf16 %v11564_v51  ;;  %4803 = vmatpush.bf16.msra.mxu2 %v4625_v0 }
 0x897   :  { %v4308_v18 = vsel %vm100_vm6, %v6990_v46, %v13577_v33  ;;  %v4309_v45 = vsel %vm100_vm6, %v6991_v31, %v13578_v39  ;;  %v13582_v47 = vunpack.i.l.bf16 %v12166_v14  ;;  %v4668_v46 = vpack.c.bf16 %v4585_v22, %v4584_v48 }
 0x898   :  { %v4549_v59 = vsel %vm165_vm2, %v13580_v4, %v13579_v2  ;;  %v13583_v9 = vunpack.i.l.bf16 %v11881_v36  ;;  %v4612_v20 = vpack.c.bf16 %v4249_v21, %v4248_v61  ;;  %v13584_v15 = vunpack.i.l.bf16 %v12094_v50  ;;  %v12414_v21 = vpop.permute.xlu2 %7058 }
 0x899   :  { %v4548_v55 = vsel %vm165_vm2, %v13582_v47, %v13581_v37  ;;  %v13585_v14 = vunpack.i.h.bf16 %v12094_v50  ;;  %v13586_v48 = vunpack.i.h.bf16 %v11881_v36  ;;  %4795 = vmatpush.bf16.msra.mxu0 %v4668_v46  ;;  %v4621_v22 = vpack.c.bf16 %v4309_v45, %v4308_v18 }
 0x89a   :  { %v4246_v31 = vsel %vm87_vm7, %v13583_v9, %v6975_v6  ;;  %v4582_v51 = vsel %vm178_vm0, %v13584_v15, %v7050_v40  ;;  %v4661_v33 = vpack.c.bf16 %v4549_v59, %v4548_v55  ;;  %4767 = vmatpush.bf16.msrb.mxu1 %v4612_v20  ;;  %v12416_v39 = vpop.permute.xlu1 %7053  ;;  %v13587_v4 = vunpack.i.l.bf16 %v11567_v35 }
 0x89b   :  { %v4583_v0 = vsel %vm178_vm0, %v13585_v14, %v7051_v27  ;;  %v4247_v61 = vsel %vm87_vm7, %v13586_v48, %v6976_v24  ;;  %4804 = vmatpush.bf16.msra.mxu2 %v4621_v22  ;;  %v13588_v37 = vunpack.i.l.bf16 %v12203_v49  ;;  %v13589_v47 = vunpack.i.h.bf16 %v11567_v35 }
 0x89c   :  { %v4664_v50 = vpack.c.bf16 %v4583_v0, %v4582_v51  ;;  %v4608_v2 = vpack.c.bf16 %v4247_v61, %v4246_v31  ;;  %v13590_v9 = vunpack.i.h.bf16 %v12203_v49  ;;  %v7061_v45 = vunpack.i.h.bf16 %v12414_v21  ;;  %v12434_v31 = vpop.permute.xlu0 %7063 }
 0x89d   :  { %v4546_v36 = vsel %vm165_vm2, %v13588_v37, %v13587_v4  ;;  %v7060_v59 = vunpack.i.l.bf16 %v12414_v21  ;;  %v7056_v55 = vunpack.i.h.bf16 %v12416_v39  ;;  %v7055_v46 = vunpack.i.l.bf16 %v12416_v39 }
 0x89e   :  { %v4547_v18 = vsel %vm165_vm2, %v13590_v9, %v13589_v47  ;;  %4796 = vmatpush.bf16.msra.mxu0 %v4664_v50  ;;  %v13591_v20 = vunpack.i.l.bf16 %v11533_v42  ;;  %4768 = vmatpush.bf16.msrb.mxu1 %v4608_v2  ;;  %v13592_v49 = vunpack.i.l.bf16 %v12112_v57  ;;  %v13593_v51 = vunpack.i.h.bf16 %v12112_v57 }
 0x89f   :  { %v13594_v0 = vunpack.i.h.bf16 %v11533_v42  ;;  %v4657_v22 = vpack.c.bf16 %v4547_v18, %v4546_v36  ;;  %v7065_v39 = vunpack.i.l.bf16 %v12434_v31  ;;  %v13596_v57 = vunpack.i.l.bf16 %v12080_v43 }
 0x8a0   :  { %v4260_v35 = vsel %vm87_vm7, %v6980_v34, %v13591_v20  ;;  %v4438_v15 = vsel %vm139_vm4, %v13592_v49, %v7055_v46  ;;  %v4439_v14 = vsel %vm139_vm4, %v13593_v51, %v7056_v55  ;;  %v13595_v34 = vpack.c.bf16 %v11958_v12, %v11950_v60 }
 0x8a1   :  { %v4261_v48 = vsel %vm87_vm7, %v6981_v13, %v13594_v0  ;;  %v4640_v61 = vpack.c.bf16 %v4439_v14, %v4438_v15  ;;  %v4392_v42 = vsel %vm126_vm5, %v13596_v57, %v7060_v59  ;;  %v13597_v13 = vunpack.i.h.bf16 %v12080_v43  ;;  %5536 = vmatmul.msk.bf16.vlgmr.msra.gmra.mxu0 %vm895_vm3, %v12050_v11 }
 0x8a2   :  { %4815 = vmatpush.bf16.msrb.mxu0 %v4661_v33  ;;  %4805 = vmatpush.bf16.msra.mxu2 %v13595_v34  ;;  %v7066_v33 = vunpack.i.h.bf16 %v12434_v31  ;;  %v4613_v12 = vpack.c.bf16 %v4261_v48, %v4260_v35  ;;  %v13598_v50 = vunpack.i.l.bf16 %v11519_v16  ;;  %v13599_v4 = vunpack.i.l.bf16 %v11576_v56  ;;  %v13618_v34 = vld [vmem:[#allocation30_spill] sm:$0xff]  ;;  %v4674_v10 = vpop.permute.xlu1 %4673 }
 0x8a3   :  { %v4393_v60 = vsel %vm126_vm5, %v13597_v13, %v7061_v45  ;;  %4781 = vmatpush.bf16.msra.mxu3 %v4640_v61  ;;  %v13600_v37 = vunpack.i.l.bf16 %v12198_v54  ;;  %v13601_v36 = vunpack.i.h.bf16 %v11576_v56  ;;  %v13602_v47 = vunpack.i.h.bf16 %v12198_v54  ;;  %v13619_v61 = vld [vmem:[#allocation17_spill] sm:$0xff] }
 0x8a4   :  { %v4258_v2 = vsel %vm87_vm7, %v6975_v6, %v13598_v50  ;;  %v13603_v18 = vunpack.i.l.bf16 %v11611_v58  ;;  %v13604_v6 = vunpack.i.h.bf16 %v11611_v58  ;;  %v13605_v35 = vpack.c.bf16 %v11466_v44, %v11463_v23  ;;  %v13624_v50 = vld [vmem:[#allocation20_spill] sm:$0xff] }
 0x8a5   :  { %v4500_v43 = vsel %vm152_vm1, %v13600_v37, %v13599_v4  ;;  %v4501_v9 = vsel %vm152_vm1, %v13602_v47, %v13601_v36  ;;  %v13606_v56 = vunpack.i.h.bf16 %v11519_v16  ;;  %v4636_v49 = vpack.c.bf16 %v4393_v60, %v4392_v42  ;;  %v13621_v42 = vld [vmem:[#allocation22_spill] sm:$0xff] }
 0x8a6   :  { %v4596_v31 = vsel %vm178_vm0, %v7040_v28, %v13603_v18  ;;  %v4597_v20 = vsel %vm178_vm0, %v7041_v53, %v13604_v6  ;;  %4769 = vmatpush.bf16.msrb.mxu1 %v13605_v35  ;;  %4816 = vmatpush.bf16.msrb.mxu0 %v4657_v22  ;;  %v4653_v28 = vpack.c.bf16 %v4501_v9, %v4500_v43  ;;  %v13607_v38 = vunpack.i.l.bf16 %v11602_v41 }
 0x8a7   :  { %v4259_v54 = vsel %vm87_vm7, %v6976_v24, %v13606_v56  ;;  %4806 = vmatpush.bf16.msra.mxu2 %v4613_v12  ;;  %v4390_v58 = vsel %vm126_vm5, %v7015_v52, %v7065_v39  ;;  %v4391_v23 = vsel %vm126_vm5, %v7016_v17, %v7066_v33  ;;  %v4669_v44 = vpack.c.bf16 %v4597_v20, %v4596_v31  ;;  %v13610_v52 = vld [vmem:[#allocation31_spill] sm:$0xff] }
 0x8a8   :  { %4782 = vmatpush.bf16.msra.mxu3 %v4636_v49  ;;  %v4609_v16 = vpack.c.bf16 %v4259_v54, %v4258_v2  ;;  %v4498_v24 = vsel %vm152_vm1, %v7035_v63, %v13607_v38  ;;  %v13608_v53 = vunpack.i.h.bf16 %v11602_v41  ;;  %v13609_v17 = vpack.c.bf16 %v11474_v8, %v11471_v29  ;;  %v13625_v2 = vld [vmem:[#allocation24_spill] sm:$0xff] }
 0x8a9   :  { %v13611_v15 = vunpack.i.l.bf16 %v13610_v52  ;;  %v13612_v63 = vunpack.i.h.bf16 %v13610_v52  ;;  %v4632_v1 = vpack.c.bf16 %v4391_v23, %v4390_v58  ;;  %v13615_v0 = vunpack.i.l.bf16 %v12255_v7 }
 0x8aa   :  { %v4499_v62 = vsel %vm152_vm1, %v7036_v32, %v13608_v53  ;;  %4770 = vmatpush.bf16.msrb.mxu1 %v13609_v17  ;;  %4817 = vmatpush.bf16.msrb.mxu0 %v4653_v28  ;;  %v13613_v32 = vld [vmem:[#allocation23_spill] sm:$0xff]  ;;  %v13617_v48 = vunpack.i.h.bf16 %v12255_v7  ;;  %v13620_v22 = vpack.c.bf16 %v13618_v34, %v13619_v61  ;;  %v13622_v13 = vunpack.i.l.bf16 %v13621_v42 }
 0x8ab   :  { %v4594_v51 = vsel %vm178_vm0, %v7050_v40, %v13611_v15  ;;  %v4595_v41 = vsel %vm178_vm0, %v7051_v27, %v13612_v63  ;;  %4807 = vmatpush.bf16.msra.mxu2 %v4609_v16  ;;  %v4649_v29 = vpack.c.bf16 %v4499_v62, %v4498_v24  ;;  %v13614_v14 = vunpack.i.l.bf16 %v13613_v32 }
 0x8ac   :  { %4783 = vmatpush.bf16.msra.mxu3 %v4632_v1  ;;  %v4665_v8 = vpack.c.bf16 %v4595_v41, %v4594_v51  ;;  %v13616_v26 = vunpack.i.h.bf16 %v13613_v32  ;;  %v4450_v60 = vsel %vm139_vm4, %v7055_v46, %v13622_v13  ;;  %v13623_v12 = vunpack.i.h.bf16 %v13621_v42 }
 0x8ad   :  { %4771 = vmatmul.bf16.vlgmr.msrb.gmra.mxu1 %v11917_v25  ;;  %v4452_v40 = vsel %vm139_vm4, %v13615_v0, %v13614_v14  ;;  %v13626_v4 = vpack.c.bf16 %v13624_v50, %v13625_v2  ;;  %v13627_v43 = vunpack.i.h.bf16 %v11558_v3  ;;  %v13628_v46 = vunpack.i.l.bf16 %v11632_v5 }
 0x8ae   :  { %4834 = vmatpush.bf16.msra.mxu1 %v4669_v44  ;;  %v4453_v27 = vsel %vm139_vm4, %v13617_v48, %v13616_v26  ;;  %4818 = vmatpush.bf16.msrb.mxu0 %v4649_v29  ;;  %v4451_v7 = vsel %vm139_vm4, %v7056_v55, %v13623_v12  ;;  %v13629_v9 = vunpack.i.l.bf16 %v11558_v3  ;;  %v13630_v31 = vunpack.i.h.bf16 %v11876_v19 }
 0x8af   :  { %4808 = vmatpush.bf16.msra.mxu2 %v13620_v22  ;;  %4784 = vmatmul.bf16.vlgmr.msra.gmra.mxu3 %v12259_v30  ;;  %v4645_v57 = vpack.c.bf16 %v4453_v27, %v4452_v40  ;;  %v4641_v37 = vpack.c.bf16 %v4451_v7, %v4450_v60  ;;  %v4404_v36 = vsel %vm126_vm5, %v7060_v59, %v13627_v43  ;;  %vm13631_vm0 = vcmask 1043456  }
 0x8b0   :  { %v4405_v55 = vsel %vm126_vm5, %v7061_v45, %v13628_v46  ;;  %v4402_v18 = vsel %vm126_vm5, %v7065_v39, %v13629_v9  ;;  %v4403_v59 = vsel %vm126_vm5, %v7066_v33, %v13630_v31  ;;  %vm13632_vm1 = vmmov %vm13631_vm0 }
 0x8b1   :  { %v4637_v47 = vpack.c.bf16 %v4405_v55, %v4404_v36  ;;  %v4633_v5 = vpack.c.bf16 %v4403_v59, %v4402_v18 }
 0x8b2   :  { %4835 = vmatpush.bf16.msra.mxu1 %v4665_v8  ;;  %4819 = vmatpush.bf16.msrb.mxu0 %v4645_v57 }
 0x8b3   :  { %4809 = vmatpush.bf16.msra.mxu2 %v13626_v4 }
 0x8b6   :  { %4810 = vmatmul.bf16.vlgmr.msra.gmra.mxu2 %v11917_v25  ;;  %4820 = vmatpush.bf16.msrb.mxu0 %v4641_v37 }
 0x8ba   :  { %4821 = vmatpush.bf16.msrb.mxu0 %v4637_v47 }
 0x8bd   :  { %5537 = vmatmul.msk.bf16.vlgmr.msra.gmra.mxu1 %vm895_vm3, %v12050_v11 }
 0x8be   :  { %4822 = vmatpush.bf16.msrb.mxu0 %v4633_v5 }
 0x8c1   :  { %4823 = vmatmul.bf16.vlgmr.msrb.gmra.mxu0 %v12259_v30 }
 0x8cd   :  { %v4694_v25 = vpop.f32.mrf.mxu0 }
 0x8ce   :  { %v4695_v33 = vadd.f32 %v4694_v25, %v4674_v10 }
 0x8d5   :  { %v4696_v21 = vpop.f32.mrf.mxu0 }
 0x8e4   :  { %v4720_v45 = vpop.f32.mrf.mxu2 }
 0x8ec   :  { %v4722_v3 = vpop.f32.mrf.mxu2 }
 0x8ee   :  { %v4759_v6 = vpop.f32.mrf.mxu0 }
 0x8f6   :  { %v4761_v20 = vpop.f32.mrf.mxu0 }
 0x8ff   :  { %v4733_v39 = vpop.f32.mrf.mxu3 }
 0x900   :  { %v4734_v54 = vadd.f32 %v4733_v39, %v4674_v10 }
 0x906   :  { %v4707_v35 = vpop.f32.mrf.mxu1 }
 0x907   :  { %v4735_v19 = vpop.f32.mrf.mxu3  ;;  %v4708_v49 = vadd.f32 %v4707_v35, %v4695_v33 }
 0x909   :  { %v4721_v11 = vadd.f32 %v4720_v45, %v4708_v49 }
 0x90e   :  { %v4709_v56 = vpop.f32.mrf.mxu1 }
 0x914   :  { %v4746_v28 = vpop.f32.mrf.mxu2 }
 0x915   :  { %v4747_v58 = vadd.f32 %v4746_v28, %v4734_v54 }
 0x917   :  { %v4760_v23 = vadd.f32 %v4759_v6, %v4747_v58 }
 0x919   :  { %7084 = vtanh.f32 %v4760_v23 }
 0x91a   :  { %7086 = vtanh.f32 %v4721_v11 }
 0x91c   :  { %v4748_v44 = vpop.f32.mrf.mxu2 }
 0x91e   :  { %v4798_v30 = vpop.f32.mrf.mxu0 }
 0x91f   :  { %v7085_v16 = vpop.eup %7084 }
 0x920   :  { %v4849_v38 = vrot.slane %v7085_v16, 4  ;;  %v7087_v24 = vpop.eup %7086 }
 0x922   :  { %v4851_v53 = vsel %vm13631_vm0, %v7087_v24, %v4849_v38 }
 0x923   :  { %4855 = vst [vmem:[%s12611_s13] sm:$0x77] %v4851_v53 }
 0x926   :  { %v4800_v62 = vpop.f32.mrf.mxu0 }
 0x92a   :  { %v4772_v17 = vpop.f32.mrf.mxu1 }
 0x92b   :  { %v4773_v41 = vadd.f32 %v4772_v17, %v4674_v10 }
 0x932   :  { %v4774_v52 = vpop.f32.mrf.mxu1  ;;  %v4785_v15 = vpop.f32.mrf.mxu3 }
 0x933   :  { %v4786_v29 = vadd.f32 %v4785_v15, %v4773_v41 }
 0x935   :  { %v4799_v0 = vadd.f32 %v4798_v30, %v4786_v29 }
 0x939   :  { %v4811_v51 = vpop.f32.mrf.mxu2 }
 0x93a   :  { %v4837_v63 = vpop.f32.mrf.mxu1  ;;  %v4787_v1 = vpop.f32.mrf.mxu3  ;;  %v4812_v8 = vadd.f32 %v4811_v51, %v4674_v10 }
 0x93e   :  { %v4824_v32 = vpop.f32.mrf.mxu0 }
 0x93f   :  { %v4825_v14 = vadd.f32 %v4824_v32, %v4812_v8 }
 0x941   :  { %v4838_v40 = vadd.f32 %v4837_v63, %v4825_v14  ;;  %v4813_v26 = vpop.f32.mrf.mxu2 }
 0x942   :  { %v4839_v48 = vpop.f32.mrf.mxu1 }
 0x943   :  { %7088 = vtanh.f32 %v4838_v40 }
 0x944   :  { %7090 = vtanh.f32 %v4799_v0 }
 0x946   :  { %v4826_v27 = vpop.f32.mrf.mxu0 }
 0x949   :  { %v7089_v34 = vpop.eup %7088 }
 0x94a   :  { %v4850_v61 = vrot.slane %v7089_v34, 4  ;;  %v7091_v22 = vpop.eup %7090 }
 0x94c   :  { %v4852_v57 = vsel %vm13632_vm1, %v7091_v22, %v4850_v61 }
 0x94d   :  { %4856 = vst [vmem:[%s12611_s13 + $0x8] sm:$0x77] %v4852_v57 }
 0x94e   :  { %4861 = vsyncpa [#allocation5], 1 }

</bundles_post_ra>
